<compile_context>
chip_gen: v7x
topology: tpu7x:2x2x1
jax: 0.10.0
libtpu: 0.0.40
codegen_flags: <defaults>
</compile_context>

<pallas_src>
import functools
import math

import jax
import jax.numpy as jnp
from jax import lax
from jax.experimental import pallas as pl
from jax.experimental.pallas import tpu as pltpu

LN_DELTA = 1e-6


def _layer_norm(x, gain, bias):
    # Matches the PyTorch module: torch.std is UNBIASED (divides by N-1) and
    # delta is added to std (not variance):  gain/(std+delta)*(x-mean)+bias.
    d = x.shape[-1]
    mean = jnp.mean(x, axis=-1, keepdims=True)
    cen = x - mean
    var = jnp.sum(cen * cen, axis=-1, keepdims=True) * (1.0 / (d - 1))
    inv_std = pl.reciprocal(jnp.sqrt(var) + LN_DELTA)   # (rows, 1), exact
    return cen * (gain * inv_std) + bias


def encoder_layer_kernel(
    x_ref,
    wqkv_ref, bqkv_ref, wo_ref, bo_ref,
    ln1_g_ref, ln1_b_ref,
    w1_ref, b1_ref, w2_ref, b2_ref,
    ln2_g_ref, ln2_b_ref,
    out_ref, attn_ref,
    *, batch_tile, seq, heads, ff_chunk):
    x = x_ref[...].astype(jnp.float32)            # (rows, D), rows = batch_tile*seq
    rows, d = x.shape
    dk = d // heads

    # ---- residual branch 1: multi-head self-attention over LayerNorm(x) ----
    xn = _layer_norm(x, ln1_g_ref[...], ln1_b_ref[...])
    # Fused QKV projection (bf16 MXU operands, f32 accumulation).  The 1/sqrt(dk)
    # scale is already folded into the q columns of wqkv/bqkv by the wrapper.
    qkv = jnp.dot(xn.astype(jnp.bfloat16), wqkv_ref[...],
                  preferred_element_type=jnp.float32) + bqkv_ref[...]

    def split_heads(t):
        # (rows, D) f32 -> (batch_tile*heads, seq, dk) bf16.
        # One reshape + one transpose per tensor (the relayout the old per-head
        # slicing loop paid 8x over); cast to bf16 after the f32 relayout.
        t4 = t.reshape(batch_tile, seq, heads, dk)
        t4 = jnp.transpose(t4, (0, 2, 1, 3))
        return t4.reshape(batch_tile * heads, seq, dk).astype(jnp.bfloat16)

    q = split_heads(qkv[:, 0 * d:1 * d])
    k = split_heads(qkv[:, 1 * d:2 * d])
    v = split_heads(qkv[:, 2 * d:3 * d])

    # Head-batched attention: single logits einsum + single PV einsum.
    logits = jnp.einsum("bqd,bkd->bqk", q, k,
                        preferred_element_type=jnp.float32)
    m = jnp.max(logits, axis=-1, keepdims=True)
    p = jnp.exp(logits - m)
    p = p * pl.reciprocal(jnp.sum(p, axis=-1, keepdims=True), approx=True)
    ctx = jnp.einsum("bqk,bkd->bqd", p.astype(jnp.bfloat16), v,
                     preferred_element_type=jnp.float32)

    # Merge heads back: (bt*H, S, dk) -> (rows, D); one transpose + reshape.
    ctx4 = ctx.reshape(batch_tile, heads, seq, dk)
    concat = jnp.transpose(ctx4, (0, 2, 1, 3)).reshape(rows, d)

    attn_proj = jnp.dot(concat.astype(jnp.bfloat16), wo_ref[...],
                        preferred_element_type=jnp.float32) + bo_ref[...]
    attn = x + attn_proj                          # dropout == identity
    attn_ref[...] = attn.astype(attn_ref.dtype)

    # ---- residual branch 2: feed-forward over LayerNorm(attn), tiled on DFF ----
    an = _layer_norm(attn, ln2_g_ref[...], ln2_b_ref[...]).astype(jnp.bfloat16)
    dff = w1_ref.shape[1]
    # Accumulator initialized with residual + output bias: no zeros
    # materialization, no trailing full-width adds.
    acc = attn + b2_ref[...]
    for c0 in range(0, dff, ff_chunk):            # static chunk loop (4 chunks)
        sl = slice(c0, c0 + ff_chunk)
        h1 = jnp.maximum(
            jnp.dot(an, w1_ref[:, sl], preferred_element_type=jnp.float32)
            + b1_ref[:, sl], 0.0)
        acc = acc + jnp.dot(h1.astype(jnp.bfloat16), w2_ref[sl, :],
                            preferred_element_type=jnp.float32)
    out_ref[...] = acc.astype(out_ref.dtype)


def encoder_layer(x, params, heads, *, ff_chunk=512, batch_tile=1):
    B, S, D = x.shape
    assert B % batch_tile == 0
    dk = D // heads
    dff = params["w1"].shape[1]
    if dff % ff_chunk != 0:
        ff_chunk = dff                             # keep chunks multiples of 128
    scale = 1.0 / math.sqrt(dk)
    wdt = jnp.bfloat16

    # Fuse Q/K/V projections into one (D, 3D) weight and fold the attention
    # scale into the q columns (weight AND bias).  Weights go to HBM as bf16;
    # biases / LN params stay f32 for VPU math.
    wqkv = jnp.concatenate(
        [params["wq"] * scale, params["wk"], params["wv"]], axis=1).astype(wdt)
    bqkv = jnp.concatenate(
        [params["bq"] * scale, params["bk"], params["bv"]], axis=1
    ).astype(jnp.float32)
    wo = params["wo"].astype(wdt)
    w1 = params["w1"].astype(wdt)
    w2 = params["w2"].astype(wdt)

    rows = batch_tile * S                          # whole sequences per grid step
    grid = (B // batch_tile,)
    x2 = x.reshape(B * S, D)                       # flatten (B, S) into MXU M dim

    kernel = functools.partial(
        encoder_layer_kernel, batch_tile=batch_tile, seq=S, heads=heads,
        ff_chunk=ff_chunk)

    call_args = (x2, wqkv, bqkv, wo, params["bo"],
                 params["ln1_g"], params["ln1_b"],
                 w1, params["b1"], w2, params["b2"],
                 params["ln2_g"], params["ln2_b"])

    def run(single_buffer_weights):
        def wspec(shape):
            n = len(shape)
            idx = lambda i, _n=n: (0,) * _n        # grid-invariant (broadcast) block
            if single_buffer_weights:
                return pl.BlockSpec(shape, idx, pipeline_mode=pl.Buffered(1))
            return pl.BlockSpec(shape, idx)

        row_in = pl.BlockSpec((rows, D), lambda i: (i, 0))
        out2, attn2 = pl.pallas_call(
            kernel,
            grid=grid,
            in_specs=[
                row_in,                            # x (row tile)
                wspec((D, 3 * D)), wspec((1, 3 * D)),  # fused Wqkv, bqkv
                wspec((D, D)), wspec((1, D)),      # Wo, bo
                wspec((1, D)), wspec((1, D)),      # ln1 gain/bias
                wspec((D, dff)), wspec((1, dff)),  # W1, b1
                wspec((dff, D)), wspec((1, D)),    # W2, b2
                wspec((1, D)), wspec((1, D)),      # ln2 gain/bias
            ],
            out_specs=[pl.BlockSpec((rows, D), lambda i: (i, 0)),
                       pl.BlockSpec((rows, D), lambda i: (i, 0))],
            out_shape=[jax.ShapeDtypeStruct((B * S, D), x.dtype),
                       jax.ShapeDtypeStruct((B * S, D), x.dtype)],
            compiler_params=pltpu.CompilerParams(
                dimension_semantics=("parallel",)),   # shardable across v7x TCs
        )(*call_args)
        return jax.block_until_ready((out2, attn2))

    try:
        out2, attn2 = run(single_buffer_weights=True)
    except Exception:
        # pipeline_mode=pl.Buffered(1) rejected by this JAX/Mosaic build:
        # fall back to default (double-buffered) weight BlockSpecs.
        out2, attn2 = run(single_buffer_weights=False)

    return out2.reshape(B, S, D), attn2.reshape(B, S, D)


def _reference(x, params, heads):
    B, S, D = x.shape
    dk = D // heads

    def ln(v, g, b):
        mean = v.mean(-1, keepdims=True)
        var = ((v - mean) ** 2).sum(-1, keepdims=True) / (v.shape[-1] - 1)
        return g[0] / (jnp.sqrt(var) + LN_DELTA) * (v - mean) + b[0]

    xn = ln(x, params["ln1_g"], params["ln1_b"])
    q = xn @ params["wq"] + params["bq"][0]
    k = xn @ params["wk"] + params["bk"][0]
    v = xn @ params["wv"] + params["bv"][0]
    qh = q.reshape(B, S, heads, dk).transpose(0, 2, 1, 3)
    kh = k.reshape(B, S, heads, dk).transpose(0, 2, 1, 3)
    vh = v.reshape(B, S, heads, dk).transpose(0, 2, 1, 3)
    logits = jnp.einsum("bhqd,bhkd->bhqk", qh, kh,
                        precision=lax.Precision.HIGHEST) / math.sqrt(dk)
    p = jax.nn.softmax(logits, axis=-1)
    ctx = jnp.einsum("bhqk,bhkd->bhqd", p, vh,
                     precision=lax.Precision.HIGHEST)
    concat = ctx.transpose(0, 2, 1, 3).reshape(B, S, D)
    attn = x + concat @ params["wo"] + params["bo"][0]
    an = ln(attn, params["ln2_g"], params["ln2_b"])
    h1 = jnp.maximum(an @ params["w1"] + params["b1"][0], 0.0)
    out = attn + h1 @ params["w2"] + params["b2"][0]
    return out, attn


if __name__ == "__main__":
    B, S, D, H, DFF = 2, 16, 128, 8, 2048

    key = jax.random.PRNGKey(0)
    ks = jax.random.split(key, 16)

    def init(k, shape, scale=0.02):
        return (scale * jax.random.normal(k, shape)).astype(jnp.float32)

    params = {
        "wq": init(ks[0], (D, D)),  "bq": init(ks[1], (1, D)),
        "wk": init(ks[2], (D, D)),  "bk": init(ks[3], (1, D)),
        "wv": init(ks[4], (D, D)),  "bv": init(ks[5], (1, D)),
        "wo": init(ks[6], (D, D)),  "bo": init(ks[7], (1, D)),
        "w1": init(ks[8], (D, DFF)), "b1": init(ks[9], (1, DFF)),
        "w2": init(ks[10], (DFF, D)), "b2": init(ks[11], (1, D)),
        "ln1_g": jnp.ones((1, D), jnp.float32),
        "ln1_b": jnp.zeros((1, D), jnp.float32),
        "ln2_g": jnp.ones((1, D), jnp.float32),
        "ln2_b": jnp.zeros((1, D), jnp.float32),
    }
    x = jax.random.normal(ks[12], (B, S, D), jnp.float32)

    out, attn = encoder_layer(x, params, heads=H)
    jax.block_until_ready((out, attn))

    ref_out, ref_attn = _reference(x, params, heads=H)
    assert out.shape == (B, S, D) and attn.shape == (B, S, D)
    assert jnp.allclose(attn, ref_attn, atol=5e-2, rtol=5e-2)
    assert jnp.allclose(out, ref_out, atol=5e-2, rtol=5e-2)

    print("KERNEL_OK")
</pallas_src>

<mosaic_0001>
module attributes {stable_mosaic.version = 11 : i64} {
  func.func @encoder_layer_kernel(%arg0: i32, %arg1: memref<16x128xf32, #tpu.memory_space<vmem>>, %arg2: memref<128x384xbf16, #tpu.memory_space<vmem>>, %arg3: memref<1x384xf32, #tpu.memory_space<vmem>>, %arg4: memref<128x128xbf16, #tpu.memory_space<vmem>>, %arg5: memref<1x128xf32, #tpu.memory_space<vmem>>, %arg6: memref<1x128xf32, #tpu.memory_space<vmem>>, %arg7: memref<1x128xf32, #tpu.memory_space<vmem>>, %arg8: memref<128x2048xbf16, #tpu.memory_space<vmem>>, %arg9: memref<1x2048xf32, #tpu.memory_space<vmem>>, %arg10: memref<2048x128xbf16, #tpu.memory_space<vmem>>, %arg11: memref<1x128xf32, #tpu.memory_space<vmem>>, %arg12: memref<1x128xf32, #tpu.memory_space<vmem>>, %arg13: memref<1x128xf32, #tpu.memory_space<vmem>>, %arg14: memref<16x128xf32, #tpu.memory_space<vmem>>, %arg15: memref<16x128xf32, #tpu.memory_space<vmem>>) attributes {dimension_semantics = [#tpu.dimension_semantics<parallel>], iteration_bounds = array<i64: 2>, scalar_prefetch = 0 : i64, scratch_operands = 0 : i64, tpu.core_type = #tpu.core_type<tc>, window_params = [{transform_indices = @transform_0, window_bounds = array<i64: 16, 128>}, {pipeline_mode = #tpu.pipeline_mode<synchronous>, transform_indices = @transform_1, window_bounds = array<i64: 128, 384>}, {pipeline_mode = #tpu.pipeline_mode<synchronous>, transform_indices = @transform_2, window_bounds = array<i64: 1, 384>}, {pipeline_mode = #tpu.pipeline_mode<synchronous>, transform_indices = @transform_3, window_bounds = array<i64: 128, 128>}, {pipeline_mode = #tpu.pipeline_mode<synchronous>, transform_indices = @transform_4, window_bounds = array<i64: 1, 128>}, {pipeline_mode = #tpu.pipeline_mode<synchronous>, transform_indices = @transform_5, window_bounds = array<i64: 1, 128>}, {pipeline_mode = #tpu.pipeline_mode<synchronous>, transform_indices = @transform_6, window_bounds = array<i64: 1, 128>}, {pipeline_mode = #tpu.pipeline_mode<synchronous>, transform_indices = @transform_7, window_bounds = array<i64: 128, 2048>}, {pipeline_mode = #tpu.pipeline_mode<synchronous>, transform_indices = @transform_8, window_bounds = array<i64: 1, 2048>}, {pipeline_mode = #tpu.pipeline_mode<synchronous>, transform_indices = @transform_9, window_bounds = array<i64: 2048, 128>}, {pipeline_mode = #tpu.pipeline_mode<synchronous>, transform_indices = @transform_10, window_bounds = array<i64: 1, 128>}, {pipeline_mode = #tpu.pipeline_mode<synchronous>, transform_indices = @transform_11, window_bounds = array<i64: 1, 128>}, {pipeline_mode = #tpu.pipeline_mode<synchronous>, transform_indices = @transform_12, window_bounds = array<i64: 1, 128>}, {transform_indices = @transform_13, window_bounds = array<i64: 16, 128>}, {transform_indices = @transform_14, window_bounds = array<i64: 16, 128>}]} {
    %c0 = arith.constant 0 : index
    %c0_0 = arith.constant 0 : index
    %0 = vector.load %arg1[%c0, %c0_0] : memref<16x128xf32, #tpu.memory_space<vmem>>, vector<16x128xf32>
    %c0_1 = arith.constant 0 : index
    %c0_2 = arith.constant 0 : index
    %1 = vector.load %arg6[%c0_1, %c0_2] : memref<1x128xf32, #tpu.memory_space<vmem>>, vector<1x128xf32>
    %c0_3 = arith.constant 0 : index
    %c0_4 = arith.constant 0 : index
    %2 = vector.load %arg7[%c0_3, %c0_4] : memref<1x128xf32, #tpu.memory_space<vmem>>, vector<1x128xf32>
    %cst = arith.constant dense<0.000000e+00> : vector<16xf32>
    %3 = vector.multi_reduction <add>, %0, %cst [1] : vector<16x128xf32> to vector<16xf32>
    %4 = vector.shape_cast %3 : vector<16xf32> to vector<16x1xf32>
    %cst_5 = arith.constant 1.280000e+02 : f32
    %5 = vector.broadcast %cst_5 : f32 to vector<16x1xf32>
    %6 = arith.divf %4, %5 : vector<16x1xf32>
    %7 = vector.broadcast %6 : vector<16x1xf32> to vector<16x128xf32>
    %8 = arith.subf %0, %7 : vector<16x128xf32>
    %9 = arith.mulf %8, %8 : vector<16x128xf32>
    %cst_6 = arith.constant dense<0.000000e+00> : vector<16xf32>
    %10 = vector.multi_reduction <add>, %9, %cst_6 [1] : vector<16x128xf32> to vector<16xf32>
    %11 = vector.shape_cast %10 : vector<16xf32> to vector<16x1xf32>
    %cst_7 = arith.constant 0.00787401571 : f32
    %12 = vector.broadcast %cst_7 : f32 to vector<16x1xf32>
    %13 = arith.mulf %11, %12 : vector<16x1xf32>
    %14 = math.sqrt %13 : vector<16x1xf32>
    %cst_8 = arith.constant 9.99999997E-7 : f32
    %15 = vector.broadcast %cst_8 : f32 to vector<16x1xf32>
    %16 = arith.addf %14, %15 : vector<16x1xf32>
    %17 = tpu.reciprocal %16 : vector<16x1xf32> -> vector<16x1xf32>
    %18 = vector.broadcast %1 : vector<1x128xf32> to vector<16x128xf32>
    %19 = vector.broadcast %17 : vector<16x1xf32> to vector<16x128xf32>
    %20 = arith.mulf %18, %19 : vector<16x128xf32>
    %21 = arith.mulf %8, %20 : vector<16x128xf32>
    %22 = vector.broadcast %2 : vector<1x128xf32> to vector<16x128xf32>
    %23 = arith.addf %21, %22 : vector<16x128xf32>
    %24 = arith.truncf %23 : vector<16x128xf32> to vector<16x128xbf16>
    %c0_9 = arith.constant 0 : index
    %c0_10 = arith.constant 0 : index
    %25 = vector.load %arg2[%c0_9, %c0_10] : memref<128x384xbf16, #tpu.memory_space<vmem>>, vector<128x384xbf16>
    %cst_11 = arith.constant dense<0.000000e+00> : vector<16x384xf32>
    %26 = tpu.matmul %24, %25, %cst_11 {dimension_numbers = #tpu.dot_dimension_numbers<[1], [0], [0], [1], [0, 0, 1, 1], [], []>} : vector<16x128xbf16>, vector<128x384xbf16>, vector<16x384xf32> -> vector<16x384xf32>
    %c0_12 = arith.constant 0 : index
    %c0_13 = arith.constant 0 : index
    %27 = vector.load %arg3[%c0_12, %c0_13] : memref<1x384xf32, #tpu.memory_space<vmem>>, vector<1x384xf32>
    %28 = vector.broadcast %27 : vector<1x384xf32> to vector<16x384xf32>
    %29 = arith.addf %26, %28 : vector<16x384xf32>
    %30 = vector.extract_strided_slice %29 {offsets = [0, 0], sizes = [16, 128], strides = [1, 1]} : vector<16x384xf32> to vector<16x128xf32>
    %31 = vector.shape_cast %30 : vector<16x128xf32> to vector<1x16x8x16xf32>
    %32 = tpu.transpose %31, [0, 2, 1, 3] : vector<1x16x8x16xf32> -> vector<1x8x16x16xf32>
    %33 = vector.shape_cast %32 : vector<1x8x16x16xf32> to vector<8x16x16xf32>
    %34 = arith.truncf %33 : vector<8x16x16xf32> to vector<8x16x16xbf16>
    %35 = vector.extract_strided_slice %29 {offsets = [0, 128], sizes = [16, 128], strides = [1, 1]} : vector<16x384xf32> to vector<16x128xf32>
    %36 = vector.shape_cast %35 : vector<16x128xf32> to vector<1x16x8x16xf32>
    %37 = tpu.transpose %36, [0, 2, 1, 3] : vector<1x16x8x16xf32> -> vector<1x8x16x16xf32>
    %38 = vector.shape_cast %37 : vector<1x8x16x16xf32> to vector<8x16x16xf32>
    %39 = arith.truncf %38 : vector<8x16x16xf32> to vector<8x16x16xbf16>
    %40 = vector.extract_strided_slice %29 {offsets = [0, 256], sizes = [16, 128], strides = [1, 1]} : vector<16x384xf32> to vector<16x128xf32>
    %41 = vector.shape_cast %40 : vector<16x128xf32> to vector<1x16x8x16xf32>
    %42 = tpu.transpose %41, [0, 2, 1, 3] : vector<1x16x8x16xf32> -> vector<1x8x16x16xf32>
    %43 = vector.shape_cast %42 : vector<1x8x16x16xf32> to vector<8x16x16xf32>
    %44 = arith.truncf %43 : vector<8x16x16xf32> to vector<8x16x16xbf16>
    "tpu.trace_start"() <{level = 10 : i32, message = "bqd,bkd->bqk"}> : () -> ()
    %cst_14 = arith.constant dense<0.000000e+00> : vector<8x16x16xf32>
    %45 = tpu.matmul %34, %39, %cst_14 {dimension_numbers = #tpu.dot_dimension_numbers<[2], [2], [1], [1], [0, 0, 0, 1, 1, 1], [0], [0]>} : vector<8x16x16xbf16>, vector<8x16x16xbf16>, vector<8x16x16xf32> -> vector<8x16x16xf32>
    "tpu.trace_stop"() : () -> ()
    %cst_15 = arith.constant dense<0xFF800000> : vector<8x16xf32>
    %46 = vector.multi_reduction <maximumf>, %45, %cst_15 [2] : vector<8x16x16xf32> to vector<8x16xf32>
    %47 = vector.shape_cast %46 : vector<8x16xf32> to vector<8x16x1xf32>
    %48 = vector.broadcast %47 : vector<8x16x1xf32> to vector<8x16x16xf32>
    %49 = arith.subf %45, %48 : vector<8x16x16xf32>
    %50 = math.exp %49 : vector<8x16x16xf32>
    %cst_16 = arith.constant dense<0.000000e+00> : vector<8x16xf32>
    %51 = vector.multi_reduction <add>, %50, %cst_16 [2] : vector<8x16x16xf32> to vector<8x16xf32>
    %52 = vector.shape_cast %51 : vector<8x16xf32> to vector<8x16x1xf32>
    %53 = tpu.reciprocal %52 {approx = true} : vector<8x16x1xf32> -> vector<8x16x1xf32>
    %54 = vector.broadcast %53 : vector<8x16x1xf32> to vector<8x16x16xf32>
    %55 = arith.mulf %50, %54 : vector<8x16x16xf32>
    %56 = arith.truncf %55 : vector<8x16x16xf32> to vector<8x16x16xbf16>
    "tpu.trace_start"() <{level = 10 : i32, message = "bqk,bkd->bqd"}> : () -> ()
    %cst_17 = arith.constant dense<0.000000e+00> : vector<8x16x16xf32>
    %57 = tpu.matmul %56, %44, %cst_17 {dimension_numbers = #tpu.dot_dimension_numbers<[2], [1], [1], [2], [0, 0, 0, 1, 1, 2], [0], [0]>} : vector<8x16x16xbf16>, vector<8x16x16xbf16>, vector<8x16x16xf32> -> vector<8x16x16xf32>
    "tpu.trace_stop"() : () -> ()
    %58 = vector.shape_cast %57 : vector<8x16x16xf32> to vector<1x8x16x16xf32>
    %59 = tpu.transpose %58, [0, 2, 1, 3] : vector<1x8x16x16xf32> -> vector<1x16x8x16xf32>
    %60 = vector.shape_cast %59 : vector<1x16x8x16xf32> to vector<16x128xf32>
    %61 = arith.truncf %60 : vector<16x128xf32> to vector<16x128xbf16>
    %c0_18 = arith.constant 0 : index
    %c0_19 = arith.constant 0 : index
    %62 = vector.load %arg4[%c0_18, %c0_19] : memref<128x128xbf16, #tpu.memory_space<vmem>>, vector<128x128xbf16>
    %cst_20 = arith.constant dense<0.000000e+00> : vector<16x128xf32>
    %63 = tpu.matmul %61, %62, %cst_20 {dimension_numbers = #tpu.dot_dimension_numbers<[1], [0], [0], [1], [0, 0, 1, 1], [], []>} : vector<16x128xbf16>, vector<128x128xbf16>, vector<16x128xf32> -> vector<16x128xf32>
    %c0_21 = arith.constant 0 : index
    %c0_22 = arith.constant 0 : index
    %64 = vector.load %arg5[%c0_21, %c0_22] : memref<1x128xf32, #tpu.memory_space<vmem>>, vector<1x128xf32>
    %65 = vector.broadcast %64 : vector<1x128xf32> to vector<16x128xf32>
    %66 = arith.addf %63, %65 : vector<16x128xf32>
    %67 = arith.addf %0, %66 : vector<16x128xf32>
    %c0_23 = arith.constant 0 : index
    %c0_24 = arith.constant 0 : index
    %68 = vector.load %arg15[%c0_23, %c0_24] : memref<16x128xf32, #tpu.memory_space<vmem>>, vector<16x128xf32>
    tpu.vector_store %arg15[%c0_23, %c0_24], %67 {strides = array<i32>} : memref<16x128xf32, #tpu.memory_space<vmem>>, vector<16x128xf32>,
    %c0_25 = arith.constant 0 : index
    %c0_26 = arith.constant 0 : index
    %69 = vector.load %arg12[%c0_25, %c0_26] : memref<1x128xf32, #tpu.memory_space<vmem>>, vector<1x128xf32>
    %c0_27 = arith.constant 0 : index
    %c0_28 = arith.constant 0 : index
    %70 = vector.load %arg13[%c0_27, %c0_28] : memref<1x128xf32, #tpu.memory_space<vmem>>, vector<1x128xf32>
    %cst_29 = arith.constant dense<0.000000e+00> : vector<16xf32>
    %71 = vector.multi_reduction <add>, %67, %cst_29 [1] : vector<16x128xf32> to vector<16xf32>
    %72 = vector.shape_cast %71 : vector<16xf32> to vector<16x1xf32>
    %cst_30 = arith.constant 1.280000e+02 : f32
    %73 = vector.broadcast %cst_30 : f32 to vector<16x1xf32>
    %74 = arith.divf %72, %73 : vector<16x1xf32>
    %75 = vector.broadcast %74 : vector<16x1xf32> to vector<16x128xf32>
    %76 = arith.subf %67, %75 : vector<16x128xf32>
    %77 = arith.mulf %76, %76 : vector<16x128xf32>
    %cst_31 = arith.constant dense<0.000000e+00> : vector<16xf32>
    %78 = vector.multi_reduction <add>, %77, %cst_31 [1] : vector<16x128xf32> to vector<16xf32>
    %79 = vector.shape_cast %78 : vector<16xf32> to vector<16x1xf32>
    %cst_32 = arith.constant 0.00787401571 : f32
    %80 = vector.broadcast %cst_32 : f32 to vector<16x1xf32>
    %81 = arith.mulf %79, %80 : vector<16x1xf32>
    %82 = math.sqrt %81 : vector<16x1xf32>
    %cst_33 = arith.constant 9.99999997E-7 : f32
    %83 = vector.broadcast %cst_33 : f32 to vector<16x1xf32>
    %84 = arith.addf %82, %83 : vector<16x1xf32>
    %85 = tpu.reciprocal %84 : vector<16x1xf32> -> vector<16x1xf32>
    %86 = vector.broadcast %69 : vector<1x128xf32> to vector<16x128xf32>
    %87 = vector.broadcast %85 : vector<16x1xf32> to vector<16x128xf32>
    %88 = arith.mulf %86, %87 : vector<16x128xf32>
    %89 = arith.mulf %76, %88 : vector<16x128xf32>
    %90 = vector.broadcast %70 : vector<1x128xf32> to vector<16x128xf32>
    %91 = arith.addf %89, %90 : vector<16x128xf32>
    %92 = arith.truncf %91 : vector<16x128xf32> to vector<16x128xbf16>
    %c0_34 = arith.constant 0 : index
    %c0_35 = arith.constant 0 : index
    %93 = vector.load %arg11[%c0_34, %c0_35] : memref<1x128xf32, #tpu.memory_space<vmem>>, vector<1x128xf32>
    %94 = vector.broadcast %93 : vector<1x128xf32> to vector<16x128xf32>
    %95 = arith.addf %67, %94 : vector<16x128xf32>
    %c0_36 = arith.constant 0 : index
    %c0_37 = arith.constant 0 : index
    %96 = vector.load %arg8[%c0_36, %c0_37] : memref<128x2048xbf16, #tpu.memory_space<vmem>>, vector<128x512xbf16>
    %cst_38 = arith.constant dense<0.000000e+00> : vector<16x512xf32>
    %97 = tpu.matmul %92, %96, %cst_38 {dimension_numbers = #tpu.dot_dimension_numbers<[1], [0], [0], [1], [0, 0, 1, 1], [], []>} : vector<16x128xbf16>, vector<128x512xbf16>, vector<16x512xf32> -> vector<16x512xf32>
    %c0_39 = arith.constant 0 : index
    %c0_40 = arith.constant 0 : index
    %98 = vector.load %arg9[%c0_39, %c0_40] : memref<1x2048xf32, #tpu.memory_space<vmem>>, vector<1x512xf32>
    %99 = vector.broadcast %98 : vector<1x512xf32> to vector<16x512xf32>
    %100 = arith.addf %97, %99 : vector<16x512xf32>
    %cst_41 = arith.constant 0.000000e+00 : f32
    %101 = vector.broadcast %cst_41 : f32 to vector<16x512xf32>
    %102 = arith.maximumf %100, %101 : vector<16x512xf32>
    %103 = arith.truncf %102 : vector<16x512xf32> to vector<16x512xbf16>
    %c0_42 = arith.constant 0 : index
    %c0_43 = arith.constant 0 : index
    %104 = vector.load %arg10[%c0_42, %c0_43] : memref<2048x128xbf16, #tpu.memory_space<vmem>>, vector<512x128xbf16>
    %cst_44 = arith.constant dense<0.000000e+00> : vector<16x128xf32>
    %105 = tpu.matmul %103, %104, %cst_44 {dimension_numbers = #tpu.dot_dimension_numbers<[1], [0], [0], [1], [0, 0, 1, 1], [], []>} : vector<16x512xbf16>, vector<512x128xbf16>, vector<16x128xf32> -> vector<16x128xf32>
    %106 = arith.addf %95, %105 : vector<16x128xf32>
    %c0_45 = arith.constant 0 : index
    %c512 = arith.constant 512 : index
    %107 = vector.load %arg8[%c0_45, %c512] : memref<128x2048xbf16, #tpu.memory_space<vmem>>, vector<128x512xbf16>
    %cst_46 = arith.constant dense<0.000000e+00> : vector<16x512xf32>
    %108 = tpu.matmul %92, %107, %cst_46 {dimension_numbers = #tpu.dot_dimension_numbers<[1], [0], [0], [1], [0, 0, 1, 1], [], []>} : vector<16x128xbf16>, vector<128x512xbf16>, vector<16x512xf32> -> vector<16x512xf32>
    %c0_47 = arith.constant 0 : index
    %c512_48 = arith.constant 512 : index
    %109 = vector.load %arg9[%c0_47, %c512_48] : memref<1x2048xf32, #tpu.memory_space<vmem>>, vector<1x512xf32>
    %110 = vector.broadcast %109 : vector<1x512xf32> to vector<16x512xf32>
    %111 = arith.addf %108, %110 : vector<16x512xf32>
    %cst_49 = arith.constant 0.000000e+00 : f32
    %112 = vector.broadcast %cst_49 : f32 to vector<16x512xf32>
    %113 = arith.maximumf %111, %112 : vector<16x512xf32>
    %114 = arith.truncf %113 : vector<16x512xf32> to vector<16x512xbf16>
    %c512_50 = arith.constant 512 : index
    %c0_51 = arith.constant 0 : index
    %115 = vector.load %arg10[%c512_50, %c0_51] : memref<2048x128xbf16, #tpu.memory_space<vmem>>, vector<512x128xbf16>
    %cst_52 = arith.constant dense<0.000000e+00> : vector<16x128xf32>
    %116 = tpu.matmul %114, %115, %cst_52 {dimension_numbers = #tpu.dot_dimension_numbers<[1], [0], [0], [1], [0, 0, 1, 1], [], []>} : vector<16x512xbf16>, vector<512x128xbf16>, vector<16x128xf32> -> vector<16x128xf32>
    %117 = arith.addf %106, %116 : vector<16x128xf32>
    %c0_53 = arith.constant 0 : index
    %c1024 = arith.constant 1024 : index
    %118 = vector.load %arg8[%c0_53, %c1024] : memref<128x2048xbf16, #tpu.memory_space<vmem>>, vector<128x512xbf16>
    %cst_54 = arith.constant dense<0.000000e+00> : vector<16x512xf32>
    %119 = tpu.matmul %92, %118, %cst_54 {dimension_numbers = #tpu.dot_dimension_numbers<[1], [0], [0], [1], [0, 0, 1, 1], [], []>} : vector<16x128xbf16>, vector<128x512xbf16>, vector<16x512xf32> -> vector<16x512xf32>
    %c0_55 = arith.constant 0 : index
    %c1024_56 = arith.constant 1024 : index
    %120 = vector.load %arg9[%c0_55, %c1024_56] : memref<1x2048xf32, #tpu.memory_space<vmem>>, vector<1x512xf32>
    %121 = vector.broadcast %120 : vector<1x512xf32> to vector<16x512xf32>
    %122 = arith.addf %119, %121 : vector<16x512xf32>
    %cst_57 = arith.constant 0.000000e+00 : f32
    %123 = vector.broadcast %cst_57 : f32 to vector<16x512xf32>
    %124 = arith.maximumf %122, %123 : vector<16x512xf32>
    %125 = arith.truncf %124 : vector<16x512xf32> to vector<16x512xbf16>
    %c1024_58 = arith.constant 1024 : index
    %c0_59 = arith.constant 0 : index
    %126 = vector.load %arg10[%c1024_58, %c0_59] : memref<2048x128xbf16, #tpu.memory_space<vmem>>, vector<512x128xbf16>
    %cst_60 = arith.constant dense<0.000000e+00> : vector<16x128xf32>
    %127 = tpu.matmul %125, %126, %cst_60 {dimension_numbers = #tpu.dot_dimension_numbers<[1], [0], [0], [1], [0, 0, 1, 1], [], []>} : vector<16x512xbf16>, vector<512x128xbf16>, vector<16x128xf32> -> vector<16x128xf32>
    %128 = arith.addf %117, %127 : vector<16x128xf32>
    %c0_61 = arith.constant 0 : index
    %c1536 = arith.constant 1536 : index
    %129 = vector.load %arg8[%c0_61, %c1536] : memref<128x2048xbf16, #tpu.memory_space<vmem>>, vector<128x512xbf16>
    %cst_62 = arith.constant dense<0.000000e+00> : vector<16x512xf32>
    %130 = tpu.matmul %92, %129, %cst_62 {dimension_numbers = #tpu.dot_dimension_numbers<[1], [0], [0], [1], [0, 0, 1, 1], [], []>} : vector<16x128xbf16>, vector<128x512xbf16>, vector<16x512xf32> -> vector<16x512xf32>
    %c0_63 = arith.constant 0 : index
    %c1536_64 = arith.constant 1536 : index
    %131 = vector.load %arg9[%c0_63, %c1536_64] : memref<1x2048xf32, #tpu.memory_space<vmem>>, vector<1x512xf32>
    %132 = vector.broadcast %131 : vector<1x512xf32> to vector<16x512xf32>
    %133 = arith.addf %130, %132 : vector<16x512xf32>
    %cst_65 = arith.constant 0.000000e+00 : f32
    %134 = vector.broadcast %cst_65 : f32 to vector<16x512xf32>
    %135 = arith.maximumf %133, %134 : vector<16x512xf32>
    %136 = arith.truncf %135 : vector<16x512xf32> to vector<16x512xbf16>
    %c1536_66 = arith.constant 1536 : index
    %c0_67 = arith.constant 0 : index
    %137 = vector.load %arg10[%c1536_66, %c0_67] : memref<2048x128xbf16, #tpu.memory_space<vmem>>, vector<512x128xbf16>
    %cst_68 = arith.constant dense<0.000000e+00> : vector<16x128xf32>
    %138 = tpu.matmul %136, %137, %cst_68 {dimension_numbers = #tpu.dot_dimension_numbers<[1], [0], [0], [1], [0, 0, 1, 1], [], []>} : vector<16x512xbf16>, vector<512x128xbf16>, vector<16x128xf32> -> vector<16x128xf32>
    %139 = arith.addf %128, %138 : vector<16x128xf32>
    %c0_69 = arith.constant 0 : index
    %c0_70 = arith.constant 0 : index
    %140 = vector.load %arg14[%c0_69, %c0_70] : memref<16x128xf32, #tpu.memory_space<vmem>>, vector<16x128xf32>
    tpu.vector_store %arg14[%c0_69, %c0_70], %139 {strides = array<i32>} : memref<16x128xf32, #tpu.memory_space<vmem>>, vector<16x128xf32>,
    return
  }
  func.func @transform_0(%arg0: i32) -> (i32, i32) {
    %c0_i32 = arith.constant 0 : i32
    %c0_i32_0 = arith.constant 0 : i32
    return %arg0, %c0_i32 : i32, i32
  }
  func.func @transform_1(%arg0: i32) -> (i32, i32) {
    %c0_i32 = arith.constant 0 : i32
    %c0_i32_0 = arith.constant 0 : i32
    %c0_i32_1 = arith.constant 0 : i32
    return %c0_i32, %c0_i32_0 : i32, i32
  }
  func.func @transform_2(%arg0: i32) -> (i32, i32) {
    %c0_i32 = arith.constant 0 : i32
    %c0_i32_0 = arith.constant 0 : i32
    %c0_i32_1 = arith.constant 0 : i32
    return %c0_i32, %c0_i32_0 : i32, i32
  }
  func.func @transform_3(%arg0: i32) -> (i32, i32) {
    %c0_i32 = arith.constant 0 : i32
    %c0_i32_0 = arith.constant 0 : i32
    %c0_i32_1 = arith.constant 0 : i32
    return %c0_i32, %c0_i32_0 : i32, i32
  }
  func.func @transform_4(%arg0: i32) -> (i32, i32) {
    %c0_i32 = arith.constant 0 : i32
    %c0_i32_0 = arith.constant 0 : i32
    %c0_i32_1 = arith.constant 0 : i32
    return %c0_i32, %c0_i32_0 : i32, i32
  }
  func.func @transform_5(%arg0: i32) -> (i32, i32) {
    %c0_i32 = arith.constant 0 : i32
    %c0_i32_0 = arith.constant 0 : i32
    %c0_i32_1 = arith.constant 0 : i32
    return %c0_i32, %c0_i32_0 : i32, i32
  }
  func.func @transform_6(%arg0: i32) -> (i32, i32) {
    %c0_i32 = arith.constant 0 : i32
    %c0_i32_0 = arith.constant 0 : i32
    %c0_i32_1 = arith.constant 0 : i32
    return %c0_i32, %c0_i32_0 : i32, i32
  }
  func.func @transform_7(%arg0: i32) -> (i32, i32) {
    %c0_i32 = arith.constant 0 : i32
    %c0_i32_0 = arith.constant 0 : i32
    %c0_i32_1 = arith.constant 0 : i32
    return %c0_i32, %c0_i32_0 : i32, i32
  }
  func.func @transform_8(%arg0: i32) -> (i32, i32) {
    %c0_i32 = arith.constant 0 : i32
    %c0_i32_0 = arith.constant 0 : i32
    %c0_i32_1 = arith.constant 0 : i32
    return %c0_i32, %c0_i32_0 : i32, i32
  }
  func.func @transform_9(%arg0: i32) -> (i32, i32) {
    %c0_i32 = arith.constant 0 : i32
    %c0_i32_0 = arith.constant 0 : i32
    %c0_i32_1 = arith.constant 0 : i32
    return %c0_i32, %c0_i32_0 : i32, i32
  }
  func.func @transform_10(%arg0: i32) -> (i32, i32) {
    %c0_i32 = arith.constant 0 : i32
    %c0_i32_0 = arith.constant 0 : i32
    %c0_i32_1 = arith.constant 0 : i32
    return %c0_i32, %c0_i32_0 : i32, i32
  }
  func.func @transform_11(%arg0: i32) -> (i32, i32) {
    %c0_i32 = arith.constant 0 : i32
    %c0_i32_0 = arith.constant 0 : i32
    %c0_i32_1 = arith.constant 0 : i32
    return %c0_i32, %c0_i32_0 : i32, i32
  }
  func.func @transform_12(%arg0: i32) -> (i32, i32) {
    %c0_i32 = arith.constant 0 : i32
    %c0_i32_0 = arith.constant 0 : i32
    %c0_i32_1 = arith.constant 0 : i32
    return %c0_i32, %c0_i32_0 : i32, i32
  }
  func.func @transform_13(%arg0: i32) -> (i32, i32) {
    %c0_i32 = arith.constant 0 : i32
    %c0_i32_0 = arith.constant 0 : i32
    return %arg0, %c0_i32 : i32, i32
  }
  func.func @transform_14(%arg0: i32) -> (i32, i32) {
    %c0_i32 = arith.constant 0 : i32
    %c0_i32_0 = arith.constant 0 : i32
    return %arg0, %c0_i32 : i32, i32
  }
}

module attributes {stable_mosaic.version = 11 : i64} {
  func.func @encoder_layer_kernel(%arg0: i32, %arg1: memref<16x128xf32, #tpu.memory_space<vmem>>, %arg2: memref<128x384xbf16, #tpu.memory_space<vmem>>, %arg3: memref<1x384xf32, #tpu.memory_space<vmem>>, %arg4: memref<128x128xbf16, #tpu.memory_space<vmem>>, %arg5: memref<1x128xf32, #tpu.memory_space<vmem>>, %arg6: memref<1x128xf32, #tpu.memory_space<vmem>>, %arg7: memref<1x128xf32, #tpu.memory_space<vmem>>, %arg8: memref<128x2048xbf16, #tpu.memory_space<vmem>>, %arg9: memref<1x2048xf32, #tpu.memory_space<vmem>>, %arg10: memref<2048x128xbf16, #tpu.memory_space<vmem>>, %arg11: memref<1x128xf32, #tpu.memory_space<vmem>>, %arg12: memref<1x128xf32, #tpu.memory_space<vmem>>, %arg13: memref<1x128xf32, #tpu.memory_space<vmem>>, %arg14: memref<16x128xf32, #tpu.memory_space<vmem>>, %arg15: memref<16x128xf32, #tpu.memory_space<vmem>>) attributes {dimension_semantics = [#tpu.dimension_semantics<parallel>], iteration_bounds = array<i64: 2>, scalar_prefetch = 0 : i64, scratch_operands = 0 : i64, tpu.core_type = #tpu.core_type<tc>, window_params = [{transform_indices = @transform_0, window_bounds = array<i64: 16, 128>}, {pipeline_mode = #tpu.pipeline_mode<synchronous>, transform_indices = @transform_1, window_bounds = array<i64: 128, 384>}, {pipeline_mode = #tpu.pipeline_mode<synchronous>, transform_indices = @transform_2, window_bounds = array<i64: 1, 384>}, {pipeline_mode = #tpu.pipeline_mode<synchronous>, transform_indices = @transform_3, window_bounds = array<i64: 128, 128>}, {pipeline_mode = #tpu.pipeline_mode<synchronous>, transform_indices = @transform_4, window_bounds = array<i64: 1, 128>}, {pipeline_mode = #tpu.pipeline_mode<synchronous>, transform_indices = @transform_5, window_bounds = array<i64: 1, 128>}, {pipeline_mode = #tpu.pipeline_mode<synchronous>, transform_indices = @transform_6, window_bounds = array<i64: 1, 128>}, {pipeline_mode = #tpu.pipeline_mode<synchronous>, transform_indices = @transform_7, window_bounds = array<i64: 128, 2048>}, {pipeline_mode = #tpu.pipeline_mode<synchronous>, transform_indices = @transform_8, window_bounds = array<i64: 1, 2048>}, {pipeline_mode = #tpu.pipeline_mode<synchronous>, transform_indices = @transform_9, window_bounds = array<i64: 2048, 128>}, {pipeline_mode = #tpu.pipeline_mode<synchronous>, transform_indices = @transform_10, window_bounds = array<i64: 1, 128>}, {pipeline_mode = #tpu.pipeline_mode<synchronous>, transform_indices = @transform_11, window_bounds = array<i64: 1, 128>}, {pipeline_mode = #tpu.pipeline_mode<synchronous>, transform_indices = @transform_12, window_bounds = array<i64: 1, 128>}, {transform_indices = @transform_13, window_bounds = array<i64: 16, 128>}, {transform_indices = @transform_14, window_bounds = array<i64: 16, 128>}]} {
    %c0 = arith.constant 0 : index
    %c0_0 = arith.constant 0 : index
    %0 = vector.load %arg1[%c0, %c0_0] : memref<16x128xf32, #tpu.memory_space<vmem>>, vector<16x128xf32>
    %c0_1 = arith.constant 0 : index
    %c0_2 = arith.constant 0 : index
    %1 = vector.load %arg6[%c0_1, %c0_2] : memref<1x128xf32, #tpu.memory_space<vmem>>, vector<1x128xf32>
    %c0_3 = arith.constant 0 : index
    %c0_4 = arith.constant 0 : index
    %2 = vector.load %arg7[%c0_3, %c0_4] : memref<1x128xf32, #tpu.memory_space<vmem>>, vector<1x128xf32>
    %cst = arith.constant dense<0.000000e+00> : vector<16xf32>
    %3 = vector.multi_reduction <add>, %0, %cst [1] : vector<16x128xf32> to vector<16xf32>
    %4 = vector.shape_cast %3 : vector<16xf32> to vector<16x1xf32>
    %cst_5 = arith.constant 1.280000e+02 : f32
    %5 = vector.broadcast %cst_5 : f32 to vector<16x1xf32>
    %6 = arith.divf %4, %5 : vector<16x1xf32>
    %7 = vector.broadcast %6 : vector<16x1xf32> to vector<16x128xf32>
    %8 = arith.subf %0, %7 : vector<16x128xf32>
    %9 = arith.mulf %8, %8 : vector<16x128xf32>
    %cst_6 = arith.constant dense<0.000000e+00> : vector<16xf32>
    %10 = vector.multi_reduction <add>, %9, %cst_6 [1] : vector<16x128xf32> to vector<16xf32>
    %11 = vector.shape_cast %10 : vector<16xf32> to vector<16x1xf32>
    %cst_7 = arith.constant 0.00787401571 : f32
    %12 = vector.broadcast %cst_7 : f32 to vector<16x1xf32>
    %13 = arith.mulf %11, %12 : vector<16x1xf32>
    %14 = math.sqrt %13 : vector<16x1xf32>
    %cst_8 = arith.constant 9.99999997E-7 : f32
    %15 = vector.broadcast %cst_8 : f32 to vector<16x1xf32>
    %16 = arith.addf %14, %15 : vector<16x1xf32>
    %17 = tpu.reciprocal %16 : vector<16x1xf32> -> vector<16x1xf32>
    %18 = vector.broadcast %1 : vector<1x128xf32> to vector<16x128xf32>
    %19 = vector.broadcast %17 : vector<16x1xf32> to vector<16x128xf32>
    %20 = arith.mulf %18, %19 : vector<16x128xf32>
    %21 = arith.mulf %8, %20 : vector<16x128xf32>
    %22 = vector.broadcast %2 : vector<1x128xf32> to vector<16x128xf32>
    %23 = arith.addf %21, %22 : vector<16x128xf32>
    %24 = arith.truncf %23 : vector<16x128xf32> to vector<16x128xbf16>
    %c0_9 = arith.constant 0 : index
    %c0_10 = arith.constant 0 : index
    %25 = vector.load %arg2[%c0_9, %c0_10] : memref<128x384xbf16, #tpu.memory_space<vmem>>, vector<128x384xbf16>
    %cst_11 = arith.constant dense<0.000000e+00> : vector<16x384xf32>
    %26 = tpu.matmul %24, %25, %cst_11 {dimension_numbers = #tpu.dot_dimension_numbers<[1], [0], [0], [1], [0, 0, 1, 1], [], []>} : vector<16x128xbf16>, vector<128x384xbf16>, vector<16x384xf32> -> vector<16x384xf32>
    %c0_12 = arith.constant 0 : index
    %c0_13 = arith.constant 0 : index
    %27 = vector.load %arg3[%c0_12, %c0_13] : memref<1x384xf32, #tpu.memory_space<vmem>>, vector<1x384xf32>
    %28 = vector.broadcast %27 : vector<1x384xf32> to vector<16x384xf32>
    %29 = arith.addf %26, %28 : vector<16x384xf32>
    %30 = vector.extract_strided_slice %29 {offsets = [0, 0], sizes = [16, 128], strides = [1, 1]} : vector<16x384xf32> to vector<16x128xf32>
    %31 = vector.shape_cast %30 : vector<16x128xf32> to vector<1x16x8x16xf32>
    %32 = tpu.transpose %31, [0, 2, 1, 3] : vector<1x16x8x16xf32> -> vector<1x8x16x16xf32>
    %33 = vector.shape_cast %32 : vector<1x8x16x16xf32> to vector<8x16x16xf32>
    %34 = arith.truncf %33 : vector<8x16x16xf32> to vector<8x16x16xbf16>
    %35 = vector.extract_strided_slice %29 {offsets = [0, 128], sizes = [16, 128], strides = [1, 1]} : vector<16x384xf32> to vector<16x128xf32>
    %36 = vector.shape_cast %35 : vector<16x128xf32> to vector<1x16x8x16xf32>
    %37 = tpu.transpose %36, [0, 2, 1, 3] : vector<1x16x8x16xf32> -> vector<1x8x16x16xf32>
    %38 = vector.shape_cast %37 : vector<1x8x16x16xf32> to vector<8x16x16xf32>
    %39 = arith.truncf %38 : vector<8x16x16xf32> to vector<8x16x16xbf16>
    %40 = vector.extract_strided_slice %29 {offsets = [0, 256], sizes = [16, 128], strides = [1, 1]} : vector<16x384xf32> to vector<16x128xf32>
    %41 = vector.shape_cast %40 : vector<16x128xf32> to vector<1x16x8x16xf32>
    %42 = tpu.transpose %41, [0, 2, 1, 3] : vector<1x16x8x16xf32> -> vector<1x8x16x16xf32>
    %43 = vector.shape_cast %42 : vector<1x8x16x16xf32> to vector<8x16x16xf32>
    %44 = arith.truncf %43 : vector<8x16x16xf32> to vector<8x16x16xbf16>
    "tpu.trace_start"() <{level = 10 : i32, message = "bqd,bkd->bqk"}> : () -> ()
    %cst_14 = arith.constant dense<0.000000e+00> : vector<8x16x16xf32>
    %45 = tpu.matmul %34, %39, %cst_14 {dimension_numbers = #tpu.dot_dimension_numbers<[2], [2], [1], [1], [0, 0, 0, 1, 1, 1], [0], [0]>} : vector<8x16x16xbf16>, vector<8x16x16xbf16>, vector<8x16x16xf32> -> vector<8x16x16xf32>
    "tpu.trace_stop"() : () -> ()
    %cst_15 = arith.constant dense<0xFF800000> : vector<8x16xf32>
    %46 = vector.multi_reduction <maximumf>, %45, %cst_15 [2] : vector<8x16x16xf32> to vector<8x16xf32>
    %47 = vector.shape_cast %46 : vector<8x16xf32> to vector<8x16x1xf32>
    %48 = vector.broadcast %47 : vector<8x16x1xf32> to vector<8x16x16xf32>
    %49 = arith.subf %45, %48 : vector<8x16x16xf32>
    %50 = math.exp %49 : vector<8x16x16xf32>
    %cst_16 = arith.constant dense<0.000000e+00> : vector<8x16xf32>
    %51 = vector.multi_reduction <add>, %50, %cst_16 [2] : vector<8x16x16xf32> to vector<8x16xf32>
    %52 = vector.shape_cast %51 : vector<8x16xf32> to vector<8x16x1xf32>
    %53 = tpu.reciprocal %52 {approx = true} : vector<8x16x1xf32> -> vector<8x16x1xf32>
    %54 = vector.broadcast %53 : vector<8x16x1xf32> to vector<8x16x16xf32>
    %55 = arith.mulf %50, %54 : vector<8x16x16xf32>
    %56 = arith.truncf %55 : vector<8x16x16xf32> to vector<8x16x16xbf16>
    "tpu.trace_start"() <{level = 10 : i32, message = "bqk,bkd->bqd"}> : () -> ()
    %cst_17 = arith.constant dense<0.000000e+00> : vector<8x16x16xf32>
    %57 = tpu.matmul %56, %44, %cst_17 {dimension_numbers = #tpu.dot_dimension_numbers<[2], [1], [1], [2], [0, 0, 0, 1, 1, 2], [0], [0]>} : vector<8x16x16xbf16>, vector<8x16x16xbf16>, vector<8x16x16xf32> -> vector<8x16x16xf32>
    "tpu.trace_stop"() : () -> ()
    %58 = vector.shape_cast %57 : vector<8x16x16xf32> to vector<1x8x16x16xf32>
    %59 = tpu.transpose %58, [0, 2, 1, 3] : vector<1x8x16x16xf32> -> vector<1x16x8x16xf32>
    %60 = vector.shape_cast %59 : vector<1x16x8x16xf32> to vector<16x128xf32>
    %61 = arith.truncf %60 : vector<16x128xf32> to vector<16x128xbf16>
    %c0_18 = arith.constant 0 : index
    %c0_19 = arith.constant 0 : index
    %62 = vector.load %arg4[%c0_18, %c0_19] : memref<128x128xbf16, #tpu.memory_space<vmem>>, vector<128x128xbf16>
    %cst_20 = arith.constant dense<0.000000e+00> : vector<16x128xf32>
    %63 = tpu.matmul %61, %62, %cst_20 {dimension_numbers = #tpu.dot_dimension_numbers<[1], [0], [0], [1], [0, 0, 1, 1], [], []>} : vector<16x128xbf16>, vector<128x128xbf16>, vector<16x128xf32> -> vector<16x128xf32>
    %c0_21 = arith.constant 0 : index
    %c0_22 = arith.constant 0 : index
    %64 = vector.load %arg5[%c0_21, %c0_22] : memref<1x128xf32, #tpu.memory_space<vmem>>, vector<1x128xf32>
    %65 = vector.broadcast %64 : vector<1x128xf32> to vector<16x128xf32>
    %66 = arith.addf %63, %65 : vector<16x128xf32>
    %67 = arith.addf %0, %66 : vector<16x128xf32>
    %c0_23 = arith.constant 0 : index
    %c0_24 = arith.constant 0 : index
    %68 = vector.load %arg15[%c0_23, %c0_24] : memref<16x128xf32, #tpu.memory_space<vmem>>, vector<16x128xf32>
    tpu.vector_store %arg15[%c0_23, %c0_24], %67 {strides = array<i32>} : memref<16x128xf32, #tpu.memory_space<vmem>>, vector<16x128xf32>,
    %c0_25 = arith.constant 0 : index
    %c0_26 = arith.constant 0 : index
    %69 = vector.load %arg12[%c0_25, %c0_26] : memref<1x128xf32, #tpu.memory_space<vmem>>, vector<1x128xf32>
    %c0_27 = arith.constant 0 : index
    %c0_28 = arith.constant 0 : index
    %70 = vector.load %arg13[%c0_27, %c0_28] : memref<1x128xf32, #tpu.memory_space<vmem>>, vector<1x128xf32>
    %cst_29 = arith.constant dense<0.000000e+00> : vector<16xf32>
    %71 = vector.multi_reduction <add>, %67, %cst_29 [1] : vector<16x128xf32> to vector<16xf32>
    %72 = vector.shape_cast %71 : vector<16xf32> to vector<16x1xf32>
    %cst_30 = arith.constant 1.280000e+02 : f32
    %73 = vector.broadcast %cst_30 : f32 to vector<16x1xf32>
    %74 = arith.divf %72, %73 : vector<16x1xf32>
    %75 = vector.broadcast %74 : vector<16x1xf32> to vector<16x128xf32>
    %76 = arith.subf %67, %75 : vector<16x128xf32>
    %77 = arith.mulf %76, %76 : vector<16x128xf32>
    %cst_31 = arith.constant dense<0.000000e+00> : vector<16xf32>
    %78 = vector.multi_reduction <add>, %77, %cst_31 [1] : vector<16x128xf32> to vector<16xf32>
    %79 = vector.shape_cast %78 : vector<16xf32> to vector<16x1xf32>
    %cst_32 = arith.constant 0.00787401571 : f32
    %80 = vector.broadcast %cst_32 : f32 to vector<16x1xf32>
    %81 = arith.mulf %79, %80 : vector<16x1xf32>
    %82 = math.sqrt %81 : vector<16x1xf32>
    %cst_33 = arith.constant 9.99999997E-7 : f32
    %83 = vector.broadcast %cst_33 : f32 to vector<16x1xf32>
    %84 = arith.addf %82, %83 : vector<16x1xf32>
    %85 = tpu.reciprocal %84 : vector<16x1xf32> -> vector<16x1xf32>
    %86 = vector.broadcast %69 : vector<1x128xf32> to vector<16x128xf32>
    %87 = vector.broadcast %85 : vector<16x1xf32> to vector<16x128xf32>
    %88 = arith.mulf %86, %87 : vector<16x128xf32>
    %89 = arith.mulf %76, %88 : vector<16x128xf32>
    %90 = vector.broadcast %70 : vector<1x128xf32> to vector<16x128xf32>
    %91 = arith.addf %89, %90 : vector<16x128xf32>
    %92 = arith.truncf %91 : vector<16x128xf32> to vector<16x128xbf16>
    %c0_34 = arith.constant 0 : index
    %c0_35 = arith.constant 0 : index
    %93 = vector.load %arg11[%c0_34, %c0_35] : memref<1x128xf32, #tpu.memory_space<vmem>>, vector<1x128xf32>
    %94 = vector.broadcast %93 : vector<1x128xf32> to vector<16x128xf32>
    %95 = arith.addf %67, %94 : vector<16x128xf32>
    %c0_36 = arith.constant 0 : index
    %c0_37 = arith.constant 0 : index
    %96 = vector.load %arg8[%c0_36, %c0_37] : memref<128x2048xbf16, #tpu.memory_space<vmem>>, vector<128x512xbf16>
    %cst_38 = arith.constant dense<0.000000e+00> : vector<16x512xf32>
    %97 = tpu.matmul %92, %96, %cst_38 {dimension_numbers = #tpu.dot_dimension_numbers<[1], [0], [0], [1], [0, 0, 1, 1], [], []>} : vector<16x128xbf16>, vector<128x512xbf16>, vector<16x512xf32> -> vector<16x512xf32>
    %c0_39 = arith.constant 0 : index
    %c0_40 = arith.constant 0 : index
    %98 = vector.load %arg9[%c0_39, %c0_40] : memref<1x2048xf32, #tpu.memory_space<vmem>>, vector<1x512xf32>
    %99 = vector.broadcast %98 : vector<1x512xf32> to vector<16x512xf32>
    %100 = arith.addf %97, %99 : vector<16x512xf32>
    %cst_41 = arith.constant 0.000000e+00 : f32
    %101 = vector.broadcast %cst_41 : f32 to vector<16x512xf32>
    %102 = arith.maximumf %100, %101 : vector<16x512xf32>
    %103 = arith.truncf %102 : vector<16x512xf32> to vector<16x512xbf16>
    %c0_42 = arith.constant 0 : index
    %c0_43 = arith.constant 0 : index
    %104 = vector.load %arg10[%c0_42, %c0_43] : memref<2048x128xbf16, #tpu.memory_space<vmem>>, vector<512x128xbf16>
    %cst_44 = arith.constant dense<0.000000e+00> : vector<16x128xf32>
    %105 = tpu.matmul %103, %104, %cst_44 {dimension_numbers = #tpu.dot_dimension_numbers<[1], [0], [0], [1], [0, 0, 1, 1], [], []>} : vector<16x512xbf16>, vector<512x128xbf16>, vector<16x128xf32> -> vector<16x128xf32>
    %106 = arith.addf %95, %105 : vector<16x128xf32>
    %c0_45 = arith.constant 0 : index
    %c512 = arith.constant 512 : index
    %107 = vector.load %arg8[%c0_45, %c512] : memref<128x2048xbf16, #tpu.memory_space<vmem>>, vector<128x512xbf16>
    %cst_46 = arith.constant dense<0.000000e+00> : vector<16x512xf32>
    %108 = tpu.matmul %92, %107, %cst_46 {dimension_numbers = #tpu.dot_dimension_numbers<[1], [0], [0], [1], [0, 0, 1, 1], [], []>} : vector<16x128xbf16>, vector<128x512xbf16>, vector<16x512xf32> -> vector<16x512xf32>
    %c0_47 = arith.constant 0 : index
    %c512_48 = arith.constant 512 : index
    %109 = vector.load %arg9[%c0_47, %c512_48] : memref<1x2048xf32, #tpu.memory_space<vmem>>, vector<1x512xf32>
    %110 = vector.broadcast %109 : vector<1x512xf32> to vector<16x512xf32>
    %111 = arith.addf %108, %110 : vector<16x512xf32>
    %cst_49 = arith.constant 0.000000e+00 : f32
    %112 = vector.broadcast %cst_49 : f32 to vector<16x512xf32>
    %113 = arith.maximumf %111, %112 : vector<16x512xf32>
    %114 = arith.truncf %113 : vector<16x512xf32> to vector<16x512xbf16>
    %c512_50 = arith.constant 512 : index
    %c0_51 = arith.constant 0 : index
    %115 = vector.load %arg10[%c512_50, %c0_51] : memref<2048x128xbf16, #tpu.memory_space<vmem>>, vector<512x128xbf16>
    %cst_52 = arith.constant dense<0.000000e+00> : vector<16x128xf32>
    %116 = tpu.matmul %114, %115, %cst_52 {dimension_numbers = #tpu.dot_dimension_numbers<[1], [0], [0], [1], [0, 0, 1, 1], [], []>} : vector<16x512xbf16>, vector<512x128xbf16>, vector<16x128xf32> -> vector<16x128xf32>
    %117 = arith.addf %106, %116 : vector<16x128xf32>
    %c0_53 = arith.constant 0 : index
    %c1024 = arith.constant 1024 : index
    %118 = vector.load %arg8[%c0_53, %c1024] : memref<128x2048xbf16, #tpu.memory_space<vmem>>, vector<128x512xbf16>
    %cst_54 = arith.constant dense<0.000000e+00> : vector<16x512xf32>
    %119 = tpu.matmul %92, %118, %cst_54 {dimension_numbers = #tpu.dot_dimension_numbers<[1], [0], [0], [1], [0, 0, 1, 1], [], []>} : vector<16x128xbf16>, vector<128x512xbf16>, vector<16x512xf32> -> vector<16x512xf32>
    %c0_55 = arith.constant 0 : index
    %c1024_56 = arith.constant 1024 : index
    %120 = vector.load %arg9[%c0_55, %c1024_56] : memref<1x2048xf32, #tpu.memory_space<vmem>>, vector<1x512xf32>
    %121 = vector.broadcast %120 : vector<1x512xf32> to vector<16x512xf32>
    %122 = arith.addf %119, %121 : vector<16x512xf32>
    %cst_57 = arith.constant 0.000000e+00 : f32
    %123 = vector.broadcast %cst_57 : f32 to vector<16x512xf32>
    %124 = arith.maximumf %122, %123 : vector<16x512xf32>
    %125 = arith.truncf %124 : vector<16x512xf32> to vector<16x512xbf16>
    %c1024_58 = arith.constant 1024 : index
    %c0_59 = arith.constant 0 : index
    %126 = vector.load %arg10[%c1024_58, %c0_59] : memref<2048x128xbf16, #tpu.memory_space<vmem>>, vector<512x128xbf16>
    %cst_60 = arith.constant dense<0.000000e+00> : vector<16x128xf32>
    %127 = tpu.matmul %125, %126, %cst_60 {dimension_numbers = #tpu.dot_dimension_numbers<[1], [0], [0], [1], [0, 0, 1, 1], [], []>} : vector<16x512xbf16>, vector<512x128xbf16>, vector<16x128xf32> -> vector<16x128xf32>
    %128 = arith.addf %117, %127 : vector<16x128xf32>
    %c0_61 = arith.constant 0 : index
    %c1536 = arith.constant 1536 : index
    %129 = vector.load %arg8[%c0_61, %c1536] : memref<128x2048xbf16, #tpu.memory_space<vmem>>, vector<128x512xbf16>
    %cst_62 = arith.constant dense<0.000000e+00> : vector<16x512xf32>
    %130 = tpu.matmul %92, %129, %cst_62 {dimension_numbers = #tpu.dot_dimension_numbers<[1], [0], [0], [1], [0, 0, 1, 1], [], []>} : vector<16x128xbf16>, vector<128x512xbf16>, vector<16x512xf32> -> vector<16x512xf32>
    %c0_63 = arith.constant 0 : index
    %c1536_64 = arith.constant 1536 : index
    %131 = vector.load %arg9[%c0_63, %c1536_64] : memref<1x2048xf32, #tpu.memory_space<vmem>>, vector<1x512xf32>
    %132 = vector.broadcast %131 : vector<1x512xf32> to vector<16x512xf32>
    %133 = arith.addf %130, %132 : vector<16x512xf32>
    %cst_65 = arith.constant 0.000000e+00 : f32
    %134 = vector.broadcast %cst_65 : f32 to vector<16x512xf32>
    %135 = arith.maximumf %133, %134 : vector<16x512xf32>
    %136 = arith.truncf %135 : vector<16x512xf32> to vector<16x512xbf16>
    %c1536_66 = arith.constant 1536 : index
    %c0_67 = arith.constant 0 : index
    %137 = vector.load %arg10[%c1536_66, %c0_67] : memref<2048x128xbf16, #tpu.memory_space<vmem>>, vector<512x128xbf16>
    %cst_68 = arith.constant dense<0.000000e+00> : vector<16x128xf32>
    %138 = tpu.matmul %136, %137, %cst_68 {dimension_numbers = #tpu.dot_dimension_numbers<[1], [0], [0], [1], [0, 0, 1, 1], [], []>} : vector<16x512xbf16>, vector<512x128xbf16>, vector<16x128xf32> -> vector<16x128xf32>
    %139 = arith.addf %128, %138 : vector<16x128xf32>
    %c0_69 = arith.constant 0 : index
    %c0_70 = arith.constant 0 : index
    %140 = vector.load %arg14[%c0_69, %c0_70] : memref<16x128xf32, #tpu.memory_space<vmem>>, vector<16x128xf32>
    tpu.vector_store %arg14[%c0_69, %c0_70], %139 {strides = array<i32>} : memref<16x128xf32, #tpu.memory_space<vmem>>, vector<16x128xf32>,
    return
  }
  func.func @transform_0(%arg0: i32) -> (i32, i32) {
    %c0_i32 = arith.constant 0 : i32
    %c0_i32_0 = arith.constant 0 : i32
    return %arg0, %c0_i32 : i32, i32
  }
  func.func @transform_1(%arg0: i32) -> (i32, i32) {
    %c0_i32 = arith.constant 0 : i32
    %c0_i32_0 = arith.constant 0 : i32
    %c0_i32_1 = arith.constant 0 : i32
    return %c0_i32, %c0_i32_0 : i32, i32
  }
  func.func @transform_2(%arg0: i32) -> (i32, i32) {
    %c0_i32 = arith.constant 0 : i32
    %c0_i32_0 = arith.constant 0 : i32
    %c0_i32_1 = arith.constant 0 : i32
    return %c0_i32, %c0_i32_0 : i32, i32
  }
  func.func @transform_3(%arg0: i32) -> (i32, i32) {
    %c0_i32 = arith.constant 0 : i32
    %c0_i32_0 = arith.constant 0 : i32
    %c0_i32_1 = arith.constant 0 : i32
    return %c0_i32, %c0_i32_0 : i32, i32
  }
  func.func @transform_4(%arg0: i32) -> (i32, i32) {
    %c0_i32 = arith.constant 0 : i32
    %c0_i32_0 = arith.constant 0 : i32
    %c0_i32_1 = arith.constant 0 : i32
    return %c0_i32, %c0_i32_0 : i32, i32
  }
  func.func @transform_5(%arg0: i32) -> (i32, i32) {
    %c0_i32 = arith.constant 0 : i32
    %c0_i32_0 = arith.constant 0 : i32
    %c0_i32_1 = arith.constant 0 : i32
    return %c0_i32, %c0_i32_0 : i32, i32
  }
  func.func @transform_6(%arg0: i32) -> (i32, i32) {
    %c0_i32 = arith.constant 0 : i32
    %c0_i32_0 = arith.constant 0 : i32
    %c0_i32_1 = arith.constant 0 : i32
    return %c0_i32, %c0_i32_0 : i32, i32
  }
  func.func @transform_7(%arg0: i32) -> (i32, i32) {
    %c0_i32 = arith.constant 0 : i32
    %c0_i32_0 = arith.constant 0 : i32
    %c0_i32_1 = arith.constant 0 : i32
    return %c0_i32, %c0_i32_0 : i32, i32
  }
  func.func @transform_8(%arg0: i32) -> (i32, i32) {
    %c0_i32 = arith.constant 0 : i32
    %c0_i32_0 = arith.constant 0 : i32
    %c0_i32_1 = arith.constant 0 : i32
    return %c0_i32, %c0_i32_0 : i32, i32
  }
  func.func @transform_9(%arg0: i32) -> (i32, i32) {
    %c0_i32 = arith.constant 0 : i32
    %c0_i32_0 = arith.constant 0 : i32
    %c0_i32_1 = arith.constant 0 : i32
    return %c0_i32, %c0_i32_0 : i32, i32
  }
  func.func @transform_10(%arg0: i32) -> (i32, i32) {
    %c0_i32 = arith.constant 0 : i32
    %c0_i32_0 = arith.constant 0 : i32
    %c0_i32_1 = arith.constant 0 : i32
    return %c0_i32, %c0_i32_0 : i32, i32
  }
  func.func @transform_11(%arg0: i32) -> (i32, i32) {
    %c0_i32 = arith.constant 0 : i32
    %c0_i32_0 = arith.constant 0 : i32
    %c0_i32_1 = arith.constant 0 : i32
    return %c0_i32, %c0_i32_0 : i32, i32
  }
  func.func @transform_12(%arg0: i32) -> (i32, i32) {
    %c0_i32 = arith.constant 0 : i32
    %c0_i32_0 = arith.constant 0 : i32
    %c0_i32_1 = arith.constant 0 : i32
    return %c0_i32, %c0_i32_0 : i32, i32
  }
  func.func @transform_13(%arg0: i32) -> (i32, i32) {
    %c0_i32 = arith.constant 0 : i32
    %c0_i32_0 = arith.constant 0 : i32
    return %arg0, %c0_i32 : i32, i32
  }
  func.func @transform_14(%arg0: i32) -> (i32, i32) {
    %c0_i32 = arith.constant 0 : i32
    %c0_i32_0 = arith.constant 0 : i32
    return %arg0, %c0_i32 : i32, i32
  }
}

</mosaic_0001>

<bundles_post_ra>
// kernel: tpu_custom_call.1
= control target key start
LH: loop header
LB: loop body
LE: loop exit
PB: predicated region body
PF: predicated region fallthrough
CT: control target
= control target key end

     0   :  { %s10173_s0 = inlined_call_operand.hbm [shape: f32[32,128], index: 0, kind: input, shape index: {}]   ;;  %s10174_s1 = inlined_call_operand.hbm [shape: bf16[128,384], index: 1, kind: input, shape index: {}]   ;;  %s10175_s2 = inlined_call_operand.vmem [shape: f32[1,384], index: 2, kind: input, shape index: {}]   ;;  %s10176_s3 = inlined_call_operand.hbm [shape: bf16[128,128], index: 3, kind: input, shape index: {}]   ;;  %s10177_s4 = inlined_call_operand.vmem [shape: f32[1,128], index: 4, kind: input, shape index: {}]   ;;  %s10178_s5 = inlined_call_operand.vmem [shape: f32[1,128], index: 5, kind: input, shape index: {}]   ;;  %s10179_s6 = inlined_call_operand.vmem [shape: f32[1,128], index: 6, kind: input, shape index: {}]   ;;  %s10180_s7 = inlined_call_operand.hbm [shape: bf16[128,2048], index: 7, kind: input, shape index: {}]   ;;  %s10181_s8 = inlined_call_operand.vmem [shape: f32[1,2048], index: 8, kind: input, shape index: {}]   ;;  %s10182_s9 = inlined_call_operand.hbm [shape: bf16[2048,128], index: 9, kind: input, shape index: {}]   ;;  %s10183_s10 = inlined_call_operand.vmem [shape: f32[1,128], index: 10, kind: input, shape index: {}]   ;;  %s10184_s11 = inlined_call_operand.vmem [shape: f32[1,128], index: 11, kind: input, shape index: {}]   ;;  %s10185_s12 = inlined_call_operand.vmem [shape: f32[1,128], index: 12, kind: input, shape index: {}]   ;;  %s10186_s13 = inlined_call_operand.hbm [shape: f32[32,128], index: 13, kind: output, shape index: {0}]   ;;  %s10187_s14 = inlined_call_operand.hbm [shape: f32[32,128], index: 14, kind: output, shape index: {1}]  }
   0x1   :  { %10198 = sst [smem:[#allocation21_spill]] %s10174_s1 }
   0x2   :  { %10199 = sst [smem:[#allocation22_spill]] %s10177_s4 }
   0x3   :  { %10200 = sst [smem:[#allocation23_spill]] %s10181_s8 }
   0x4   :  { %10201 = sst [smem:[#allocation24_spill]] %s10183_s10 }
   0x5   :  { %10202 = sst [smem:[#allocation25_spill]] %s10184_s11 }
   0x6   :  { %10203 = sst [smem:[#allocation26_spill]] %s10185_s12 }
   0x7   :  { %10204 = sst [smem:[#allocation27_spill]] %s10186_s13 }
   0x8   :  { %10205 = sst [smem:[#allocation28_spill]] %s10187_s14 }
   0x9   :  { %20 = vsyncpa [#allocation3], 0 }
   0xa   :  { %22 = vsyncpa [#allocation3 + $0x1], 0 }
   0xb   :  { %23 = vsyncpa [#allocation6], 0 }
   0xc   :  { %24 = vsyncpa [#allocation9], 0 }
   0xd   :  { %25 = vsyncpa [#allocation4], 0 }
   0xe   :  { %27 = vsyncpa [#allocation4 + $0x1], 0 }
   0xf   :  { %28 = vsyncpa [#allocation13], 0 }
  0x10   :  { %30 = vsyncpa [#allocation13 + $0x1], 0  ;;  %s8686_s29 = smov 0   ;;  %s8688_s30 = smov 0  }
  0x11   :  { %s8690_s15 = smov 0   ;;  %s8692_s16 = smov 0  }
  0x12 LB: > { %10206 = sst [smem:[#allocation19_spill]] %s8569_s29  ;;  %s8707_s17 = sadd.s32 4294967295, %s8581_s16   ;;  %s8581_s16 = sphi %s8692_s16, %s10244_s16   ;;  %s8577_s15 = sphi %s8690_s15, %s10243_s15   ;;  %s8573_s30 = sphi %s8688_s30, %s10242_s30   ;;  %s8569_s29 = sphi %s8686_s29, %s10241_s29  }
  0x13   : > { %s7168_s18 = sadd.s32 4294967294, %s8581_s16   ;;  %p56_p0 = scmp.ne.s32.totalorder %s8573_s30, %s8569_s29 }
  0x14   : > { %p10191_p1 = scmp.eq.s32.totalorder %s8707_s17, 0  ;;  %p338_p3 = scmp.eq.s32.totalorder %s7168_s18, 1 }
  0x15   : > { %p7169_p5 = scmp.ge.s32.totalorder %s8581_s16, 1  ;;  %p371_p7 = scmp.lt.s32.totalorder %s8581_s16, 3 }
  0x16   : > { %p8716_p4 = por %p10191_p1, %p56_p0  ;;  %p8721_p6 = por %p338_p3, %p56_p0 }
  0x17   : > { %p8726_p8 = pnand %p7169_p5, %p371_p7  ;;  %s8583_s22 = smov [#allocation5]  }
  0x18   : > { %s10207_s19 = scalar_select %p8716_p4, 1, 0 }
  0x19   : > { %s10208_s20 = scalar_select %p8721_p6, 1, 0 }
  0x1a   : > { %s10210_s21 = scalar_select %p8726_p8, 1, 0 }
  0x1b   : > { %10209 = sst [smem:[#allocation20_spill]] %s10208_s20  ;;  %s383_s23 = sshll.u32 %s8583_s22, 4  ;;  %s8730_s23 = int_to_ptr.vmem [resolvable:$true] %s383_s23 }
  0x1c   : > { %p7955_p9 = pneg %p8726_p8  ;;  %s8584_s25 = smov [#allocation8]  }
  0x1d   : > { %s421_s26 = sshll.u32 %s8584_s25, 4  ;;  %s10212_s1 = sld [smem:[#allocation21_spill]]  ;;  %s8741_s26 = int_to_ptr.vmem [resolvable:$true] %s421_s26 }
  0x1e   : > { %p8737_p11 = pnand %p7955_p9, %p10191_p1 }
  0x20   : > { %p8751_p13 = pneg %p8737_p11 }
  0x23   : > { %s8333_s18 = scalar_lea.hbm %s10212_s1, 3072 }
  0x24   : > { %p8334_p12 = scmp.ne.s32.totalorder %s10212_s1, %s8333_s18  ;;  %p8340_p5 = scmp.lt.u32.totalorder %s8333_s18, %s10212_s1 }
  0x26   : > { %p8336_p0 = pnand %p8751_p13, %p8334_p12 }
  0x28   : > { %p8337_p3 = pneg %p8336_p0 }
  0x2a   : > { %p8342_p7 = pnand %p8340_p5, %p8337_p3 }
  0x2c   : > { %8345 = shalt.err (!%p8342_p7)
}
  0x2d   : > { %s8346_s20 = scalar_lea.vmem %s8730_s23, 3072  ;;  %p8354_p2 = scmp.lt.s32.totalorder %s8730_s23, %s8730_s23 }
  0x2e   : > { %p8347_p9 = scmp.ne.s32.totalorder %s8730_s23, %s8346_s20  ;;  %p8355_p6 = scmp.lt.s32.totalorder %s8346_s20, %s8346_s20 }
  0x30   : > { %p8349_p10 = pnand %p8347_p9, %p8751_p13  ;;  %p8356_p12 = por %p8355_p6, %p8354_p2 }
  0x32   : > { %p8350_p1 = pneg %p8349_p10 }
  0x34   : > { %p8357_p0 = pnand %p8356_p12, %p8350_p1 }
  0x36   : > { %8360 = shalt.err (!%p8357_p0)
}
  0x37   : > { %s8585_s27 = smov 192   ;;  %s8586_s13 = smov 12  }
  0x38   : > { %7958 = dma.hbm_to_vmem [thread:$0]  (!%p8737_p11), %s10212_s1, 3072, %s8730_s23, [#allocation6], %s8585_s27, %s8585_s27, %s8586_s13  }
  0x39   : > { %s8361_s14 = scalar_lea.hbm %s10180_s7, 16384 }
  0x3a   : > { %p8362_p2 = scmp.ne.s32.totalorder %s10180_s7, %s8361_s14  ;;  %p8368_p10 = scmp.lt.u32.totalorder %s8361_s14, %s10180_s7 }
  0x3c   : > { %p8364_p1 = pnand %p8362_p2, %p8751_p13 }
  0x3e   : > { %p8365_p6 = pneg %p8364_p1 }
  0x40   : > { %p8370_p3 = pnand %p8368_p10, %p8365_p6 }
  0x42   : > { %8373 = shalt.err (!%p8370_p3)
}
  0x43   : > { %s8374_s23 = scalar_lea.vmem %s8741_s26, 16384  ;;  %p8382_p12 = scmp.lt.s32.totalorder %s8741_s26, %s8741_s26 }
  0x44   : > { %p8375_p5 = scmp.ne.s32.totalorder %s8741_s26, %s8374_s23  ;;  %p8383_p0 = scmp.lt.s32.totalorder %s8374_s23, %s8374_s23 }
  0x46   : > { %p8377_p7 = pnand %p8375_p5, %p8751_p13  ;;  %p8384_p2 = por %p8383_p0, %p8382_p12 }
  0x48   : > { %p8378_p9 = pneg %p8377_p7 }
  0x4a   : > { %p8385_p1 = pnand %p8384_p2, %p8378_p9 }
  0x4c   : > { %8388 = shalt.err (!%p8385_p1)
}
  0x4d   : > { %s8587_s8 = smov 1024   ;;  %s8588_s10 = smov 64  }
  0x4e   : > { %7964 = dma.hbm_to_vmem [thread:$0]  (!%p8737_p11), %s10180_s7, 16384, %s8741_s26, [#allocation9], %s8587_s8, %s8587_s8, %s8588_s10  }
  0x4f   : > { %s8589_s27 = smov [#allocation7]   ;;  %s8590_s28 = smov [#allocation10]  }
  0x50   : > { %s399_s13 = sshll.u32 %s8589_s27, 4  ;;  %s437_s18 = sshll.u32 %s8590_s28, 4  ;;  %s400_s13 = int_to_ptr.vmem [resolvable:$true] %s399_s13  ;;  %s438_s18 = int_to_ptr.vmem [resolvable:$true] %s437_s18 }
  0x51   : > { %s8389_s20 = scalar_lea.hbm %s10176_s3, 1024 }
  0x52   : > { %p8390_p6 = scmp.ne.s32.totalorder %s10176_s3, %s8389_s20  ;;  %p8396_p5 = scmp.lt.u32.totalorder %s8389_s20, %s10176_s3 }
  0x54   : > { %p8392_p10 = pnand %p8390_p6, %p8751_p13 }
  0x56   : > { %p8393_p3 = pneg %p8392_p10 }
  0x58   : > { %p8398_p7 = pnand %p8396_p5, %p8393_p3 }
  0x5a   : > { %8401 = shalt.err (!%p8398_p7)
}
  0x5b   : > { %s8402_s26 = scalar_lea.vmem %s400_s13, 1024  ;;  %p8410_p2 = scmp.lt.s32.totalorder %s400_s13, %s400_s13 }
  0x5c   : > { %p8403_p9 = scmp.ne.s32.totalorder %s400_s13, %s8402_s26  ;;  %p8411_p1 = scmp.lt.s32.totalorder %s8402_s26, %s8402_s26 }
  0x5e   : > { %p8405_p12 = pnand %p8403_p9, %p8751_p13  ;;  %p8412_p4 = por %p8411_p1, %p8410_p2 }
  0x60   : > { %p8406_p0 = pneg %p8405_p12 }
  0x62   : > { %p8413_p8 = pnand %p8412_p4, %p8406_p0 }
  0x64   : > { %8416 = shalt.err (!%p8413_p8)
}
  0x65   : > { %s8591_s1 = smov 4   ;;  %s8417_s14 = scalar_lea.hbm %s10182_s9, 16384 }
  0x66   : > { %7961 = dma.hbm_to_vmem [thread:$0]  (!%p8737_p11), %s10176_s3, 1024, %s400_s13, [#allocation6], %s8588_s10, %s8588_s10, %s8591_s1  }
  0x67   : > { %p8418_p4 = scmp.ne.s32.totalorder %s10182_s9, %s8417_s14  ;;  %p8424_p10 = scmp.lt.u32.totalorder %s8417_s14, %s10182_s9 }
  0x69   : > { %p8420_p8 = pnand %p8418_p4, %p8751_p13 }
  0x6b   : > { %p8421_p6 = pneg %p8420_p8 }
  0x6d   : > { %p8426_p3 = pnand %p8424_p10, %p8421_p6 }
  0x6f   : > { %8429 = shalt.err (!%p8426_p3)
}
  0x70   : > { %s8430_s20 = scalar_lea.vmem %s438_s18, 16384  ;;  %p8438_p12 = scmp.lt.s32.totalorder %s438_s18, %s438_s18 }
  0x71   : > { %p8431_p5 = scmp.ne.s32.totalorder %s438_s18, %s8430_s20  ;;  %p8439_p0 = scmp.lt.s32.totalorder %s8430_s20, %s8430_s20 }
  0x73   : > { %p8433_p7 = pnand %p8431_p5, %p8751_p13  ;;  %p8440_p2 = por %p8439_p0, %p8438_p12 }
  0x75   : > { %p8434_p9 = pneg %p8433_p7 }
  0x77   : > { %p8441_p1 = pnand %p8440_p2, %p8434_p9 }
  0x79   : > { %8444 = shalt.err (!%p8441_p1)
}
  0x7a   : > { %7967 = dma.hbm_to_vmem [thread:$0]  (!%p8737_p11), %s10182_s9, 16384, %s438_s18, [#allocation9], %s8588_s10, %s8588_s10, %s8591_s1  }
  0x7b   : > { %s8837_s29 = sadd.s32 1, %s8581_s16   ;;  %s43_s26 = sadd.s32 1, %s8577_s15 }
  0x7c   : > { %s40_s24 = ssub.s32 %s8581_s16, %s8837_s29  ;;  %p50_p4 = scmp.ne.s32.totalorder %s8577_s15, %s8573_s30 }
  0x7d   : > { %p41_p13 = scmp.eq.s32.totalorder %s40_s24, 0  ;;  %p51_p8 = scmp.eq.s32.totalorder %s8581_s16, 0 }
  0x7e   : > { %p7983_p6 = scmp.lt.s32.totalorder %s8581_s16, 2  ;;  %p10214_p3 = scmp.eq.s32.totalorder %s8707_s17, 1 }
  0x7f   : > { %s8847_s4 = scalar_select %p41_p13, %s8577_s15, %s43_s26  }
  0x80   : > { %p52_p10 = por %p51_p8, %p50_p4  ;;  %p8851_p5 = por %p10214_p3, %p50_p4 }
  0x81   : > { %s460_s8 = sand.u32 1, %s8577_s15   ;;  %s7568_s12 = sshll.u32 %s8581_s16, 8 }
  0x82   : > { %s7175_s10 = sshll.u32 %s460_s8, 4  ;;  %s8860_s14 = scalar_lea.hbm %s10173_s0, %s7568_s12 }
  0x83   : > { %s464_s27 = scalar_lea.vmem [#allocation2], %s7175_s10  ;;  %p8862_p11 = pnand %p7983_p6, %p52_p10 }
  0x84   : > { %s471_s28 = sshll.u32 %s464_s27, 4  ;;  %s8868_s25 = scalar_lea.sflag [#allocation3], %s460_s8  ;;  %s8866_s28 = int_to_ptr.vmem [resolvable:$true] %s471_s28 }
  0x85   : > { %s8445_s20 = scalar_lea.hbm %s8860_s14, 256  ;;  %p8447_p9 = pneg %p8862_p11 }
  0x86   : > { %p8446_p7 = scmp.ne.s32.totalorder %s8860_s14, %s8445_s20  ;;  %s8450_s24 = scalar_lea.hbm %s10173_s0, 512 }
  0x87   : > { %p8451_p2 = scmp.lt.u32.totalorder %s8860_s14, %s10173_s0  ;;  %p8452_p1 = scmp.lt.u32.totalorder %s8450_s24, %s8445_s20 }
  0x88   : > { %p8448_p12 = pnand %p8447_p9, %p8446_p7  ;;  %p8454_p4 = scmp.lt.u32.totalorder %s8445_s20, %s8860_s14 }
  0x89   : > { %p8453_p13 = por %p8452_p1, %p8451_p2 }
  0x8a   : > { %p8449_p0 = pneg %p8448_p12 }
  0x8b   : > { %p8455_p8 = por %p8454_p4, %p8453_p13 }
  0x8d   : > { %p8456_p6 = pnand %p8455_p8, %p8449_p0 }
  0x8f   : > { %8459 = shalt.err (!%p8456_p6)
}
  0x90   : > { %s8460_s8 = scalar_lea.vmem %s8866_s28, 256  ;;  %s8592_s10 = smov [#allocation2]  }
  0x91   : > { %p8461_p10 = scmp.ne.s32.totalorder %s8866_s28, %s8460_s8  ;;  %s8465_s18 = sshll.u32 %s8592_s10, 4  ;;  %s8466_s18 = int_to_ptr.vmem [resolvable:$false] %s8465_s18 }
  0x92   : > { %s8467_s1 = scalar_lea.vmem %s8466_s18, 512  ;;  %p8468_p12 = scmp.lt.s32.totalorder %s8866_s28, %s8466_s18 }
  0x93   : > { %p8463_p3 = pnand %p8461_p10, %p8447_p9  ;;  %p8469_p2 = scmp.lt.s32.totalorder %s8467_s1, %s8460_s8 }
  0x95   : > { %p8464_p7 = pneg %p8463_p3  ;;  %p8470_p1 = por %p8469_p2, %p8468_p12 }
  0x97   : > { %p8471_p13 = pnand %p8470_p1, %p8464_p7 }
  0x99   : > { %8474 = shalt.err (!%p8471_p13)
}
  0x9a   : > { %s8593_s27 = smov 128   ;;  %s8594_s20 = smov 8  }
  0x9b   : > { %7971 = dma.hbm_to_vmem [thread:$0]  (!%p8862_p11), %s8860_s14, 256, %s8866_s28, %s8868_s25, %s8593_s27, %s8593_s27, %s8594_s20  }
  0x9c   : > { %p10217_p9 = scmp.ne.s32.totalorder %s10210_s21, 0 }
  0x9d   : > { %s8899_s13 = sand.u32 (!%p10217_p9), 1, %s8573_s30   ;;  %p10218_p0 = scmp.ne.s32.totalorder (!%p10217_p9), %s10207_s19, 0 }
  0x9e   : > { %483 = sbr.rel (%p10217_p9) target bundleno = 3674 (0xe5a), region = 72  ;;  %s8902_s23 = sshll.u32 (!%p10217_p9), %s8899_s13, 4 }
  0x9f   : > { %s486_s24 = scalar_lea.sflag (!%p10217_p9), [#allocation3], %s8899_s13  ;;  %s8906_s26 = scalar_lea.vmem (!%p10217_p9), [#allocation2], %s8902_s23 }
  0xa5   : > { %8548 = dma.done.wait (%p10218_p0), %s486_s24, 256  }
  0xa6   : > { %8550 = vsyncadd (%p10218_p0), %s486_s24, 4294967040  ;;  %p10219_p11 = scmp.eq.s32.totalorder %s8707_s17, 0 }
  0xa8   : > { %8552 = dma.done.wait (%p10219_p11), [#allocation6], 4096   ;;  %p10220_p4 = pmov %p10219_p11 }
  0xaa   : > { %8554 = vsyncadd (%p10220_p4), [#allocation6], 4294963200  ;;  %p10221_p8 = pmov %p10220_p4 }
  0xab   : > { %p10222_p6 = pmov %p10220_p4 }
  0xac   : > { %8556 = dma.done.wait (%p10221_p8), [#allocation9], 32768  }
  0xad   : > { %8558 = vsyncadd (%p10222_p6), [#allocation9], 4294934528  ;;  %v559_v0 = vld [vmem:[%s8906_s26] sm:$0xff]  ;;  %v560_v1 = vld [vmem:[%s8906_s26 + $0x8] sm:$0xff]  ;;  %v8595_v13 = vmov 0.0   ;;  %v10196_v27 = vmov 0   ;;  %v651_v63 = vlaneseq }
  0xae   : > { %563 = vadd.xlane.f32.xlu0 %v559_v0  ;;  %v8081_v10 = vld [vmem:[#allocation5 + $0x4] ss:$12 sps:$4 sm:$0xff]   ;;  %v8083_v11 = vld [vmem:[#allocation5] ss:$12 sps:$4 sm:$0xff]   ;;  %v8084_v12 = vld [vmem:[#allocation5 + $0x8] ss:$12 sps:$4 sm:$0xff]   ;;  %7797 = vmatprep.subr.bf16.mxu1 %v8595_v13 }
  0xaf   : > { %794 = vmatprep.subr.bf16.mxu0 %v8081_v10  ;;  %7798 = vmatpush3.bf16.msra.mxu1 %v8084_v12  ;;  %v8085_v14 = vld [vmem:[#allocation5 + $0x1c] ss:$12 sps:$4 sm:$0xff]   ;;  %v8087_v15 = vld [vmem:[#allocation5 + $0x18] ss:$12 sps:$4 sm:$0xff]   ;;  %v8088_v16 = vld [vmem:[#allocation5 + $0x20] ss:$12 sps:$4 sm:$0xff]  }
  0xb0   : > { %795 = vmatpush1.bf16.msra.mxu0 %v8083_v11  ;;  %7799 = vmatprep.subr.bf16.mxu1 %v8595_v13  ;;  %v8089_v17 = vld [vmem:[#allocation5 + $0x34] ss:$12 sps:$4 sm:$0xff]   ;;  %v8091_v18 = vld [vmem:[#allocation5 + $0x30] ss:$12 sps:$4 sm:$0xff]   ;;  %v8092_v19 = vld [vmem:[#allocation5 + $0x38] ss:$12 sps:$4 sm:$0xff]  }
  0xb1   : > { %796 = vmatprep.subr.bf16.mxu0 %v8085_v14  ;;  %v8093_v20 = vld [vmem:[#allocation5 + $0x4c] ss:$12 sps:$4 sm:$0xff]   ;;  %v8095_v21 = vld [vmem:[#allocation5 + $0x48] ss:$12 sps:$4 sm:$0xff]   ;;  %v8096_v22 = vld [vmem:[#allocation5 + $0x50] ss:$12 sps:$4 sm:$0xff]   ;;  %826 = vmatprep.mubr.bf16.mxu0 %v10196_v27 }
  0xb2   : > { %565 = vadd.xlane.f32.xlu0 %v560_v1  ;;  %v8097_v23 = vld [vmem:[#allocation5 + $0x64] ss:$12 sps:$4 sm:$0xff]   ;;  %v8099_v24 = vld [vmem:[#allocation5 + $0x60] ss:$12 sps:$4 sm:$0xff]   ;;  %v8100_v25 = vld [vmem:[#allocation5 + $0x68] ss:$12 sps:$4 sm:$0xff]  }
  0xb3   : > { %7800 = vmatpush3.bf16.msra.mxu1 %v8088_v16  ;;  %v8101_v26 = vld [vmem:[#allocation5 + $0x7c] ss:$12 sps:$4 sm:$0xff]   ;;  %vm8597_vm0 = vmmov 0   ;;  %v8103_v28 = vld [vmem:[#allocation5 + $0x78] ss:$12 sps:$4 sm:$0xff]   ;;  %s8598_s12 = smov 112  }
  0xb4   : > { %797 = vmatpush1.bf16.msra.mxu0 %v8087_v15  ;;  %7801 = vmatprep.subr.bf16.mxu1 %v8595_v13  ;;  %v8104_v29 = vld [vmem:[#allocation5 + $0x80] ss:$12 sps:$4 sm:$0xff]   ;;  %v8107_v31 = vld [vmem:[#allocation5 + $0x90] ss:$12 sps:$4 sm:$0xff]   ;;  %v8108_v32 = vld [vmem:[#allocation5 + $0x98] ss:$12 sps:$4 sm:$0xff]  }
  0xb5   : > { %798 = vmatprep.subr.bf16.mxu0 %v8089_v17  ;;  %7813 = vmatprep.mubr.msk.bf16.mxu1 %vm8597_vm0, %v8595_v13  ;;  %v8105_v30 = vld [vmem:[#allocation5 + $0x94] ss:$12 sps:$4 sm:$0xff]   ;;  %v8109_v33 = vld [vmem:[#allocation5 + $0xac] ss:$12 sps:$4 sm:$0xff]   ;;  %v8112_v35 = vld [vmem:[#allocation5 + $0xb0] ss:$12 sps:$4 sm:$0xff]  }
  0xb6   : > { %v8111_v34 = vld [vmem:[#allocation5 + $0xa8] ss:$12 sps:$4 sm:$0xff]   ;;  %v7186_v52 = vld [vmem:[%s10178_s5] ss:$0 sm:$0xff]  ;;  %s8599_s8 = smov 96   ;;  %s8600_s10 = smov 80  }
  0xb7   : > { %7802 = vmatpush3.bf16.msra.mxu1 %v8092_v19  ;;  %v7187_v58 = vld [vmem:[%s10179_s6] ss:$0 sm:$0xff]  ;;  %s8601_s18 = smov 64   ;;  %s8602_s1 = smov 48   ;;  %vm2666_vm5 = vcmask 130048   ;;  %vm4181_vm6 = vcmask 261120  }
  0xb8   : > { %799 = vmatpush1.bf16.msra.mxu0 %v8091_v18  ;;  %7803 = vmatprep.subr.bf16.mxu1 %v8595_v13  ;;  %s8603_s27 = smov 32   ;;  %s8604_s20 = smov 16   ;;  %vm4184_vm7 = vcmask 392192   ;;  %vm4187_vm8 = vcmask 523264   ;;  %vm4190_vm9 = vcmask 654336   ;;  %vm4193_vm10 = vcmask 785408  }
  0xb9   : > { %800 = vmatprep.subr.bf16.mxu0 %v8093_v20  ;;  %vm4196_vm11 = vcmask 916480   ;;  %s10229_s21 = sld [smem:[#allocation22_spill]]  ;;  %s9945_s14 = scalar_lea.vmem [#allocation12], %s8902_s23 }
  0xba   : > { %s10230_s22 = sld [smem:[#allocation25_spill]]  ;;  %s6996_s24 = scalar_lea.sflag [#allocation13], %s8899_s13 }
  0xbb   : > { %7804 = vmatpush3.bf16.msra.mxu1 %v8096_v22 }
  0xbc   : > { %801 = vmatpush1.bf16.msra.mxu0 %v8095_v21  ;;  %7805 = vmatprep.subr.bf16.mxu1 %v8595_v13 }
  0xbd   : > { %802 = vmatprep.subr.bf16.mxu0 %v8097_v23  ;;  %v8605_v23 = vmov 1983009808  }
  0xbf   : > { %7806 = vmatpush3.bf16.msra.mxu1 %v8100_v25 }
  0xc0   : > { %803 = vmatpush1.bf16.msra.mxu0 %v8099_v24  ;;  %7807 = vmatprep.subr.bf16.mxu1 %v8595_v13  ;;  %v925_v24 = vunpack.c.l.s4 %v8605_v23 }
  0xc1   : > { %804 = vmatprep.subr.bf16.mxu0 %v8101_v26 }
  0xc3   : > { %7808 = vmatpush3.bf16.msra.mxu1 %v8104_v29 }
  0xc4   : > { %805 = vmatpush1.bf16.msra.mxu0 %v8103_v28  ;;  %7809 = vmatprep.subr.bf16.mxu1 %v8595_v13  ;;  %v8606_v28 = vmov 1934713408  }
  0xc5   : > { %806 = vmatprep.subr.bf16.mxu0 %v8105_v30  ;;  %v989_v29 = vunpack.c.l.s4 %v8606_v28  ;;  %v926_v30 = vunpack.c.0.s8 %v925_v24 }
  0xc7   : > { %7810 = vmatpush3.bf16.msra.mxu1 %v8108_v32 }
  0xc8   : > { %807 = vmatpush1.bf16.msra.mxu0 %v8107_v31  ;;  %7811 = vmatprep.subr.bf16.mxu1 %v8595_v13 }
  0xc9   : > { %808 = vmatprep.subr.bf16.mxu0 %v8109_v33  ;;  %v990_v33 = vunpack.c.0.s8 %v989_v29 }
  0xcb   : > { %7812 = vmatpush3.bf16.msra.mxu1 %v8112_v35 }
  0xcc   : > { %809 = vmatpush1.bf16.msra.mxu0 %v8111_v34  ;;  %7817 = vmatprep.subr.bf16.mxu1 %v8595_v13 }
  0xcd   : > { %7841 = vmatprep.subr.bf16.mxu0 %v8595_v13 }
 0x13b   : > { %v564_v2 = vpop.xlane.xlu0 %563 }
 0x13c   : > { %v568_v3 = vmul.f32 0.0078125, %v564_v2  ;;  %v649_v2 = vld [vmem:[%s10175_s2] sm:$0x7] }
 0x13e   : > { %v8922_v4 = vsub.f32 %v559_v0, %v568_v3  ;;  %v8955_v0 = vshrl.u32 %v651_v63, 7 }
 0x13f   : > { %v566_v5 = vpop.xlane.xlu0 %565 }
 0x140   : > { %v569_v6 = vmul.f32 0.0078125, %v566_v5  ;;  %v572_v7 = vmul.f32 %v8922_v4, %v8922_v4  ;;  %v8964_v3 = vsub.s32 1, %v8955_v0  ;;  %v9021_v19 = vsub.s32 2, %v8955_v0 }
 0x141   : > { %v9063_v34 = vsub.s32 %v926_v30, %v8955_v0 }
 0x142   : > { %v8926_v8 = vsub.f32 %v560_v1, %v569_v6  ;;  %574 = vadd.xlane.f32.xlu1 %v572_v7  ;;  %v8958_v1 = vsub.s32 0, %v8955_v0  ;;  %v658_v5 = vrot.slane %v649_v2, %v8964_v3  ;;  %v662_v20 = vrot.slane %v649_v2, %v9021_v19 }
 0x144   : > { %v573_v9 = vmul.f32 %v8926_v8, %v8926_v8 }
 0x146   : > { %576 = vadd.xlane.f32.xlu1 %v573_v9 }
 0x1cf   : > { %v575_v36 = vpop.xlane.xlu1 %574 }
 0x1d0   : > { %v578_v37 = vmul.f32 0.007874016, %v575_v36 }
 0x1d2   : > { %8249 = vrsqrt.f32 %v578_v37  ;;  %vm582_vm1 = vcmp.eq.f32.partialorder %v578_v37, inf  ;;  %v585_v42 = vand.u32 2147483648, %v578_v37  ;;  %vm584_vm2 = vcmp.eq.f32.partialorder %v578_v37, 0.0 }
 0x1d3   : > { %v577_v38 = vpop.xlane.xlu1 %576 }
 0x1d4   : > { %v579_v39 = vmul.f32 0.007874016, %v577_v38 }
 0x1d6   : > { %8251 = vrsqrt.f32 %v579_v39  ;;  %vm589_vm3 = vcmp.eq.f32.partialorder %v579_v39, inf  ;;  %v592_v48 = vand.u32 2147483648, %v579_v39  ;;  %vm591_vm4 = vcmp.eq.f32.partialorder %v579_v39, 0.0 }
 0x1dc   : > { %v8250_v40 = vpop.eup %8249 }
 0x1dd   : > { %v581_v41 = vmul.f32 %v8250_v40, %v578_v37 }
 0x1df   : > { %v583_v43 = vsel %vm582_vm1, %v578_v37, %v581_v41  ;;  %v9068_v41 = vsub.s32 %v990_v33, %v8955_v0 }
 0x1e0   : > { %v8252_v44 = vpop.eup %8251  ;;  %v586_v45 = vsel %vm584_vm2, %v585_v42, %v583_v43 }
 0x1e1   : > { %v594_v46 = vadd.f32 1e-06, %v586_v45  ;;  %v588_v47 = vmul.f32 %v8252_v44, %v579_v39 }
 0x1e3   : > { %v590_v49 = vsel %vm589_vm3, %v579_v39, %v588_v47  ;;  %8253 = vrcp.f32 %v594_v46 }
 0x1e4   : > { %v593_v50 = vsel %vm591_vm4, %v592_v48, %v590_v49 }
 0x1e5   : > { %v595_v51 = vadd.f32 1e-06, %v593_v50 }
 0x1e7   : > { %8255 = vrcp.f32 %v595_v51 }
 0x1ed   : > { %v8254_v53 = vpop.eup %8253 }
 0x1ee   : > { %v604_v54 = vmul.f32 %v8254_v53, %v7186_v52 }
 0x1f0   : > { %v606_v57 = vmul.f32 %v604_v54, %v8922_v4  ;;  %v654_v4 = vrot.slane %v649_v2, %v8958_v1 }
 0x1f1   : > { %v8256_v55 = vpop.eup %8255 }
 0x1f2   : > { %v605_v56 = vmul.f32 %v8256_v55, %v7186_v52  ;;  %v614_v60 = vadd.f32 %v7187_v58, %v606_v57 }
 0x1f4   : > { %v607_v59 = vmul.f32 %v605_v56, %v8926_v8 }
 0x1f6   : > { %v615_v61 = vadd.f32 %v7187_v58, %v607_v59 }
 0x1f8   : > { %v616_v62 = vpack.c.bf16 %v615_v61, %v614_v60 }
 0x1fa   : > { %827 = vmatmul.mubr.bf16.vlgmr.msra.gmra.mrb[0].mxu0 %v616_v62  ;;  %7814 = vmatmul.mubr.bf16.vlgmr.msra.gmra.mrb[0].mxu1 %v616_v62 }
 0x1fb   : > { %7819 = vmatprep.mubr.msk.bf16.mxu1 %vm8597_vm0, %v8595_v13  ;;  %7843 = vmatprep.mubr.msk.bf16.mxu0 %vm8597_vm0, %v8595_v13 }
 0x2cd   : > { %v828_v6 = vpop.f32.mrb[0].mxu0  ;;  %v871_v7 = vpop.f32.mrb[0].mxu1 }
 0x2ce   : > { %v8968_v8 = vadd.f32 %v828_v6, %v654_v4  ;;  %v830_v9 = vpop.f32.mrb[1].mxu0  ;;  %v7815_v10 = vpop.f32.mrb[1].mxu1  ;;  %v9032_v21 = vadd.f32 %v871_v7, %v662_v20 }
 0x2cf   : > { %v8970_v11 = vadd.f32 %v830_v9, %v658_v5  ;;  %v832_v12 = vpop.f32.mrb[2].mxu0  ;;  %v874_v14 = vpop.f32.mrb[2].mxu1 }
 0x2d0   : > { %v834_v15 = vpop.f32.mrb[3].mxu0  ;;  %v7816_v16 = vpop.f32.mrb[3].mxu1  ;;  %880 = vrot.lane.b32.xlu0 %v8968_v8, %s8598_s12  ;;  %v8976_v17 = vadd.f32 %v832_v12, %v654_v4  ;;  %v9042_v22 = vadd.f32 %v874_v14, %v662_v20 }
 0x2d1   : > { %1482 = vrot.lane.b32.xlu1 %v8970_v11, %s8599_s8  ;;  %v8982_v18 = vadd.f32 %v834_v15, %v658_v5 }
 0x2d4   : > { %1476 = vrot.lane.b32.xlu0 %v8970_v11, %s8598_s12 }
 0x2d5   : > { %882 = vrot.lane.b32.xlu1 %v8976_v17, %s8598_s12 }
 0x2d8   : > { %1488 = vrot.lane.b32.xlu0 %v8970_v11, %s8600_s10 }
 0x2d9   : > { %1478 = vrot.lane.b32.xlu1 %v8982_v18, %s8598_s12 }
 0x2dc   : > { %886 = vrot.lane.b32.xlu0 %v8968_v8, %s8599_s8 }
 0x2dd   : > { %1484 = vrot.lane.b32.xlu1 %v8982_v18, %s8599_s8 }
 0x2e0   : > { %892 = vrot.lane.b32.xlu0 %v8968_v8, %s8600_s10 }
 0x2e1   : > { %1490 = vrot.lane.b32.xlu1 %v8982_v18, %s8600_s10 }
 0x2e4   : > { %1494 = vrot.lane.b32.xlu0 %v8970_v11, %s8601_s18 }
 0x2e5   : > { %888 = vrot.lane.b32.xlu1 %v8976_v17, %s8599_s8 }
 0x2e8   : > { %1500 = vrot.lane.b32.xlu0 %v8970_v11, %s8602_s1 }
 0x2e9   : > { %894 = vrot.lane.b32.xlu1 %v8976_v17, %s8600_s10 }
 0x2ec   : > { %1506 = vrot.lane.b32.xlu0 %v8970_v11, %s8603_s27 }
 0x2ed   : > { %900 = vrot.lane.b32.xlu1 %v8976_v17, %s8601_s18 }
 0x2f0   : > { %1512 = vrot.lane.b32.xlu0 %v8970_v11, %s8604_s20 }
 0x2f1   : > { %906 = vrot.lane.b32.xlu1 %v8976_v17, %s8602_s1 }
 0x2f4   : > { %898 = vrot.lane.b32.xlu0 %v8968_v8, %s8601_s18 }
 0x2f5   : > { %1496 = vrot.lane.b32.xlu1 %v8982_v18, %s8601_s18 }
 0x2f8   : > { %904 = vrot.lane.b32.xlu0 %v8968_v8, %s8602_s1 }
 0x2f9   : > { %1502 = vrot.lane.b32.xlu1 %v8982_v18, %s8602_s1 }
 0x2fc   : > { %910 = vrot.lane.b32.xlu0 %v8968_v8, %s8603_s27 }
 0x2fd   : > { %1508 = vrot.lane.b32.xlu1 %v8982_v18, %s8603_s27 }
 0x300   : > { %916 = vrot.lane.b32.xlu0 %v8968_v8, %s8604_s20 }
 0x301   : > { %1514 = vrot.lane.b32.xlu1 %v8982_v18, %s8604_s20 }
 0x304   : > { %2072 = vrot.lane.b32.xlu0 %v9032_v21, %s8598_s12 }
 0x305   : > { %912 = vrot.lane.b32.xlu1 %v8976_v17, %s8603_s27 }
 0x308   : > { %2084 = vrot.lane.b32.xlu0 %v9032_v21, %s8600_s10 }
 0x309   : > { %918 = vrot.lane.b32.xlu1 %v8976_v17, %s8604_s20 }
 0x30c   : > { %2090 = vrot.lane.b32.xlu0 %v9032_v21, %s8601_s18 }
 0x30d   : > { %2074 = vrot.lane.b32.xlu1 %v9042_v22, %s8598_s12 }
 0x311   : > { %2078 = vrot.lane.b32.xlu1 %v9032_v21, %s8599_s8 }
 0x315   : > { %2080 = vrot.lane.b32.xlu1 %v9042_v22, %s8599_s8 }
 0x319   : > { %2086 = vrot.lane.b32.xlu1 %v9042_v22, %s8600_s10 }
 0x31d   : > { %2092 = vrot.lane.b32.xlu1 %v9042_v22, %s8601_s18 }
 0x321   : > { %2096 = vrot.lane.b32.xlu1 %v9032_v21, %s8602_s1 }
 0x325   : > { %2098 = vrot.lane.b32.xlu1 %v9042_v22, %s8602_s1 }
 0x342   : > { %v881_v25 = vpop.permute.xlu0 %880 }
 0x343   : > { %v1483_v26 = vpop.permute.xlu1 %1482 }
 0x344   : > { %v1518_v35 = vcombine.low %v8970_v11, %v1483_v26  ;;  %v1519_v36 = vcombine.high %v8970_v11, %v1483_v26 }
 0x346   : > { %v1477_v31 = vpop.permute.xlu0 %1476  ;;  %v1526_v42 = vrot.slane %v1518_v35, %v9063_v34  ;;  %v1533_v43 = vrot.slane %v1519_v36, %v9063_v34 }
 0x347   : > { %v9060_v32 = vpop.permute.xlu1 %882 }
 0x34a   : > { %v1489_v37 = vpop.permute.xlu0 %1488 }
 0x34b   : > { %v1534_v38 = vcombine.low %v1477_v31, %v1489_v37  ;;  %v1535_v39 = vcombine.high %v1477_v31, %v1489_v37  ;;  %v1479_v40 = vpop.permute.xlu1 %1478 }
 0x34d   : > { %v1542_v44 = vrot.slane %v1534_v38, %v9063_v34  ;;  %v1549_v45 = vrot.slane %v1535_v39, %v9063_v34 }
 0x34e   : > { %v887_v46 = vpop.permute.xlu0 %886 }
 0x34f   : > { %v1582_v47 = vcombine.low %v1526_v42, %v1542_v44  ;;  %v1583_v48 = vcombine.high %v1526_v42, %v1542_v44  ;;  %v1598_v49 = vcombine.low %v1533_v43, %v1549_v45  ;;  %v1599_v50 = vcombine.high %v1533_v43, %v1549_v45  ;;  %v1485_v51 = vpop.permute.xlu1 %1484 }
 0x350   : > { %v922_v52 = vcombine.low %v8968_v8, %v887_v46  ;;  %v923_v53 = vcombine.high %v8968_v8, %v887_v46  ;;  %v1654_v54 = vcombine.low %v8982_v18, %v1485_v51  ;;  %v1655_v55 = vcombine.high %v8982_v18, %v1485_v51 }
 0x351   : > { %v1590_v56 = vrot.slane %v1582_v47, %v9068_v41  ;;  %v1597_v57 = vrot.slane %v1583_v48, %v9068_v41  ;;  %v1606_v58 = vrot.slane %v1598_v49, %v9068_v41  ;;  %v1613_v59 = vrot.slane %v1599_v50, %v9068_v41 }
 0x352   : > { %v893_v60 = vpop.permute.xlu0 %892  ;;  %v930_v9 = vrot.slane %v922_v52, %v9063_v34  ;;  %v937_v10 = vrot.slane %v923_v53, %v9063_v34  ;;  %v1662_v11 = vrot.slane %v1654_v54, %v9063_v34  ;;  %v1669_v12 = vrot.slane %v1655_v55, %v9063_v34 }
 0x353   : > { %v7228_v61 = vcombine.low %v1590_v56, %v1597_v57  ;;  %v7230_v62 = vcombine.high %v1590_v56, %v1597_v57  ;;  %v7232_v63 = vcombine.low %v1606_v58, %v1613_v59  ;;  %v7234_v2 = vcombine.high %v1606_v58, %v1613_v59  ;;  %v1491_v4 = vpop.permute.xlu1 %1490 }
 0x354   : > { %v938_v5 = vcombine.low %v881_v25, %v893_v60  ;;  %v939_v6 = vcombine.high %v881_v25, %v893_v60  ;;  %v1670_v7 = vcombine.low %v1479_v40, %v1491_v4  ;;  %v1671_v8 = vcombine.high %v1479_v40, %v1491_v4 }
 0x355   : > { %v9093_v23 = vrot.slane %v7228_v61, %v9063_v34  ;;  %v9096_v24 = vrot.slane %v7230_v62, %v9063_v34  ;;  %v9099_v25 = vrot.slane %v7232_v63, %v9063_v34  ;;  %v9102_v26 = vrot.slane %v7234_v2, %v9063_v34 }
 0x356   : > { %v946_v14 = vrot.slane %v938_v5, %v9063_v34  ;;  %v953_v15 = vrot.slane %v939_v6, %v9063_v34  ;;  %v1678_v16 = vrot.slane %v1670_v7, %v9063_v34  ;;  %v1685_v18 = vrot.slane %v1671_v8, %v9063_v34  ;;  %v9090_v20 = vpop.permute.xlu0 %1494 }
 0x357   : > { %v889_v28 = vpop.permute.xlu1 %888  ;;  %v1854_v61 = vcombine.low %v9093_v23, %v9096_v24  ;;  %v1886_v62 = vcombine.low %v9099_v25, %v9102_v26 }
 0x358   : > { %v986_v29 = vcombine.low %v930_v9, %v946_v14  ;;  %v987_v30 = vcombine.high %v930_v9, %v946_v14  ;;  %v1002_v31 = vcombine.low %v937_v10, %v953_v15  ;;  %v1003_v33 = vcombine.high %v937_v10, %v953_v15 }
 0x359   : > { %v1718_v35 = vcombine.low %v1662_v11, %v1678_v16  ;;  %v1719_v36 = vcombine.high %v1662_v11, %v1678_v16  ;;  %v1734_v37 = vcombine.low %v1669_v12, %v1685_v18  ;;  %v1735_v38 = vcombine.high %v1669_v12, %v1685_v18 }
 0x35a   : > { %v994_v39 = vrot.slane %v986_v29, %v9068_v41  ;;  %v1001_v40 = vrot.slane %v987_v30, %v9068_v41  ;;  %v1010_v42 = vrot.slane %v1002_v31, %v9068_v41  ;;  %v1017_v43 = vrot.slane %v1003_v33, %v9068_v41  ;;  %v1501_v44 = vpop.permute.xlu0 %1500 }
 0x35b   : > { %v9109_v45 = vrot.slane %v1718_v35, %v9068_v41  ;;  %v9112_v46 = vrot.slane %v1719_v36, %v9068_v41  ;;  %v9115_v47 = vrot.slane %v1734_v37, %v9068_v41  ;;  %v9118_v48 = vrot.slane %v1735_v38, %v9068_v41  ;;  %v895_v49 = vpop.permute.xlu1 %894 }
 0x35c   : > { %v7212_v50 = vcombine.low %v994_v39, %v1001_v40  ;;  %v7214_v51 = vcombine.high %v994_v39, %v1001_v40  ;;  %v7216_v52 = vcombine.low %v1010_v42, %v1017_v43  ;;  %v7218_v53 = vcombine.high %v1010_v42, %v1017_v43 }
 0x35d   : > { %v7236_v54 = vcombine.low %v9109_v45, %v9112_v46  ;;  %v7238_v5 = vcombine.high %v9109_v45, %v9112_v46  ;;  %v7240_v6 = vcombine.low %v9115_v47, %v9118_v48  ;;  %v7242_v7 = vcombine.high %v9115_v47, %v9118_v48 }
 0x35e   : > { %v9123_v55 = vrot.slane %v7212_v50, %v9063_v34  ;;  %v9126_v56 = vrot.slane %v7214_v51, %v9063_v34  ;;  %v9129_v57 = vrot.slane %v7216_v52, %v9063_v34  ;;  %v9132_v58 = vrot.slane %v7218_v53, %v9063_v34  ;;  %v1507_v59 = vpop.permute.xlu0 %1506 }
 0x35f   : > { %v9134_v60 = vpop.permute.xlu1 %900  ;;  %v9145_v4 = vrot.slane %v7236_v54, %v9063_v34  ;;  %v1058_v8 = vcombine.low %v8976_v17, %v889_v28  ;;  %v1059_v9 = vcombine.high %v8976_v17, %v889_v28  ;;  %v1074_v10 = vcombine.low %v9060_v32, %v895_v49 }
 0x360   : > { %v1075_v11 = vcombine.high %v9060_v32, %v895_v49  ;;  %v1258_v12 = vcombine.low %v9123_v55, %v9126_v56  ;;  %v1259_v14 = vcombine.high %v9123_v55, %v9126_v56  ;;  %v1290_v15 = vcombine.low %v9129_v57, %v9132_v58 }
 0x361   : > { %v1291_v16 = vcombine.high %v9129_v57, %v9132_v58  ;;  %v1066_v29 = vrot.slane %v1058_v8, %v9063_v34  ;;  %v1073_v17 = vrot.slane %v1059_v9, %v9063_v34  ;;  %v1082_v28 = vrot.slane %v1074_v10, %v9063_v34 }
 0x362   : > { %v1513_v18 = vpop.permute.xlu0 %1512  ;;  %v1089_v32 = vrot.slane %v1075_v11, %v9063_v34  ;;  %v1550_v31 = vcombine.low %v9090_v20, %v1507_v59  ;;  %v1551_v33 = vcombine.high %v9090_v20, %v1507_v59 }
 0x363   : > { %v9169_v30 = vpop.permute.xlu1 %906  ;;  %v1566_v35 = vcombine.low %v1501_v44, %v1513_v18  ;;  %v1567_v36 = vcombine.high %v1501_v44, %v1513_v18  ;;  %v1122_v37 = vcombine.low %v1066_v29, %v1082_v28  ;;  %v1123_v38 = vcombine.high %v1066_v29, %v1082_v28 }
 0x364   : > { %v1138_v39 = vcombine.low %v1073_v17, %v1089_v32  ;;  %v1139_v40 = vcombine.high %v1073_v17, %v1089_v32  ;;  %v1558_v42 = vrot.slane %v1550_v31, %v9063_v34  ;;  %v1565_v43 = vrot.slane %v1551_v33, %v9063_v34 }
 0x365   : > { %v1574_v45 = vrot.slane %v1566_v35, %v9063_v34  ;;  %v1581_v46 = vrot.slane %v1567_v36, %v9063_v34  ;;  %v1130_v48 = vrot.slane %v1122_v37, %v9068_v41  ;;  %v1137_v20 = vrot.slane %v1123_v38, %v9068_v41 }
 0x366   : > { %v9177_v47 = vpop.permute.xlu0 %898  ;;  %v1146_v44 = vrot.slane %v1138_v39, %v9068_v41  ;;  %v1153_v49 = vrot.slane %v1139_v40, %v9068_v41  ;;  %v9206_v31 = vrot.slane %v1258_v12, %v9068_v41  ;;  %v9209_v33 = vrot.slane %v7238_v5, %v9063_v34 }
 0x367   : > { %v9183_v50 = vpop.permute.xlu1 %1496  ;;  %v1614_v51 = vcombine.low %v1558_v42, %v1574_v45  ;;  %v1615_v52 = vcombine.high %v1558_v42, %v1574_v45  ;;  %v1630_v53 = vcombine.low %v1565_v43, %v1581_v46  ;;  %v1631_v54 = vcombine.high %v1565_v43, %v1581_v46 }
 0x368   : > { %v7220_v55 = vcombine.low %v1130_v48, %v1137_v20  ;;  %v7222_v56 = vcombine.high %v1130_v48, %v1137_v20  ;;  %v7224_v57 = vcombine.low %v1146_v44, %v1153_v49  ;;  %v7226_v58 = vcombine.high %v1146_v44, %v1153_v49 }
 0x369   : > { %v1622_v59 = vrot.slane %v1614_v51, %v9068_v41  ;;  %v1629_v8 = vrot.slane %v1615_v52, %v9068_v41  ;;  %v9188_v9 = vrot.slane %v1630_v53, %v9068_v41  ;;  %v9191_v10 = vrot.slane %v1631_v54, %v9068_v41 }
 0x36a   : > { %v905_v11 = vpop.permute.xlu0 %904  ;;  %v9194_v18 = vrot.slane %v7220_v55, %v9063_v34  ;;  %v9197_v29 = vrot.slane %v7222_v56, %v9063_v34  ;;  %v9200_v17 = vrot.slane %v7224_v57, %v9063_v34  ;;  %v9203_v28 = vrot.slane %v7226_v58, %v9063_v34 }
 0x36b   : > { %v1503_v32 = vpop.permute.xlu1 %1502  ;;  %v9212_v35 = vrot.slane %v7240_v6, %v9063_v34  ;;  %v9215_v36 = vrot.slane %v7242_v7, %v9063_v34  ;;  %v7229_v39 = vcombine.low %v1622_v59, %v1629_v8  ;;  %v7231_v40 = vcombine.high %v1622_v59, %v1629_v8 }
 0x36c   : > { %v1394_v37 = vcombine.low %v9194_v18, %v9197_v29  ;;  %v1426_v38 = vcombine.low %v9200_v17, %v9203_v28  ;;  %v9222_v12 = vrot.slane %v1259_v14, %v9068_v41  ;;  %v9225_v5 = vrot.slane %v1290_v15, %v9068_v41 }
 0x36d   : > { %v9228_v6 = vrot.slane %v1291_v16, %v9068_v41  ;;  %v7233_v7 = vcombine.low %v9188_v9, %v9191_v10  ;;  %v1862_v16 = vrot.slane %v1854_v61, %v9068_v41  ;;  %v1894_v48 = vrot.slane %v1886_v62, %v9068_v41 }
 0x36e   : > { %v911_v42 = vpop.permute.xlu0 %910  ;;  %v9235_v45 = vrot.slane %v1394_v37, %v9068_v41  ;;  %v9238_v46 = vrot.slane %v1426_v38, %v9068_v41  ;;  %v1990_v20 = vcombine.low %v9145_v4, %v9209_v33  ;;  %v2022_v44 = vcombine.low %v9212_v35, %v9215_v36 }
 0x36f   : > { %v1509_v15 = vpop.permute.xlu1 %1508  ;;  %v9257_v51 = vrot.slane %v7229_v39, %v9063_v34  ;;  %v9260_v52 = vrot.slane %v7231_v40, %v9063_v34  ;;  %v954_v61 = vcombine.low %v9177_v47, %v911_v42  ;;  %v955_v54 = vcombine.high %v9177_v47, %v911_v42 }
 0x370   : > { %v1998_v53 = vrot.slane %v1990_v20, %v9068_v41  ;;  %v2030_v62 = vrot.slane %v2022_v44, %v9068_v41  ;;  %v1686_v55 = vcombine.low %v9183_v50, %v1509_v15  ;;  %v9268_v57 = vrot.slane %v7233_v7, %v9063_v34 }
 0x371   : > { %v1918_v58 = vcombine.low %v1862_v16, %v1894_v48  ;;  %v1687_v59 = vcombine.high %v9183_v50, %v1509_v15  ;;  %v1322_v8 = vcombine.low %v9206_v31, %v9225_v5  ;;  %v962_v39 = vrot.slane %v954_v61, %v9063_v34 }
 0x372   : > { %v917_v56 = vpop.permute.xlu0 %916  ;;  %v2054_v38 = vcombine.low %v1998_v53, %v2030_v62  ;;  %v1458_v40 = vcombine.low %v9235_v45, %v9238_v46  ;;  %v2055_v47 = vcombine.high %v1998_v53, %v2030_v62  ;;  %v969_v2 = vrot.slane %v955_v54, %v9063_v34 }
 0x373   : > { %v1515_v37 = vpop.permute.xlu1 %1514  ;;  %v970_v42 = vcombine.low %v905_v11, %v917_v56  ;;  %v971_v20 = vcombine.high %v905_v11, %v917_v56  ;;  %v1694_v50 = vrot.slane %v1686_v55, %v9063_v34  ;;  %v1919_v15 = vcombine.high %v1862_v16, %v1894_v48 }
 0x374   : > { %v1702_v44 = vcombine.low %v1503_v32, %v1515_v37  ;;  %v1703_v27 = vcombine.high %v1503_v32, %v1515_v37  ;;  %v2062_v7 = vpack.c.bf16 %v2054_v38, %v1918_v58  ;;  %v1701_v32 = vrot.slane %v1687_v59, %v9063_v34 }
 0x375   : > { %v978_v63 = vrot.slane %v970_v42, %v9063_v34  ;;  %v985_v49 = vrot.slane %v971_v20, %v9063_v34  ;;  %v1466_v53 = vpack.c.bf16 %v1458_v40, %v1322_v8  ;;  %v2063_v62 = vpack.c.bf16 %v2055_v47, %v1919_v15 }
 0x376   : > { %v1710_v61 = vrot.slane %v1702_v44, %v9063_v34  ;;  %v1717_v14 = vrot.slane %v1703_v27, %v9063_v34  ;;  %v2671_v11 = vsel %vm2666_vm5, %v2062_v7, 0 }
 0x377   : > { %v9282_v43 = vpop.permute.xlu1 %912  ;;  %7818 = vmatpush3.bf16.xpose.msra.mxu1 %v2671_v11  ;;  %v1018_v54 = vcombine.low %v962_v39, %v978_v63  ;;  %v1019_v55 = vcombine.high %v962_v39, %v978_v63  ;;  %v1034_v16 = vcombine.low %v969_v2, %v985_v49  ;;  %v1035_v48 = vcombine.high %v969_v2, %v985_v49  ;;  %v2073_v39 = vpop.permute.xlu0 %2072 }
 0x378   : > { %7823 = vmatprep.subr.bf16.mxu1 %v8595_v13  ;;  %v1750_v56 = vcombine.low %v1694_v50, %v1710_v61  ;;  %v1751_v58 = vcombine.high %v1694_v50, %v1710_v61  ;;  %v1766_v37 = vcombine.low %v1701_v32, %v1717_v14  ;;  %v1767_v38 = vcombine.high %v1701_v32, %v1717_v14 }
 0x379   : > { %v1026_v27 = vrot.slane %v1018_v54, %v9068_v41  ;;  %v1033_v42 = vrot.slane %v1019_v55, %v9068_v41  ;;  %v1042_v20 = vrot.slane %v1034_v16, %v9068_v41  ;;  %v1049_v59 = vrot.slane %v1035_v48, %v9068_v41 }
 0x37a   : > { %v1758_v40 = vrot.slane %v1750_v56, %v9068_v41  ;;  %v1765_v63 = vrot.slane %v1751_v58, %v9068_v41  ;;  %v1774_v2 = vrot.slane %v1766_v37, %v9068_v41  ;;  %v1781_v49 = vrot.slane %v1767_v38, %v9068_v41 }
 0x37b   : > { %v919_v8 = vpop.permute.xlu1 %918  ;;  %v7213_v47 = vcombine.low %v1026_v27, %v1033_v42  ;;  %v7215_v14 = vcombine.high %v1026_v27, %v1033_v42  ;;  %v7217_v44 = vcombine.low %v1042_v20, %v1049_v59  ;;  %v7219_v7 = vcombine.high %v1042_v20, %v1049_v59 }
 0x37c   : > { %v7237_v50 = vcombine.low %v1758_v40, %v1765_v63  ;;  %v7239_v15 = vcombine.high %v1758_v40, %v1765_v63  ;;  %v7241_v61 = vcombine.low %v1774_v2, %v1781_v49  ;;  %v7243_v11 = vcombine.high %v1774_v2, %v1781_v49 }
 0x37d   : > { %v9296_v32 = vrot.slane %v7213_v47, %v9063_v34  ;;  %v9299_v54 = vrot.slane %v7215_v14, %v9063_v34  ;;  %v9302_v55 = vrot.slane %v7217_v44, %v9063_v34  ;;  %v9305_v16 = vrot.slane %v7219_v7, %v9063_v34 }
 0x37e   : > { %v10223_v56 = vcombine.high %v9194_v18, %v9197_v29  ;;  %v10224_v37 = vcombine.high %v9188_v9, %v9191_v10  ;;  %7820 = vmatmul.mubr.msk.bf16.vlgmr.msra.gmra.mrb[4].mxu1 %vm2666_vm5, %v1466_v53  ;;  %v2718_v27 = vsel %vm2666_vm5, %v2063_v62, 0  ;;  %v1090_v42 = vcombine.low %v9134_v60, %v9282_v43 }
 0x37f   : > { %v9307_v48 = vpop.permute.xlu1 %2074  ;;  %v10225_v20 = vcombine.high %v9200_v17, %v9203_v28  ;;  %7824 = vmatpush3.bf16.xpose.msra.mxu1 %v2718_v27  ;;  %v9332_v29 = vrot.slane %v7237_v50, %v9063_v34  ;;  %v1091_v9 = vcombine.high %v9134_v60, %v9282_v43  ;;  %v1323_v10 = vcombine.high %v9206_v31, %v9225_v5  ;;  %v2085_v28 = vpop.permute.xlu0 %2084 }
 0x380   : > { %v9313_v58 = vrot.slane %v10223_v56, %v9068_v41  ;;  %v9319_v38 = vrot.slane %v10224_v37, %v9063_v34  ;;  %v9339_v53 = vrot.slane %v7239_v15, %v9063_v34  ;;  %v9342_v62 = vrot.slane %v7241_v61, %v9063_v34  ;;  %7825 = vmatprep.mubr.msk.bf16.mxu1 %vm8597_vm0, %v8595_v13 }
 0x381   : > { %v9329_v18 = vrot.slane %v10225_v20, %v9068_v41  ;;  %v1459_v17 = vcombine.high %v9235_v45, %v9238_v46  ;;  %7829 = vmatprep.subr.bf16.mxu1 %v8595_v13  ;;  %v1274_v60 = vcombine.low %v9296_v32, %v9299_v54  ;;  %v1275_v31 = vcombine.high %v9296_v32, %v9299_v54 }
 0x382   : > { %v1306_v5 = vcombine.low %v9302_v55, %v9305_v16  ;;  %v9356_v43 = vrot.slane %v7243_v11, %v9063_v34  ;;  %v1098_v59 = vrot.slane %v1090_v42, %v9063_v34  ;;  %v10226_v45 = vcombine.high %v9093_v23, %v9096_v24 }
 0x383   : > { %v10227_v40 = vcombine.high %v9099_v25, %v9102_v26  ;;  %v1991_v2 = vcombine.high %v9145_v4, %v9209_v33  ;;  %v2023_v49 = vcombine.high %v9212_v35, %v9215_v36  ;;  %v2130_v47 = vcombine.low %v2073_v39, %v2085_v28  ;;  %v2079_v7 = vpop.permute.xlu1 %2078 }
 0x384   : > { %v1869_v46 = vrot.slane %v10226_v45, %v9068_v41  ;;  %v2131_v14 = vcombine.high %v2073_v39, %v2085_v28  ;;  %v1106_v44 = vcombine.low %v9169_v30, %v919_v8  ;;  %v1105_v50 = vrot.slane %v1091_v9, %v9063_v34 }
 0x385   : > { %v1901_v63 = vrot.slane %v10227_v40, %v9068_v41  ;;  %v1467_v23 = vpack.c.bf16 %v1459_v17, %v1323_v10  ;;  %v2005_v24 = vrot.slane %v1991_v2, %v9068_v41  ;;  %v1107_v15 = vcombine.high %v9169_v30, %v919_v8 }
 0x386   : > { %v9376_v25 = vrot.slane %v1274_v60, %v9068_v41  ;;  %v2037_v4 = vrot.slane %v2023_v49, %v9068_v41  ;;  %v1114_v33 = vrot.slane %v1106_v44, %v9063_v34  ;;  %v2138_v35 = vrot.slane %v2130_v47, %v9063_v34 }
 0x387   : > { %v1920_v26 = vcombine.low %v1869_v46, %v1901_v63  ;;  %7826 = vmatmul.mubr.msk.bf16.vlgmr.msra.gmra.mrb[8].mxu1 %vm2666_vm5, %v1467_v23  ;;  %v2145_v36 = vrot.slane %v2131_v14, %v9063_v34  ;;  %v1121_v39 = vrot.slane %v1107_v15, %v9063_v34  ;;  %v2114_v61 = vcombine.low %v9032_v21, %v2079_v7 }
 0x388   : > { %v2056_v11 = vcombine.low %v2005_v24, %v2037_v4  ;;  %v1154_v30 = vcombine.low %v1098_v59, %v1114_v33  ;;  %v1155_v8 = vcombine.high %v1098_v59, %v1114_v33  ;;  %7831 = vmatprep.mubr.msk.bf16.mxu1 %vm8597_vm0, %v8595_v13  ;;  %v2057_v56 = vcombine.high %v2005_v24, %v2037_v4 }
 0x389   : > { %v1170_v37 = vcombine.low %v1105_v50, %v1121_v39  ;;  %v1171_v27 = vcombine.high %v1105_v50, %v1121_v39  ;;  %v1460_v42 = vcombine.low %v9313_v58, %v9329_v18  ;;  %v2115_v20 = vcombine.high %v9032_v21, %v2079_v7 }
 0x38a   : > { %v2064_v9 = vpack.c.bf16 %v2056_v11, %v1920_v26  ;;  %v1162_v10 = vrot.slane %v1154_v30, %v9068_v41  ;;  %v1169_v17 = vrot.slane %v1155_v8, %v9068_v41  ;;  %v1921_v28 = vcombine.high %v1869_v46, %v1901_v63  ;;  %v2081_v26 = vpop.permute.xlu1 %2080 }
 0x38b   : > { %v1178_v60 = vrot.slane %v1170_v37, %v9068_v41  ;;  %v1185_v59 = vrot.slane %v1171_v27, %v9068_v41  ;;  %v2122_v45 = vrot.slane %v2114_v61, %v9063_v34  ;;  %v2129_v40 = vrot.slane %v2115_v20, %v9063_v34 }
 0x38c   : > { %v2765_v2 = vsel %vm2666_vm5, %v2064_v9, 0  ;;  %v7221_v49 = vcombine.low %v1162_v10, %v1169_v17  ;;  %v7223_v47 = vcombine.high %v1162_v10, %v1169_v17  ;;  %v2065_v14 = vpack.c.bf16 %v2057_v56, %v1921_v28 }
 0x38d   : > { %7830 = vmatpush3.bf16.xpose.msra.mxu1 %v2765_v2  ;;  %v7225_v44 = vcombine.low %v1178_v60, %v1185_v59  ;;  %v7227_v7 = vcombine.high %v1178_v60, %v1185_v59  ;;  %v2178_v50 = vcombine.low %v2122_v45, %v2138_v35  ;;  %v2179_v23 = vcombine.high %v2122_v45, %v2138_v35 }
 0x38e   : > { %v9398_v46 = vrot.slane %v7221_v49, %v9063_v34  ;;  %v9401_v63 = vrot.slane %v7223_v47, %v9063_v34  ;;  %7835 = vmatprep.subr.bf16.mxu1 %v8595_v13  ;;  %v2194_v24 = vcombine.low %v2129_v40, %v2145_v36  ;;  %v2195_v15 = vcombine.high %v2129_v40, %v2145_v36  ;;  %v2087_v49 = vpop.permute.xlu1 %2086 }
 0x38f   : > { %v9405_v4 = vrot.slane %v7225_v44, %v9063_v34  ;;  %v9408_v33 = vrot.slane %v7227_v7, %v9063_v34  ;;  %v2186_v39 = vrot.slane %v2178_v50, %v9068_v41  ;;  %v2193_v35 = vrot.slane %v2179_v23, %v9068_v41 }
 0x390   : > { %v1410_v61 = vcombine.low %v9398_v46, %v9401_v63  ;;  %v1324_v11 = vcombine.low %v9222_v12, %v9228_v6  ;;  %v2202_v30 = vrot.slane %v2194_v24, %v9068_v41  ;;  %v2209_v36 = vrot.slane %v2195_v15, %v9068_v41 }
 0x391   : > { %v9422_v8 = vrot.slane %v1306_v5, %v9068_v41  ;;  %v1442_v56 = vcombine.low %v9405_v4, %v9408_v33  ;;  %v7244_v37 = vcombine.low %v2186_v39, %v2193_v35  ;;  %v7246_v27 = vcombine.high %v2186_v39, %v2193_v35 }
 0x392   : > { %v1468_v20 = vpack.c.bf16 %v1460_v42, %v1324_v11  ;;  %v2812_v9 = vsel %vm2666_vm5, %v2065_v14, 0  ;;  %v7248_v10 = vcombine.low %v2202_v30, %v2209_v36  ;;  %v7250_v17 = vcombine.high %v2202_v30, %v2209_v36 }
 0x393   : > { %v1411_v28 = vcombine.high %v9398_v46, %v9401_v63  ;;  %v9430_v60 = vrot.slane %v1410_v61, %v9068_v41  ;;  %v1443_v5 = vcombine.high %v9405_v4, %v9408_v33  ;;  %v9435_v59 = vrot.slane %v1442_v56, %v9068_v41 }
 0x394   : > { %7832 = vmatmul.mubr.msk.bf16.vlgmr.msra.gmra.mrb[12].mxu1 %vm2666_vm5, %v1468_v20  ;;  %v9439_v42 = vrot.slane %v7244_v37, %v9063_v34  ;;  %v9442_v45 = vrot.slane %v7246_v27, %v9063_v34  ;;  %v2250_v40 = vcombine.low %v9042_v22, %v2081_v26  ;;  %v2251_v2 = vcombine.high %v9042_v22, %v2081_v26 }
 0x395   : > { %7836 = vmatpush3.bf16.xpose.msra.mxu1 %v2812_v9  ;;  %v9447_v47 = vrot.slane %v7248_v10, %v9063_v34  ;;  %7837 = vmatprep.mubr.msk.bf16.mxu1 %vm8597_vm0, %v8595_v13  ;;  %v1461_v14 = vcombine.high %v9313_v58, %v9329_v18  ;;  %v1870_v44 = vcombine.low %v9257_v51, %v9260_v52 }
 0x396   : > { %v9456_v7 = vrot.slane %v7250_v17, %v9063_v34  ;;  %v1325_v50 = vcombine.high %v9222_v12, %v9228_v6  ;;  %7847 = vmatprep.subr.bf16.mxu1 %v8595_v13  ;;  %v1902_v23 = vcombine.low %v9268_v57, %v9319_v38  ;;  %v2006_v24 = vcombine.low %v9332_v29, %v9339_v53 }
 0x397   : > { %v2258_v15 = vrot.slane %v2250_v40, %v9063_v34  ;;  %v1878_v58 = vrot.slane %v1870_v44, %v9068_v41  ;;  %v2038_v18 = vcombine.low %v9342_v62, %v9356_v43  ;;  %v2266_v26 = vcombine.low %v9307_v48, %v2087_v49 }
 0x398   : > { %v2265_v39 = vrot.slane %v2251_v2, %v9063_v34  ;;  %v1910_v12 = vrot.slane %v1902_v23, %v9068_v41  ;;  %v2014_v6 = vrot.slane %v2006_v24, %v9068_v41  ;;  %v2267_v35 = vcombine.high %v9307_v48, %v2087_v49 }
 0x399   : > { %v1469_v61 = vpack.c.bf16 %v1461_v14, %v1325_v50  ;;  %v2046_v11 = vrot.slane %v2038_v18, %v9068_v41  ;;  %v2274_v30 = vrot.slane %v2266_v26, %v9063_v34  ;;  %v1326_v36 = vcombine.low %v9376_v25, %v9422_v8 }
 0x39a   : > { %v1922_v56 = vcombine.low %v1878_v58, %v1910_v12  ;;  %v1923_v37 = vcombine.high %v1878_v58, %v1910_v12  ;;  %v2281_v27 = vrot.slane %v2267_v35, %v9063_v34  ;;  %v1462_v20 = vcombine.low %v9430_v60, %v9435_v59 }
 0x39b   : > { %v2058_v9 = vcombine.low %v2014_v6, %v2046_v11  ;;  %v2059_v10 = vcombine.high %v2014_v6, %v2046_v11  ;;  %v2314_v17 = vcombine.low %v2258_v15, %v2274_v30  ;;  %v2315_v40 = vcombine.high %v2258_v15, %v2274_v30 }
 0x39c   : > { %7838 = vmatmul.mubr.msk.bf16.vlgmr.msra.gmra.mrb[16].mxu1 %vm2666_vm5, %v1469_v61  ;;  %v2330_v48 = vcombine.low %v2265_v39, %v2281_v27  ;;  %v2331_v2 = vcombine.high %v2265_v39, %v2281_v27  ;;  %v1327_v49 = vcombine.high %v9376_v25, %v9422_v8  ;;  %v1463_v14 = vcombine.high %v9430_v60, %v9435_v59 }
 0x39d   : > { %v2066_v44 = vpack.c.bf16 %v2058_v9, %v1922_v56  ;;  %v2067_v50 = vpack.c.bf16 %v2059_v10, %v1923_v37  ;;  %v2322_v23 = vrot.slane %v2314_v17, %v9068_v41  ;;  %v2329_v24 = vrot.slane %v2315_v40, %v9068_v41  ;;  %7849 = vmatprep.mubr.msk.bf16.mxu1 %vm8597_vm0, %v8595_v13 }
 0x39e   : > { %v2338_v15 = vrot.slane %v2330_v48, %v9068_v41  ;;  %v2345_v58 = vrot.slane %v2331_v2, %v9068_v41  ;;  %v1871_v18 = vcombine.high %v9257_v51, %v9260_v52  ;;  %v1903_v25 = vcombine.high %v9268_v57, %v9319_v38 }
 0x39f   : > { %v2859_v8 = vsel %vm2666_vm5, %v2066_v44, 0  ;;  %v2906_v60 = vsel %vm2666_vm5, %v2067_v50, 0  ;;  %v7252_v59 = vcombine.low %v2322_v23, %v2329_v24  ;;  %v7254_v26 = vcombine.high %v2322_v23, %v2329_v24 }
 0x3a0   : > { %7842 = vmatpush3.bf16.xpose.msra.mxu0 %v2859_v8  ;;  %7848 = vmatpush3.bf16.xpose.msra.mxu1 %v2906_v60  ;;  %v7256_v39 = vcombine.low %v2338_v15, %v2345_v58  ;;  %v7258_v12 = vcombine.high %v2338_v15, %v2345_v58  ;;  %v1885_v6 = vrot.slane %v1871_v18, %v9068_v41 }
 0x3a1   : > { %v2530_v35 = vrot.slane %v7252_v59, %v9063_v34  ;;  %v2546_v61 = vrot.slane %v7254_v26, %v9063_v34  ;;  %7853 = vmatprep.subr.bf16.mxu0 %v8595_v13  ;;  %7859 = vmatprep.subr.bf16.mxu1 %v8595_v13  ;;  %v1917_v51 = vrot.slane %v1903_v25, %v9068_v41 }
 0x3a2   : > { %v2562_v52 = vrot.slane %v7256_v39, %v9063_v34  ;;  %v2578_v57 = vrot.slane %v7258_v12, %v9063_v34  ;;  %v2007_v38 = vcombine.high %v9332_v29, %v9339_v53  ;;  %v2039_v11 = vcombine.high %v9342_v62, %v9356_v43 }
 0x3a3   : > { %v1289_v30 = vrot.slane %v1275_v31, %v9068_v41  ;;  %v1307_v56 = vcombine.high %v9302_v55, %v9305_v16  ;;  %v1470_v37 = vpack.c.bf16 %v1462_v20, %v1326_v36  ;;  %v1471_v27 = vpack.c.bf16 %v1463_v14, %v1327_v49 }
 0x3a4   : > { %v1425_v9 = vrot.slane %v1411_v28, %v9068_v41  ;;  %v1457_v29 = vrot.slane %v1443_v5, %v9068_v41  ;;  %v2021_v53 = vrot.slane %v2007_v38, %v9068_v41  ;;  %v2053_v32 = vrot.slane %v2039_v11, %v9068_v41 }
 0x3a5   : > { %v1924_v54 = vcombine.low %v1885_v6, %v1917_v51  ;;  %v2450_v55 = vcombine.low %v9439_v42, %v9442_v45  ;;  %v2482_v16 = vcombine.low %v9447_v47, %v9456_v7  ;;  %v2586_v62 = vcombine.low %v2530_v35, %v2546_v61 }
 0x3a6   : > { %v2060_v31 = vcombine.low %v2021_v53, %v2053_v32  ;;  %v1925_v43 = vcombine.high %v1885_v6, %v1917_v51  ;;  %v2061_v46 = vcombine.high %v2021_v53, %v2053_v32  ;;  %v2618_v63 = vcombine.low %v2562_v52, %v2578_v57 }
 0x3a7   : > { %7844 = vmatmul.mubr.msk.bf16.vlgmr.msra.gmra.mrb[4].mxu0 %vm2666_vm5, %v1470_v37  ;;  %7850 = vmatmul.mubr.msk.bf16.vlgmr.msra.gmra.mrb[20].mxu1 %vm2666_vm5, %v1471_v27  ;;  %v2458_v4 = vrot.slane %v2450_v55, %v9068_v41  ;;  %v2490_v33 = vrot.slane %v2482_v16, %v9068_v41  ;;  %v2594_v28 = vrot.slane %v2586_v62, %v9068_v41 }
 0x3a8   : > { %v2068_v5 = vpack.c.bf16 %v2060_v31, %v1924_v54  ;;  %v2069_v36 = vpack.c.bf16 %v2061_v46, %v1925_v43  ;;  %7855 = vmatprep.mubr.msk.bf16.mxu0 %vm8597_vm0, %v8595_v13  ;;  %7861 = vmatprep.mubr.msk.bf16.mxu1 %vm8597_vm0, %v8595_v13  ;;  %v2626_v20 = vrot.slane %v2618_v63, %v9068_v41 }
 0x3a9   : > { %v1321_v10 = vrot.slane %v1307_v56, %v9068_v41  ;;  %v1464_v17 = vcombine.low %v1425_v9, %v1457_v29  ;;  %v2451_v40 = vcombine.high %v9439_v42, %v9442_v45  ;;  %v2483_v48 = vcombine.high %v9447_v47, %v9456_v7 }
 0x3aa   : > { %v2953_v2 = vsel %vm2666_vm5, %v2068_v5, 0  ;;  %v3000_v49 = vsel %vm2666_vm5, %v2069_v36, 0  ;;  %v2650_v14 = vcombine.low %v2594_v28, %v2626_v20  ;;  %v2651_v44 = vcombine.high %v2594_v28, %v2626_v20 }
 0x3ab   : > { %7854 = vmatpush3.bf16.xpose.msra.mxu0 %v2953_v2  ;;  %7860 = vmatpush3.bf16.xpose.msra.mxu1 %v3000_v49  ;;  %v2465_v50 = vrot.slane %v2451_v40, %v9068_v41  ;;  %v2497_v23 = vrot.slane %v2483_v48, %v9068_v41  ;;  %v2587_v24 = vcombine.high %v2530_v35, %v2546_v61 }
 0x3ac   : > { %v1465_v15 = vcombine.high %v1425_v9, %v1457_v29  ;;  %7865 = vmatprep.subr.bf16.mxu0 %v8595_v13  ;;  %7871 = vmatprep.subr.bf16.mxu1 %v8595_v13  ;;  %v2514_v42 = vcombine.low %v2458_v4, %v2490_v33  ;;  %v2619_v45 = vcombine.high %v2562_v52, %v2578_v57 }
 0x3ad   : > { %v2515_v47 = vcombine.high %v2458_v4, %v2490_v33  ;;  %v2516_v7 = vcombine.low %v2465_v50, %v2497_v23  ;;  %v2601_v58 = vrot.slane %v2587_v24, %v9068_v41  ;;  %v2517_v18 = vcombine.high %v2465_v50, %v2497_v23 }
 0x3ae   : > { %v1328_v25 = vcombine.low %v1289_v30, %v1321_v10  ;;  %v1329_v8 = vcombine.high %v1289_v30, %v1321_v10  ;;  %v2633_v60 = vrot.slane %v2619_v45, %v9068_v41  ;;  %v2658_v59 = vpack.c.bf16 %v2650_v14, %v2514_v42 }
 0x3af   : > { %v2659_v26 = vpack.c.bf16 %v2651_v44, %v2515_v47 }
 0x3b0   : > { %v1472_v39 = vpack.c.bf16 %v1464_v17, %v1328_v25  ;;  %v1473_v12 = vpack.c.bf16 %v1465_v15, %v1329_v8  ;;  %v2652_v6 = vcombine.low %v2601_v58, %v2633_v60  ;;  %v2653_v35 = vcombine.high %v2601_v58, %v2633_v60 }
 0x3b2   : > { %7856 = vmatmul.mubr.msk.bf16.vlgmr.msra.gmra.mrb[8].mxu0 %vm2666_vm5, %v1472_v39  ;;  %7862 = vmatmul.mubr.msk.bf16.vlgmr.msra.gmra.mrb[24].mxu1 %vm2666_vm5, %v1473_v12  ;;  %v9555_v61 = vpack.c.bf16 %v2652_v6, %v2516_v7  ;;  %v9557_v51 = vpack.c.bf16 %v2653_v35, %v2517_v18  ;;  %v9641_v35 = vpop.permute.xlu0 %2090 }
 0x3b3   : > { %7866 = vmatpush3.bf16.msra.mxu0 %v2658_v59  ;;  %7872 = vmatpush3.bf16.msra.mxu1 %v2659_v26  ;;  %v9633_v26 = vpop.permute.xlu1 %2092 }
 0x3b4   : > { %7867 = vmatprep.mubr.msk.bf16.mxu0 %vm8597_vm0, %v8595_v13  ;;  %7877 = vmatprep.subr.bf16.mxu0 %v8595_v13 }
 0x3b5   : > { %7873 = vmatprep.mubr.msk.bf16.mxu1 %vm8597_vm0, %v8595_v13  ;;  %7883 = vmatprep.subr.bf16.mxu1 %v8595_v13 }
 0x3b7   : > { %v9635_v39 = vpop.permute.xlu1 %2096 }
 0x3bb   : > { %v9637_v12 = vpop.permute.xlu1 %2098 }
 0x451   : > { %v9565_v52 = vpop.f32.mrb[4].mxu1 }
 0x452   : > { %v7821_v57 = vpop.f32.mrb[5].mxu1  ;;  %v3043_v38 = vsel %vm2666_vm5, %v9565_v52, -inf }
 0x453   : > { %3044 = vmax.xlane.f32.xlu0 %v3043_v38  ;;  %v9569_v11 = vpop.f32.mrb[6].mxu1 }
 0x454   : > { %v7822_v30 = vpop.f32.mrb[7].mxu1  ;;  %v3046_v56 = vsel %vm2666_vm5, %v9569_v11, -inf }
 0x455   : > { %3047 = vmax.xlane.f32.xlu1 %v3046_v56 }
 0x45a   : > { %v9573_v37 = vpop.f32.mrb[8].mxu1 }
 0x45b   : > { %v7827_v27 = vpop.f32.mrb[9].mxu1  ;;  %v3049_v40 = vsel %vm2666_vm5, %v9573_v37, -inf }
 0x45c   : > { %v9575_v9 = vpop.f32.mrb[10].mxu1 }
 0x45d   : > { %v7828_v29 = vpop.f32.mrb[11].mxu1  ;;  %v3052_v45 = vsel %vm2666_vm5, %v9575_v9, -inf }
 0x467   : > { %v9577_v53 = vpop.f32.mrb[12].mxu1 }
 0x468   : > { %v7833_v32 = vpop.f32.mrb[13].mxu1  ;;  %v3055_v7 = vsel %vm2666_vm5, %v9577_v53, -inf }
 0x469   : > { %v9579_v54 = vpop.f32.mrb[14].mxu1 }
 0x46a   : > { %v7834_v55 = vpop.f32.mrb[15].mxu1  ;;  %v3058_v47 = vsel %vm2666_vm5, %v9579_v54, -inf }
 0x46f   : > { %v9581_v16 = vpop.f32.mrb[16].mxu1 }
 0x470   : > { %v7839_v62 = vpop.f32.mrb[17].mxu1  ;;  %v3061_v18 = vsel %vm2666_vm5, %v9581_v16, -inf }
 0x471   : > { %v9583_v31 = vpop.f32.mrb[18].mxu1 }
 0x472   : > { %v7840_v43 = vpop.f32.mrb[19].mxu1  ;;  %v3064_v58 = vsel %vm2666_vm5, %v9583_v31, -inf }
 0x47a   : > { %v9585_v46 = vpop.f32.mrb[4].mxu0  ;;  %v9587_v63 = vpop.f32.mrb[20].mxu1 }
 0x47b   : > { %v7845_v4 = vpop.f32.mrb[5].mxu0  ;;  %v7851_v33 = vpop.f32.mrb[21].mxu1  ;;  %v3067_v28 = vsel %vm2666_vm5, %v9585_v46, -inf  ;;  %v3073_v8 = vsel %vm2666_vm5, %v9587_v63, -inf }
 0x47c   : > { %v9591_v5 = vpop.f32.mrb[22].mxu1  ;;  %3068 = vmax.xlane.f32.xlu0 %v3067_v28  ;;  %v9593_v36 = vpop.f32.mrb[6].mxu0 }
 0x47d   : > { %v7846_v20 = vpop.f32.mrb[7].mxu0  ;;  %v7852_v10 = vpop.f32.mrb[23].mxu1  ;;  %v3070_v17 = vsel %vm2666_vm5, %v9593_v36, -inf  ;;  %v3076_v25 = vsel %vm2666_vm5, %v9591_v5, -inf }
 0x47e   : > { %3071 = vmax.xlane.f32.xlu1 %v3070_v17 }
 0x480   : > { %3050 = vmax.xlane.f32.xlu0 %v3049_v40 }
 0x485   : > { %v9599_v48 = vpop.f32.mrb[8].mxu0  ;;  %v9601_v2 = vpop.f32.mrb[24].mxu1 }
 0x486   : > { %v7857_v49 = vpop.f32.mrb[9].mxu0  ;;  %v7863_v14 = vpop.f32.mrb[25].mxu1  ;;  %v3079_v44 = vsel %vm2666_vm5, %v9599_v48, -inf  ;;  %v3085_v59 = vsel %vm2666_vm5, %v9601_v2, -inf }
 0x487   : > { %v9605_v50 = vpop.f32.mrb[26].mxu1  ;;  %3080 = vmax.xlane.f32.xlu0 %v3079_v44  ;;  %v9607_v23 = vpop.f32.mrb[10].mxu0 }
 0x488   : > { %v7858_v24 = vpop.f32.mrb[11].mxu0  ;;  %v7864_v15 = vpop.f32.mrb[27].mxu1  ;;  %v3082_v42 = vsel %vm2666_vm5, %v9607_v23, -inf  ;;  %v3088_v60 = vsel %vm2666_vm5, %v9605_v50, -inf }
 0x489   : > { %3083 = vmax.xlane.f32.xlu1 %v3082_v42 }
 0x48b   : > { %3053 = vmax.xlane.f32.xlu0 %v3052_v45 }
 0x48d   : > { %3059 = vmax.xlane.f32.xlu1 %v3058_v47 }
 0x48f   : > { %3056 = vmax.xlane.f32.xlu0 %v3055_v7 }
 0x491   : > { %3065 = vmax.xlane.f32.xlu1 %v3064_v58 }
 0x493   : > { %3062 = vmax.xlane.f32.xlu0 %v3061_v18 }
 0x495   : > { %3077 = vmax.xlane.f32.xlu1 %v3076_v25 }
 0x497   : > { %3074 = vmax.xlane.f32.xlu0 %v3073_v8 }
 0x499   : > { %3089 = vmax.xlane.f32.xlu1 %v3088_v60 }
 0x4aa   : > { %2104 = vrot.lane.b32.xlu1 %v9042_v22, %s8603_s27 }
 0x4ad   : > { %2102 = vrot.lane.b32.xlu0 %v9032_v21, %s8603_s27 }
 0x4cc   : > { %3086 = vmax.xlane.f32.xlu0 %v3085_v59 }
 0x4e0   : > { %v3045_v30 = vpop.xlane.xlu0 %3044 }
 0x4e1   : > { %v3091_v56 = vsub.f32 %v9565_v52, %v3045_v30 }
 0x4e2   : > { %2108 = vrot.lane.b32.xlu0 %v9032_v21, %s8604_s20  ;;  %v3048_v6 = vpop.xlane.xlu1 %3047 }
 0x4e3   : > { %v3092_v57 = vsub.f32 %v9569_v11, %v3048_v6  ;;  %v3107_v27 = vmul.f32 1.442695, %v3091_v56 }
 0x4e5   : > { %v3109_v38 = vmul.f32 1.442695, %v3092_v57 }
 0x4e7   : > { %8257 = vpow2.f32 %v3109_v38 }
 0x4e8   : > { %8259 = vpow2.f32 %v3107_v27 }
 0x4f1   : > { %v9645_v29 = vpop.eup %8257 }
 0x4f2   : > { %v3142_v32 = vsel %vm2666_vm5, %v9645_v29, 0.0  ;;  %v9649_v55 = vpop.eup %8259 }
 0x4f3   : > { %3143 = vadd.xlane.f32.xlu1 %v3142_v32  ;;  %v3139_v21 = vsel %vm2666_vm5, %v9649_v55, 0.0 }
 0x501   : > { %3140 = vadd.xlane.f32.xlu0 %v3139_v21 }
 0x509   : > { %v3069_v11 = vpop.xlane.xlu0 %3068 }
 0x50a   : > { %v3099_v62 = vsub.f32 %v9585_v46, %v3069_v11 }
 0x50b   : > { %v3072_v43 = vpop.xlane.xlu1 %3071 }
 0x50c   : > { %v3123_v4 = vmul.f32 1.442695, %v3099_v62  ;;  %v3100_v52 = vsub.f32 %v9593_v36, %v3072_v43 }
 0x50d   : > { %v3051_v33 = vpop.xlane.xlu0 %3050 }
 0x50e   : > { %8261 = vpow2.f32 %v3123_v4  ;;  %v3125_v28 = vmul.f32 1.442695, %v3100_v52  ;;  %v3093_v20 = vsub.f32 %v9573_v37, %v3051_v33 }
 0x510   : > { %8263 = vpow2.f32 %v3125_v28  ;;  %v3111_v10 = vmul.f32 1.442695, %v3093_v20 }
 0x512   : > { %8265 = vpow2.f32 %v3111_v10 }
 0x514   : > { %v3081_v17 = vpop.xlane.xlu0 %3080 }
 0x515   : > { %v3103_v21 = vsub.f32 %v9599_v48, %v3081_v17 }
 0x516   : > { %v9656_v40 = vpop.xlane.xlu1 %3083 }
 0x517   : > { %v3104_v49 = vsub.f32 %v9607_v23, %v9656_v40 }
 0x518   : > { %v9660_v14 = vpop.eup %8261  ;;  %v3054_v46 = vpop.xlane.xlu0 %3053 }
 0x519   : > { %v3094_v44 = vsub.f32 %v9575_v9, %v3054_v46  ;;  %v3163_v36 = vsel %vm2666_vm5, %v9660_v14, 0.0 }
 0x51a   : > { %v9665_v24 = vpop.eup %8263  ;;  %v3060_v37 = vpop.xlane.xlu1 %3059  ;;  %3164 = vadd.xlane.f32.xlu0 %v3163_v36 }
 0x51b   : > { %v3113_v15 = vmul.f32 1.442695, %v3094_v44  ;;  %v3096_v42 = vsub.f32 %v9579_v54, %v3060_v37  ;;  %v3166_v45 = vsel %vm2666_vm5, %v9665_v24, 0.0 }
 0x51c   : > { %v9670_v47 = vpop.eup %8265  ;;  %v3057_v7 = vpop.xlane.xlu0 %3056  ;;  %3167 = vadd.xlane.f32.xlu1 %v3166_v45 }
 0x51d   : > { %8267 = vpow2.f32 %v3113_v15  ;;  %v3117_v58 = vmul.f32 1.442695, %v3096_v42  ;;  %v3095_v9 = vsub.f32 %v9577_v53, %v3057_v7  ;;  %v3145_v18 = vsel %vm2666_vm5, %v9670_v47, 0.0 }
 0x51e   : > { %v3066_v25 = vpop.xlane.xlu1 %3065  ;;  %3146 = vadd.xlane.f32.xlu0 %v3145_v18  ;;  %v3133_v15 = vmul.f32 1.442695, %v3104_v49 }
 0x51f   : > { %8269 = vpow2.f32 %v3117_v58  ;;  %v3115_v8 = vmul.f32 1.442695, %v3095_v9  ;;  %v3098_v54 = vsub.f32 %v9583_v31, %v3066_v25 }
 0x520   : > { %v3063_v60 = vpop.xlane.xlu0 %3062 }
 0x521   : > { %8271 = vpow2.f32 %v3115_v8  ;;  %v3097_v59 = vsub.f32 %v9581_v16, %v3063_v60  ;;  %v3121_v6 = vmul.f32 1.442695, %v3098_v54 }
 0x522   : > { %v3078_v57 = vpop.xlane.xlu1 %3077 }
 0x523   : > { %v3119_v38 = vmul.f32 1.442695, %v3097_v59  ;;  %v3102_v30 = vsub.f32 %v9591_v5, %v3078_v57  ;;  %v3131_v5 = vmul.f32 1.442695, %v3103_v21 }
 0x524   : > { %v3075_v56 = vpop.xlane.xlu0 %3074 }
 0x525   : > { %8273 = vpow2.f32 %v3119_v38  ;;  %v3129_v53 = vmul.f32 1.442695, %v3102_v30  ;;  %v3101_v27 = vsub.f32 %v9587_v63, %v3075_v56 }
 0x526   : > { %8275 = vpow2.f32 %v3121_v6  ;;  %v3090_v36 = vpop.xlane.xlu1 %3089 }
 0x527   : > { %v9679_v32 = vpop.eup %8267  ;;  %8277 = vpow2.f32 %v3129_v53  ;;  %v3127_v31 = vmul.f32 1.442695, %v3101_v27  ;;  %v3106_v42 = vsub.f32 %v9605_v50, %v3090_v36 }
 0x528   : > { %v3148_v16 = vsel %vm2666_vm5, %v9679_v32, 0.0  ;;  %v2103_v37 = vpop.permute.xlu0 %2102 }
 0x529   : > { %v9684_v11 = vpop.eup %8269  ;;  %3149 = vadd.xlane.f32.xlu1 %v3148_v16  ;;  %8279 = vpow2.f32 %v3127_v31  ;;  %v3137_v58 = vmul.f32 1.442695, %v3106_v42  ;;  %v2146_v21 = vcombine.low %v9641_v35, %v2103_v37 }
 0x52a   : > { %v3154_v63 = vsel %vm2666_vm5, %v9684_v11, 0.0  ;;  %8281 = vpow2.f32 %v3131_v5  ;;  %v9731_v40 = vpop.permute.xlu1 %2104 }
 0x52b   : > { %v9686_v62 = vpop.eup %8271  ;;  %8283 = vpow2.f32 %v3133_v15  ;;  %v2154_v16 = vrot.slane %v2146_v21, %v9063_v34 }
 0x52c   : > { %v3151_v43 = vsel %vm2666_vm5, %v9686_v62, 0.0 }
 0x52d   : > { %3155 = vadd.xlane.f32.xlu1 %v3154_v63  ;;  %3152 = vadd.xlane.f32.xlu0 %v3151_v43 }
 0x52f   : > { %v9692_v48 = vpop.eup %8273 }
 0x530   : > { %v9694_v4 = vpop.eup %8275  ;;  %v3157_v52 = vsel %vm2666_vm5, %v9692_v48, 0.0 }
 0x531   : > { %v9698_v33 = vpop.eup %8277  ;;  %3158 = vadd.xlane.f32.xlu0 %v3157_v52  ;;  %v3160_v20 = vsel %vm2666_vm5, %v9694_v4, 0.0 }
 0x532   : > { %v3172_v28 = vsel %vm2666_vm5, %v9698_v33, 0.0 }
 0x533   : > { %3173 = vadd.xlane.f32.xlu1 %v3172_v28  ;;  %v9704_v10 = vpop.eup %8279 }
 0x534   : > { %v3169_v17 = vsel %vm2666_vm5, %v9704_v10, 0.0  ;;  %v9708_v46 = vpop.eup %8281 }
 0x535   : > { %3161 = vadd.xlane.f32.xlu0 %v3160_v20  ;;  %v3175_v44 = vsel %vm2666_vm5, %v9708_v46, 0.0  ;;  %v9719_v18 = vpop.eup %8283 }
 0x539   : > { %3170 = vadd.xlane.f32.xlu0 %v3169_v17 }
 0x53d   : > { %3176 = vadd.xlane.f32.xlu0 %v3175_v44 }
 0x544   : > { %2110 = vrot.lane.b32.xlu1 %v9042_v22, %s8604_s20  ;;  %v3178_v22 = vsel %vm2666_vm5, %v9719_v18, 0.0 }
 0x559   : > { %v3087_v45 = vpop.xlane.xlu0 %3086 }
 0x55a   : > { %v3105_v7 = vsub.f32 %v9601_v2, %v3087_v45 }
 0x55c   : > { %v3135_v9 = vmul.f32 1.442695, %v3105_v7 }
 0x55d   : > { %v2109_v49 = vpop.permute.xlu0 %2108 }
 0x55e   : > { %8285 = vpow2.f32 %v3135_v9  ;;  %v2162_v56 = vcombine.low %v9635_v39, %v2109_v49  ;;  %v2283_v9 = vcombine.high %v9633_v26, %v9731_v40 }
 0x55f   : > { %8287 = vpow2.f32 %v3137_v58  ;;  %v2282_v58 = vcombine.low %v9633_v26, %v9731_v40 }
 0x560   : > { %v2170_v31 = vrot.slane %v2162_v56, %v9063_v34  ;;  %v2297_v40 = vrot.slane %v2283_v9, %v9063_v34 }
 0x562   : > { %v2210_v43 = vcombine.low %v2154_v16, %v2170_v31  ;;  %v2211_v52 = vcombine.high %v2154_v16, %v2170_v31 }
 0x564   : > { %v2225_v44 = vrot.slane %v2211_v52, %v9068_v41 }
 0x568   : > { %v9723_v25 = vpop.eup %8285  ;;  %3179 = vadd.xlane.f32.xlu1 %v3178_v22 }
 0x569   : > { %v3181_v23 = vsel %vm2666_vm5, %v9723_v25, 0.0  ;;  %v9727_v50 = vpop.eup %8287 }
 0x56a   : > { %3182 = vadd.xlane.f32.xlu0 %v3181_v23  ;;  %v3184_v2 = vsel %vm2666_vm5, %v9727_v50, 0.0 }
 0x56e   : > { %3185 = vadd.xlane.f32.xlu0 %v3184_v2 }
 0x580   : > { %v3144_v8 = vpop.xlane.xlu1 %3143 }
 0x581   : > { %8289 = vrcp.f32 %v3144_v8 }
 0x58b   : > { %v8290_v60 = vpop.eup %8289 }
 0x58c   : > { %v3204_v6 = vmul.f32 %v8290_v60, %v9645_v29  ;;  %v2163_v29 = vcombine.high %v9635_v39, %v2109_v49 }
 0x58e   : > { %v3141_v54 = vpop.xlane.xlu0 %3140  ;;  %v2177_v5 = vrot.slane %v2163_v29, %v9063_v34 }
 0x58f   : > { %8291 = vrcp.f32 %v3141_v54 }
 0x599   : > { %v8292_v59 = vpop.eup %8291 }
 0x59a   : > { %v3203_v57 = vmul.f32 %v8292_v59, %v9649_v55  ;;  %v2147_v55 = vcombine.high %v9641_v35, %v2103_v37  ;;  %v2218_v35 = vrot.slane %v2210_v43, %v9068_v41 }
 0x59c   : > { %v3219_v38 = vpack.c.bf16 %v3204_v6, %v3203_v57  ;;  %v2161_v63 = vrot.slane %v2147_v55, %v9063_v34  ;;  %v7245_v22 = vcombine.low %v2218_v35, %v2225_v44  ;;  %v7247_v8 = vcombine.high %v2218_v35, %v2225_v44 }
 0x59e   : > { %7868 = vmatmul.mubr.msk.bf16.vlgmr.msra.gmra.mrb[12].mxu0 %vm2666_vm5, %v3219_v38  ;;  %v2226_v17 = vcombine.low %v2161_v63, %v2177_v5  ;;  %v2227_v39 = vcombine.high %v2161_v63, %v2177_v5  ;;  %v2290_v38 = vrot.slane %v2282_v58, %v9063_v34 }
 0x59f   : > { %7878 = vmatpush3.bf16.msra.mxu0 %v9555_v61  ;;  %7879 = vmatprep.mubr.msk.bf16.mxu0 %vm8597_vm0, %v8595_v13 }
 0x5a0   : > { %7889 = vmatprep.subr.bf16.mxu0 %v8595_v13  ;;  %v2234_v15 = vrot.slane %v2226_v17, %v9068_v41  ;;  %v2241_v42 = vrot.slane %v2227_v39, %v9068_v41 }
 0x5a2   : > { %v7249_v54 = vcombine.low %v2234_v15, %v2241_v42  ;;  %v7251_v60 = vcombine.high %v2234_v15, %v2241_v42 }
 0x5a7   : > { %v3165_v30 = vpop.xlane.xlu0 %3164 }
 0x5a9   : > { %v3168_v53 = vpop.xlane.xlu1 %3167 }
 0x5ab   : > { %v3147_v27 = vpop.xlane.xlu0 %3146 }
 0x5ac   : > { %8293 = vrcp.f32 %v3147_v27 }
 0x5b6   : > { %v3150_v61 = vpop.xlane.xlu1 %3149  ;;  %v8294_v37 = vpop.eup %8293 }
 0x5b7   : > { %8295 = vrcp.f32 %v3150_v61  ;;  %v3205_v23 = vmul.f32 %v8294_v37, %v9670_v47  ;;  %v2401_v47 = vrot.slane %v7245_v22, %v9063_v34 }
 0x5ba   : > { %v3156_v28 = vpop.xlane.xlu1 %3155  ;;  %v3153_v20 = vpop.xlane.xlu0 %3152 }
 0x5bb   : > { %8297 = vrcp.f32 %v3156_v28 }
 0x5bc   : > { %8299 = vrcp.f32 %v3153_v20 }
 0x5be   : > { %v3159_v36 = vpop.xlane.xlu0 %3158 }
 0x5bf   : > { %8301 = vrcp.f32 %v3159_v36 }
 0x5c0   : > { %v3174_v45 = vpop.xlane.xlu1 %3173 }
 0x5c1   : > { %v8296_v7 = vpop.eup %8295 }
 0x5c2   : > { %v3206_v2 = vmul.f32 %v8296_v7, %v9679_v32  ;;  %v3162_v49 = vpop.xlane.xlu0 %3161 }
 0x5c3   : > { %8303 = vrcp.f32 %v3162_v49 }
 0x5c4   : > { %v2111_v59 = vpop.permute.xlu1 %2110  ;;  %v3220_v6 = vpack.c.bf16 %v3206_v2, %v3205_v23  ;;  %8305 = vrcp.f32 %v3165_v30  ;;  %v2433_v30 = vrot.slane %v7249_v54, %v9063_v34 }
 0x5c5   : > { %v8298_v57 = vpop.eup %8297  ;;  %v2298_v56 = vcombine.low %v9637_v12, %v2111_v59  ;;  %v2299_v27 = vcombine.high %v9637_v12, %v2111_v59  ;;  %8307 = vrcp.f32 %v3168_v53  ;;  %v2417_v12 = vrot.slane %v7247_v8, %v9063_v34 }
 0x5c6   : > { %v8300_v26 = vpop.eup %8299  ;;  %v3208_v32 = vmul.f32 %v8298_v57, %v9684_v11  ;;  %7874 = vmatmul.mubr.msk.bf16.vlgmr.msra.gmra.mrb[28].mxu1 %vm2666_vm5, %v3220_v6  ;;  %v3171_v21 = vpop.xlane.xlu0 %3170  ;;  %v2449_v11 = vrot.slane %v7251_v60, %v9063_v34 }
 0x5c7   : > { %v3207_v29 = vmul.f32 %v8300_v26, %v9686_v62  ;;  %v2306_v55 = vrot.slane %v2298_v56, %v9063_v34  ;;  %v2313_v31 = vrot.slane %v2299_v27, %v9063_v34  ;;  %7884 = vmatpush3.bf16.msra.mxu1 %v9557_v51  ;;  %7885 = vmatprep.mubr.msk.bf16.mxu1 %vm8597_vm0, %v8595_v13  ;;  %8309 = vrcp.f32 %v3171_v21 }
 0x5c8   : > { %7895 = vmatprep.subr.bf16.mxu1 %v8595_v13  ;;  %8311 = vrcp.f32 %v3174_v45  ;;  %v2466_v20 = vcombine.low %v2401_v47, %v2417_v12  ;;  %v2498_v17 = vcombine.low %v2433_v30, %v2449_v11  ;;  %v2467_v45 = vcombine.high %v2401_v47, %v2417_v12 }
 0x5c9   : > { %v2346_v53 = vcombine.low %v2290_v38, %v2306_v55  ;;  %v2347_v62 = vcombine.high %v2290_v38, %v2306_v55  ;;  %v2362_v61 = vcombine.low %v2297_v40, %v2313_v31  ;;  %v2363_v16 = vcombine.high %v2297_v40, %v2313_v31  ;;  %v8302_v63 = vpop.eup %8301 }
 0x5ca   : > { %v3221_v5 = vpack.c.bf16 %v3208_v32, %v3207_v29  ;;  %v3209_v15 = vmul.f32 %v8302_v63, %v9692_v48  ;;  %v2474_v49 = vrot.slane %v2466_v20, %v9068_v41  ;;  %v2506_v8 = vrot.slane %v2498_v17, %v9068_v41 }
 0x5cb   : > { %v2354_v51 = vrot.slane %v2346_v53, %v9068_v41  ;;  %v2361_v43 = vrot.slane %v2347_v62, %v9068_v41  ;;  %v2370_v52 = vrot.slane %v2362_v61, %v9068_v41  ;;  %v2377_v28 = vrot.slane %v2363_v16, %v9068_v41 }
 0x5cc   : > { %7880 = vmatmul.mubr.msk.bf16.vlgmr.msra.gmra.mrb[16].mxu0 %vm2666_vm5, %v3221_v5  ;;  %v2499_v54 = vcombine.high %v2433_v30, %v2449_v11  ;;  %v2481_v47 = vrot.slane %v2467_v45, %v9068_v41  ;;  %v2518_v21 = vcombine.low %v2474_v49, %v2506_v8  ;;  %v2519_v55 = vcombine.high %v2474_v49, %v2506_v8 }
 0x5cd   : > { %v8304_v39 = vpop.eup %8303  ;;  %v7253_v35 = vcombine.low %v2354_v51, %v2361_v43  ;;  %v7255_v44 = vcombine.high %v2354_v51, %v2361_v43  ;;  %v7257_v36 = vcombine.low %v2370_v52, %v2377_v28  ;;  %v7259_v37 = vcombine.high %v2370_v52, %v2377_v28  ;;  %7891 = vmatprep.mubr.msk.bf16.mxu0 %vm8597_vm0, %v8595_v13 }
 0x5ce   : > { %v3210_v42 = vmul.f32 %v8304_v39, %v9694_v4  ;;  %v8306_v23 = vpop.eup %8305  ;;  %v2513_v32 = vrot.slane %v2499_v54, %v9068_v41 }
 0x5cf   : > { %v2537_v7 = vrot.slane %v7253_v35, %v9063_v34  ;;  %v2553_v58 = vrot.slane %v7255_v44, %v9063_v34  ;;  %v2569_v9 = vrot.slane %v7257_v36, %v9063_v34  ;;  %v2585_v22 = vrot.slane %v7259_v37, %v9063_v34  ;;  %v8308_v60 = vpop.eup %8307 }
 0x5d0   : > { %v3222_v2 = vpack.c.bf16 %v3210_v42, %v3209_v15  ;;  %v3212_v12 = vmul.f32 %v8308_v60, %v9665_v24  ;;  %v3211_v16 = vmul.f32 %v8306_v23, %v9660_v14  ;;  %v2520_v63 = vcombine.low %v2481_v47, %v2513_v32  ;;  %v3177_v14 = vpop.xlane.xlu0 %3176 }
 0x5d1   : > { %v2602_v48 = vcombine.low %v2537_v7, %v2553_v58  ;;  %v2634_v59 = vcombine.low %v2569_v9, %v2585_v22  ;;  %v2603_v4 = vcombine.high %v2537_v7, %v2553_v58  ;;  %v2635_v6 = vcombine.high %v2569_v9, %v2585_v22  ;;  %v8310_v57 = vpop.eup %8309 }
 0x5d2   : > { %7886 = vmatmul.mubr.msk.bf16.vlgmr.msra.gmra.mrb[32].mxu1 %vm2666_vm5, %v3222_v2  ;;  %v8312_v40 = vpop.eup %8311  ;;  %v3213_v30 = vmul.f32 %v8310_v57, %v9704_v10  ;;  %v2521_v51 = vcombine.high %v2481_v47, %v2513_v32  ;;  %v3223_v43 = vpack.c.bf16 %v3212_v12, %v3211_v16  ;;  %8313 = vrcp.f32 %v3177_v14 }
 0x5d3   : > { %v2610_v38 = vrot.slane %v2602_v48, %v9068_v41  ;;  %v2642_v56 = vrot.slane %v2634_v59, %v9068_v41  ;;  %7897 = vmatprep.mubr.msk.bf16.mxu1 %vm8597_vm0, %v8595_v13  ;;  %v2617_v27 = vrot.slane %v2603_v4, %v9068_v41  ;;  %v2649_v26 = vrot.slane %v2635_v6, %v9068_v41 }
 0x5d4   : > { %v3214_v5 = vmul.f32 %v8312_v40, %v9698_v33  ;;  %v10228_v58 = vmov 0  }
 0x5d5   : > { %v2654_v29 = vcombine.low %v2610_v38, %v2642_v56  ;;  %v2655_v31 = vcombine.high %v2610_v38, %v2642_v56  ;;  %v2656_v62 = vcombine.low %v2617_v27, %v2649_v26  ;;  %v2657_v61 = vcombine.high %v2617_v27, %v2649_v26 }
 0x5d6   : > { %v3224_v52 = vpack.c.bf16 %v3214_v5, %v3213_v30 }
 0x5d7   : > { %v2662_v11 = vpack.c.bf16 %v2654_v29, %v2518_v21  ;;  %v2663_v53 = vpack.c.bf16 %v2655_v31, %v2519_v55  ;;  %v2664_v24 = vpack.c.bf16 %v2656_v62, %v2520_v63  ;;  %v2665_v10 = vpack.c.bf16 %v2657_v61, %v2521_v51 }
 0x5d9   : > { %7890 = vmatpush3.bf16.msra.mxu0 %v2662_v11  ;;  %7896 = vmatpush3.bf16.msra.mxu1 %v2663_v53 }
 0x5da   : > { %7901 = vmatprep.subr.bf16.mxu0 %v8595_v13  ;;  %7907 = vmatprep.subr.bf16.mxu1 %v8595_v13 }
 0x5dc   : > { %7892 = vmatmul.mubr.msk.bf16.vlgmr.msra.gmra.mrb[20].mxu0 %vm2666_vm5, %v3223_v43  ;;  %7898 = vmatmul.mubr.msk.bf16.vlgmr.msra.gmra.mrb[36].mxu1 %vm2666_vm5, %v3224_v52  ;;  %v8314_v17 = vpop.eup %8313 }
 0x5dd   : > { %7902 = vmatpush3.bf16.msra.mxu0 %v2664_v24  ;;  %7908 = vmatpush3.bf16.msra.mxu1 %v2665_v10  ;;  %v3215_v35 = vmul.f32 %v8314_v17, %v9708_v46 }
 0x5de   : > { %7903 = vmatprep.mubr.msk.bf16.mxu0 %vm8597_vm0, %v8595_v13  ;;  %7909 = vmatprep.mubr.msk.bf16.mxu1 %vm8597_vm0, %v8595_v13 }
 0x5df   : > { %7913 = vmatprep.subr.bf16.mxu0 %v8595_v13 }
 0x5f5   : > { %v3180_v33 = vpop.xlane.xlu1 %3179 }
 0x5f6   : > { %8315 = vrcp.f32 %v3180_v33 }
 0x5f7   : > { %v3183_v28 = vpop.xlane.xlu0 %3182 }
 0x5f8   : > { %8317 = vrcp.f32 %v3183_v28 }
 0x5fb   : > { %v3186_v20 = vpop.xlane.xlu0 %3185 }
 0x5fc   : > { %8319 = vrcp.f32 %v3186_v20 }
 0x600   : > { %v8316_v39 = vpop.eup %8315 }
 0x601   : > { %v3216_v44 = vmul.f32 %v8316_v39, %v9719_v18 }
 0x602   : > { %v8318_v37 = vpop.eup %8317 }
 0x603   : > { %v3225_v36 = vpack.c.bf16 %v3216_v44, %v3215_v35  ;;  %v3217_v42 = vmul.f32 %v8318_v37, %v9723_v25 }
 0x605   : > { %7904 = vmatmul.mubr.msk.bf16.vlgmr.msra.gmra.mrb[24].mxu0 %vm2666_vm5, %v3225_v36 }
 0x606   : > { %v8320_v15 = vpop.eup %8319  ;;  %7929 = vmatprep.mubr.msk.bf16.mxu0 %vm8597_vm0, %v8595_v13 }
 0x607   : > { %v3218_v45 = vmul.f32 %v8320_v15, %v9727_v50 }
 0x609   : > { %v3226_v7 = vpack.c.bf16 %v3218_v45, %v3217_v42 }
 0x60b   : > { %7910 = vmatmul.mubr.msk.bf16.vlgmr.msra.gmra.mrb[40].mxu1 %vm2666_vm5, %v3226_v7 }
 0x60c   : > { %4626 = vmatprep.mubr.bf16.mxu1 %v10228_v58 }
 0x671   : > { %v3264_v46 = vpop.f32.mrb[12].mxu0 }
 0x672   : > { %v7869_v9 = vpop.f32.mrb[13].mxu0 }
 0x673   : > { %v3267_v18 = vpop.f32.mrb[14].mxu0 }
 0x674   : > { %v7870_v22 = vpop.f32.mrb[15].mxu0 }
 0x699   : > { %v3308_v23 = vpop.f32.mrb[28].mxu1 }
 0x69a   : > { %v7875_v2 = vpop.f32.mrb[29].mxu1 }
 0x69b   : > { %v3311_v49 = vpop.f32.mrb[30].mxu1 }
 0x69c   : > { %v7876_v8 = vpop.f32.mrb[31].mxu1 }
 0x69f   : > { %v3352_v54 = vpop.f32.mrb[16].mxu0 }
 0x6a0   : > { %v3579_v60 = vcombine.low %v3264_v46, %v3352_v54  ;;  %v3580_v48 = vcombine.high %v3264_v46, %v3352_v54  ;;  %v7881_v59 = vpop.f32.mrb[17].mxu0 }
 0x6a1   : > { %v3355_v25 = vpop.f32.mrb[18].mxu0 }
 0x6a2   : > { %v3715_v4 = vcombine.low %v3267_v18, %v3355_v25  ;;  %v3716_v50 = vcombine.high %v3267_v18, %v3355_v25  ;;  %v7882_v6 = vpop.f32.mrb[19].mxu0  ;;  %v3587_v26 = vrot.slane %v3579_v60, %v9063_v34  ;;  %v3594_v40 = vrot.slane %v3580_v48, %v9063_v34 }
 0x6a4   : > { %v3723_v62 = vrot.slane %v3715_v4, %v9063_v34  ;;  %v3730_v61 = vrot.slane %v3716_v50, %v9063_v34 }
 0x6a5   : > { %v3396_v57 = vpop.f32.mrb[32].mxu1 }
 0x6a6   : > { %v3595_v38 = vcombine.low %v3308_v23, %v3396_v57  ;;  %v3596_v56 = vcombine.high %v3308_v23, %v3396_v57  ;;  %v7887_v27 = vpop.f32.mrb[33].mxu1 }
 0x6a7   : > { %v3399_v47 = vpop.f32.mrb[34].mxu1 }
 0x6a8   : > { %v3603_v32 = vrot.slane %v3595_v38, %v9063_v34  ;;  %v3610_v21 = vrot.slane %v3596_v56, %v9063_v34  ;;  %v3731_v29 = vcombine.low %v3311_v49, %v3399_v47  ;;  %v3732_v55 = vcombine.high %v3311_v49, %v3399_v47  ;;  %v7888_v31 = vpop.f32.mrb[35].mxu1 }
 0x6aa   : > { %v3643_v12 = vcombine.low %v3587_v26, %v3603_v32  ;;  %v3644_v30 = vcombine.high %v3587_v26, %v3603_v32  ;;  %v3659_v11 = vcombine.low %v3594_v40, %v3610_v21  ;;  %v3660_v53 = vcombine.high %v3594_v40, %v3610_v21 }
 0x6ab   : > { %v3739_v16 = vrot.slane %v3731_v29, %v9063_v34  ;;  %v3746_v5 = vrot.slane %v3732_v55, %v9063_v34 }
 0x6ac   : > { %v3651_v63 = vrot.slane %v3643_v12, %v9068_v41  ;;  %v3658_v51 = vrot.slane %v3644_v30, %v9068_v41  ;;  %v3667_v43 = vrot.slane %v3659_v11, %v9068_v41  ;;  %v3674_v52 = vrot.slane %v3660_v53, %v9068_v41 }
 0x6ad   : > { %v3779_v24 = vcombine.low %v3723_v62, %v3739_v16  ;;  %v3780_v10 = vcombine.high %v3723_v62, %v3739_v16  ;;  %v3795_v14 = vcombine.low %v3730_v61, %v3746_v5  ;;  %v3796_v33 = vcombine.high %v3730_v61, %v3746_v5  ;;  %v8113_v62 = vld [vmem:[#allocation7] sm:$0xff]  }
 0x6ae   : > { %v7276_v28 = vcombine.low %v3651_v63, %v3658_v51  ;;  %v7278_v20 = vcombine.high %v3651_v63, %v3658_v51  ;;  %v7280_v17 = vcombine.low %v3667_v43, %v3674_v52  ;;  %v7282_v39 = vcombine.high %v3667_v43, %v3674_v52  ;;  %7914 = vmatpush3.bf16.msra.mxu0 %v8113_v62  ;;  %v8114_v51 = vld [vmem:[#allocation7 + $0x8] sm:$0xff]  }
 0x6af   : > { %v3787_v35 = vrot.slane %v3779_v24, %v9068_v41  ;;  %v3794_v44 = vrot.slane %v3780_v10, %v9068_v41  ;;  %v3803_v36 = vrot.slane %v3795_v14, %v9068_v41  ;;  %v3810_v37 = vrot.slane %v3796_v33, %v9068_v41  ;;  %v9837_v15 = vpop.f32.mrb[20].mxu0  ;;  %v9839_v42 = vpop.f32.mrb[36].mxu1  ;;  %7915 = vmatprep.subr.bf16.mxu0 %v8595_v13 }
 0x6b0   : > { %v3859_v45 = vrot.slane %v7276_v28, %v9063_v34  ;;  %v3875_v7 = vrot.slane %v7278_v20, %v9063_v34  ;;  %v3891_v46 = vrot.slane %v7280_v17, %v9063_v34  ;;  %v3907_v9 = vrot.slane %v7282_v39, %v9063_v34  ;;  %v7893_v18 = vpop.f32.mrb[21].mxu0  ;;  %v7899_v22 = vpop.f32.mrb[37].mxu1  ;;  %v8115_v20 = vld [vmem:[#allocation7 + $0x10] sm:$0xff]   ;;  %v8116_v17 = vld [vmem:[#allocation7 + $0x18] sm:$0xff]   ;;  %v8117_v39 = vld [vmem:[#allocation7 + $0x20] sm:$0xff]  }
 0x6b1   : > { %v7284_v23 = vcombine.low %v3787_v35, %v3794_v44  ;;  %v7286_v2 = vcombine.high %v3787_v35, %v3794_v44  ;;  %v7288_v49 = vcombine.low %v3803_v36, %v3810_v37  ;;  %v7290_v8 = vcombine.high %v3803_v36, %v3810_v37  ;;  %v9845_v54 = vpop.f32.mrb[22].mxu0  ;;  %v9847_v60 = vpop.f32.mrb[38].mxu1  ;;  %v8118_v35 = vld [vmem:[#allocation7 + $0x28] sm:$0xff]  }
 0x6b2   : > { %v7894_v48 = vpop.f32.mrb[23].mxu0  ;;  %v7900_v59 = vpop.f32.mrb[39].mxu1  ;;  %v3916_v25 = vcombine.high %v3859_v45, %v3875_v7  ;;  %v3948_v4 = vcombine.high %v3891_v46, %v3907_v9  ;;  %v3915_v50 = vcombine.low %v3859_v45, %v3875_v7  ;;  %v3947_v6 = vcombine.low %v3891_v46, %v3907_v9  ;;  %7916 = vmatpush3.bf16.msra.mxu0 %v8114_v51 }
 0x6b3   : > { %v3995_v57 = vrot.slane %v7284_v23, %v9063_v34  ;;  %v4011_v38 = vrot.slane %v7286_v2, %v9063_v34  ;;  %v4027_v56 = vrot.slane %v7288_v49, %v9063_v34  ;;  %v4043_v27 = vrot.slane %v7290_v8, %v9063_v34  ;;  %7917 = vmatprep.subr.bf16.mxu0 %v8595_v13 }
 0x6b4   : > { %v3930_v26 = vrot.slane %v3916_v25, %v9068_v41  ;;  %v3962_v40 = vrot.slane %v3948_v4, %v9068_v41  ;;  %v9856_v47 = vrot.slane %v3915_v50, %v9068_v41  ;;  %v9859_v32 = vrot.slane %v3947_v6, %v9068_v41 }
 0x6b5   : > { %v4052_v21 = vcombine.high %v3995_v57, %v4011_v38  ;;  %v4084_v29 = vcombine.high %v4027_v56, %v4043_v27  ;;  %v4051_v55 = vcombine.low %v3995_v57, %v4011_v38  ;;  %v4083_v31 = vcombine.low %v4027_v56, %v4043_v27 }
 0x6b6   : > { %v3981_v12 = vcombine.low %v3930_v26, %v3962_v40  ;;  %v3979_v30 = vcombine.low %v9856_v47, %v9859_v32  ;;  %v3980_v11 = vcombine.high %v9856_v47, %v9859_v32  ;;  %v3982_v53 = vcombine.high %v3930_v26, %v3962_v40  ;;  %7918 = vmatpush3.bf16.msra.mxu0 %v8115_v20 }
 0x6b7   : > { %v4066_v61 = vrot.slane %v4052_v21, %v9068_v41  ;;  %v4098_v16 = vrot.slane %v4084_v29, %v9068_v41  ;;  %v9868_v5 = vrot.slane %v4051_v55, %v9068_v41  ;;  %v9871_v63 = vrot.slane %v4083_v31, %v9068_v41  ;;  %7919 = vmatprep.subr.bf16.mxu0 %v8595_v13 }
 0x6b9   : > { %v4117_v43 = vcombine.low %v4066_v61, %v4098_v16  ;;  %v4116_v52 = vcombine.high %v9868_v5, %v9871_v63  ;;  %v4115_v24 = vcombine.low %v9868_v5, %v9871_v63  ;;  %v4118_v10 = vcombine.high %v4066_v61, %v4098_v16 }
 0x6ba   : > { %7920 = vmatpush3.bf16.msra.mxu0 %v8116_v17 }
 0x6bb   : > { %v8051_v14 = vpack.i.bf16 %v4117_v43, %v3981_v12  ;;  %v8046_v33 = vpack.i.bf16 %v4116_v52, %v3980_v11  ;;  %v8056_v28 = vpack.i.bf16 %v4118_v10, %v3982_v53  ;;  %7921 = vmatprep.subr.bf16.mxu0 %v8595_v13 }
 0x6bd   : > { %8052 = vrot.lane.b32.xlu1 %v8051_v14, %s8603_s27  ;;  %8047 = vrot.lane.b32.xlu0 %v8046_v33, %s8604_s20  ;;  %s10234_s27 = sld [smem:[#allocation28_spill]] }
 0x6be   : > { %7922 = vmatpush3.bf16.msra.mxu0 %v8117_v39 }
 0x6bf   : > { %7923 = vmatprep.subr.bf16.mxu0 %v8595_v13 }
 0x6c1   : > { %8057 = vrot.lane.b32.xlu1 %v8056_v28, %s8602_s1  ;;  %s10232_s1 = sld [smem:[#allocation23_spill]] }
 0x6c2   : > { %7924 = vmatpush3.bf16.msra.mxu0 %v8118_v35 }
 0x6c3   : > { %7925 = vmatprep.subr.bf16.mxu0 %v8595_v13 }
 0x6d8   : > { %v3528_v44 = vpop.f32.mrb[24].mxu0 }
 0x6d9   : > { %v3611_v36 = vcombine.low %v9837_v15, %v3528_v44  ;;  %v3612_v37 = vcombine.high %v9837_v15, %v3528_v44  ;;  %v7905_v45 = vpop.f32.mrb[25].mxu0 }
 0x6da   : > { %v3531_v7 = vpop.f32.mrb[26].mxu0 }
 0x6db   : > { %v3747_v46 = vcombine.low %v9845_v54, %v3531_v7  ;;  %v3748_v9 = vcombine.high %v9845_v54, %v3531_v7  ;;  %v7906_v18 = vpop.f32.mrb[27].mxu0  ;;  %v3619_v8 = vrot.slane %v3611_v36, %v9063_v34  ;;  %v3626_v48 = vrot.slane %v3612_v37, %v9063_v34 }
 0x6dd   : > { %v3762_v27 = vrot.slane %v3748_v9, %v9063_v34 }
 0x6de   : > { %v3572_v22 = vpop.f32.mrb[40].mxu1 }
 0x6df   : > { %v3627_v23 = vcombine.low %v9839_v42, %v3572_v22  ;;  %v3628_v2 = vcombine.high %v9839_v42, %v3572_v22  ;;  %v7911_v49 = vpop.f32.mrb[41].mxu1  ;;  %v3755_v42 = vrot.slane %v3747_v46, %v9063_v34 }
 0x6e0   : > { %v3575_v59 = vpop.f32.mrb[42].mxu1 }
 0x6e1   : > { %v3635_v15 = vrot.slane %v3627_v23, %v9063_v34  ;;  %v3642_v25 = vrot.slane %v3628_v2, %v9063_v34  ;;  %v3763_v4 = vcombine.low %v9847_v60, %v3575_v59  ;;  %v3764_v54 = vcombine.high %v9847_v60, %v3575_v59  ;;  %v7912_v50 = vpop.f32.mrb[43].mxu1  ;;  %v8119_v2 = vld [vmem:[#allocation7 + $0x30] sm:$0xff]  }
 0x6e2   : > { %7926 = vmatpush3.bf16.msra.mxu0 %v8119_v2 }
 0x6e3   : > { %v3675_v6 = vcombine.low %v3619_v8, %v3635_v15  ;;  %v3676_v57 = vcombine.high %v3619_v8, %v3635_v15  ;;  %v3691_v38 = vcombine.low %v3626_v48, %v3642_v25  ;;  %v3692_v56 = vcombine.high %v3626_v48, %v3642_v25  ;;  %7927 = vmatprep.subr.bf16.mxu0 %v8595_v13 }
 0x6e4   : > { %v3771_v26 = vrot.slane %v3763_v4, %v9063_v34  ;;  %v3778_v40 = vrot.slane %v3764_v54, %v9063_v34 }
 0x6e5   : > { %v3683_v21 = vrot.slane %v3675_v6, %v9068_v41  ;;  %v3690_v29 = vrot.slane %v3676_v57, %v9068_v41  ;;  %v3699_v55 = vrot.slane %v3691_v38, %v9068_v41  ;;  %v3706_v60 = vrot.slane %v3692_v56, %v9068_v41 }
 0x6e6   : > { %v3811_v31 = vcombine.low %v3755_v42, %v3771_v26  ;;  %v3812_v12 = vcombine.high %v3755_v42, %v3771_v26  ;;  %v3827_v11 = vcombine.low %v3762_v27, %v3778_v40  ;;  %v3828_v53 = vcombine.high %v3762_v27, %v3778_v40  ;;  %v8120_v26 = vld [vmem:[#allocation7 + $0x38] sm:$0xff]  }
 0x6e7   : > { %v7277_v62 = vcombine.low %v3683_v21, %v3690_v29  ;;  %v7279_v61 = vcombine.high %v3683_v21, %v3690_v29  ;;  %v7281_v16 = vcombine.low %v3699_v55, %v3706_v60  ;;  %v7283_v51 = vcombine.high %v3699_v55, %v3706_v60  ;;  %7928 = vmatpush3.bf16.msra.mxu0 %v8120_v26 }
 0x6e8   : > { %v3819_v43 = vrot.slane %v3811_v31, %v9068_v41  ;;  %v3826_v52 = vrot.slane %v3812_v12, %v9068_v41  ;;  %v3835_v10 = vrot.slane %v3827_v11, %v9068_v41  ;;  %v3842_v14 = vrot.slane %v3828_v53, %v9068_v41 }
 0x6e9   : > { %v3866_v33 = vrot.slane %v7277_v62, %v9063_v34  ;;  %v3882_v28 = vrot.slane %v7279_v61, %v9063_v34  ;;  %v3898_v20 = vrot.slane %v7281_v16, %v9063_v34  ;;  %v3914_v17 = vrot.slane %v7283_v51, %v9063_v34 }
 0x6ea   : > { %v7285_v39 = vcombine.low %v3819_v43, %v3826_v52  ;;  %v7287_v35 = vcombine.high %v3819_v43, %v3826_v52  ;;  %v7289_v44 = vcombine.low %v3835_v10, %v3842_v14  ;;  %v7291_v36 = vcombine.high %v3835_v10, %v3842_v14 }
 0x6eb   : > { %v3931_v37 = vcombine.low %v3866_v33, %v3882_v28  ;;  %v3963_v45 = vcombine.low %v3898_v20, %v3914_v17  ;;  %v3932_v7 = vcombine.high %v3866_v33, %v3882_v28  ;;  %v3964_v46 = vcombine.high %v3898_v20, %v3914_v17 }
 0x6ec   : > { %v4002_v9 = vrot.slane %v7285_v39, %v9063_v34  ;;  %v4018_v18 = vrot.slane %v7287_v35, %v9063_v34  ;;  %v4034_v22 = vrot.slane %v7289_v44, %v9063_v34  ;;  %v4050_v23 = vrot.slane %v7291_v36, %v9063_v34 }
 0x6ed   : > { %v3939_v49 = vrot.slane %v3931_v37, %v9068_v41  ;;  %v3971_v8 = vrot.slane %v3963_v45, %v9068_v41  ;;  %v3946_v48 = vrot.slane %v3932_v7, %v9068_v41  ;;  %v3978_v59 = vrot.slane %v3964_v46, %v9068_v41 }
 0x6ee   : > { %v4067_v15 = vcombine.low %v4002_v9, %v4018_v18  ;;  %v4099_v25 = vcombine.low %v4034_v22, %v4050_v23  ;;  %v4068_v4 = vcombine.high %v4002_v9, %v4018_v18  ;;  %v4100_v54 = vcombine.high %v4034_v22, %v4050_v23 }
 0x6ef   : > { %v3984_v50 = vcombine.high %v3939_v49, %v3971_v8  ;;  %v3983_v6 = vcombine.low %v3939_v49, %v3971_v8  ;;  %v3986_v57 = vcombine.high %v3946_v48, %v3978_v59  ;;  %v3985_v38 = vcombine.low %v3946_v48, %v3978_v59  ;;  %v7292_v48 = vld [vmem:[%s10229_s21] ss:$0 sm:$0xff]  ;;  %s10233_s21 = sld [smem:[#allocation24_spill]] }
 0x6f0   : > { %v4075_v34 = vrot.slane %v4067_v15, %v9068_v41  ;;  %v4107_v56 = vrot.slane %v4099_v25, %v9068_v41  ;;  %v4082_v42 = vrot.slane %v4068_v4, %v9068_v41  ;;  %v4114_v27 = vrot.slane %v4100_v54, %v9068_v41  ;;  %v8329_v54 = vld [vmem:[%s8906_s26] sm:$0xff] }
 0x6f2   : > { %v4120_v40 = vcombine.high %v4075_v34, %v4107_v56  ;;  %v4119_v21 = vcombine.low %v4075_v34, %v4107_v56  ;;  %v4122_v29 = vcombine.high %v4082_v42, %v4114_v27  ;;  %v4121_v55 = vcombine.low %v4082_v42, %v4114_v27 }
 0x6f4   : > { %v8066_v60 = vpack.i.bf16 %v4120_v40, %v3984_v50  ;;  %v8061_v31 = vpack.i.bf16 %v4119_v21, %v3983_v6  ;;  %v8076_v12 = vpack.i.bf16 %v4122_v29, %v3986_v57  ;;  %v8071_v11 = vpack.i.bf16 %v4121_v55, %v3985_v38  ;;  %v8330_v38 = vld [vmem:[%s8906_s26 + $0x8] sm:$0xff] }
 0x6f6   : > { %8067 = vrot.lane.b32.xlu0 %v8066_v60, %s8600_s10  ;;  %8062 = vrot.lane.b32.xlu1 %v8061_v31, %s8601_s18  ;;  %v4380_v60 = vld [vmem:[#allocation8] sm:$0xff] }
 0x6f7   : > { %v4382_v31 = vld [vmem:[#allocation8 + $0x40] sm:$0xff] }
 0x6fa   : > { %8077 = vrot.lane.b32.xlu0 %v8076_v12, %s8598_s12  ;;  %8072 = vrot.lane.b32.xlu1 %v8071_v11, %s8599_s8  ;;  %v4381_v12 = vld [vmem:[#allocation8 + $0x8] sm:$0xff]  ;;  %v7305_v11 = vcombine.high %v4380_v60, %v4382_v31  ;;  %s10231_s8 = sld [smem:[#allocation26_spill]]  ;;  %s7025_s12 = sshll.u32 %s9945_s14, 4  ;;  %s10080_s12 = int_to_ptr.vmem [resolvable:$true] %s7025_s12 }
 0x6fb   : > { %s8475_s19 = scalar_lea.vmem %s10080_s12, 256 }
 0x6fc   : > { %4594 = vmatprep.subr.bf16.mxu1 %v7305_v11  ;;  %p8476_p10 = scmp.ne.s32.totalorder %s10080_s12, %s8475_s19 }
 0x6fe   : > { %p8477_p3 = pnand %p8476_p10, %p8851_p5 }
 0x700   : > { %p8478_p7 = pneg %p8477_p3 }
 0x72f   : > { %v8053_v13 = vpop.permute.xlu1 %8052  ;;  %v8048_v41 = vpop.permute.xlu0 %8047 }
 0x730   : > { %v8050_v53 = vunpack.i.h.bf16 %v8048_v41  ;;  %v8049_v62 = vunpack.i.l.bf16 %v8048_v41  ;;  %v8055_v16 = vunpack.i.h.bf16 %v8053_v13  ;;  %v8054_v51 = vunpack.i.l.bf16 %v8053_v13  ;;  %v4383_v13 = vld [vmem:[#allocation8 + $0x48] sm:$0xff] }
 0x731   : > { %v7304_v41 = vcombine.low %v4380_v60, %v4382_v31  ;;  %v4411_v60 = vld [vmem:[#allocation8 + $0x3c8] sm:$0xff] }
 0x732   : > { %v4180_v43 = vsel %vm2666_vm5, %v4115_v24, %v8050_v53  ;;  %v4179_v52 = vsel %vm2666_vm5, %v3979_v30, %v8049_v62  ;;  %v7306_v53 = vcombine.low %v4381_v12, %v4383_v13  ;;  %v7307_v62 = vcombine.high %v4381_v12, %v4383_v13 }
 0x733   : > { %v8058_v61 = vpop.permute.xlu1 %8057  ;;  %v4182_v20 = vsel %vm4181_vm6, %v4179_v52, %v8054_v51  ;;  %v4183_v17 = vsel %vm4181_vm6, %v4180_v43, %v8055_v16  ;;  %4595 = vmatpush1.bf16.msra.mxu1 %v7304_v41  ;;  %v4386_v16 = vld [vmem:[#allocation8 + $0xc0] sm:$0xff]  ;;  %v4385_v51 = vld [vmem:[#allocation8 + $0x88] sm:$0xff] }
 0x734   : > { %v8060_v10 = vunpack.i.h.bf16 %v8058_v61  ;;  %v8059_v14 = vunpack.i.l.bf16 %v8058_v61  ;;  %4637 = vmatprep.subr.bf16.mxu0 %v7307_v62  ;;  %v4384_v61 = vld [vmem:[#allocation8 + $0x80] sm:$0xff]  ;;  %v4387_v52 = vld [vmem:[#allocation8 + $0xc8] sm:$0xff] }
 0x735   : > { %v7309_v43 = vcombine.high %v4384_v61, %v4386_v16  ;;  %v8121_v62 = vld [vmem:[#allocation10 + $0x40] sm:$0xff]  }
 0x736   : > { %v4185_v44 = vsel %vm4184_vm7, %v4182_v20, %v8059_v14  ;;  %v4186_v36 = vsel %vm4184_vm7, %v4183_v17, %v8060_v10  ;;  %v7308_v10 = vcombine.low %v4384_v61, %v4386_v16  ;;  %v7310_v14 = vcombine.low %v4385_v51, %v4387_v52  ;;  %v4390_v20 = vld [vmem:[#allocation8 + $0x140] sm:$0xff]  ;;  %v4389_v17 = vld [vmem:[#allocation8 + $0x108] sm:$0xff] }
 0x737   : > { %4596 = vmatprep.subr.bf16.mxu1 %v7309_v43  ;;  %v8122_v61 = vld [vmem:[#allocation10 + $0xc0] sm:$0xff]  }
 0x738   : > { %4597 = vmatpush1.bf16.msra.mxu1 %v7308_v10 }
 0x768   : > { %v8063_v33 = vpop.permute.xlu1 %8062  ;;  %v8068_v28 = vpop.permute.xlu0 %8067 }
 0x769   : > { %v8065_v39 = vunpack.i.h.bf16 %v8063_v33  ;;  %v8064_v35 = vunpack.i.l.bf16 %v8063_v33  ;;  %v8070_v5 = vunpack.i.h.bf16 %v8068_v28  ;;  %v8069_v63 = vunpack.i.l.bf16 %v8068_v28  ;;  %v4388_v28 = vld [vmem:[#allocation8 + $0x100] sm:$0xff] }
 0x76a   : > { %v7311_v33 = vcombine.high %v4385_v51, %v4387_v52 }
 0x76b   : > { %v4188_v24 = vsel %vm4187_vm8, %v4185_v44, %v8064_v35  ;;  %v4189_v37 = vsel %vm4187_vm8, %v4186_v36, %v8065_v39  ;;  %v7313_v39 = vcombine.high %v4388_v28, %v4390_v20  ;;  %v4391_v35 = vld [vmem:[#allocation8 + $0x148] sm:$0xff]  ;;  %v4392_v44 = vld [vmem:[#allocation8 + $0x180] sm:$0xff] }
 0x76c   : > { %v8073_v47 = vpop.permute.xlu1 %8072  ;;  %v8078_v32 = vpop.permute.xlu0 %8077  ;;  %v4191_v9 = vsel %vm4190_vm9, %v4188_v24, %v8069_v63  ;;  %v4192_v18 = vsel %vm4190_vm9, %v4189_v37, %v8070_v5  ;;  %v4394_v36 = vld [vmem:[#allocation8 + $0x1c0] sm:$0xff]  ;;  %v7312_v5 = vcombine.low %v4388_v28, %v4390_v20  ;;  %v7315_v63 = vcombine.high %v4389_v17, %v4391_v35  ;;  %v4393_v24 = vld [vmem:[#allocation8 + $0x188] sm:$0xff] }
 0x76d   : > { %v8075_v30 = vunpack.i.h.bf16 %v8073_v47  ;;  %v8074_v45 = vunpack.i.l.bf16 %v8073_v47  ;;  %v8080_v7 = vunpack.i.h.bf16 %v8078_v32  ;;  %v8079_v46 = vunpack.i.l.bf16 %v8078_v32  ;;  %v4395_v37 = vld [vmem:[#allocation8 + $0x1c8] sm:$0xff]  ;;  %4598 = vmatprep.subr.bf16.mxu1 %v7313_v39 }
 0x76e   : > { %v7314_v47 = vcombine.low %v4389_v17, %v4391_v35  ;;  %v7317_v32 = vcombine.high %v4392_v44, %v4394_v36  ;;  %4599 = vmatpush1.bf16.msra.mxu1 %v7312_v5 }
 0x76f   : > { %v4194_v22 = vsel %vm4193_vm10, %v4191_v9, %v8074_v45  ;;  %v4195_v23 = vsel %vm4193_vm10, %v4192_v18, %v8075_v30  ;;  %v7319_v30 = vcombine.high %v4393_v24, %v4395_v37  ;;  %v4396_v45 = vld [vmem:[#allocation8 + $0x200] sm:$0xff]  ;;  %v4399_v9 = vld [vmem:[#allocation8 + $0x248] sm:$0xff]  ;;  %v7316_v18 = vcombine.low %v4392_v44, %v4394_v36 }
 0x770   : > { %v4197_v2 = vsel %vm4196_vm11, %v4194_v22, %v8079_v46  ;;  %v4198_v49 = vsel %vm4196_vm11, %v4195_v23, %v8080_v7  ;;  %v4398_v7 = vld [vmem:[#allocation8 + $0x240] sm:$0xff]  ;;  %v4397_v46 = vld [vmem:[#allocation8 + $0x208] sm:$0xff]  ;;  %4600 = vmatprep.subr.bf16.mxu1 %v7317_v32  ;;  %v7318_v22 = vcombine.low %v4393_v24, %v4395_v37 }
 0x771   : > { %v4199_v8 = vpack.c.bf16 %v4198_v49, %v4197_v2  ;;  %v7321_v23 = vcombine.high %v4396_v45, %v4398_v7  ;;  %v7323_v2 = vcombine.high %v4397_v46, %v4399_v9  ;;  %v4400_v49 = vld [vmem:[#allocation8 + $0x280] sm:$0xff] }
 0x772   : > { %4601 = vmatpush1.bf16.msra.mxu1 %v7316_v18  ;;  %v7301_v24 = vld [vmem:[%s10230_s22] ss:$0 sm:$0xff] }
 0x773   : > { %7930 = vmatmul.mubr.bf16.vlgmr.msra.gmra.mrb[28].mxu0 %v4199_v8  ;;  %v4402_v8 = vld [vmem:[#allocation8 + $0x2c0] sm:$0xff]  ;;  %4602 = vmatprep.subr.bf16.mxu1 %v7321_v23 }
 0x774   : > { %4669 = vmatprep.mubr.bf16.mxu0 %v10228_v58  ;;  %4638 = vmatpush1.bf16.msra.mxu0 %v7306_v53  ;;  %v8124_v23 = vld [vmem:[#allocation10 + $0x80] sm:$0xff]  }
 0x775   : > { %4639 = vmatprep.subr.bf16.mxu0 %v7311_v33 }
 0x778   : > { %4640 = vmatpush1.bf16.msra.mxu0 %v7310_v14 }
 0x779   : > { %4641 = vmatprep.subr.bf16.mxu0 %v7315_v63 }
 0x77c   : > { %4642 = vmatpush1.bf16.msra.mxu0 %v7314_v47 }
 0x77d   : > { %4643 = vmatprep.subr.bf16.mxu0 %v7319_v30 }
 0x780   : > { %4644 = vmatpush1.bf16.msra.mxu0 %v7318_v22  ;;  %v8123_v22 = vld [vmem:[#allocation10] sm:$0xff]  }
 0x781   : > { %4645 = vmatprep.subr.bf16.mxu0 %v7323_v2 }
 0x846   : > { %v4305_v59 = vpop.f32.mrb[28].mxu0 }
 0x847   : > { %v4306_v15 = vadd.f32 %v7292_v48, %v4305_v59  ;;  %v7931_v25 = vpop.f32.mrb[29].mxu0  ;;  %v4403_v59 = vld [vmem:[#allocation8 + $0x2c8] sm:$0xff] }
 0x848   : > { %v4308_v4 = vpop.f32.mrb[30].mxu0  ;;  %v7322_v25 = vcombine.low %v4397_v46, %v4399_v9 }
 0x849   : > { %v4312_v50 = vadd.f32 %v8329_v54, %v4306_v15  ;;  %v4309_v6 = vadd.f32 %v7292_v48, %v4308_v4  ;;  %v7932_v57 = vpop.f32.mrb[31].mxu0  ;;  %v4401_v48 = vld [vmem:[#allocation8 + $0x288] sm:$0xff]  ;;  %v7320_v15 = vcombine.low %v4396_v45, %v4398_v7  ;;  %v7325_v4 = vcombine.high %v4400_v49, %v4402_v8  ;;  %v7302_v7 = vld [vmem:[%s10231_s8] ss:$0 sm:$0xff]  ;;  %s7569_s8 = sshll.u32 %s8707_s17, 8 }
 0x84a   : > { %v7327_v54 = vcombine.high %v4401_v48, %v4403_v59  ;;  %v4405_v57 = vld [vmem:[#allocation8 + $0x308] sm:$0xff]  ;;  %4646 = vmatpush1.bf16.msra.mxu0 %v7322_v25  ;;  %v8132_v25 = vld [vmem:[#allocation10 + $0x90] sm:$0xff]   ;;  %s10087_s20 = scalar_lea.hbm %s10234_s27, %s7569_s8 }
 0x84b   : > { %4314 = vst [vmem:[%s9945_s14] sm:$0xff] %v4312_v50  ;;  %v4313_v34 = vadd.f32 %v8330_v38, %v4309_v6  ;;  %4318 = vadd.xlane.f32.xlu1 %v4312_v50  ;;  %v4406_v6 = vld [vmem:[#allocation8 + $0x340] sm:$0xff]  ;;  %v4407_v38 = vld [vmem:[#allocation8 + $0x348] sm:$0xff]  ;;  %4603 = vmatpush1.bf16.msra.mxu1 %v7320_v15  ;;  %v8131_v15 = vld [vmem:[#allocation10 + $0x10] sm:$0xff]  }
 0x84c   : > { %4604 = vmatprep.subr.bf16.mxu1 %v7325_v4  ;;  %4647 = vmatprep.subr.bf16.mxu0 %v7327_v54  ;;  %v7330_v12 = vcombine.low %v4405_v57, %v4407_v38  ;;  %v8133_v4 = vld [vmem:[#allocation10 + $0x58] sm:$0xff]  }
 0x84d   : > { %4315 = vst [vmem:[%s9945_s14 + $0x8] sm:$0xff] %v4313_v34  ;;  %4320 = vadd.xlane.f32.xlu0 %v4313_v34  ;;  %v8134_v54 = vld [vmem:[#allocation10 + $0xd8] sm:$0xff]  }
 0x8d8   : > { %v4319_v56 = vpop.xlane.xlu1 %4318 }
 0x8d9   : > { %v4322_v42 = vmul.f32 0.0078125, %v4319_v56  ;;  %v7326_v56 = vcombine.low %v4401_v48, %v4403_v59  ;;  %v8128_v48 = vld [vmem:[#allocation10 + $0x88] sm:$0xff]   ;;  %v8129_v59 = vld [vmem:[#allocation10 + $0x50] sm:$0xff]  }
 0x8da   : > { %v4321_v27 = vpop.xlane.xlu0 %4320 }
 0x8db   : > { %v9950_v26 = vsub.f32 %v4312_v50, %v4322_v42  ;;  %v4323_v40 = vmul.f32 0.0078125, %v4321_v27  ;;  %v4404_v50 = vld [vmem:[#allocation8 + $0x300] sm:$0xff]  ;;  %v7331_v27 = vcombine.high %v4405_v57, %v4407_v38  ;;  %4648 = vmatpush1.bf16.msra.mxu0 %v7326_v56 }
 0x8dc   : > { %v7329_v42 = vcombine.high %v4404_v50, %v4406_v6  ;;  %v7328_v31 = vcombine.low %v4404_v50, %v4406_v6  ;;  %v8135_v50 = vld [vmem:[#allocation10 + $0x18] sm:$0xff]   ;;  %v8137_v57 = vld [vmem:[#allocation10 + $0x60] sm:$0xff]  }
 0x8dd   : > { %v9952_v21 = vsub.f32 %v4313_v34, %v4323_v40  ;;  %v4326_v29 = vmul.f32 %v9950_v26, %v9950_v26  ;;  %v7324_v34 = vcombine.low %v4400_v49, %v4402_v8  ;;  %v4408_v40 = vld [vmem:[#allocation8 + $0x380] sm:$0xff]  ;;  %4649 = vmatprep.subr.bf16.mxu0 %v7331_v27  ;;  %v8125_v49 = vld [vmem:[#allocation10 + $0x48] sm:$0xff]   ;;  %v8136_v6 = vld [vmem:[#allocation10 + $0x98] sm:$0xff]  }
 0x8de   : > { %v8126_v8 = vld [vmem:[#allocation10 + $0xc8] sm:$0xff]   ;;  %v8138_v38 = vld [vmem:[#allocation10 + $0xe0] sm:$0xff]  }
 0x8df   : > { %4328 = vadd.xlane.f32.xlu0 %v4326_v29  ;;  %v4327_v55 = vmul.f32 %v9952_v21, %v9952_v21  ;;  %v4410_v29 = vld [vmem:[#allocation8 + $0x3c0] sm:$0xff]  ;;  %4605 = vmatpush1.bf16.msra.mxu1 %v7324_v34  ;;  %v8142_v27 = vld [vmem:[#allocation10 + $0xe8] sm:$0xff]  }
 0x8e0   : > { %4606 = vmatprep.subr.bf16.mxu1 %v7329_v42  ;;  %v7333_v11 = vcombine.high %v4408_v40, %v4410_v29  ;;  %v7332_v41 = vcombine.low %v4408_v40, %v4410_v29  ;;  %4650 = vmatpush1.bf16.msra.mxu0 %v7330_v12  ;;  %v8139_v34 = vld [vmem:[#allocation10 + $0x20] sm:$0xff]   ;;  %v8141_v42 = vld [vmem:[#allocation10 + $0x68] sm:$0xff]   ;;  %v8148_v12 = vld [vmem:[#allocation10 + $0xb0] sm:$0xff]  }
 0x8e1   : > { %v8140_v56 = vld [vmem:[#allocation10 + $0xa0] sm:$0xff]   ;;  %v8143_v40 = vld [vmem:[#allocation10 + $0x28] sm:$0xff]  }
 0x8e2   : > { %v8144_v29 = vld [vmem:[#allocation10 + $0xa8] sm:$0xff]  }
 0x8e3   : > { %4330 = vadd.xlane.f32.xlu0 %v4327_v55  ;;  %v4409_v55 = vld [vmem:[#allocation8 + $0x388] sm:$0xff]  ;;  %4607 = vmatpush1.bf16.msra.mxu1 %v7328_v31  ;;  %v8147_v31 = vld [vmem:[#allocation10 + $0x30] sm:$0xff]  }
 0x8e4   : > { %v7335_v13 = vcombine.high %v4409_v55, %v4411_v60  ;;  %4608 = vmatprep.subr.bf16.mxu1 %v7333_v11  ;;  %v7334_v53 = vcombine.low %v4409_v55, %v4411_v60  ;;  %v8145_v55 = vld [vmem:[#allocation10 + $0x70] sm:$0xff]   ;;  %v8149_v11 = vld [vmem:[#allocation10 + $0x78] sm:$0xff]  }
 0x8e5   : > { %v8146_v60 = vld [vmem:[#allocation10 + $0xf0] sm:$0xff]  }
 0x8e6   : > { %4651 = vmatprep.subr.bf16.mxu0 %v7335_v13  ;;  %v8150_v13 = vld [vmem:[#allocation10 + $0xf8] sm:$0xff]  }
 0x8e7   : > { %4609 = vmatpush1.bf16.msra.mxu1 %v7332_v41  ;;  %4652 = vmatpush1.bf16.msra.mxu0 %v7334_v53  ;;  %v8151_v41 = vld [vmem:[#allocation10 + $0x38] sm:$0xff]  }
 0x8e8   : > { %7621 = vmatprep.subr.bf16.mxu1 %v8121_v62  ;;  %7643 = vmatprep.subr.bf16.mxu0 %v8122_v61  ;;  %v8152_v53 = vld [vmem:[#allocation10 + $0xb8] sm:$0xff]   ;;  %v5032_v62 = vld [vmem:[#allocation8 + $0x10] sm:$0xff] }
 0x8e9   : > { %v5034_v61 = vld [vmem:[#allocation8 + $0x50] sm:$0xff] }
 0x96c   : > { %v4329_v16 = vpop.xlane.xlu0 %4328 }
 0x96d   : > { %v4332_v51 = vmul.f32 0.007874016, %v4329_v16  ;;  %v5033_v16 = vld [vmem:[#allocation8 + $0x18] sm:$0xff] }
 0x96f   : > { %8321 = vrsqrt.f32 %v4332_v51  ;;  %vm4336_vm12 = vcmp.eq.f32.partialorder %v4332_v51, inf  ;;  %v4339_v33 = vand.u32 2147483648, %v4332_v51  ;;  %vm4338_vm13 = vcmp.eq.f32.partialorder %v4332_v51, 0.0 }
 0x970   : > { %v4331_v43 = vpop.xlane.xlu0 %4330 }
 0x971   : > { %v4333_v52 = vmul.f32 0.007874016, %v4331_v43  ;;  %v7369_v43 = vcombine.high %v5032_v62, %v5034_v61 }
 0x973   : > { %8323 = vrsqrt.f32 %v4333_v52  ;;  %vm4343_vm14 = vcmp.eq.f32.partialorder %v4333_v52, inf  ;;  %v4346_v44 = vand.u32 2147483648, %v4333_v52  ;;  %vm4345_vm15 = vcmp.eq.f32.partialorder %v4333_v52, 0.0 }
 0x979   : > { %v8322_v10 = vpop.eup %8321 }
 0x97a   : > { %v4335_v14 = vmul.f32 %v8322_v10, %v4332_v51 }
 0x97c   : > { %v4337_v28 = vsel %vm4336_vm12, %v4332_v51, %v4335_v14  ;;  %v7368_v51 = vcombine.low %v5032_v62, %v5034_v61  ;;  %v5047_v62 = vld [vmem:[#allocation8 + $0x1d8] sm:$0xff] }
 0x97d   : > { %v8324_v20 = vpop.eup %8323  ;;  %v4340_v17 = vsel %vm4338_vm13, %v4339_v33, %v4337_v28  ;;  %v4412_v33 = vld [vmem:[%s10232_s1] sm:$0xf]  ;;  %v9974_v28 = vsub.s32 3, %v8955_v0 }
 0x97e   : > { %v4348_v39 = vadd.f32 1e-06, %v4340_v17  ;;  %v4342_v35 = vmul.f32 %v8324_v20, %v4333_v52  ;;  %v4417_v20 = vrot.slane %v4412_v33, %v8958_v1  ;;  %v4425_v17 = vrot.slane %v4412_v33, %v9021_v19 }
 0x980   : > { %8325 = vrcp.f32 %v4348_v39  ;;  %v4344_v36 = vsel %vm4343_vm14, %v4333_v52, %v4342_v35  ;;  %v5035_v52 = vld [vmem:[#allocation8 + $0x58] sm:$0xff]  ;;  %v4421_v39 = vrot.slane %v4412_v33, %v8964_v3  ;;  %v4429_v35 = vrot.slane %v4412_v33, %v9974_v28 }
 0x981   : > { %v4347_v5 = vsel %vm4345_vm15, %v4346_v44, %v4344_v36  ;;  %v7370_v10 = vcombine.low %v5033_v16, %v5035_v52  ;;  %v7371_v14 = vcombine.high %v5033_v16, %v5035_v52  ;;  %v5048_v52 = vld [vmem:[#allocation8 + $0x210] sm:$0xff]  ;;  %v5051_v33 = vld [vmem:[#allocation8 + $0x258] sm:$0xff] }
 0x982   : > { %v4349_v63 = vadd.f32 1e-06, %v4347_v5 }
 0x984   : > { %8327 = vrcp.f32 %v4349_v63 }
 0x98a   : > { %v8326_v37 = vpop.eup %8325 }
 0x98b   : > { %v4358_v47 = vmul.f32 %v8326_v37, %v7301_v24 }
 0x98d   : > { %v4360_v30 = vmul.f32 %v4358_v47, %v9950_v26  ;;  %v8127_v26 = vld [vmem:[#allocation10 + $0x8] sm:$0xff]  }
 0x98e   : > { %v8328_v32 = vpop.eup %8327 }
 0x98f   : > { %v4359_v45 = vmul.f32 %v8328_v32, %v7301_v24  ;;  %v4368_v9 = vadd.f32 %v7302_v7, %v4360_v30 }
 0x991   : > { %v4361_v46 = vmul.f32 %v4359_v45, %v9952_v21  ;;  %v8130_v21 = vld [vmem:[#allocation10 + $0xd0] sm:$0xff]  }
 0x993   : > { %v4369_v18 = vadd.f32 %v7302_v7, %v4361_v46 }
 0x995   : > { %v9966_v2 = vpack.c.bf16 %v4369_v18, %v4368_v9 }
 0x997   : > { %4627 = vmatmul.mubr.bf16.vlgmr.msra.gmra.mrb[44].mxu1 %v9966_v2  ;;  %4670 = vmatmul.mubr.bf16.vlgmr.msra.gmra.mrb[32].mxu0 %v9966_v2 }
 0x998   : > { %7622 = vmatpush3.bf16.msra.mxu1 %v8123_v22  ;;  %7644 = vmatpush3.bf16.msra.mxu0 %v8124_v23 }
 0x999   : > { %7623 = vmatprep.subr.bf16.mxu1 %v8125_v49  ;;  %7645 = vmatprep.subr.bf16.mxu0 %v8126_v8 }
 0x99c   : > { %7624 = vmatpush3.bf16.msra.mxu1 %v8127_v26  ;;  %7646 = vmatpush3.bf16.msra.mxu0 %v8128_v48  ;;  %v5036_v48 = vld [vmem:[#allocation8 + $0x90] sm:$0xff] }
 0x99d   : > { %7625 = vmatprep.subr.bf16.mxu1 %v8129_v59  ;;  %7647 = vmatprep.subr.bf16.mxu0 %v8130_v21  ;;  %v5038_v59 = vld [vmem:[#allocation8 + $0xd0] sm:$0xff] }
 0x9a0   : > { %7626 = vmatpush3.bf16.msra.mxu1 %v8131_v15  ;;  %7648 = vmatpush3.bf16.msra.mxu0 %v8132_v25 }
 0x9a1   : > { %7627 = vmatprep.subr.bf16.mxu1 %v8133_v4  ;;  %7649 = vmatprep.subr.bf16.mxu0 %v8134_v54  ;;  %v5037_v54 = vld [vmem:[#allocation8 + $0x98] sm:$0xff] }
 0x9a4   : > { %7628 = vmatpush3.bf16.msra.mxu1 %v8135_v50  ;;  %7650 = vmatpush3.bf16.msra.mxu0 %v8136_v6  ;;  %v5039_v50 = vld [vmem:[#allocation8 + $0xd8] sm:$0xff] }
 0x9a5   : > { %7629 = vmatprep.subr.bf16.mxu1 %v8137_v57  ;;  %7651 = vmatprep.subr.bf16.mxu0 %v8138_v38 }
 0x9a8   : > { %7630 = vmatpush3.bf16.msra.mxu1 %v8139_v34  ;;  %7652 = vmatpush3.bf16.msra.mxu0 %v8140_v56  ;;  %v7373_v56 = vcombine.high %v5036_v48, %v5038_v59 }
 0x9a9   : > { %7631 = vmatprep.subr.bf16.mxu1 %v8141_v42  ;;  %7653 = vmatprep.subr.bf16.mxu0 %v8142_v27  ;;  %v7375_v42 = vcombine.high %v5037_v54, %v5039_v50  ;;  %v5040_v27 = vld [vmem:[#allocation8 + $0x110] sm:$0xff] }
 0x9ac   : > { %7632 = vmatpush3.bf16.msra.mxu1 %v8143_v40  ;;  %7654 = vmatpush3.bf16.msra.mxu0 %v8144_v29  ;;  %v5042_v40 = vld [vmem:[#allocation8 + $0x150] sm:$0xff]  ;;  %v5041_v29 = vld [vmem:[#allocation8 + $0x118] sm:$0xff] }
 0x9ad   : > { %7633 = vmatprep.subr.bf16.mxu1 %v8145_v55  ;;  %7655 = vmatprep.subr.bf16.mxu0 %v8146_v60  ;;  %v5043_v55 = vld [vmem:[#allocation8 + $0x158] sm:$0xff]  ;;  %v7372_v60 = vcombine.low %v5036_v48, %v5038_v59  ;;  %v7376_v61 = vcombine.low %v5040_v27, %v5042_v40 }
 0x9ae   : > { %v7378_v16 = vcombine.low %v5041_v29, %v5043_v55 }
 0x9b0   : > { %7634 = vmatpush3.bf16.msra.mxu1 %v8147_v31  ;;  %7656 = vmatpush3.bf16.msra.mxu0 %v8148_v12  ;;  %v7374_v31 = vcombine.low %v5037_v54, %v5039_v50  ;;  %v7377_v12 = vcombine.high %v5040_v27, %v5042_v40  ;;  %v8153_v54 = vld [vmem:[#allocation10 + $0x140] sm:$0xff]   ;;  %v8161_v27 = vld [vmem:[#allocation10 + $0x150] sm:$0xff]  }
 0x9b1   : > { %7635 = vmatprep.subr.bf16.mxu1 %v8149_v11  ;;  %7657 = vmatprep.subr.bf16.mxu0 %v8150_v13  ;;  %v7379_v11 = vcombine.high %v5041_v29, %v5043_v55  ;;  %v5044_v13 = vld [vmem:[#allocation8 + $0x190] sm:$0xff]  ;;  %v8154_v50 = vld [vmem:[#allocation10 + $0x1c0] sm:$0xff]  }
 0x9b2   : > { %v8162_v40 = vld [vmem:[#allocation10 + $0x1d0] sm:$0xff]  }
 0x9b3   : > { %v8163_v29 = vld [vmem:[#allocation10 + $0x110] sm:$0xff]  }
 0x9b4   : > { %7636 = vmatpush3.bf16.msra.mxu1 %v8151_v41  ;;  %7658 = vmatpush3.bf16.msra.mxu0 %v8152_v53  ;;  %v5046_v41 = vld [vmem:[#allocation8 + $0x1d0] sm:$0xff]  ;;  %v5045_v53 = vld [vmem:[#allocation8 + $0x198] sm:$0xff] }
 0x9b5   : > { %5246 = vmatprep.subr.bf16.mxu1 %v7369_v43  ;;  %5289 = vmatprep.subr.bf16.mxu0 %v7371_v14  ;;  %v7383_v43 = vcombine.high %v5045_v53, %v5047_v62  ;;  %v5049_v14 = vld [vmem:[#allocation8 + $0x218] sm:$0xff]  ;;  %v8164_v55 = vld [vmem:[#allocation10 + $0x190] sm:$0xff]  }
 0xa6a   : > { %v4628_v44 = vpop.f32.mrb[44].mxu1  ;;  %v4671_v36 = vpop.f32.mrb[32].mxu0 }
 0xa6b   : > { %v4629_v5 = vadd.f32 %v4628_v44, %v4417_v20  ;;  %v4672_v63 = vadd.f32 %v4671_v36, %v4425_v17  ;;  %v4630_v24 = vpop.f32.mrb[45].mxu1  ;;  %v4673_v37 = vpop.f32.mrb[33].mxu0  ;;  %v5052_v44 = vld [vmem:[#allocation8 + $0x290] sm:$0xff] }
 0xa6c   : > { %v4631_v47 = vadd.f32 %v4630_v24, %v4421_v39  ;;  %v4674_v32 = vadd.f32 %v4673_v37, %v4429_v35  ;;  %v4632_v30 = vpop.f32.mrb[46].mxu1  ;;  %v4675_v45 = vpop.f32.mrb[34].mxu0  ;;  %v5054_v36 = vld [vmem:[#allocation8 + $0x2d0] sm:$0xff]  ;;  %v7386_v37 = vcombine.low %v5049_v14, %v5051_v33 }
 0xa6d   : > { %v4633_v0 = vadd.f32 %v4632_v30, %v4417_v20  ;;  %v4676_v7 = vadd.f32 %v4675_v45, %v4425_v17  ;;  %v4634_v46 = vpop.f32.mrb[47].mxu1  ;;  %v4677_v9 = vpop.f32.mrb[35].mxu0  ;;  %v4680_v23 = vmax.f32 %v4629_v5, 0.0  ;;  %v4682_v49 = vmax.f32 %v4672_v63, 0.0  ;;  %v5053_v5 = vld [vmem:[#allocation8 + $0x298] sm:$0xff]  ;;  %v5056_v30 = vld [vmem:[#allocation8 + $0x310] sm:$0xff] }
 0xa6e   : > { %v4635_v18 = vadd.f32 %v4634_v46, %v4421_v39  ;;  %v4678_v22 = vadd.f32 %v4677_v9, %v4429_v35  ;;  %v4681_v21 = vmax.f32 %v4631_v47, 0.0  ;;  %v4683_v15 = vmax.f32 %v4674_v32, 0.0  ;;  %v5055_v63 = vld [vmem:[#allocation8 + $0x2d8] sm:$0xff]  ;;  %v5058_v45 = vld [vmem:[#allocation8 + $0x350] sm:$0xff] }
 0xa6f   : > { %v4684_v8 = vmax.f32 %v4633_v0, 0.0  ;;  %v4686_v26 = vmax.f32 %v4676_v7, 0.0  ;;  %v7380_v20 = vcombine.low %v5044_v13, %v5046_v41  ;;  %v7382_v17 = vcombine.low %v5045_v53, %v5047_v62  ;;  %v5057_v0 = vld [vmem:[#allocation8 + $0x318] sm:$0xff]  ;;  %v8171_v53 = vld [vmem:[#allocation10 + $0x120] sm:$0xff]  }
 0xa70   : > { %v4685_v25 = vmax.f32 %v4635_v18, 0.0  ;;  %v4687_v4 = vmax.f32 %v4678_v22, 0.0  ;;  %v7387_v35 = vcombine.high %v5049_v14, %v5051_v33  ;;  %v7389_v47 = vcombine.high %v5052_v44, %v5054_v36  ;;  %v5059_v7 = vld [vmem:[#allocation8 + $0x358] sm:$0xff]  ;;  %v8172_v62 = vld [vmem:[#allocation10 + $0x1a0] sm:$0xff]   ;;  %v8179_v14 = vld [vmem:[#allocation10 + $0x130] sm:$0xff]  }
 0xa71   : > { %v4688_v6 = vpack.c.bf16 %v4684_v8, %v4680_v23  ;;  %v4690_v57 = vpack.c.bf16 %v4686_v26, %v4682_v49  ;;  %v7391_v32 = vcombine.high %v5053_v5, %v5055_v63  ;;  %v7388_v46 = vcombine.low %v5052_v44, %v5054_v36  ;;  %v5060_v23 = vld [vmem:[#allocation8 + $0x390] sm:$0xff]  ;;  %v5061_v8 = vld [vmem:[#allocation8 + $0x398] sm:$0xff]  ;;  %v9984_v44 = vld [vmem:[#allocation8 + $0x20] sm:$0xff] }
 0xa72   : > { %v4689_v38 = vpack.c.bf16 %v4685_v25, %v4681_v21  ;;  %v4691_v34 = vpack.c.bf16 %v4687_v4, %v4683_v15  ;;  %v7390_v9 = vcombine.low %v5053_v5, %v5055_v63  ;;  %v7393_v18 = vcombine.high %v5056_v30, %v5058_v45  ;;  %v5062_v49 = vld [vmem:[#allocation8 + $0x3d0] sm:$0xff]  ;;  %v5063_v26 = vld [vmem:[#allocation8 + $0x3d8] sm:$0xff]  ;;  %v9986_v36 = vld [vmem:[#allocation8 + $0x60] sm:$0xff] }
 0xa73   : > { %v7395_v22 = vcombine.high %v5057_v0, %v5059_v7  ;;  %v7392_v48 = vcombine.low %v5056_v30, %v5058_v45  ;;  %v7394_v59 = vcombine.low %v5057_v0, %v5059_v7  ;;  %v7397_v21 = vcombine.high %v5060_v23, %v5062_v49  ;;  %v8180_v33 = vld [vmem:[#allocation10 + $0x1b0] sm:$0xff]   ;;  %v9988_v5 = vld [vmem:[#allocation8 + $0x28] sm:$0xff] }
 0xa74   : > { %4980 = vmatprep.mubr.bf16.mxu1 %v4689_v38  ;;  %5021 = vmatprep.mubr.bf16.mxu0 %v4691_v34  ;;  %v7399_v15 = vcombine.high %v5061_v8, %v5063_v26  ;;  %v7396_v25 = vcombine.low %v5060_v23, %v5062_v49  ;;  %v7398_v4 = vcombine.low %v5061_v8, %v5063_v26  ;;  %v8157_v38 = vld [vmem:[#allocation10 + $0x148] sm:$0xff]  }
 0xa75   : > { %4981 = vmatmul.mubr.bf16.vlgmr.msra.gmra.mrb[48].mxu1 %v4688_v6  ;;  %5022 = vmatmul.mubr.bf16.vlgmr.msra.gmra.mrb[36].mxu0 %v4690_v57  ;;  %v8155_v6 = vld [vmem:[#allocation10 + $0x100] sm:$0xff]   ;;  %v8158_v34 = vld [vmem:[#allocation10 + $0x1c8] sm:$0xff]   ;;  %v7432_v63 = vcombine.low %v9984_v44, %v9986_v36 }
 0xa76   : > { %5247 = vmatpush1.bf16.msra.mxu1 %v7368_v51  ;;  %5290 = vmatpush1.bf16.msra.mxu0 %v7370_v10  ;;  %v7381_v51 = vcombine.high %v5044_v13, %v5046_v41  ;;  %v5050_v10 = vld [vmem:[#allocation8 + $0x250] sm:$0xff]  ;;  %v8156_v57 = vld [vmem:[#allocation10 + $0x180] sm:$0xff]  }
 0xa77   : > { %5248 = vmatprep.subr.bf16.mxu1 %v7373_v56  ;;  %5291 = vmatprep.subr.bf16.mxu0 %v7375_v42  ;;  %v7385_v39 = vcombine.high %v5048_v52, %v5050_v10  ;;  %v7384_v24 = vcombine.low %v5048_v52, %v5050_v10  ;;  %v8159_v56 = vld [vmem:[#allocation10 + $0x108] sm:$0xff]   ;;  %v8169_v13 = vld [vmem:[#allocation10 + $0x160] sm:$0xff]   ;;  %v8177_v52 = vld [vmem:[#allocation10 + $0x170] sm:$0xff]  }
 0xa78   : > { %5278 = vmatprep.mubr.bf16.mxu1 %v10228_v58  ;;  %5321 = vmatprep.mubr.bf16.mxu0 %v10228_v58  ;;  %v8160_v42 = vld [vmem:[#allocation10 + $0x188] sm:$0xff]   ;;  %v8170_v41 = vld [vmem:[#allocation10 + $0x1e0] sm:$0xff]   ;;  %v8178_v10 = vld [vmem:[#allocation10 + $0x1f0] sm:$0xff]  }
 0xa7a   : > { %5249 = vmatpush1.bf16.msra.mxu1 %v7372_v60  ;;  %5292 = vmatpush1.bf16.msra.mxu0 %v7374_v31  ;;  %v8165_v60 = vld [vmem:[#allocation10 + $0x158] sm:$0xff]  }
 0xa7b   : > { %5250 = vmatprep.subr.bf16.mxu1 %v7377_v12  ;;  %5293 = vmatprep.subr.bf16.mxu0 %v7379_v11  ;;  %v8166_v31 = vld [vmem:[#allocation10 + $0x1d8] sm:$0xff]  }
 0xa7c   : > { %v8167_v12 = vld [vmem:[#allocation10 + $0x118] sm:$0xff]  }
 0xa7d   : > { %v8168_v11 = vld [vmem:[#allocation10 + $0x198] sm:$0xff]  }
 0xa7e   : > { %5251 = vmatpush1.bf16.msra.mxu1 %v7376_v61  ;;  %5294 = vmatpush1.bf16.msra.mxu0 %v7378_v16  ;;  %v8173_v61 = vld [vmem:[#allocation10 + $0x168] sm:$0xff]  }
 0xa7f   : > { %5252 = vmatprep.subr.bf16.mxu1 %v7381_v51  ;;  %5295 = vmatprep.subr.bf16.mxu0 %v7383_v43  ;;  %v8174_v16 = vld [vmem:[#allocation10 + $0x1e8] sm:$0xff]  }
 0xa80   : > { %v8175_v51 = vld [vmem:[#allocation10 + $0x128] sm:$0xff]  }
 0xa81   : > { %v8176_v43 = vld [vmem:[#allocation10 + $0x1a8] sm:$0xff]  }
 0xa82   : > { %5253 = vmatpush1.bf16.msra.mxu1 %v7380_v20  ;;  %5296 = vmatpush1.bf16.msra.mxu0 %v7382_v17  ;;  %v8181_v20 = vld [vmem:[#allocation10 + $0x178] sm:$0xff]  }
 0xa83   : > { %5254 = vmatprep.subr.bf16.mxu1 %v7385_v39  ;;  %5297 = vmatprep.subr.bf16.mxu0 %v7387_v35  ;;  %v8182_v17 = vld [vmem:[#allocation10 + $0x1f8] sm:$0xff]  }
 0xa84   : > { %v8183_v39 = vld [vmem:[#allocation10 + $0x138] sm:$0xff]  }
 0xa85   : > { %v8184_v35 = vld [vmem:[#allocation10 + $0x1b8] sm:$0xff]  }
 0xa86   : > { %5255 = vmatpush1.bf16.msra.mxu1 %v7384_v24  ;;  %5298 = vmatpush1.bf16.msra.mxu0 %v7386_v37  ;;  %v7433_v24 = vcombine.high %v9984_v44, %v9986_v36  ;;  %v9994_v37 = vld [vmem:[#allocation8 + $0x68] sm:$0xff] }
 0xa87   : > { %5256 = vmatprep.subr.bf16.mxu1 %v7389_v47  ;;  %5299 = vmatprep.subr.bf16.mxu0 %v7391_v32  ;;  %v7434_v47 = vcombine.low %v9988_v5, %v9994_v37  ;;  %v7435_v32 = vcombine.high %v9988_v5, %v9994_v37  ;;  %v5700_v37 = vld [vmem:[#allocation8 + $0x220] sm:$0xff] }
 0xa8a   : > { %5257 = vmatpush1.bf16.msra.mxu1 %v7388_v46  ;;  %5300 = vmatpush1.bf16.msra.mxu0 %v7390_v9 }
 0xa8b   : > { %5258 = vmatprep.subr.bf16.mxu1 %v7393_v18  ;;  %5301 = vmatprep.subr.bf16.mxu0 %v7395_v22 }
 0xa8e   : > { %5259 = vmatpush1.bf16.msra.mxu1 %v7392_v48  ;;  %5302 = vmatpush1.bf16.msra.mxu0 %v7394_v59 }
 0xa8f   : > { %5260 = vmatprep.subr.bf16.mxu1 %v7397_v21  ;;  %5303 = vmatprep.subr.bf16.mxu0 %v7399_v15  ;;  %v5064_v21 = vld [vmem:[%s10232_s1 + $0x4] sm:$0xf] }
 0xa90   : > { %v5069_v15 = vrot.slane %v5064_v21, %v8958_v1 }
 0xa92   : > { %5261 = vmatpush1.bf16.msra.mxu1 %v7396_v25  ;;  %5304 = vmatpush1.bf16.msra.mxu0 %v7398_v4  ;;  %v5077_v25 = vrot.slane %v5064_v21, %v9021_v19  ;;  %v5073_v4 = vrot.slane %v5064_v21, %v8964_v3 }
 0xa93   : > { %7665 = vmatprep.subr.bf16.mxu1 %v8153_v54  ;;  %7687 = vmatprep.subr.bf16.mxu0 %v8154_v50  ;;  %v5081_v54 = vrot.slane %v5064_v21, %v9974_v28  ;;  %v5699_v21 = vld [vmem:[#allocation8 + $0x1e8] sm:$0xff] }
 0xa95   : > { %5279 = vmatmul.mubr.bf16.vlgmr.msra.gmra.mrb[52].mxu1 %v9966_v2  ;;  %5322 = vmatmul.mubr.bf16.vlgmr.msra.gmra.mrb[40].mxu0 %v9966_v2 }
 0xa96   : > { %7666 = vmatpush3.bf16.msra.mxu1 %v8155_v6  ;;  %7688 = vmatpush3.bf16.msra.mxu0 %v8156_v57 }
 0xa97   : > { %7667 = vmatprep.subr.bf16.mxu1 %v8157_v38  ;;  %7689 = vmatprep.subr.bf16.mxu0 %v8158_v34 }
 0xa9a   : > { %7668 = vmatpush3.bf16.msra.mxu1 %v8159_v56  ;;  %7690 = vmatpush3.bf16.msra.mxu0 %v8160_v42 }
 0xa9b   : > { %7669 = vmatprep.subr.bf16.mxu1 %v8161_v27  ;;  %7691 = vmatprep.subr.bf16.mxu0 %v8162_v40 }
 0xa9e   : > { %7670 = vmatpush3.bf16.msra.mxu1 %v8163_v29  ;;  %7692 = vmatpush3.bf16.msra.mxu0 %v8164_v55 }
 0xa9f   : > { %7671 = vmatprep.subr.bf16.mxu1 %v8165_v60  ;;  %7693 = vmatprep.subr.bf16.mxu0 %v8166_v31 }
 0xaa2   : > { %7672 = vmatpush3.bf16.msra.mxu1 %v8167_v12  ;;  %7694 = vmatpush3.bf16.msra.mxu0 %v8168_v11 }
 0xaa3   : > { %7673 = vmatprep.subr.bf16.mxu1 %v8169_v13  ;;  %7695 = vmatprep.subr.bf16.mxu0 %v8170_v41 }
 0xaa6   : > { %7674 = vmatpush3.bf16.msra.mxu1 %v8171_v53  ;;  %7696 = vmatpush3.bf16.msra.mxu0 %v8172_v62 }
 0xaa7   : > { %7675 = vmatprep.subr.bf16.mxu1 %v8173_v61  ;;  %7697 = vmatprep.subr.bf16.mxu0 %v8174_v16  ;;  %v5688_v16 = vld [vmem:[#allocation8 + $0xa0] sm:$0xff] }
 0xaaa   : > { %7676 = vmatpush3.bf16.msra.mxu1 %v8175_v51  ;;  %7698 = vmatpush3.bf16.msra.mxu0 %v8176_v43  ;;  %v5690_v51 = vld [vmem:[#allocation8 + $0xe0] sm:$0xff] }
 0xaab   : > { %7677 = vmatprep.subr.bf16.mxu1 %v8177_v52  ;;  %7699 = vmatprep.subr.bf16.mxu0 %v8178_v10 }
 0xaae   : > { %7678 = vmatpush3.bf16.msra.mxu1 %v8179_v14  ;;  %7700 = vmatpush3.bf16.msra.mxu0 %v8180_v33  ;;  %v5689_v33 = vld [vmem:[#allocation8 + $0xa8] sm:$0xff] }
 0xaaf   : > { %7679 = vmatprep.subr.bf16.mxu1 %v8181_v20  ;;  %7701 = vmatprep.subr.bf16.mxu0 %v8182_v17  ;;  %v5691_v20 = vld [vmem:[#allocation8 + $0xe8] sm:$0xff] }
 0xab2   : > { %7680 = vmatpush3.bf16.msra.mxu1 %v8183_v39  ;;  %7702 = vmatpush3.bf16.msra.mxu0 %v8184_v35 }
 0xab3   : > { %5898 = vmatprep.subr.bf16.mxu1 %v7433_v24  ;;  %5941 = vmatprep.subr.bf16.mxu0 %v7435_v32  ;;  %v7437_v32 = vcombine.high %v5688_v16, %v5690_v51 }
 0xb48   : > { %v7637_v30 = vpop.f32.mrb[48].mxu1  ;;  %v7659_v45 = vpop.f32.mrb[36].mxu0 }
 0xb49   : > { %v7638_v0 = vpop.f32.mrb[49].mxu1  ;;  %v7660_v7 = vpop.f32.mrb[37].mxu0 }
 0xb4a   : > { %v7639_v46 = vadd.f32 %v7638_v0, %v7637_v30  ;;  %v7661_v9 = vadd.f32 %v7660_v7, %v7659_v45  ;;  %v7640_v18 = vpop.f32.mrb[50].mxu1  ;;  %v7662_v22 = vpop.f32.mrb[38].mxu0  ;;  %v7439_v30 = vcombine.high %v5689_v33, %v5691_v20  ;;  %v5692_v45 = vld [vmem:[#allocation8 + $0x120] sm:$0xff]  ;;  %v5693_v7 = vld [vmem:[#allocation8 + $0x128] sm:$0xff] }
 0xb4b   : > { %v7641_v23 = vpop.f32.mrb[51].mxu1  ;;  %v7663_v49 = vpop.f32.mrb[39].mxu0  ;;  %v5694_v0 = vld [vmem:[#allocation8 + $0x160] sm:$0xff] }
 0xb4c   : > { %v10000_v8 = vadd.f32 %v7661_v9, %v7639_v46  ;;  %v7642_v26 = vadd.f32 %v7641_v23, %v7640_v18  ;;  %v7664_v48 = vadd.f32 %v7663_v49, %v7662_v22  ;;  %v5695_v46 = vld [vmem:[#allocation8 + $0x168] sm:$0xff]  ;;  %v7436_v9 = vcombine.low %v5688_v16, %v5690_v51  ;;  %v5696_v49 = vld [vmem:[#allocation8 + $0x1a0] sm:$0xff] }
 0xb4d   : > { %v7438_v18 = vcombine.low %v5689_v33, %v5691_v20  ;;  %v7441_v22 = vcombine.high %v5692_v45, %v5694_v0  ;;  %v7443_v23 = vcombine.high %v5693_v7, %v5695_v46  ;;  %v7440_v44 = vcombine.low %v5692_v45, %v5694_v0  ;;  %v5713_v16 = vld [vmem:[#allocation8 + $0x3a8] sm:$0xff] }
 0xb4e   : > { %v10002_v59 = vadd.f32 %v7664_v48, %v7642_v26  ;;  %v5698_v26 = vld [vmem:[#allocation8 + $0x1e0] sm:$0xff]  ;;  %v5697_v48 = vld [vmem:[#allocation8 + $0x1a8] sm:$0xff]  ;;  %v7442_v36 = vcombine.low %v5693_v7, %v5695_v46  ;;  %v8193_v7 = vld [vmem:[#allocation10 + $0x250] sm:$0xff]  }
 0xb4f   : > { %v7445_v5 = vcombine.high %v5696_v49, %v5698_v26  ;;  %v5715_v51 = vld [vmem:[#allocation8 + $0x3e8] sm:$0xff]  ;;  %v8194_v46 = vld [vmem:[#allocation10 + $0x2d0] sm:$0xff]  }
 0xb50   : > { %v7462_v20 = vcombine.low %v5713_v16, %v5715_v51  ;;  %v8191_v45 = vld [vmem:[#allocation10 + $0x208] sm:$0xff]  }
 0xb51   : > { %v8192_v0 = vld [vmem:[#allocation10 + $0x288] sm:$0xff]  }
 0xb68   : > { %v5280_v50 = vpop.f32.mrb[52].mxu1  ;;  %v5323_v6 = vpop.f32.mrb[40].mxu0 }
 0xb69   : > { %v5281_v57 = vadd.f32 %v5280_v50, %v5069_v15  ;;  %v5324_v38 = vadd.f32 %v5323_v6, %v5077_v25  ;;  %v5282_v34 = vpop.f32.mrb[53].mxu1  ;;  %v5325_v56 = vpop.f32.mrb[41].mxu0 }
 0xb6a   : > { %v5283_v42 = vadd.f32 %v5282_v34, %v5073_v4  ;;  %v5326_v27 = vadd.f32 %v5325_v56, %v5081_v54  ;;  %v5284_v40 = vpop.f32.mrb[54].mxu1  ;;  %v5327_v29 = vpop.f32.mrb[42].mxu0  ;;  %v5705_v34 = vld [vmem:[#allocation8 + $0x2a8] sm:$0xff] }
 0xb6b   : > { %v5285_v55 = vadd.f32 %v5284_v40, %v5069_v15  ;;  %v5328_v60 = vadd.f32 %v5327_v29, %v5077_v25  ;;  %v5286_v31 = vpop.f32.mrb[55].mxu1  ;;  %v5329_v12 = vpop.f32.mrb[43].mxu0  ;;  %v5332_v41 = vmax.f32 %v5281_v57, 0.0  ;;  %v5334_v53 = vmax.f32 %v5324_v38, 0.0  ;;  %v5701_v15 = vld [vmem:[#allocation8 + $0x228] sm:$0xff]  ;;  %v5704_v57 = vld [vmem:[#allocation8 + $0x2a0] sm:$0xff] }
 0xb6c   : > { %v5287_v11 = vadd.f32 %v5286_v31, %v5073_v4  ;;  %v5330_v13 = vadd.f32 %v5329_v12, %v5081_v54  ;;  %v5333_v43 = vmax.f32 %v5283_v42, 0.0  ;;  %v5335_v52 = vmax.f32 %v5326_v27, 0.0  ;;  %v5703_v25 = vld [vmem:[#allocation8 + $0x268] sm:$0xff]  ;;  %v5706_v38 = vld [vmem:[#allocation8 + $0x2e0] sm:$0xff] }
 0xb6d   : > { %v5336_v62 = vmax.f32 %v5285_v55, 0.0  ;;  %v5338_v61 = vmax.f32 %v5328_v60, 0.0  ;;  %v7444_v4 = vcombine.low %v5696_v49, %v5698_v26  ;;  %v7446_v54 = vcombine.low %v5697_v48, %v5699_v21  ;;  %v5707_v56 = vld [vmem:[#allocation8 + $0x2e8] sm:$0xff]  ;;  %v5708_v55 = vld [vmem:[#allocation8 + $0x320] sm:$0xff]  ;;  %v8199_v49 = vld [vmem:[#allocation10 + $0x218] sm:$0xff]  }
 0xb6e   : > { %v5337_v10 = vmax.f32 %v5287_v11, 0.0  ;;  %v5339_v14 = vmax.f32 %v5330_v13, 0.0  ;;  %v7451_v6 = vcombine.high %v5701_v15, %v5703_v25  ;;  %v7450_v27 = vcombine.low %v5701_v15, %v5703_v25  ;;  %v5710_v60 = vld [vmem:[#allocation8 + $0x360] sm:$0xff]  ;;  %v5709_v31 = vld [vmem:[#allocation8 + $0x328] sm:$0xff]  ;;  %v8200_v26 = vld [vmem:[#allocation10 + $0x298] sm:$0xff]  }
 0xb6f   : > { %v5340_v17 = vpack.c.bf16 %v5336_v62, %v5332_v41  ;;  %v5342_v39 = vpack.c.bf16 %v5338_v61, %v5334_v53  ;;  %v7453_v40 = vcombine.high %v5704_v57, %v5706_v38  ;;  %v7455_v29 = vcombine.high %v5705_v34, %v5707_v56  ;;  %v5711_v12 = vld [vmem:[#allocation8 + $0x368] sm:$0xff]  ;;  %v5712_v62 = vld [vmem:[#allocation8 + $0x3a0] sm:$0xff]  ;;  %v8209_v15 = vld [vmem:[#allocation10 + $0x270] sm:$0xff]  }
 0xb70   : > { %v5341_v35 = vpack.c.bf16 %v5337_v10, %v5333_v43  ;;  %v5343_v24 = vpack.c.bf16 %v5339_v14, %v5335_v52  ;;  %v7452_v11 = vcombine.low %v5704_v57, %v5706_v38  ;;  %v7454_v13 = vcombine.low %v5705_v34, %v5707_v56  ;;  %v5714_v61 = vld [vmem:[#allocation8 + $0x3e0] sm:$0xff]  ;;  %v8210_v25 = vld [vmem:[#allocation10 + $0x2f0] sm:$0xff]   ;;  %v8215_v57 = vld [vmem:[#allocation10 + $0x238] sm:$0xff]  }
 0xb71   : > { %v7457_v41 = vcombine.high %v5708_v55, %v5710_v60  ;;  %v7459_v53 = vcombine.high %v5709_v31, %v5711_v12  ;;  %v7456_v43 = vcombine.low %v5708_v55, %v5710_v60  ;;  %v7458_v52 = vcombine.low %v5709_v31, %v5711_v12  ;;  %v8216_v38 = vld [vmem:[#allocation10 + $0x2b8] sm:$0xff]   ;;  %v10021_v34 = vld [vmem:[#allocation8 + $0x30] sm:$0xff]  ;;  %v7303_v31 = vld [vmem:[%s10233_s21] ss:$0 sm:$0xff]  ;;  %s8607_s21 = smov [#allocation12]  }
 0xb72   : > { %5632 = vmatprep.mubr.bf16.mxu1 %v5341_v35  ;;  %5673 = vmatprep.mubr.bf16.mxu0 %v5343_v24  ;;  %v7461_v10 = vcombine.high %v5712_v62, %v5714_v61  ;;  %v7463_v14 = vcombine.high %v5713_v16, %v5715_v51  ;;  %v7460_v33 = vcombine.low %v5712_v62, %v5714_v61  ;;  %v8187_v35 = vld [vmem:[#allocation10 + $0x200] sm:$0xff]   ;;  %v10023_v56 = vld [vmem:[#allocation8 + $0x70] sm:$0xff] }
 0xb73   : > { %5633 = vmatmul.mubr.bf16.vlgmr.msra.gmra.mrb[56].mxu1 %v5340_v17  ;;  %5674 = vmatmul.mubr.bf16.vlgmr.msra.gmra.mrb[44].mxu0 %v5342_v39  ;;  %v8185_v17 = vld [vmem:[#allocation10 + $0x240] sm:$0xff]  }
 0xb74   : > { %5899 = vmatpush1.bf16.msra.mxu1 %v7432_v63  ;;  %5942 = vmatpush1.bf16.msra.mxu0 %v7434_v47  ;;  %v7447_v63 = vcombine.high %v5697_v48, %v5699_v21  ;;  %v5702_v47 = vld [vmem:[#allocation8 + $0x260] sm:$0xff] }
 0xb75   : > { %5900 = vmatprep.subr.bf16.mxu1 %v7437_v32  ;;  %5943 = vmatprep.subr.bf16.mxu0 %v7439_v30  ;;  %v7449_v50 = vcombine.high %v5700_v37, %v5702_v47  ;;  %v7448_v42 = vcombine.low %v5700_v37, %v5702_v47  ;;  %v8186_v39 = vld [vmem:[#allocation10 + $0x2c0] sm:$0xff]   ;;  %v8189_v32 = vld [vmem:[#allocation10 + $0x248] sm:$0xff]  }
 0xb76   : > { %5930 = vmatprep.mubr.bf16.mxu1 %v10228_v58  ;;  %5973 = vmatprep.mubr.bf16.mxu0 %v10228_v58  ;;  %v8188_v24 = vld [vmem:[#allocation10 + $0x280] sm:$0xff]   ;;  %v8190_v30 = vld [vmem:[#allocation10 + $0x2c8] sm:$0xff]  }
 0xb77   : > { %v8201_v48 = vld [vmem:[#allocation10 + $0x260] sm:$0xff]   ;;  %v8207_v37 = vld [vmem:[#allocation10 + $0x228] sm:$0xff]  }
 0xb78   : > { %5901 = vmatpush1.bf16.msra.mxu1 %v7436_v9  ;;  %5944 = vmatpush1.bf16.msra.mxu0 %v7438_v18  ;;  %v8195_v9 = vld [vmem:[#allocation10 + $0x210] sm:$0xff]   ;;  %v8202_v21 = vld [vmem:[#allocation10 + $0x2e0] sm:$0xff]   ;;  %v8208_v47 = vld [vmem:[#allocation10 + $0x2a8] sm:$0xff]  }
 0xb79   : > { %5902 = vmatprep.subr.bf16.mxu1 %v7441_v22  ;;  %5945 = vmatprep.subr.bf16.mxu0 %v7443_v23  ;;  %v8196_v18 = vld [vmem:[#allocation10 + $0x290] sm:$0xff]   ;;  %v8197_v22 = vld [vmem:[#allocation10 + $0x258] sm:$0xff]  }
 0xb7a   : > { %v8198_v23 = vld [vmem:[#allocation10 + $0x2d8] sm:$0xff]  }
 0xb7c   : > { %5903 = vmatpush1.bf16.msra.mxu1 %v7440_v44  ;;  %5946 = vmatpush1.bf16.msra.mxu0 %v7442_v36  ;;  %v8203_v44 = vld [vmem:[#allocation10 + $0x220] sm:$0xff]  }
 0xb7d   : > { %5904 = vmatprep.subr.bf16.mxu1 %v7445_v5  ;;  %5947 = vmatprep.subr.bf16.mxu0 %v7447_v63  ;;  %v8204_v36 = vld [vmem:[#allocation10 + $0x2a0] sm:$0xff]   ;;  %v8205_v5 = vld [vmem:[#allocation10 + $0x268] sm:$0xff]  }
 0xb7e   : > { %v8206_v63 = vld [vmem:[#allocation10 + $0x2e8] sm:$0xff]  }
 0xb80   : > { %5905 = vmatpush1.bf16.msra.mxu1 %v7444_v4  ;;  %5948 = vmatpush1.bf16.msra.mxu0 %v7446_v54  ;;  %v8211_v4 = vld [vmem:[#allocation10 + $0x230] sm:$0xff]  }
 0xb81   : > { %5906 = vmatprep.subr.bf16.mxu1 %v7449_v50  ;;  %5949 = vmatprep.subr.bf16.mxu0 %v7451_v6  ;;  %v8212_v54 = vld [vmem:[#allocation10 + $0x2b0] sm:$0xff]   ;;  %v8213_v50 = vld [vmem:[#allocation10 + $0x278] sm:$0xff]  }
 0xb82   : > { %v8214_v6 = vld [vmem:[#allocation10 + $0x2f8] sm:$0xff]  }
 0xb84   : > { %5907 = vmatpush1.bf16.msra.mxu1 %v7448_v42  ;;  %5950 = vmatpush1.bf16.msra.mxu0 %v7450_v27  ;;  %v10025_v42 = vld [vmem:[#allocation8 + $0x38] sm:$0xff]  ;;  %v7496_v27 = vcombine.low %v10021_v34, %v10023_v56 }
 0xb85   : > { %5908 = vmatprep.subr.bf16.mxu1 %v7453_v40  ;;  %5951 = vmatprep.subr.bf16.mxu0 %v7455_v29  ;;  %v7497_v40 = vcombine.high %v10021_v34, %v10023_v56  ;;  %v10031_v29 = vld [vmem:[#allocation8 + $0x78] sm:$0xff] }
 0xb86   : > { %v7498_v55 = vcombine.low %v10025_v42, %v10031_v29  ;;  %v7499_v60 = vcombine.high %v10025_v42, %v10031_v29  ;;  %v6352_v29 = vld [vmem:[#allocation8 + $0x230] sm:$0xff] }
 0xb88   : > { %5909 = vmatpush1.bf16.msra.mxu1 %v7452_v11  ;;  %5952 = vmatpush1.bf16.msra.mxu0 %v7454_v13 }
 0xb89   : > { %5910 = vmatprep.subr.bf16.mxu1 %v7457_v41  ;;  %5953 = vmatprep.subr.bf16.mxu0 %v7459_v53  ;;  %v8331_v53 = vld [vmem:[%s9945_s14] sm:$0xff] }
 0xb8a   : > { %v4378_v62 = vadd.f32 %v8331_v53, %v7303_v31 }
 0xb8c   : > { %5911 = vmatpush1.bf16.msra.mxu1 %v7456_v43  ;;  %5954 = vmatpush1.bf16.msra.mxu0 %v7458_v52  ;;  %v8332_v52 = vld [vmem:[%s9945_s14 + $0x8] sm:$0xff]  ;;  %s8479_s14 = sshll.u32 %s8607_s21, 4  ;;  %s8480_s14 = int_to_ptr.vmem [resolvable:$false] %s8479_s14 }
 0xb8d   : > { %5912 = vmatprep.subr.bf16.mxu1 %v7461_v10  ;;  %5955 = vmatprep.subr.bf16.mxu0 %v7463_v14  ;;  %v4379_v10 = vadd.f32 %v8332_v52, %v7303_v31  ;;  %v6346_v52 = vld [vmem:[#allocation8 + $0x170] sm:$0xff]  ;;  %s8481_s26 = scalar_lea.vmem %s8480_s14, 512  ;;  %p8482_p12 = scmp.lt.s32.totalorder %s10080_s12, %s8480_s14 }
 0xb8e   : > { %p8483_p2 = scmp.lt.s32.totalorder %s8481_s26, %s8475_s19 }
 0xb90   : > { %5913 = vmatpush1.bf16.msra.mxu1 %v7460_v33  ;;  %5956 = vmatpush1.bf16.msra.mxu0 %v7462_v20  ;;  %v5030_v20 = vadd.f32 %v10000_v8, %v4378_v62  ;;  %p8484_p1 = por %p8483_p2, %p8482_p12 }
 0xb91   : > { %7709 = vmatprep.subr.bf16.mxu1 %v8185_v17  ;;  %7731 = vmatprep.subr.bf16.mxu0 %v8186_v39 }
 0xb92   : > { %p8485_p13 = pnand %p8484_p1, %p8478_p7 }
 0xb93   : > { %5931 = vmatmul.mubr.bf16.vlgmr.msra.gmra.mrb[60].mxu1 %v9966_v2  ;;  %5974 = vmatmul.mubr.bf16.vlgmr.msra.gmra.mrb[48].mxu0 %v9966_v2 }
 0xb94   : > { %7710 = vmatpush3.bf16.msra.mxu1 %v8187_v35  ;;  %7732 = vmatpush3.bf16.msra.mxu0 %v8188_v24  ;;  %v5031_v24 = vadd.f32 %v10002_v59, %v4379_v10  ;;  %v6345_v10 = vld [vmem:[#allocation8 + $0x138] sm:$0xff] }
 0xb95   : > { %7711 = vmatprep.subr.bf16.mxu1 %v8189_v32  ;;  %7733 = vmatprep.subr.bf16.mxu0 %v8190_v30 }
 0xb98   : > { %7712 = vmatpush3.bf16.msra.mxu1 %v8191_v45  ;;  %7734 = vmatpush3.bf16.msra.mxu0 %v8192_v0  ;;  %v5716_v0 = vld [vmem:[%s10232_s1 + $0x8] sm:$0xf] }
 0xb99   : > { %7713 = vmatprep.subr.bf16.mxu1 %v8193_v7  ;;  %7735 = vmatprep.subr.bf16.mxu0 %v8194_v46  ;;  %v5721_v7 = vrot.slane %v5716_v0, %v8958_v1  ;;  %v5729_v46 = vrot.slane %v5716_v0, %v9021_v19  ;;  %v5725_v8 = vrot.slane %v5716_v0, %v8964_v3 }
 0xb9c   : > { %7714 = vmatpush3.bf16.msra.mxu1 %v8195_v9  ;;  %7736 = vmatpush3.bf16.msra.mxu0 %v8196_v18  ;;  %v5733_v9 = vrot.slane %v5716_v0, %v9974_v28  ;;  %v6351_v0 = vld [vmem:[#allocation8 + $0x1f8] sm:$0xff] }
 0xb9d   : > { %7715 = vmatprep.subr.bf16.mxu1 %v8197_v22  ;;  %7737 = vmatprep.subr.bf16.mxu0 %v8198_v23 }
 0xba0   : > { %7716 = vmatpush3.bf16.msra.mxu1 %v8199_v49  ;;  %7738 = vmatpush3.bf16.msra.mxu0 %v8200_v26 }
 0xba1   : > { %7717 = vmatprep.subr.bf16.mxu1 %v8201_v48  ;;  %7739 = vmatprep.subr.bf16.mxu0 %v8202_v21 }
 0xba4   : > { %7718 = vmatpush3.bf16.msra.mxu1 %v8203_v44  ;;  %7740 = vmatpush3.bf16.msra.mxu0 %v8204_v36 }
 0xba5   : > { %7719 = vmatprep.subr.bf16.mxu1 %v8205_v5  ;;  %7741 = vmatprep.subr.bf16.mxu0 %v8206_v63 }
 0xba8   : > { %7720 = vmatpush3.bf16.msra.mxu1 %v8207_v37  ;;  %7742 = vmatpush3.bf16.msra.mxu0 %v8208_v47 }
 0xba9   : > { %7721 = vmatprep.subr.bf16.mxu1 %v8209_v15  ;;  %7743 = vmatprep.subr.bf16.mxu0 %v8210_v25 }
 0xbac   : > { %7722 = vmatpush3.bf16.msra.mxu1 %v8211_v4  ;;  %7744 = vmatpush3.bf16.msra.mxu0 %v8212_v54 }
 0xbad   : > { %7723 = vmatprep.subr.bf16.mxu1 %v8213_v50  ;;  %7745 = vmatprep.subr.bf16.mxu0 %v8214_v6 }
 0xbb0   : > { %7724 = vmatpush3.bf16.msra.mxu1 %v8215_v57  ;;  %7746 = vmatpush3.bf16.msra.mxu0 %v8216_v38  ;;  %v6340_v57 = vld [vmem:[#allocation8 + $0xb0] sm:$0xff] }
 0xbb1   : > { %6550 = vmatprep.subr.bf16.mxu1 %v7497_v40  ;;  %6593 = vmatprep.subr.bf16.mxu0 %v7499_v60  ;;  %v6342_v38 = vld [vmem:[#allocation8 + $0xf0] sm:$0xff] }
 0xc46   : > { %v7681_v12 = vpop.f32.mrb[56].mxu1  ;;  %v7703_v11 = vpop.f32.mrb[44].mxu0 }
 0xc47   : > { %v7682_v13 = vpop.f32.mrb[57].mxu1  ;;  %v7704_v41 = vpop.f32.mrb[45].mxu0 }
 0xc48   : > { %v7683_v61 = vadd.f32 %v7682_v13, %v7681_v12  ;;  %v7705_v16 = vadd.f32 %v7704_v41, %v7703_v11  ;;  %v7684_v51 = vpop.f32.mrb[58].mxu1  ;;  %v7706_v43 = vpop.f32.mrb[46].mxu0  ;;  %v6341_v11 = vld [vmem:[#allocation8 + $0xb8] sm:$0xff] }
 0xc49   : > { %v7685_v14 = vpop.f32.mrb[59].mxu1  ;;  %v7707_v33 = vpop.f32.mrb[47].mxu0  ;;  %v6343_v13 = vld [vmem:[#allocation8 + $0xf8] sm:$0xff] }
 0xc4a   : > { %v5676_v17 = vadd.f32 %v7705_v16, %v7683_v61  ;;  %v7686_v39 = vadd.f32 %v7685_v14, %v7684_v51  ;;  %v7708_v35 = vadd.f32 %v7707_v33, %v7706_v43  ;;  %v7501_v16 = vcombine.high %v6340_v57, %v6342_v38  ;;  %v6344_v43 = vld [vmem:[#allocation8 + $0x130] sm:$0xff]  ;;  %v6347_v14 = vld [vmem:[#allocation8 + $0x178] sm:$0xff] }
 0xc4b   : > { %v7503_v51 = vcombine.high %v6341_v11, %v6343_v13  ;;  %v7500_v33 = vcombine.low %v6340_v57, %v6342_v38  ;;  %v7504_v34 = vcombine.low %v6344_v43, %v6346_v52  ;;  %v7506_v56 = vcombine.low %v6345_v10, %v6347_v14  ;;  %v6367_v57 = vld [vmem:[#allocation8 + $0x3f8] sm:$0xff] }
 0xc4c   : > { %v10044_v32 = vadd.f32 %v5676_v17, %v5030_v20  ;;  %v5679_v30 = vadd.f32 %v7708_v35, %v7686_v39  ;;  %v7502_v20 = vcombine.low %v6341_v11, %v6343_v13  ;;  %v7505_v17 = vcombine.high %v6344_v43, %v6346_v52  ;;  %v6348_v35 = vld [vmem:[#allocation8 + $0x1b0] sm:$0xff]  ;;  %v8217_v13 = vld [vmem:[#allocation10 + $0x340] sm:$0xff]   ;;  %v8224_v43 = vld [vmem:[#allocation10 + $0x388] sm:$0xff]  }
 0xc4d   : > { %v7507_v39 = vcombine.high %v6345_v10, %v6347_v14  ;;  %v8225_v52 = vld [vmem:[#allocation10 + $0x350] sm:$0xff]  }
 0xc4e   : > { %v10046_v45 = vadd.f32 %v5679_v30, %v5031_v24  ;;  %v6350_v24 = vld [vmem:[#allocation8 + $0x1f0] sm:$0xff]  ;;  %v6349_v30 = vld [vmem:[#allocation8 + $0x1b8] sm:$0xff] }
 0xc4f   : > { %v7509_v42 = vcombine.high %v6348_v35, %v6350_v24  ;;  %v8226_v10 = vld [vmem:[#allocation10 + $0x3d0] sm:$0xff]  }
 0xc50   : > { %v8227_v14 = vld [vmem:[#allocation10 + $0x310] sm:$0xff]  }
 0xc66   : > { %v5932_v18 = vpop.f32.mrb[60].mxu1  ;;  %v5975_v22 = vpop.f32.mrb[48].mxu0 }
 0xc67   : > { %v5933_v59 = vadd.f32 %v5932_v18, %v5721_v7  ;;  %v5976_v23 = vadd.f32 %v5975_v22, %v5729_v46  ;;  %v5934_v49 = vpop.f32.mrb[61].mxu1  ;;  %v5977_v26 = vpop.f32.mrb[49].mxu0  ;;  %v6356_v22 = vld [vmem:[#allocation8 + $0x2b0] sm:$0xff] }
 0xc68   : > { %v5935_v48 = vadd.f32 %v5934_v49, %v5725_v8  ;;  %v5978_v21 = vadd.f32 %v5977_v26, %v5733_v9  ;;  %v5936_v44 = vpop.f32.mrb[62].mxu1  ;;  %v5979_v36 = vpop.f32.mrb[50].mxu0  ;;  %v6359_v49 = vld [vmem:[#allocation8 + $0x2f8] sm:$0xff] }
 0xc69   : > { %v5937_v5 = vadd.f32 %v5936_v44, %v5721_v7  ;;  %v5980_v63 = vadd.f32 %v5979_v36, %v5729_v46  ;;  %v5938_v37 = vpop.f32.mrb[63].mxu1  ;;  %v5981_v47 = vpop.f32.mrb[51].mxu0  ;;  %v5984_v4 = vmax.f32 %v5933_v59, 0.0  ;;  %v5986_v54 = vmax.f32 %v5976_v23, 0.0  ;;  %v6353_v7 = vld [vmem:[#allocation8 + $0x238] sm:$0xff]  ;;  %v6358_v59 = vld [vmem:[#allocation8 + $0x2f0] sm:$0xff] }
 0xc6a   : > { %v5939_v15 = vadd.f32 %v5938_v37, %v5725_v8  ;;  %v5982_v25 = vadd.f32 %v5981_v47, %v5733_v9  ;;  %v5985_v40 = vmax.f32 %v5935_v48, 0.0  ;;  %v5987_v60 = vmax.f32 %v5978_v21, 0.0  ;;  %v6355_v46 = vld [vmem:[#allocation8 + $0x278] sm:$0xff]  ;;  %v6360_v36 = vld [vmem:[#allocation8 + $0x330] sm:$0xff] }
 0xc6b   : > { %v5988_v50 = vmax.f32 %v5937_v5, 0.0  ;;  %v5990_v6 = vmax.f32 %v5980_v63, 0.0  ;;  %v7508_v8 = vcombine.low %v6348_v35, %v6350_v24  ;;  %v7510_v9 = vcombine.low %v6349_v30, %v6351_v0  ;;  %v6357_v23 = vld [vmem:[#allocation8 + $0x2b8] sm:$0xff]  ;;  %v6362_v5 = vld [vmem:[#allocation8 + $0x370] sm:$0xff]  ;;  %v8233_v35 = vld [vmem:[#allocation10 + $0x360] sm:$0xff]  }
 0xc6c   : > { %v5989_v31 = vmax.f32 %v5939_v15, 0.0  ;;  %v5991_v12 = vmax.f32 %v5982_v25, 0.0  ;;  %v7514_v48 = vcombine.low %v6353_v7, %v6355_v46  ;;  %v7517_v21 = vcombine.high %v6356_v22, %v6358_v59  ;;  %v6361_v63 = vld [vmem:[#allocation8 + $0x338] sm:$0xff]  ;;  %v8234_v24 = vld [vmem:[#allocation10 + $0x3e0] sm:$0xff]  }
 0xc6d   : > { %v5992_v41 = vpack.c.bf16 %v5988_v50, %v5984_v4  ;;  %v5994_v53 = vpack.c.bf16 %v5990_v6, %v5986_v54  ;;  %v7519_v44 = vcombine.high %v6357_v23, %v6359_v49  ;;  %v6363_v37 = vld [vmem:[#allocation8 + $0x378] sm:$0xff]  ;;  %v7516_v47 = vcombine.low %v6356_v22, %v6358_v59  ;;  %v6364_v54 = vld [vmem:[#allocation8 + $0x3b0] sm:$0xff] }
 0xc6e   : > { %v5993_v62 = vpack.c.bf16 %v5989_v31, %v5985_v40  ;;  %v5995_v61 = vpack.c.bf16 %v5991_v12, %v5987_v60  ;;  %v7518_v15 = vcombine.low %v6357_v23, %v6359_v49  ;;  %v7521_v25 = vcombine.high %v6360_v36, %v6362_v5  ;;  %v6366_v50 = vld [vmem:[#allocation8 + $0x3f0] sm:$0xff]  ;;  %v6365_v6 = vld [vmem:[#allocation8 + $0x3b8] sm:$0xff] }
 0xc6f   : > { %v7523_v4 = vcombine.high %v6361_v63, %v6363_v37  ;;  %v7520_v38 = vcombine.low %v6360_v36, %v6362_v5  ;;  %v7522_v40 = vcombine.low %v6361_v63, %v6363_v37  ;;  %v7525_v60 = vcombine.high %v6364_v54, %v6366_v50 }
 0xc70   : > { %6284 = vmatprep.mubr.bf16.mxu1 %v5993_v62  ;;  %6325 = vmatprep.mubr.bf16.mxu0 %v5995_v61  ;;  %v7527_v31 = vcombine.high %v6365_v6, %v6367_v57  ;;  %v7524_v12 = vcombine.low %v6364_v54, %v6366_v50  ;;  %v7526_v11 = vcombine.low %v6365_v6, %v6367_v57  ;;  %v8220_v62 = vld [vmem:[#allocation10 + $0x380] sm:$0xff]   ;;  %v8221_v61 = vld [vmem:[#allocation10 + $0x348] sm:$0xff]  }
 0xc71   : > { %6285 = vmatmul.mubr.bf16.vlgmr.msra.gmra.mrb[64].mxu1 %v5992_v41  ;;  %6326 = vmatmul.mubr.bf16.vlgmr.msra.gmra.mrb[52].mxu0 %v5994_v53  ;;  %v8218_v41 = vld [vmem:[#allocation10 + $0x3c0] sm:$0xff]   ;;  %v6368_v54 = vld [vmem:[%s10232_s1 + $0xc] sm:$0xf] }
 0xc72   : > { %6551 = vmatpush1.bf16.msra.mxu1 %v7496_v27  ;;  %6594 = vmatpush1.bf16.msra.mxu0 %v7498_v55  ;;  %v7511_v27 = vcombine.high %v6349_v30, %v6351_v0  ;;  %v6354_v55 = vld [vmem:[#allocation8 + $0x270] sm:$0xff]  ;;  %v8219_v53 = vld [vmem:[#allocation10 + $0x300] sm:$0xff]   ;;  %v6373_v50 = vrot.slane %v6368_v54, %v8958_v1  ;;  %v6381_v6 = vrot.slane %v6368_v54, %v9021_v19 }
 0xc73   : > { %6552 = vmatprep.subr.bf16.mxu1 %v7501_v16  ;;  %6595 = vmatprep.subr.bf16.mxu0 %v7503_v51  ;;  %v7513_v18 = vcombine.high %v6352_v29, %v6354_v55  ;;  %v7512_v26 = vcombine.low %v6352_v29, %v6354_v55  ;;  %v8222_v16 = vld [vmem:[#allocation10 + $0x3c8] sm:$0xff]   ;;  %v8235_v30 = vld [vmem:[#allocation10 + $0x320] sm:$0xff]   ;;  %v8241_v29 = vld [vmem:[#allocation10 + $0x370] sm:$0xff]   ;;  %v6377_v57 = vrot.slane %v6368_v54, %v8964_v3 }
 0xc74   : > { %6582 = vmatprep.mubr.bf16.mxu1 %v10228_v58  ;;  %6625 = vmatprep.mubr.bf16.mxu0 %v10228_v58  ;;  %v7515_v58 = vcombine.high %v6353_v7, %v6355_v46  ;;  %v8223_v51 = vld [vmem:[#allocation10 + $0x308] sm:$0xff]   ;;  %v8236_v0 = vld [vmem:[#allocation10 + $0x3a0] sm:$0xff]   ;;  %v8242_v55 = vld [vmem:[#allocation10 + $0x3f0] sm:$0xff]  }
 0xc75   : > { %v8243_v7 = vld [vmem:[#allocation10 + $0x330] sm:$0xff]  }
 0xc76   : > { %6553 = vmatpush1.bf16.msra.mxu1 %v7500_v33  ;;  %6596 = vmatpush1.bf16.msra.mxu0 %v7502_v20  ;;  %v8229_v33 = vld [vmem:[#allocation10 + $0x358] sm:$0xff]   ;;  %v8244_v46 = vld [vmem:[#allocation10 + $0x3b0] sm:$0xff]  }
 0xc77   : > { %6554 = vmatprep.subr.bf16.mxu1 %v7505_v17  ;;  %6597 = vmatprep.subr.bf16.mxu0 %v7507_v39  ;;  %v8230_v20 = vld [vmem:[#allocation10 + $0x3d8] sm:$0xff]  }
 0xc78   : > { %v8231_v17 = vld [vmem:[#allocation10 + $0x318] sm:$0xff]  }
 0xc79   : > { %v8232_v39 = vld [vmem:[#allocation10 + $0x398] sm:$0xff]  }
 0xc7a   : > { %6555 = vmatpush1.bf16.msra.mxu1 %v7504_v34  ;;  %6598 = vmatpush1.bf16.msra.mxu0 %v7506_v56  ;;  %v8237_v34 = vld [vmem:[#allocation10 + $0x368] sm:$0xff]  }
 0xc7b   : > { %6556 = vmatprep.subr.bf16.mxu1 %v7509_v42  ;;  %6599 = vmatprep.subr.bf16.mxu0 %v7511_v27  ;;  %v8238_v56 = vld [vmem:[#allocation10 + $0x3e8] sm:$0xff]  }
 0xc7c   : > { %v8239_v42 = vld [vmem:[#allocation10 + $0x328] sm:$0xff]  }
 0xc7d   : > { %v8240_v27 = vld [vmem:[#allocation10 + $0x3a8] sm:$0xff]  }
 0xc7e   : > { %6557 = vmatpush1.bf16.msra.mxu1 %v7508_v8  ;;  %6600 = vmatpush1.bf16.msra.mxu0 %v7510_v9  ;;  %v8245_v8 = vld [vmem:[#allocation10 + $0x378] sm:$0xff]  }
 0xc7f   : > { %6558 = vmatprep.subr.bf16.mxu1 %v7513_v18  ;;  %6601 = vmatprep.subr.bf16.mxu0 %v7515_v58  ;;  %v8246_v9 = vld [vmem:[#allocation10 + $0x3f8] sm:$0xff]  }
 0xc80   : > { %v8247_v18 = vld [vmem:[#allocation10 + $0x338] sm:$0xff]  }
 0xc81   : > { %v8248_v58 = vld [vmem:[#allocation10 + $0x3b8] sm:$0xff]  }
 0xc82   : > { %6559 = vmatpush1.bf16.msra.mxu1 %v7512_v26  ;;  %6602 = vmatpush1.bf16.msra.mxu0 %v7514_v48 }
 0xc83   : > { %6560 = vmatprep.subr.bf16.mxu1 %v7517_v21  ;;  %6603 = vmatprep.subr.bf16.mxu0 %v7519_v44 }
 0xc86   : > { %6561 = vmatpush1.bf16.msra.mxu1 %v7516_v47  ;;  %6604 = vmatpush1.bf16.msra.mxu0 %v7518_v15 }
 0xc87   : > { %6562 = vmatprep.subr.bf16.mxu1 %v7521_v25  ;;  %6605 = vmatprep.subr.bf16.mxu0 %v7523_v4 }
 0xc8a   : > { %6563 = vmatpush1.bf16.msra.mxu1 %v7520_v38  ;;  %6606 = vmatpush1.bf16.msra.mxu0 %v7522_v40  ;;  %v6385_v38 = vrot.slane %v6368_v54, %v9974_v28 }
 0xc8b   : > { %6564 = vmatprep.subr.bf16.mxu1 %v7525_v60  ;;  %6607 = vmatprep.subr.bf16.mxu0 %v7527_v31 }
 0xc8e   : > { %6565 = vmatpush1.bf16.msra.mxu1 %v7524_v12  ;;  %6608 = vmatpush1.bf16.msra.mxu0 %v7526_v11 }
 0xc8f   : > { %7753 = vmatprep.subr.bf16.mxu1 %v8217_v13  ;;  %7775 = vmatprep.subr.bf16.mxu0 %v8218_v41 }
 0xc91   : > { %6583 = vmatmul.mubr.bf16.vlgmr.msra.gmra.mrb[68].mxu1 %v9966_v2  ;;  %6626 = vmatmul.mubr.bf16.vlgmr.msra.gmra.mrb[56].mxu0 %v9966_v2  ;;  %v8228_v2 = vld [vmem:[#allocation10 + $0x390] sm:$0xff]  }
 0xc92   : > { %7754 = vmatpush3.bf16.msra.mxu1 %v8219_v53  ;;  %7776 = vmatpush3.bf16.msra.mxu0 %v8220_v62 }
 0xc93   : > { %7755 = vmatprep.subr.bf16.mxu1 %v8221_v61  ;;  %7777 = vmatprep.subr.bf16.mxu0 %v8222_v16 }
 0xc96   : > { %7756 = vmatpush3.bf16.msra.mxu1 %v8223_v51  ;;  %7778 = vmatpush3.bf16.msra.mxu0 %v8224_v43 }
 0xc97   : > { %7757 = vmatprep.subr.bf16.mxu1 %v8225_v52  ;;  %7779 = vmatprep.subr.bf16.mxu0 %v8226_v10 }
 0xc9a   : > { %7758 = vmatpush3.bf16.msra.mxu1 %v8227_v14  ;;  %7780 = vmatpush3.bf16.msra.mxu0 %v8228_v2 }
 0xc9b   : > { %7759 = vmatprep.subr.bf16.mxu1 %v8229_v33  ;;  %7781 = vmatprep.subr.bf16.mxu0 %v8230_v20 }
 0xc9e   : > { %7760 = vmatpush3.bf16.msra.mxu1 %v8231_v17  ;;  %7782 = vmatpush3.bf16.msra.mxu0 %v8232_v39 }
 0xc9f   : > { %7761 = vmatprep.subr.bf16.mxu1 %v8233_v35  ;;  %7783 = vmatprep.subr.bf16.mxu0 %v8234_v24 }
 0xca2   : > { %7762 = vmatpush3.bf16.msra.mxu1 %v8235_v30  ;;  %7784 = vmatpush3.bf16.msra.mxu0 %v8236_v0 }
 0xca3   : > { %7763 = vmatprep.subr.bf16.mxu1 %v8237_v34  ;;  %7785 = vmatprep.subr.bf16.mxu0 %v8238_v56 }
 0xca6   : > { %7764 = vmatpush3.bf16.msra.mxu1 %v8239_v42  ;;  %7786 = vmatpush3.bf16.msra.mxu0 %v8240_v27 }
 0xca7   : > { %7765 = vmatprep.subr.bf16.mxu1 %v8241_v29  ;;  %7787 = vmatprep.subr.bf16.mxu0 %v8242_v55 }
 0xcaa   : > { %7766 = vmatpush3.bf16.msra.mxu1 %v8243_v7  ;;  %7788 = vmatpush3.bf16.msra.mxu0 %v8244_v46 }
 0xcab   : > { %7767 = vmatprep.subr.bf16.mxu1 %v8245_v8  ;;  %7789 = vmatprep.subr.bf16.mxu0 %v8246_v9 }
 0xcae   : > { %7768 = vmatpush3.bf16.msra.mxu1 %v8247_v18  ;;  %7790 = vmatpush3.bf16.msra.mxu0 %v8248_v58 }
 0xd44   : > { %v7725_v22 = vpop.f32.mrb[64].mxu1  ;;  %v7747_v59 = vpop.f32.mrb[52].mxu0 }
 0xd45   : > { %v7726_v23 = vpop.f32.mrb[65].mxu1  ;;  %v7748_v49 = vpop.f32.mrb[53].mxu0 }
 0xd46   : > { %v7727_v26 = vadd.f32 %v7726_v23, %v7725_v22  ;;  %v7749_v48 = vadd.f32 %v7748_v49, %v7747_v59  ;;  %v7728_v21 = vpop.f32.mrb[66].mxu1  ;;  %v7750_v44 = vpop.f32.mrb[54].mxu0 }
 0xd47   : > { %v7729_v36 = vpop.f32.mrb[67].mxu1  ;;  %v7751_v5 = vpop.f32.mrb[55].mxu0 }
 0xd48   : > { %v6328_v63 = vadd.f32 %v7749_v48, %v7727_v26  ;;  %v7730_v37 = vadd.f32 %v7729_v36, %v7728_v21  ;;  %v7752_v47 = vadd.f32 %v7751_v5, %v7750_v44 }
 0xd4a   : > { %v10066_v15 = vadd.f32 %v6328_v63, %v10044_v32  ;;  %v6331_v25 = vadd.f32 %v7752_v47, %v7730_v37 }
 0xd4c   : > { %v10069_v4 = vadd.f32 %v6331_v25, %v10046_v45 }
 0xd64   : > { %v6584_v40 = vpop.f32.mrb[68].mxu1  ;;  %v6627_v60 = vpop.f32.mrb[56].mxu0 }
 0xd65   : > { %v6585_v32 = vadd.f32 %v6584_v40, %v6373_v50  ;;  %v6628_v31 = vadd.f32 %v6627_v60, %v6381_v6  ;;  %v6586_v12 = vpop.f32.mrb[69].mxu1  ;;  %v6629_v11 = vpop.f32.mrb[57].mxu0 }
 0xd66   : > { %v6587_v45 = vadd.f32 %v6586_v12, %v6377_v57  ;;  %v6630_v13 = vadd.f32 %v6629_v11, %v6385_v38  ;;  %v6588_v41 = vpop.f32.mrb[70].mxu1  ;;  %v6631_v53 = vpop.f32.mrb[58].mxu0 }
 0xd67   : > { %v6589_v62 = vadd.f32 %v6588_v41, %v6373_v50  ;;  %v6632_v61 = vadd.f32 %v6631_v53, %v6381_v6  ;;  %v6590_v16 = vpop.f32.mrb[71].mxu1  ;;  %v6633_v1 = vpop.f32.mrb[59].mxu0  ;;  %v6636_v43 = vmax.f32 %v6585_v32, 0.0  ;;  %v6638_v3 = vmax.f32 %v6628_v31, 0.0 }
 0xd68   : > { %v6591_v51 = vadd.f32 %v6590_v16, %v6377_v57  ;;  %v6634_v19 = vadd.f32 %v6633_v1, %v6385_v38  ;;  %v6637_v10 = vmax.f32 %v6587_v45, 0.0  ;;  %v6639_v14 = vmax.f32 %v6630_v13, 0.0 }
 0xd69   : > { %v6640_v28 = vmax.f32 %v6589_v62, 0.0  ;;  %v6642_v52 = vmax.f32 %v6632_v61, 0.0 }
 0xd6a   : > { %v6641_v2 = vmax.f32 %v6591_v51, 0.0  ;;  %v6643_v33 = vmax.f32 %v6634_v19, 0.0 }
 0xd6b   : > { %v6644_v20 = vpack.c.bf16 %v6640_v28, %v6636_v43  ;;  %v6646_v17 = vpack.c.bf16 %v6642_v52, %v6638_v3 }
 0xd6c   : > { %v6645_v39 = vpack.c.bf16 %v6641_v2, %v6637_v10  ;;  %v6647_v35 = vpack.c.bf16 %v6643_v33, %v6639_v14 }
 0xd6e   : > { %6936 = vmatprep.mubr.bf16.mxu1 %v6645_v39  ;;  %6977 = vmatprep.mubr.bf16.mxu0 %v6647_v35 }
 0xd6f   : > { %6937 = vmatmul.mubr.bf16.vlgmr.msra.gmra.mrb[72].mxu1 %v6644_v20  ;;  %6978 = vmatmul.mubr.bf16.vlgmr.msra.gmra.mrb[60].mxu0 %v6646_v17 }
 0xd70   : > { %8488 = shalt.err (!%p8485_p13)
}
 0xd71   : > { %s8489_s28 = scalar_lea.hbm %s10087_s20, 256  ;;  %s8493_s10 = scalar_lea.hbm %s10234_s27, 512 }
 0xd72   : > { %p8490_p9 = scmp.ne.s32.totalorder %s10087_s20, %s8489_s28  ;;  %p8494_p4 = scmp.lt.u32.totalorder %s10087_s20, %s10234_s27 }
 0xd73   : > { %p8495_p8 = scmp.lt.u32.totalorder %s8493_s10, %s8489_s28  ;;  %p8497_p10 = scmp.lt.u32.totalorder %s8489_s28, %s10087_s20 }
 0xd74   : > { %p8491_p0 = pnand %p8490_p9, %p8851_p5 }
 0xd75   : > { %p8496_p6 = por %p8495_p8, %p8494_p4 }
 0xd76   : > { %p8492_p11 = pneg %p8491_p0 }
 0xd77   : > { %p8498_p3 = por %p8497_p10, %p8496_p6 }
 0xd79   : > { %p8499_p7 = pnand %p8498_p3, %p8492_p11 }
 0xd7b   : > { %8502 = shalt.err (!%p8499_p7)
}
 0xd7c   : > { %s8608_s19 = smov 128   ;;  %s8609_s14 = smov 8  }
 0xd7d   : > { %7952 = dma.vmem_to_hbm [thread:$0]  (%p8851_p5), %s10080_s12, 256, %s10087_s20, %s6996_s24, %s8608_s19, %s8608_s19, %s8609_s14  }
 0xd7e   : > { %s547_s26 = scalar_lea.vmem [#allocation11], %s8902_s23  ;;  %s10235_s24 = sld [smem:[#allocation27_spill]] }
 0xd7f   : > { %s7009_s28 = sshll.u32 %s547_s26, 4  ;;  %s6991_s23 = scalar_lea.sflag [#allocation4], %s8899_s13  ;;  %s10118_s28 = int_to_ptr.vmem [resolvable:$true] %s7009_s28 }
 0xd80   : > { %s8503_s25 = scalar_lea.vmem %s10118_s28, 256  ;;  %s8610_s10 = smov [#allocation11]  }
 0xd81   : > { %p8504_p12 = scmp.ne.s32.totalorder %s10118_s28, %s8503_s25  ;;  %s8507_s18 = sshll.u32 %s8610_s10, 4  ;;  %s8508_s18 = int_to_ptr.vmem [resolvable:$false] %s8507_s18 }
 0xd82   : > { %s8509_s21 = scalar_lea.vmem %s8508_s18, 512  ;;  %p8510_p13 = scmp.lt.s32.totalorder %s10118_s28, %s8508_s18 }
 0xd83   : > { %p8505_p2 = pnand %p8504_p12, %p8851_p5  ;;  %p8511_p9 = scmp.lt.s32.totalorder %s8509_s21, %s8503_s25 }
 0xd84   : > { %s10126_s22 = scalar_lea.hbm %s10235_s24, %s7569_s8 }
 0xd85   : > { %p8506_p1 = pneg %p8505_p2  ;;  %p8512_p0 = por %p8511_p9, %p8510_p13 }
 0xd87   : > { %p8513_p11 = pnand %p8512_p0, %p8506_p1 }
 0xe42   : > { %v7769_v24 = vpop.f32.mrb[72].mxu1  ;;  %v7791_v30 = vpop.f32.mrb[60].mxu0 }
 0xe43   : > { %v7770_v0 = vpop.f32.mrb[73].mxu1  ;;  %v7792_v34 = vpop.f32.mrb[61].mxu0 }
 0xe44   : > { %v7771_v56 = vadd.f32 %v7770_v0, %v7769_v24  ;;  %v7793_v42 = vadd.f32 %v7792_v34, %v7791_v30  ;;  %v7772_v27 = vpop.f32.mrb[74].mxu1  ;;  %v7794_v29 = vpop.f32.mrb[62].mxu0 }
 0xe45   : > { %v7773_v55 = vpop.f32.mrb[75].mxu1  ;;  %v7795_v7 = vpop.f32.mrb[63].mxu0 }
 0xe46   : > { %v6980_v46 = vadd.f32 %v7793_v42, %v7771_v56  ;;  %v7774_v8 = vadd.f32 %v7773_v55, %v7772_v27  ;;  %v7796_v9 = vadd.f32 %v7795_v7, %v7794_v29 }
 0xe48   : > { %v6986_v18 = vadd.f32 %v6980_v46, %v10066_v15  ;;  %v6983_v58 = vadd.f32 %v7796_v9, %v7774_v8 }
 0xe4a   : > { %6988 = vst [vmem:[%s547_s26] sm:$0xff] %v6986_v18  ;;  %v6987_v22 = vadd.f32 %v6983_v58, %v10069_v4 }
 0xe4c   : > { %6989 = vst [vmem:[%s547_s26 + $0x8] sm:$0xff] %v6987_v22 }
 0xe4d   : > { %8516 = shalt.err (!%p8513_p11)
}
 0xe4e   : > { %s8517_s17 = scalar_lea.hbm %s10126_s22, 256  ;;  %s8521_s12 = scalar_lea.hbm %s10235_s24, 512 }
 0xe4f   : > { %p8518_p4 = scmp.ne.s32.totalorder %s10126_s22, %s8517_s17  ;;  %p8522_p10 = scmp.lt.u32.totalorder %s10126_s22, %s10235_s24 }
 0xe50   : > { %p8523_p3 = scmp.lt.u32.totalorder %s8521_s12, %s8517_s17  ;;  %p8525_p12 = scmp.lt.u32.totalorder %s8517_s17, %s10126_s22 }
 0xe51   : > { %p8519_p8 = pnand %p8518_p4, %p8851_p5 }
 0xe52   : > { %p8524_p7 = por %p8523_p3, %p8522_p10 }
 0xe53   : > { %p8520_p6 = pneg %p8519_p8 }
 0xe54   : > { %p8526_p2 = por %p8525_p12, %p8524_p7 }
 0xe56   : > { %p8527_p1 = pnand %p8526_p2, %p8520_p6 }
 0xe58   : > { %8530 = shalt.err (!%p8527_p1)
}
 0xe59   : > { %7951 = dma.vmem_to_hbm [thread:$0]  (%p8851_p5), %s10118_s28, 256, %s10126_s22, %s6991_s23, %s8608_s19, %s8608_s19, %s8609_s14  }
 0xe5a PF: > { %s10236_s25 = sld [smem:[#allocation19_spill]]  ;;  %s10237_s18 = sld [smem:[#allocation20_spill]] }
 0xe5b   : > { %p10239_p9 = scmp.ge.s32.totalorder %s8581_s16, 2 }
 0xe60   : > { %s7040_s21 = sand.u32 1, %s10236_s25   ;;  %p10238_p13 = scmp.ne.s32.totalorder %s10237_s18, 0 }
 0xe61   : > { %s7041_s17 = scalar_lea.sflag [#allocation4], %s7040_s21 }
 0xe62   : > { %p7973_p0 = pnand %p10239_p9, %p10238_p13 }
 0xe64   : > { %8560 = dma.done.wait (!%p7973_p0), %s7041_s17, 256  }
 0xe65   : > { %8562 = vsyncadd (!%p7973_p0), %s7041_s17, 4294967040  ;;  %s7050_s11 = scalar_lea.sflag [#allocation13], %s7040_s21 }
 0xe66   : > { %8564 = dma.done.wait (!%p7973_p0), %s7050_s11, 256  }
 0xe67   : > { %8566 = vsyncadd (!%p7973_p0), %s7050_s11, 4294967040  ;;  %s10240_s13 = smov %s8837_s29  ;;  %p33_p5 = scmp.ge.s32.totalorder %s8837_s29, 4  }
 0xe68   : > { %s10241_s29 = smov %s8573_s30  ;;  %s10242_s30 = smov %s8577_s15 }
 0xe69   : > { %s10243_s15 = smov %s8847_s4  ;;  %s10244_s16 = smov %s10240_s13 }
 0xe6a   :  { %35 = sbr.rel (!%p33_p5) target bundleno = 18 (0x12), region = 150 }
 0xe71   :  { %7055 = vsyncpa [#allocation3], 1 }
 0xe72   :  { %7057 = vsyncpa [#allocation3 + $0x1], 1 }
 0xe73   :  { %7058 = vsyncpa [#allocation6], 1 }
 0xe74   :  { %7059 = vsyncpa [#allocation9], 1 }
 0xe75   :  { %7060 = vsyncpa [#allocation4], 1 }
 0xe76   :  { %7062 = vsyncpa [#allocation4 + $0x1], 1 }
 0xe77   :  { %7063 = vsyncpa [#allocation13], 1 }
 0xe78   :  { %7065 = vsyncpa [#allocation13 + $0x1], 1 }

// kernel: tpu_custom_call.1
= control target key start
LH: loop header
LB: loop body
LE: loop exit
PB: predicated region body
PF: predicated region fallthrough
CT: control target
= control target key end

     0   :  { %s10173_s0 = inlined_call_operand.hbm [shape: f32[32,128], index: 0, kind: input, shape index: {}]   ;;  %s10174_s1 = inlined_call_operand.hbm [shape: bf16[128,384], index: 1, kind: input, shape index: {}]   ;;  %s10175_s2 = inlined_call_operand.vmem [shape: f32[1,384], index: 2, kind: input, shape index: {}]   ;;  %s10176_s3 = inlined_call_operand.hbm [shape: bf16[128,128], index: 3, kind: input, shape index: {}]   ;;  %s10177_s4 = inlined_call_operand.vmem [shape: f32[1,128], index: 4, kind: input, shape index: {}]   ;;  %s10178_s5 = inlined_call_operand.vmem [shape: f32[1,128], index: 5, kind: input, shape index: {}]   ;;  %s10179_s6 = inlined_call_operand.vmem [shape: f32[1,128], index: 6, kind: input, shape index: {}]   ;;  %s10180_s7 = inlined_call_operand.hbm [shape: bf16[128,2048], index: 7, kind: input, shape index: {}]   ;;  %s10181_s8 = inlined_call_operand.vmem [shape: f32[1,2048], index: 8, kind: input, shape index: {}]   ;;  %s10182_s9 = inlined_call_operand.hbm [shape: bf16[2048,128], index: 9, kind: input, shape index: {}]   ;;  %s10183_s10 = inlined_call_operand.vmem [shape: f32[1,128], index: 10, kind: input, shape index: {}]   ;;  %s10184_s11 = inlined_call_operand.vmem [shape: f32[1,128], index: 11, kind: input, shape index: {}]   ;;  %s10185_s12 = inlined_call_operand.vmem [shape: f32[1,128], index: 12, kind: input, shape index: {}]   ;;  %s10186_s13 = inlined_call_operand.hbm [shape: f32[32,128], index: 13, kind: output, shape index: {0}]   ;;  %s10187_s14 = inlined_call_operand.hbm [shape: f32[32,128], index: 14, kind: output, shape index: {1}]  }
   0x1   :  { %10198 = sst [smem:[#allocation21_spill]] %s10174_s1 }
   0x2   :  { %10199 = sst [smem:[#allocation22_spill]] %s10177_s4 }
   0x3   :  { %10200 = sst [smem:[#allocation23_spill]] %s10181_s8 }
   0x4   :  { %10201 = sst [smem:[#allocation24_spill]] %s10183_s10 }
   0x5   :  { %10202 = sst [smem:[#allocation25_spill]] %s10184_s11 }
   0x6   :  { %10203 = sst [smem:[#allocation26_spill]] %s10185_s12 }
   0x7   :  { %10204 = sst [smem:[#allocation27_spill]] %s10186_s13 }
   0x8   :  { %10205 = sst [smem:[#allocation28_spill]] %s10187_s14 }
   0x9   :  { %20 = vsyncpa [#allocation3], 0 }
   0xa   :  { %22 = vsyncpa [#allocation3 + $0x1], 0 }
   0xb   :  { %23 = vsyncpa [#allocation6], 0 }
   0xc   :  { %24 = vsyncpa [#allocation9], 0 }
   0xd   :  { %25 = vsyncpa [#allocation4], 0 }
   0xe   :  { %27 = vsyncpa [#allocation4 + $0x1], 0 }
   0xf   :  { %28 = vsyncpa [#allocation13], 0 }
  0x10   :  { %30 = vsyncpa [#allocation13 + $0x1], 0  ;;  %s8686_s29 = smov 0   ;;  %s8688_s30 = smov 0  }
  0x11   :  { %s8690_s15 = smov 0   ;;  %s8692_s16 = smov 0  }
  0x12 LB: > { %10206 = sst [smem:[#allocation19_spill]] %s8569_s29  ;;  %s8707_s17 = sadd.s32 4294967295, %s8581_s16   ;;  %s8581_s16 = sphi %s8692_s16, %s10244_s16   ;;  %s8577_s15 = sphi %s8690_s15, %s10243_s15   ;;  %s8573_s30 = sphi %s8688_s30, %s10242_s30   ;;  %s8569_s29 = sphi %s8686_s29, %s10241_s29  }
  0x13   : > { %s7168_s18 = sadd.s32 4294967294, %s8581_s16   ;;  %p56_p0 = scmp.ne.s32.totalorder %s8573_s30, %s8569_s29 }
  0x14   : > { %p10191_p1 = scmp.eq.s32.totalorder %s8707_s17, 0  ;;  %p338_p3 = scmp.eq.s32.totalorder %s7168_s18, 1 }
  0x15   : > { %p7169_p5 = scmp.ge.s32.totalorder %s8581_s16, 1  ;;  %p371_p7 = scmp.lt.s32.totalorder %s8581_s16, 3 }
  0x16   : > { %p8716_p4 = por %p10191_p1, %p56_p0  ;;  %p8721_p6 = por %p338_p3, %p56_p0 }
  0x17   : > { %p8726_p8 = pnand %p7169_p5, %p371_p7  ;;  %s8583_s22 = smov [#allocation5]  }
  0x18   : > { %s10207_s19 = scalar_select %p8716_p4, 1, 0 }
  0x19   : > { %s10208_s20 = scalar_select %p8721_p6, 1, 0 }
  0x1a   : > { %s10210_s21 = scalar_select %p8726_p8, 1, 0 }
  0x1b   : > { %10209 = sst [smem:[#allocation20_spill]] %s10208_s20  ;;  %s383_s23 = sshll.u32 %s8583_s22, 4  ;;  %s8730_s23 = int_to_ptr.vmem [resolvable:$true] %s383_s23 }
  0x1c   : > { %p7955_p9 = pneg %p8726_p8  ;;  %s8584_s25 = smov [#allocation8]  }
  0x1d   : > { %s421_s26 = sshll.u32 %s8584_s25, 4  ;;  %s10212_s1 = sld [smem:[#allocation21_spill]]  ;;  %s8741_s26 = int_to_ptr.vmem [resolvable:$true] %s421_s26 }
  0x1e   : > { %p8737_p11 = pnand %p7955_p9, %p10191_p1 }
  0x20   : > { %p8751_p13 = pneg %p8737_p11 }
  0x23   : > { %s8333_s18 = scalar_lea.hbm %s10212_s1, 3072 }
  0x24   : > { %p8334_p12 = scmp.ne.s32.totalorder %s10212_s1, %s8333_s18  ;;  %p8340_p5 = scmp.lt.u32.totalorder %s8333_s18, %s10212_s1 }
  0x26   : > { %p8336_p0 = pnand %p8751_p13, %p8334_p12 }
  0x28   : > { %p8337_p3 = pneg %p8336_p0 }
  0x2a   : > { %p8342_p7 = pnand %p8340_p5, %p8337_p3 }
  0x2c   : > { %8345 = shalt.err (!%p8342_p7)
}
  0x2d   : > { %s8346_s20 = scalar_lea.vmem %s8730_s23, 3072  ;;  %p8354_p2 = scmp.lt.s32.totalorder %s8730_s23, %s8730_s23 }
  0x2e   : > { %p8347_p9 = scmp.ne.s32.totalorder %s8730_s23, %s8346_s20  ;;  %p8355_p6 = scmp.lt.s32.totalorder %s8346_s20, %s8346_s20 }
  0x30   : > { %p8349_p10 = pnand %p8347_p9, %p8751_p13  ;;  %p8356_p12 = por %p8355_p6, %p8354_p2 }
  0x32   : > { %p8350_p1 = pneg %p8349_p10 }
  0x34   : > { %p8357_p0 = pnand %p8356_p12, %p8350_p1 }
  0x36   : > { %8360 = shalt.err (!%p8357_p0)
}
  0x37   : > { %s8585_s27 = smov 192   ;;  %s8586_s13 = smov 12  }
  0x38   : > { %7958 = dma.hbm_to_vmem [thread:$0]  (!%p8737_p11), %s10212_s1, 3072, %s8730_s23, [#allocation6], %s8585_s27, %s8585_s27, %s8586_s13  }
  0x39   : > { %s8361_s14 = scalar_lea.hbm %s10180_s7, 16384 }
  0x3a   : > { %p8362_p2 = scmp.ne.s32.totalorder %s10180_s7, %s8361_s14  ;;  %p8368_p10 = scmp.lt.u32.totalorder %s8361_s14, %s10180_s7 }
  0x3c   : > { %p8364_p1 = pnand %p8362_p2, %p8751_p13 }
  0x3e   : > { %p8365_p6 = pneg %p8364_p1 }
  0x40   : > { %p8370_p3 = pnand %p8368_p10, %p8365_p6 }
  0x42   : > { %8373 = shalt.err (!%p8370_p3)
}
  0x43   : > { %s8374_s23 = scalar_lea.vmem %s8741_s26, 16384  ;;  %p8382_p12 = scmp.lt.s32.totalorder %s8741_s26, %s8741_s26 }
  0x44   : > { %p8375_p5 = scmp.ne.s32.totalorder %s8741_s26, %s8374_s23  ;;  %p8383_p0 = scmp.lt.s32.totalorder %s8374_s23, %s8374_s23 }
  0x46   : > { %p8377_p7 = pnand %p8375_p5, %p8751_p13  ;;  %p8384_p2 = por %p8383_p0, %p8382_p12 }
  0x48   : > { %p8378_p9 = pneg %p8377_p7 }
  0x4a   : > { %p8385_p1 = pnand %p8384_p2, %p8378_p9 }
  0x4c   : > { %8388 = shalt.err (!%p8385_p1)
}
  0x4d   : > { %s8587_s8 = smov 1024   ;;  %s8588_s10 = smov 64  }
  0x4e   : > { %7964 = dma.hbm_to_vmem [thread:$0]  (!%p8737_p11), %s10180_s7, 16384, %s8741_s26, [#allocation9], %s8587_s8, %s8587_s8, %s8588_s10  }
  0x4f   : > { %s8589_s27 = smov [#allocation7]   ;;  %s8590_s28 = smov [#allocation10]  }
  0x50   : > { %s399_s13 = sshll.u32 %s8589_s27, 4  ;;  %s437_s18 = sshll.u32 %s8590_s28, 4  ;;  %s400_s13 = int_to_ptr.vmem [resolvable:$true] %s399_s13  ;;  %s438_s18 = int_to_ptr.vmem [resolvable:$true] %s437_s18 }
  0x51   : > { %s8389_s20 = scalar_lea.hbm %s10176_s3, 1024 }
  0x52   : > { %p8390_p6 = scmp.ne.s32.totalorder %s10176_s3, %s8389_s20  ;;  %p8396_p5 = scmp.lt.u32.totalorder %s8389_s20, %s10176_s3 }
  0x54   : > { %p8392_p10 = pnand %p8390_p6, %p8751_p13 }
  0x56   : > { %p8393_p3 = pneg %p8392_p10 }
  0x58   : > { %p8398_p7 = pnand %p8396_p5, %p8393_p3 }
  0x5a   : > { %8401 = shalt.err (!%p8398_p7)
}
  0x5b   : > { %s8402_s26 = scalar_lea.vmem %s400_s13, 1024  ;;  %p8410_p2 = scmp.lt.s32.totalorder %s400_s13, %s400_s13 }
  0x5c   : > { %p8403_p9 = scmp.ne.s32.totalorder %s400_s13, %s8402_s26  ;;  %p8411_p1 = scmp.lt.s32.totalorder %s8402_s26, %s8402_s26 }
  0x5e   : > { %p8405_p12 = pnand %p8403_p9, %p8751_p13  ;;  %p8412_p4 = por %p8411_p1, %p8410_p2 }
  0x60   : > { %p8406_p0 = pneg %p8405_p12 }
  0x62   : > { %p8413_p8 = pnand %p8412_p4, %p8406_p0 }
  0x64   : > { %8416 = shalt.err (!%p8413_p8)
}
  0x65   : > { %s8591_s1 = smov 4   ;;  %s8417_s14 = scalar_lea.hbm %s10182_s9, 16384 }
  0x66   : > { %7961 = dma.hbm_to_vmem [thread:$0]  (!%p8737_p11), %s10176_s3, 1024, %s400_s13, [#allocation6], %s8588_s10, %s8588_s10, %s8591_s1  }
  0x67   : > { %p8418_p4 = scmp.ne.s32.totalorder %s10182_s9, %s8417_s14  ;;  %p8424_p10 = scmp.lt.u32.totalorder %s8417_s14, %s10182_s9 }
  0x69   : > { %p8420_p8 = pnand %p8418_p4, %p8751_p13 }
  0x6b   : > { %p8421_p6 = pneg %p8420_p8 }
  0x6d   : > { %p8426_p3 = pnand %p8424_p10, %p8421_p6 }
  0x6f   : > { %8429 = shalt.err (!%p8426_p3)
}
  0x70   : > { %s8430_s20 = scalar_lea.vmem %s438_s18, 16384  ;;  %p8438_p12 = scmp.lt.s32.totalorder %s438_s18, %s438_s18 }
  0x71   : > { %p8431_p5 = scmp.ne.s32.totalorder %s438_s18, %s8430_s20  ;;  %p8439_p0 = scmp.lt.s32.totalorder %s8430_s20, %s8430_s20 }
  0x73   : > { %p8433_p7 = pnand %p8431_p5, %p8751_p13  ;;  %p8440_p2 = por %p8439_p0, %p8438_p12 }
  0x75   : > { %p8434_p9 = pneg %p8433_p7 }
  0x77   : > { %p8441_p1 = pnand %p8440_p2, %p8434_p9 }
  0x79   : > { %8444 = shalt.err (!%p8441_p1)
}
  0x7a   : > { %7967 = dma.hbm_to_vmem [thread:$0]  (!%p8737_p11), %s10182_s9, 16384, %s438_s18, [#allocation9], %s8588_s10, %s8588_s10, %s8591_s1  }
  0x7b   : > { %s8837_s29 = sadd.s32 1, %s8581_s16   ;;  %s43_s26 = sadd.s32 1, %s8577_s15 }
  0x7c   : > { %s40_s24 = ssub.s32 %s8581_s16, %s8837_s29  ;;  %p50_p4 = scmp.ne.s32.totalorder %s8577_s15, %s8573_s30 }
  0x7d   : > { %p41_p13 = scmp.eq.s32.totalorder %s40_s24, 0  ;;  %p51_p8 = scmp.eq.s32.totalorder %s8581_s16, 0 }
  0x7e   : > { %p7983_p6 = scmp.lt.s32.totalorder %s8581_s16, 2  ;;  %p10214_p3 = scmp.eq.s32.totalorder %s8707_s17, 1 }
  0x7f   : > { %s8847_s4 = scalar_select %p41_p13, %s8577_s15, %s43_s26  }
  0x80   : > { %p52_p10 = por %p51_p8, %p50_p4  ;;  %p8851_p5 = por %p10214_p3, %p50_p4 }
  0x81   : > { %s460_s8 = sand.u32 1, %s8577_s15   ;;  %s7568_s12 = sshll.u32 %s8581_s16, 8 }
  0x82   : > { %s7175_s10 = sshll.u32 %s460_s8, 4  ;;  %s8860_s14 = scalar_lea.hbm %s10173_s0, %s7568_s12 }
  0x83   : > { %s464_s27 = scalar_lea.vmem [#allocation2], %s7175_s10  ;;  %p8862_p11 = pnand %p7983_p6, %p52_p10 }
  0x84   : > { %s471_s28 = sshll.u32 %s464_s27, 4  ;;  %s8868_s25 = scalar_lea.sflag [#allocation3], %s460_s8  ;;  %s8866_s28 = int_to_ptr.vmem [resolvable:$true] %s471_s28 }
  0x85   : > { %s8445_s20 = scalar_lea.hbm %s8860_s14, 256  ;;  %p8447_p9 = pneg %p8862_p11 }
  0x86   : > { %p8446_p7 = scmp.ne.s32.totalorder %s8860_s14, %s8445_s20  ;;  %s8450_s24 = scalar_lea.hbm %s10173_s0, 512 }
  0x87   : > { %p8451_p2 = scmp.lt.u32.totalorder %s8860_s14, %s10173_s0  ;;  %p8452_p1 = scmp.lt.u32.totalorder %s8450_s24, %s8445_s20 }
  0x88   : > { %p8448_p12 = pnand %p8447_p9, %p8446_p7  ;;  %p8454_p4 = scmp.lt.u32.totalorder %s8445_s20, %s8860_s14 }
  0x89   : > { %p8453_p13 = por %p8452_p1, %p8451_p2 }
  0x8a   : > { %p8449_p0 = pneg %p8448_p12 }
  0x8b   : > { %p8455_p8 = por %p8454_p4, %p8453_p13 }
  0x8d   : > { %p8456_p6 = pnand %p8455_p8, %p8449_p0 }
  0x8f   : > { %8459 = shalt.err (!%p8456_p6)
}
  0x90   : > { %s8460_s8 = scalar_lea.vmem %s8866_s28, 256  ;;  %s8592_s10 = smov [#allocation2]  }
  0x91   : > { %p8461_p10 = scmp.ne.s32.totalorder %s8866_s28, %s8460_s8  ;;  %s8465_s18 = sshll.u32 %s8592_s10, 4  ;;  %s8466_s18 = int_to_ptr.vmem [resolvable:$false] %s8465_s18 }
  0x92   : > { %s8467_s1 = scalar_lea.vmem %s8466_s18, 512  ;;  %p8468_p12 = scmp.lt.s32.totalorder %s8866_s28, %s8466_s18 }
  0x93   : > { %p8463_p3 = pnand %p8461_p10, %p8447_p9  ;;  %p8469_p2 = scmp.lt.s32.totalorder %s8467_s1, %s8460_s8 }
  0x95   : > { %p8464_p7 = pneg %p8463_p3  ;;  %p8470_p1 = por %p8469_p2, %p8468_p12 }
  0x97   : > { %p8471_p13 = pnand %p8470_p1, %p8464_p7 }
  0x99   : > { %8474 = shalt.err (!%p8471_p13)
}
  0x9a   : > { %s8593_s27 = smov 128   ;;  %s8594_s20 = smov 8  }
  0x9b   : > { %7971 = dma.hbm_to_vmem [thread:$0]  (!%p8862_p11), %s8860_s14, 256, %s8866_s28, %s8868_s25, %s8593_s27, %s8593_s27, %s8594_s20  }
  0x9c   : > { %p10217_p9 = scmp.ne.s32.totalorder %s10210_s21, 0 }
  0x9d   : > { %s8899_s13 = sand.u32 (!%p10217_p9), 1, %s8573_s30   ;;  %p10218_p0 = scmp.ne.s32.totalorder (!%p10217_p9), %s10207_s19, 0 }
  0x9e   : > { %483 = sbr.rel (%p10217_p9) target bundleno = 3674 (0xe5a), region = 72  ;;  %s8902_s23 = sshll.u32 (!%p10217_p9), %s8899_s13, 4 }
  0x9f   : > { %s486_s24 = scalar_lea.sflag (!%p10217_p9), [#allocation3], %s8899_s13  ;;  %s8906_s26 = scalar_lea.vmem (!%p10217_p9), [#allocation2], %s8902_s23 }
  0xa5   : > { %8548 = dma.done.wait (%p10218_p0), %s486_s24, 256  }
  0xa6   : > { %8550 = vsyncadd (%p10218_p0), %s486_s24, 4294967040  ;;  %p10219_p11 = scmp.eq.s32.totalorder %s8707_s17, 0 }
  0xa8   : > { %8552 = dma.done.wait (%p10219_p11), [#allocation6], 4096   ;;  %p10220_p4 = pmov %p10219_p11 }
  0xaa   : > { %8554 = vsyncadd (%p10220_p4), [#allocation6], 4294963200  ;;  %p10221_p8 = pmov %p10220_p4 }
  0xab   : > { %p10222_p6 = pmov %p10220_p4 }
  0xac   : > { %8556 = dma.done.wait (%p10221_p8), [#allocation9], 32768  }
  0xad   : > { %8558 = vsyncadd (%p10222_p6), [#allocation9], 4294934528  ;;  %v559_v0 = vld [vmem:[%s8906_s26] sm:$0xff]  ;;  %v560_v1 = vld [vmem:[%s8906_s26 + $0x8] sm:$0xff]  ;;  %v8595_v13 = vmov 0.0   ;;  %v10196_v27 = vmov 0   ;;  %v651_v63 = vlaneseq }
  0xae   : > { %563 = vadd.xlane.f32.xlu0 %v559_v0  ;;  %v8081_v10 = vld [vmem:[#allocation5 + $0x4] ss:$12 sps:$4 sm:$0xff]   ;;  %v8083_v11 = vld [vmem:[#allocation5] ss:$12 sps:$4 sm:$0xff]   ;;  %v8084_v12 = vld [vmem:[#allocation5 + $0x8] ss:$12 sps:$4 sm:$0xff]   ;;  %7797 = vmatprep.subr.bf16.mxu1 %v8595_v13 }
  0xaf   : > { %794 = vmatprep.subr.bf16.mxu0 %v8081_v10  ;;  %7798 = vmatpush3.bf16.msra.mxu1 %v8084_v12  ;;  %v8085_v14 = vld [vmem:[#allocation5 + $0x1c] ss:$12 sps:$4 sm:$0xff]   ;;  %v8087_v15 = vld [vmem:[#allocation5 + $0x18] ss:$12 sps:$4 sm:$0xff]   ;;  %v8088_v16 = vld [vmem:[#allocation5 + $0x20] ss:$12 sps:$4 sm:$0xff]  }
  0xb0   : > { %795 = vmatpush1.bf16.msra.mxu0 %v8083_v11  ;;  %7799 = vmatprep.subr.bf16.mxu1 %v8595_v13  ;;  %v8089_v17 = vld [vmem:[#allocation5 + $0x34] ss:$12 sps:$4 sm:$0xff]   ;;  %v8091_v18 = vld [vmem:[#allocation5 + $0x30] ss:$12 sps:$4 sm:$0xff]   ;;  %v8092_v19 = vld [vmem:[#allocation5 + $0x38] ss:$12 sps:$4 sm:$0xff]  }
  0xb1   : > { %796 = vmatprep.subr.bf16.mxu0 %v8085_v14  ;;  %v8093_v20 = vld [vmem:[#allocation5 + $0x4c] ss:$12 sps:$4 sm:$0xff]   ;;  %v8095_v21 = vld [vmem:[#allocation5 + $0x48] ss:$12 sps:$4 sm:$0xff]   ;;  %v8096_v22 = vld [vmem:[#allocation5 + $0x50] ss:$12 sps:$4 sm:$0xff]   ;;  %826 = vmatprep.mubr.bf16.mxu0 %v10196_v27 }
  0xb2   : > { %565 = vadd.xlane.f32.xlu0 %v560_v1  ;;  %v8097_v23 = vld [vmem:[#allocation5 + $0x64] ss:$12 sps:$4 sm:$0xff]   ;;  %v8099_v24 = vld [vmem:[#allocation5 + $0x60] ss:$12 sps:$4 sm:$0xff]   ;;  %v8100_v25 = vld [vmem:[#allocation5 + $0x68] ss:$12 sps:$4 sm:$0xff]  }
  0xb3   : > { %7800 = vmatpush3.bf16.msra.mxu1 %v8088_v16  ;;  %v8101_v26 = vld [vmem:[#allocation5 + $0x7c] ss:$12 sps:$4 sm:$0xff]   ;;  %vm8597_vm0 = vmmov 0   ;;  %v8103_v28 = vld [vmem:[#allocation5 + $0x78] ss:$12 sps:$4 sm:$0xff]   ;;  %s8598_s12 = smov 112  }
  0xb4   : > { %797 = vmatpush1.bf16.msra.mxu0 %v8087_v15  ;;  %7801 = vmatprep.subr.bf16.mxu1 %v8595_v13  ;;  %v8104_v29 = vld [vmem:[#allocation5 + $0x80] ss:$12 sps:$4 sm:$0xff]   ;;  %v8107_v31 = vld [vmem:[#allocation5 + $0x90] ss:$12 sps:$4 sm:$0xff]   ;;  %v8108_v32 = vld [vmem:[#allocation5 + $0x98] ss:$12 sps:$4 sm:$0xff]  }
  0xb5   : > { %798 = vmatprep.subr.bf16.mxu0 %v8089_v17  ;;  %7813 = vmatprep.mubr.msk.bf16.mxu1 %vm8597_vm0, %v8595_v13  ;;  %v8105_v30 = vld [vmem:[#allocation5 + $0x94] ss:$12 sps:$4 sm:$0xff]   ;;  %v8109_v33 = vld [vmem:[#allocation5 + $0xac] ss:$12 sps:$4 sm:$0xff]   ;;  %v8112_v35 = vld [vmem:[#allocation5 + $0xb0] ss:$12 sps:$4 sm:$0xff]  }
  0xb6   : > { %v8111_v34 = vld [vmem:[#allocation5 + $0xa8] ss:$12 sps:$4 sm:$0xff]   ;;  %v7186_v52 = vld [vmem:[%s10178_s5] ss:$0 sm:$0xff]  ;;  %s8599_s8 = smov 96   ;;  %s8600_s10 = smov 80  }
  0xb7   : > { %7802 = vmatpush3.bf16.msra.mxu1 %v8092_v19  ;;  %v7187_v58 = vld [vmem:[%s10179_s6] ss:$0 sm:$0xff]  ;;  %s8601_s18 = smov 64   ;;  %s8602_s1 = smov 48   ;;  %vm2666_vm5 = vcmask 130048   ;;  %vm4181_vm6 = vcmask 261120  }
  0xb8   : > { %799 = vmatpush1.bf16.msra.mxu0 %v8091_v18  ;;  %7803 = vmatprep.subr.bf16.mxu1 %v8595_v13  ;;  %s8603_s27 = smov 32   ;;  %s8604_s20 = smov 16   ;;  %vm4184_vm7 = vcmask 392192   ;;  %vm4187_vm8 = vcmask 523264   ;;  %vm4190_vm9 = vcmask 654336   ;;  %vm4193_vm10 = vcmask 785408  }
  0xb9   : > { %800 = vmatprep.subr.bf16.mxu0 %v8093_v20  ;;  %vm4196_vm11 = vcmask 916480   ;;  %s10229_s21 = sld [smem:[#allocation22_spill]]  ;;  %s9945_s14 = scalar_lea.vmem [#allocation12], %s8902_s23 }
  0xba   : > { %s10230_s22 = sld [smem:[#allocation25_spill]]  ;;  %s6996_s24 = scalar_lea.sflag [#allocation13], %s8899_s13 }
  0xbb   : > { %7804 = vmatpush3.bf16.msra.mxu1 %v8096_v22 }
  0xbc   : > { %801 = vmatpush1.bf16.msra.mxu0 %v8095_v21  ;;  %7805 = vmatprep.subr.bf16.mxu1 %v8595_v13 }
  0xbd   : > { %802 = vmatprep.subr.bf16.mxu0 %v8097_v23  ;;  %v8605_v23 = vmov 1983009808  }
  0xbf   : > { %7806 = vmatpush3.bf16.msra.mxu1 %v8100_v25 }
  0xc0   : > { %803 = vmatpush1.bf16.msra.mxu0 %v8099_v24  ;;  %7807 = vmatprep.subr.bf16.mxu1 %v8595_v13  ;;  %v925_v24 = vunpack.c.l.s4 %v8605_v23 }
  0xc1   : > { %804 = vmatprep.subr.bf16.mxu0 %v8101_v26 }
  0xc3   : > { %7808 = vmatpush3.bf16.msra.mxu1 %v8104_v29 }
  0xc4   : > { %805 = vmatpush1.bf16.msra.mxu0 %v8103_v28  ;;  %7809 = vmatprep.subr.bf16.mxu1 %v8595_v13  ;;  %v8606_v28 = vmov 1934713408  }
  0xc5   : > { %806 = vmatprep.subr.bf16.mxu0 %v8105_v30  ;;  %v989_v29 = vunpack.c.l.s4 %v8606_v28  ;;  %v926_v30 = vunpack.c.0.s8 %v925_v24 }
  0xc7   : > { %7810 = vmatpush3.bf16.msra.mxu1 %v8108_v32 }
  0xc8   : > { %807 = vmatpush1.bf16.msra.mxu0 %v8107_v31  ;;  %7811 = vmatprep.subr.bf16.mxu1 %v8595_v13 }
  0xc9   : > { %808 = vmatprep.subr.bf16.mxu0 %v8109_v33  ;;  %v990_v33 = vunpack.c.0.s8 %v989_v29 }
  0xcb   : > { %7812 = vmatpush3.bf16.msra.mxu1 %v8112_v35 }
  0xcc   : > { %809 = vmatpush1.bf16.msra.mxu0 %v8111_v34  ;;  %7817 = vmatprep.subr.bf16.mxu1 %v8595_v13 }
  0xcd   : > { %7841 = vmatprep.subr.bf16.mxu0 %v8595_v13 }
 0x13b   : > { %v564_v2 = vpop.xlane.xlu0 %563 }
 0x13c   : > { %v568_v3 = vmul.f32 0.0078125, %v564_v2  ;;  %v649_v2 = vld [vmem:[%s10175_s2] sm:$0x7] }
 0x13e   : > { %v8922_v4 = vsub.f32 %v559_v0, %v568_v3  ;;  %v8955_v0 = vshrl.u32 %v651_v63, 7 }
 0x13f   : > { %v566_v5 = vpop.xlane.xlu0 %565 }
 0x140   : > { %v569_v6 = vmul.f32 0.0078125, %v566_v5  ;;  %v572_v7 = vmul.f32 %v8922_v4, %v8922_v4  ;;  %v8964_v3 = vsub.s32 1, %v8955_v0  ;;  %v9021_v19 = vsub.s32 2, %v8955_v0 }
 0x141   : > { %v9063_v34 = vsub.s32 %v926_v30, %v8955_v0 }
 0x142   : > { %v8926_v8 = vsub.f32 %v560_v1, %v569_v6  ;;  %574 = vadd.xlane.f32.xlu1 %v572_v7  ;;  %v8958_v1 = vsub.s32 0, %v8955_v0  ;;  %v658_v5 = vrot.slane %v649_v2, %v8964_v3  ;;  %v662_v20 = vrot.slane %v649_v2, %v9021_v19 }
 0x144   : > { %v573_v9 = vmul.f32 %v8926_v8, %v8926_v8 }
 0x146   : > { %576 = vadd.xlane.f32.xlu1 %v573_v9 }
 0x1cf   : > { %v575_v36 = vpop.xlane.xlu1 %574 }
 0x1d0   : > { %v578_v37 = vmul.f32 0.007874016, %v575_v36 }
 0x1d2   : > { %8249 = vrsqrt.f32 %v578_v37  ;;  %vm582_vm1 = vcmp.eq.f32.partialorder %v578_v37, inf  ;;  %v585_v42 = vand.u32 2147483648, %v578_v37  ;;  %vm584_vm2 = vcmp.eq.f32.partialorder %v578_v37, 0.0 }
 0x1d3   : > { %v577_v38 = vpop.xlane.xlu1 %576 }
 0x1d4   : > { %v579_v39 = vmul.f32 0.007874016, %v577_v38 }
 0x1d6   : > { %8251 = vrsqrt.f32 %v579_v39  ;;  %vm589_vm3 = vcmp.eq.f32.partialorder %v579_v39, inf  ;;  %v592_v48 = vand.u32 2147483648, %v579_v39  ;;  %vm591_vm4 = vcmp.eq.f32.partialorder %v579_v39, 0.0 }
 0x1dc   : > { %v8250_v40 = vpop.eup %8249 }
 0x1dd   : > { %v581_v41 = vmul.f32 %v8250_v40, %v578_v37 }
 0x1df   : > { %v583_v43 = vsel %vm582_vm1, %v578_v37, %v581_v41  ;;  %v9068_v41 = vsub.s32 %v990_v33, %v8955_v0 }
 0x1e0   : > { %v8252_v44 = vpop.eup %8251  ;;  %v586_v45 = vsel %vm584_vm2, %v585_v42, %v583_v43 }
 0x1e1   : > { %v594_v46 = vadd.f32 1e-06, %v586_v45  ;;  %v588_v47 = vmul.f32 %v8252_v44, %v579_v39 }
 0x1e3   : > { %v590_v49 = vsel %vm589_vm3, %v579_v39, %v588_v47  ;;  %8253 = vrcp.f32 %v594_v46 }
 0x1e4   : > { %v593_v50 = vsel %vm591_vm4, %v592_v48, %v590_v49 }
 0x1e5   : > { %v595_v51 = vadd.f32 1e-06, %v593_v50 }
 0x1e7   : > { %8255 = vrcp.f32 %v595_v51 }
 0x1ed   : > { %v8254_v53 = vpop.eup %8253 }
 0x1ee   : > { %v604_v54 = vmul.f32 %v8254_v53, %v7186_v52 }
 0x1f0   : > { %v606_v57 = vmul.f32 %v604_v54, %v8922_v4  ;;  %v654_v4 = vrot.slane %v649_v2, %v8958_v1 }
 0x1f1   : > { %v8256_v55 = vpop.eup %8255 }
 0x1f2   : > { %v605_v56 = vmul.f32 %v8256_v55, %v7186_v52  ;;  %v614_v60 = vadd.f32 %v7187_v58, %v606_v57 }
 0x1f4   : > { %v607_v59 = vmul.f32 %v605_v56, %v8926_v8 }
 0x1f6   : > { %v615_v61 = vadd.f32 %v7187_v58, %v607_v59 }
 0x1f8   : > { %v616_v62 = vpack.c.bf16 %v615_v61, %v614_v60 }
 0x1fa   : > { %827 = vmatmul.mubr.bf16.vlgmr.msra.gmra.mrb[0].mxu0 %v616_v62  ;;  %7814 = vmatmul.mubr.bf16.vlgmr.msra.gmra.mrb[0].mxu1 %v616_v62 }
 0x1fb   : > { %7819 = vmatprep.mubr.msk.bf16.mxu1 %vm8597_vm0, %v8595_v13  ;;  %7843 = vmatprep.mubr.msk.bf16.mxu0 %vm8597_vm0, %v8595_v13 }
 0x2cd   : > { %v828_v6 = vpop.f32.mrb[0].mxu0  ;;  %v871_v7 = vpop.f32.mrb[0].mxu1 }
 0x2ce   : > { %v8968_v8 = vadd.f32 %v828_v6, %v654_v4  ;;  %v830_v9 = vpop.f32.mrb[1].mxu0  ;;  %v7815_v10 = vpop.f32.mrb[1].mxu1  ;;  %v9032_v21 = vadd.f32 %v871_v7, %v662_v20 }
 0x2cf   : > { %v8970_v11 = vadd.f32 %v830_v9, %v658_v5  ;;  %v832_v12 = vpop.f32.mrb[2].mxu0  ;;  %v874_v14 = vpop.f32.mrb[2].mxu1 }
 0x2d0   : > { %v834_v15 = vpop.f32.mrb[3].mxu0  ;;  %v7816_v16 = vpop.f32.mrb[3].mxu1  ;;  %880 = vrot.lane.b32.xlu0 %v8968_v8, %s8598_s12  ;;  %v8976_v17 = vadd.f32 %v832_v12, %v654_v4  ;;  %v9042_v22 = vadd.f32 %v874_v14, %v662_v20 }
 0x2d1   : > { %1482 = vrot.lane.b32.xlu1 %v8970_v11, %s8599_s8  ;;  %v8982_v18 = vadd.f32 %v834_v15, %v658_v5 }
 0x2d4   : > { %1476 = vrot.lane.b32.xlu0 %v8970_v11, %s8598_s12 }
 0x2d5   : > { %882 = vrot.lane.b32.xlu1 %v8976_v17, %s8598_s12 }
 0x2d8   : > { %1488 = vrot.lane.b32.xlu0 %v8970_v11, %s8600_s10 }
 0x2d9   : > { %1478 = vrot.lane.b32.xlu1 %v8982_v18, %s8598_s12 }
 0x2dc   : > { %886 = vrot.lane.b32.xlu0 %v8968_v8, %s8599_s8 }
 0x2dd   : > { %1484 = vrot.lane.b32.xlu1 %v8982_v18, %s8599_s8 }
 0x2e0   : > { %892 = vrot.lane.b32.xlu0 %v8968_v8, %s8600_s10 }
 0x2e1   : > { %1490 = vrot.lane.b32.xlu1 %v8982_v18, %s8600_s10 }
 0x2e4   : > { %1494 = vrot.lane.b32.xlu0 %v8970_v11, %s8601_s18 }
 0x2e5   : > { %888 = vrot.lane.b32.xlu1 %v8976_v17, %s8599_s8 }
 0x2e8   : > { %1500 = vrot.lane.b32.xlu0 %v8970_v11, %s8602_s1 }
 0x2e9   : > { %894 = vrot.lane.b32.xlu1 %v8976_v17, %s8600_s10 }
 0x2ec   : > { %1506 = vrot.lane.b32.xlu0 %v8970_v11, %s8603_s27 }
 0x2ed   : > { %900 = vrot.lane.b32.xlu1 %v8976_v17, %s8601_s18 }
 0x2f0   : > { %1512 = vrot.lane.b32.xlu0 %v8970_v11, %s8604_s20 }
 0x2f1   : > { %906 = vrot.lane.b32.xlu1 %v8976_v17, %s8602_s1 }
 0x2f4   : > { %898 = vrot.lane.b32.xlu0 %v8968_v8, %s8601_s18 }
 0x2f5   : > { %1496 = vrot.lane.b32.xlu1 %v8982_v18, %s8601_s18 }
 0x2f8   : > { %904 = vrot.lane.b32.xlu0 %v8968_v8, %s8602_s1 }
 0x2f9   : > { %1502 = vrot.lane.b32.xlu1 %v8982_v18, %s8602_s1 }
 0x2fc   : > { %910 = vrot.lane.b32.xlu0 %v8968_v8, %s8603_s27 }
 0x2fd   : > { %1508 = vrot.lane.b32.xlu1 %v8982_v18, %s8603_s27 }
 0x300   : > { %916 = vrot.lane.b32.xlu0 %v8968_v8, %s8604_s20 }
 0x301   : > { %1514 = vrot.lane.b32.xlu1 %v8982_v18, %s8604_s20 }
 0x304   : > { %2072 = vrot.lane.b32.xlu0 %v9032_v21, %s8598_s12 }
 0x305   : > { %912 = vrot.lane.b32.xlu1 %v8976_v17, %s8603_s27 }
 0x308   : > { %2084 = vrot.lane.b32.xlu0 %v9032_v21, %s8600_s10 }
 0x309   : > { %918 = vrot.lane.b32.xlu1 %v8976_v17, %s8604_s20 }
 0x30c   : > { %2090 = vrot.lane.b32.xlu0 %v9032_v21, %s8601_s18 }
 0x30d   : > { %2074 = vrot.lane.b32.xlu1 %v9042_v22, %s8598_s12 }
 0x311   : > { %2078 = vrot.lane.b32.xlu1 %v9032_v21, %s8599_s8 }
 0x315   : > { %2080 = vrot.lane.b32.xlu1 %v9042_v22, %s8599_s8 }
 0x319   : > { %2086 = vrot.lane.b32.xlu1 %v9042_v22, %s8600_s10 }
 0x31d   : > { %2092 = vrot.lane.b32.xlu1 %v9042_v22, %s8601_s18 }
 0x321   : > { %2096 = vrot.lane.b32.xlu1 %v9032_v21, %s8602_s1 }
 0x325   : > { %2098 = vrot.lane.b32.xlu1 %v9042_v22, %s8602_s1 }
 0x342   : > { %v881_v25 = vpop.permute.xlu0 %880 }
 0x343   : > { %v1483_v26 = vpop.permute.xlu1 %1482 }
 0x344   : > { %v1518_v35 = vcombine.low %v8970_v11, %v1483_v26  ;;  %v1519_v36 = vcombine.high %v8970_v11, %v1483_v26 }
 0x346   : > { %v1477_v31 = vpop.permute.xlu0 %1476  ;;  %v1526_v42 = vrot.slane %v1518_v35, %v9063_v34  ;;  %v1533_v43 = vrot.slane %v1519_v36, %v9063_v34 }
 0x347   : > { %v9060_v32 = vpop.permute.xlu1 %882 }
 0x34a   : > { %v1489_v37 = vpop.permute.xlu0 %1488 }
 0x34b   : > { %v1534_v38 = vcombine.low %v1477_v31, %v1489_v37  ;;  %v1535_v39 = vcombine.high %v1477_v31, %v1489_v37  ;;  %v1479_v40 = vpop.permute.xlu1 %1478 }
 0x34d   : > { %v1542_v44 = vrot.slane %v1534_v38, %v9063_v34  ;;  %v1549_v45 = vrot.slane %v1535_v39, %v9063_v34 }
 0x34e   : > { %v887_v46 = vpop.permute.xlu0 %886 }
 0x34f   : > { %v1582_v47 = vcombine.low %v1526_v42, %v1542_v44  ;;  %v1583_v48 = vcombine.high %v1526_v42, %v1542_v44  ;;  %v1598_v49 = vcombine.low %v1533_v43, %v1549_v45  ;;  %v1599_v50 = vcombine.high %v1533_v43, %v1549_v45  ;;  %v1485_v51 = vpop.permute.xlu1 %1484 }
 0x350   : > { %v922_v52 = vcombine.low %v8968_v8, %v887_v46  ;;  %v923_v53 = vcombine.high %v8968_v8, %v887_v46  ;;  %v1654_v54 = vcombine.low %v8982_v18, %v1485_v51  ;;  %v1655_v55 = vcombine.high %v8982_v18, %v1485_v51 }
 0x351   : > { %v1590_v56 = vrot.slane %v1582_v47, %v9068_v41  ;;  %v1597_v57 = vrot.slane %v1583_v48, %v9068_v41  ;;  %v1606_v58 = vrot.slane %v1598_v49, %v9068_v41  ;;  %v1613_v59 = vrot.slane %v1599_v50, %v9068_v41 }
 0x352   : > { %v893_v60 = vpop.permute.xlu0 %892  ;;  %v930_v9 = vrot.slane %v922_v52, %v9063_v34  ;;  %v937_v10 = vrot.slane %v923_v53, %v9063_v34  ;;  %v1662_v11 = vrot.slane %v1654_v54, %v9063_v34  ;;  %v1669_v12 = vrot.slane %v1655_v55, %v9063_v34 }
 0x353   : > { %v7228_v61 = vcombine.low %v1590_v56, %v1597_v57  ;;  %v7230_v62 = vcombine.high %v1590_v56, %v1597_v57  ;;  %v7232_v63 = vcombine.low %v1606_v58, %v1613_v59  ;;  %v7234_v2 = vcombine.high %v1606_v58, %v1613_v59  ;;  %v1491_v4 = vpop.permute.xlu1 %1490 }
 0x354   : > { %v938_v5 = vcombine.low %v881_v25, %v893_v60  ;;  %v939_v6 = vcombine.high %v881_v25, %v893_v60  ;;  %v1670_v7 = vcombine.low %v1479_v40, %v1491_v4  ;;  %v1671_v8 = vcombine.high %v1479_v40, %v1491_v4 }
 0x355   : > { %v9093_v23 = vrot.slane %v7228_v61, %v9063_v34  ;;  %v9096_v24 = vrot.slane %v7230_v62, %v9063_v34  ;;  %v9099_v25 = vrot.slane %v7232_v63, %v9063_v34  ;;  %v9102_v26 = vrot.slane %v7234_v2, %v9063_v34 }
 0x356   : > { %v946_v14 = vrot.slane %v938_v5, %v9063_v34  ;;  %v953_v15 = vrot.slane %v939_v6, %v9063_v34  ;;  %v1678_v16 = vrot.slane %v1670_v7, %v9063_v34  ;;  %v1685_v18 = vrot.slane %v1671_v8, %v9063_v34  ;;  %v9090_v20 = vpop.permute.xlu0 %1494 }
 0x357   : > { %v889_v28 = vpop.permute.xlu1 %888  ;;  %v1854_v61 = vcombine.low %v9093_v23, %v9096_v24  ;;  %v1886_v62 = vcombine.low %v9099_v25, %v9102_v26 }
 0x358   : > { %v986_v29 = vcombine.low %v930_v9, %v946_v14  ;;  %v987_v30 = vcombine.high %v930_v9, %v946_v14  ;;  %v1002_v31 = vcombine.low %v937_v10, %v953_v15  ;;  %v1003_v33 = vcombine.high %v937_v10, %v953_v15 }
 0x359   : > { %v1718_v35 = vcombine.low %v1662_v11, %v1678_v16  ;;  %v1719_v36 = vcombine.high %v1662_v11, %v1678_v16  ;;  %v1734_v37 = vcombine.low %v1669_v12, %v1685_v18  ;;  %v1735_v38 = vcombine.high %v1669_v12, %v1685_v18 }
 0x35a   : > { %v994_v39 = vrot.slane %v986_v29, %v9068_v41  ;;  %v1001_v40 = vrot.slane %v987_v30, %v9068_v41  ;;  %v1010_v42 = vrot.slane %v1002_v31, %v9068_v41  ;;  %v1017_v43 = vrot.slane %v1003_v33, %v9068_v41  ;;  %v1501_v44 = vpop.permute.xlu0 %1500 }
 0x35b   : > { %v9109_v45 = vrot.slane %v1718_v35, %v9068_v41  ;;  %v9112_v46 = vrot.slane %v1719_v36, %v9068_v41  ;;  %v9115_v47 = vrot.slane %v1734_v37, %v9068_v41  ;;  %v9118_v48 = vrot.slane %v1735_v38, %v9068_v41  ;;  %v895_v49 = vpop.permute.xlu1 %894 }
 0x35c   : > { %v7212_v50 = vcombine.low %v994_v39, %v1001_v40  ;;  %v7214_v51 = vcombine.high %v994_v39, %v1001_v40  ;;  %v7216_v52 = vcombine.low %v1010_v42, %v1017_v43  ;;  %v7218_v53 = vcombine.high %v1010_v42, %v1017_v43 }
 0x35d   : > { %v7236_v54 = vcombine.low %v9109_v45, %v9112_v46  ;;  %v7238_v5 = vcombine.high %v9109_v45, %v9112_v46  ;;  %v7240_v6 = vcombine.low %v9115_v47, %v9118_v48  ;;  %v7242_v7 = vcombine.high %v9115_v47, %v9118_v48 }
 0x35e   : > { %v9123_v55 = vrot.slane %v7212_v50, %v9063_v34  ;;  %v9126_v56 = vrot.slane %v7214_v51, %v9063_v34  ;;  %v9129_v57 = vrot.slane %v7216_v52, %v9063_v34  ;;  %v9132_v58 = vrot.slane %v7218_v53, %v9063_v34  ;;  %v1507_v59 = vpop.permute.xlu0 %1506 }
 0x35f   : > { %v9134_v60 = vpop.permute.xlu1 %900  ;;  %v9145_v4 = vrot.slane %v7236_v54, %v9063_v34  ;;  %v1058_v8 = vcombine.low %v8976_v17, %v889_v28  ;;  %v1059_v9 = vcombine.high %v8976_v17, %v889_v28  ;;  %v1074_v10 = vcombine.low %v9060_v32, %v895_v49 }
 0x360   : > { %v1075_v11 = vcombine.high %v9060_v32, %v895_v49  ;;  %v1258_v12 = vcombine.low %v9123_v55, %v9126_v56  ;;  %v1259_v14 = vcombine.high %v9123_v55, %v9126_v56  ;;  %v1290_v15 = vcombine.low %v9129_v57, %v9132_v58 }
 0x361   : > { %v1291_v16 = vcombine.high %v9129_v57, %v9132_v58  ;;  %v1066_v29 = vrot.slane %v1058_v8, %v9063_v34  ;;  %v1073_v17 = vrot.slane %v1059_v9, %v9063_v34  ;;  %v1082_v28 = vrot.slane %v1074_v10, %v9063_v34 }
 0x362   : > { %v1513_v18 = vpop.permute.xlu0 %1512  ;;  %v1089_v32 = vrot.slane %v1075_v11, %v9063_v34  ;;  %v1550_v31 = vcombine.low %v9090_v20, %v1507_v59  ;;  %v1551_v33 = vcombine.high %v9090_v20, %v1507_v59 }
 0x363   : > { %v9169_v30 = vpop.permute.xlu1 %906  ;;  %v1566_v35 = vcombine.low %v1501_v44, %v1513_v18  ;;  %v1567_v36 = vcombine.high %v1501_v44, %v1513_v18  ;;  %v1122_v37 = vcombine.low %v1066_v29, %v1082_v28  ;;  %v1123_v38 = vcombine.high %v1066_v29, %v1082_v28 }
 0x364   : > { %v1138_v39 = vcombine.low %v1073_v17, %v1089_v32  ;;  %v1139_v40 = vcombine.high %v1073_v17, %v1089_v32  ;;  %v1558_v42 = vrot.slane %v1550_v31, %v9063_v34  ;;  %v1565_v43 = vrot.slane %v1551_v33, %v9063_v34 }
 0x365   : > { %v1574_v45 = vrot.slane %v1566_v35, %v9063_v34  ;;  %v1581_v46 = vrot.slane %v1567_v36, %v9063_v34  ;;  %v1130_v48 = vrot.slane %v1122_v37, %v9068_v41  ;;  %v1137_v20 = vrot.slane %v1123_v38, %v9068_v41 }
 0x366   : > { %v9177_v47 = vpop.permute.xlu0 %898  ;;  %v1146_v44 = vrot.slane %v1138_v39, %v9068_v41  ;;  %v1153_v49 = vrot.slane %v1139_v40, %v9068_v41  ;;  %v9206_v31 = vrot.slane %v1258_v12, %v9068_v41  ;;  %v9209_v33 = vrot.slane %v7238_v5, %v9063_v34 }
 0x367   : > { %v9183_v50 = vpop.permute.xlu1 %1496  ;;  %v1614_v51 = vcombine.low %v1558_v42, %v1574_v45  ;;  %v1615_v52 = vcombine.high %v1558_v42, %v1574_v45  ;;  %v1630_v53 = vcombine.low %v1565_v43, %v1581_v46  ;;  %v1631_v54 = vcombine.high %v1565_v43, %v1581_v46 }
 0x368   : > { %v7220_v55 = vcombine.low %v1130_v48, %v1137_v20  ;;  %v7222_v56 = vcombine.high %v1130_v48, %v1137_v20  ;;  %v7224_v57 = vcombine.low %v1146_v44, %v1153_v49  ;;  %v7226_v58 = vcombine.high %v1146_v44, %v1153_v49 }
 0x369   : > { %v1622_v59 = vrot.slane %v1614_v51, %v9068_v41  ;;  %v1629_v8 = vrot.slane %v1615_v52, %v9068_v41  ;;  %v9188_v9 = vrot.slane %v1630_v53, %v9068_v41  ;;  %v9191_v10 = vrot.slane %v1631_v54, %v9068_v41 }
 0x36a   : > { %v905_v11 = vpop.permute.xlu0 %904  ;;  %v9194_v18 = vrot.slane %v7220_v55, %v9063_v34  ;;  %v9197_v29 = vrot.slane %v7222_v56, %v9063_v34  ;;  %v9200_v17 = vrot.slane %v7224_v57, %v9063_v34  ;;  %v9203_v28 = vrot.slane %v7226_v58, %v9063_v34 }
 0x36b   : > { %v1503_v32 = vpop.permute.xlu1 %1502  ;;  %v9212_v35 = vrot.slane %v7240_v6, %v9063_v34  ;;  %v9215_v36 = vrot.slane %v7242_v7, %v9063_v34  ;;  %v7229_v39 = vcombine.low %v1622_v59, %v1629_v8  ;;  %v7231_v40 = vcombine.high %v1622_v59, %v1629_v8 }
 0x36c   : > { %v1394_v37 = vcombine.low %v9194_v18, %v9197_v29  ;;  %v1426_v38 = vcombine.low %v9200_v17, %v9203_v28  ;;  %v9222_v12 = vrot.slane %v1259_v14, %v9068_v41  ;;  %v9225_v5 = vrot.slane %v1290_v15, %v9068_v41 }
 0x36d   : > { %v9228_v6 = vrot.slane %v1291_v16, %v9068_v41  ;;  %v7233_v7 = vcombine.low %v9188_v9, %v9191_v10  ;;  %v1862_v16 = vrot.slane %v1854_v61, %v9068_v41  ;;  %v1894_v48 = vrot.slane %v1886_v62, %v9068_v41 }
 0x36e   : > { %v911_v42 = vpop.permute.xlu0 %910  ;;  %v9235_v45 = vrot.slane %v1394_v37, %v9068_v41  ;;  %v9238_v46 = vrot.slane %v1426_v38, %v9068_v41  ;;  %v1990_v20 = vcombine.low %v9145_v4, %v9209_v33  ;;  %v2022_v44 = vcombine.low %v9212_v35, %v9215_v36 }
 0x36f   : > { %v1509_v15 = vpop.permute.xlu1 %1508  ;;  %v9257_v51 = vrot.slane %v7229_v39, %v9063_v34  ;;  %v9260_v52 = vrot.slane %v7231_v40, %v9063_v34  ;;  %v954_v61 = vcombine.low %v9177_v47, %v911_v42  ;;  %v955_v54 = vcombine.high %v9177_v47, %v911_v42 }
 0x370   : > { %v1998_v53 = vrot.slane %v1990_v20, %v9068_v41  ;;  %v2030_v62 = vrot.slane %v2022_v44, %v9068_v41  ;;  %v1686_v55 = vcombine.low %v9183_v50, %v1509_v15  ;;  %v9268_v57 = vrot.slane %v7233_v7, %v9063_v34 }
 0x371   : > { %v1918_v58 = vcombine.low %v1862_v16, %v1894_v48  ;;  %v1687_v59 = vcombine.high %v9183_v50, %v1509_v15  ;;  %v1322_v8 = vcombine.low %v9206_v31, %v9225_v5  ;;  %v962_v39 = vrot.slane %v954_v61, %v9063_v34 }
 0x372   : > { %v917_v56 = vpop.permute.xlu0 %916  ;;  %v2054_v38 = vcombine.low %v1998_v53, %v2030_v62  ;;  %v1458_v40 = vcombine.low %v9235_v45, %v9238_v46  ;;  %v2055_v47 = vcombine.high %v1998_v53, %v2030_v62  ;;  %v969_v2 = vrot.slane %v955_v54, %v9063_v34 }
 0x373   : > { %v1515_v37 = vpop.permute.xlu1 %1514  ;;  %v970_v42 = vcombine.low %v905_v11, %v917_v56  ;;  %v971_v20 = vcombine.high %v905_v11, %v917_v56  ;;  %v1694_v50 = vrot.slane %v1686_v55, %v9063_v34  ;;  %v1919_v15 = vcombine.high %v1862_v16, %v1894_v48 }
 0x374   : > { %v1702_v44 = vcombine.low %v1503_v32, %v1515_v37  ;;  %v1703_v27 = vcombine.high %v1503_v32, %v1515_v37  ;;  %v2062_v7 = vpack.c.bf16 %v2054_v38, %v1918_v58  ;;  %v1701_v32 = vrot.slane %v1687_v59, %v9063_v34 }
 0x375   : > { %v978_v63 = vrot.slane %v970_v42, %v9063_v34  ;;  %v985_v49 = vrot.slane %v971_v20, %v9063_v34  ;;  %v1466_v53 = vpack.c.bf16 %v1458_v40, %v1322_v8  ;;  %v2063_v62 = vpack.c.bf16 %v2055_v47, %v1919_v15 }
 0x376   : > { %v1710_v61 = vrot.slane %v1702_v44, %v9063_v34  ;;  %v1717_v14 = vrot.slane %v1703_v27, %v9063_v34  ;;  %v2671_v11 = vsel %vm2666_vm5, %v2062_v7, 0 }
 0x377   : > { %v9282_v43 = vpop.permute.xlu1 %912  ;;  %7818 = vmatpush3.bf16.xpose.msra.mxu1 %v2671_v11  ;;  %v1018_v54 = vcombine.low %v962_v39, %v978_v63  ;;  %v1019_v55 = vcombine.high %v962_v39, %v978_v63  ;;  %v1034_v16 = vcombine.low %v969_v2, %v985_v49  ;;  %v1035_v48 = vcombine.high %v969_v2, %v985_v49  ;;  %v2073_v39 = vpop.permute.xlu0 %2072 }
 0x378   : > { %7823 = vmatprep.subr.bf16.mxu1 %v8595_v13  ;;  %v1750_v56 = vcombine.low %v1694_v50, %v1710_v61  ;;  %v1751_v58 = vcombine.high %v1694_v50, %v1710_v61  ;;  %v1766_v37 = vcombine.low %v1701_v32, %v1717_v14  ;;  %v1767_v38 = vcombine.high %v1701_v32, %v1717_v14 }
 0x379   : > { %v1026_v27 = vrot.slane %v1018_v54, %v9068_v41  ;;  %v1033_v42 = vrot.slane %v1019_v55, %v9068_v41  ;;  %v1042_v20 = vrot.slane %v1034_v16, %v9068_v41  ;;  %v1049_v59 = vrot.slane %v1035_v48, %v9068_v41 }
 0x37a   : > { %v1758_v40 = vrot.slane %v1750_v56, %v9068_v41  ;;  %v1765_v63 = vrot.slane %v1751_v58, %v9068_v41  ;;  %v1774_v2 = vrot.slane %v1766_v37, %v9068_v41  ;;  %v1781_v49 = vrot.slane %v1767_v38, %v9068_v41 }
 0x37b   : > { %v919_v8 = vpop.permute.xlu1 %918  ;;  %v7213_v47 = vcombine.low %v1026_v27, %v1033_v42  ;;  %v7215_v14 = vcombine.high %v1026_v27, %v1033_v42  ;;  %v7217_v44 = vcombine.low %v1042_v20, %v1049_v59  ;;  %v7219_v7 = vcombine.high %v1042_v20, %v1049_v59 }
 0x37c   : > { %v7237_v50 = vcombine.low %v1758_v40, %v1765_v63  ;;  %v7239_v15 = vcombine.high %v1758_v40, %v1765_v63  ;;  %v7241_v61 = vcombine.low %v1774_v2, %v1781_v49  ;;  %v7243_v11 = vcombine.high %v1774_v2, %v1781_v49 }
 0x37d   : > { %v9296_v32 = vrot.slane %v7213_v47, %v9063_v34  ;;  %v9299_v54 = vrot.slane %v7215_v14, %v9063_v34  ;;  %v9302_v55 = vrot.slane %v7217_v44, %v9063_v34  ;;  %v9305_v16 = vrot.slane %v7219_v7, %v9063_v34 }
 0x37e   : > { %v10223_v56 = vcombine.high %v9194_v18, %v9197_v29  ;;  %v10224_v37 = vcombine.high %v9188_v9, %v9191_v10  ;;  %7820 = vmatmul.mubr.msk.bf16.vlgmr.msra.gmra.mrb[4].mxu1 %vm2666_vm5, %v1466_v53  ;;  %v2718_v27 = vsel %vm2666_vm5, %v2063_v62, 0  ;;  %v1090_v42 = vcombine.low %v9134_v60, %v9282_v43 }
 0x37f   : > { %v9307_v48 = vpop.permute.xlu1 %2074  ;;  %v10225_v20 = vcombine.high %v9200_v17, %v9203_v28  ;;  %7824 = vmatpush3.bf16.xpose.msra.mxu1 %v2718_v27  ;;  %v9332_v29 = vrot.slane %v7237_v50, %v9063_v34  ;;  %v1091_v9 = vcombine.high %v9134_v60, %v9282_v43  ;;  %v1323_v10 = vcombine.high %v9206_v31, %v9225_v5  ;;  %v2085_v28 = vpop.permute.xlu0 %2084 }
 0x380   : > { %v9313_v58 = vrot.slane %v10223_v56, %v9068_v41  ;;  %v9319_v38 = vrot.slane %v10224_v37, %v9063_v34  ;;  %v9339_v53 = vrot.slane %v7239_v15, %v9063_v34  ;;  %v9342_v62 = vrot.slane %v7241_v61, %v9063_v34  ;;  %7825 = vmatprep.mubr.msk.bf16.mxu1 %vm8597_vm0, %v8595_v13 }
 0x381   : > { %v9329_v18 = vrot.slane %v10225_v20, %v9068_v41  ;;  %v1459_v17 = vcombine.high %v9235_v45, %v9238_v46  ;;  %7829 = vmatprep.subr.bf16.mxu1 %v8595_v13  ;;  %v1274_v60 = vcombine.low %v9296_v32, %v9299_v54  ;;  %v1275_v31 = vcombine.high %v9296_v32, %v9299_v54 }
 0x382   : > { %v1306_v5 = vcombine.low %v9302_v55, %v9305_v16  ;;  %v9356_v43 = vrot.slane %v7243_v11, %v9063_v34  ;;  %v1098_v59 = vrot.slane %v1090_v42, %v9063_v34  ;;  %v10226_v45 = vcombine.high %v9093_v23, %v9096_v24 }
 0x383   : > { %v10227_v40 = vcombine.high %v9099_v25, %v9102_v26  ;;  %v1991_v2 = vcombine.high %v9145_v4, %v9209_v33  ;;  %v2023_v49 = vcombine.high %v9212_v35, %v9215_v36  ;;  %v2130_v47 = vcombine.low %v2073_v39, %v2085_v28  ;;  %v2079_v7 = vpop.permute.xlu1 %2078 }
 0x384   : > { %v1869_v46 = vrot.slane %v10226_v45, %v9068_v41  ;;  %v2131_v14 = vcombine.high %v2073_v39, %v2085_v28  ;;  %v1106_v44 = vcombine.low %v9169_v30, %v919_v8  ;;  %v1105_v50 = vrot.slane %v1091_v9, %v9063_v34 }
 0x385   : > { %v1901_v63 = vrot.slane %v10227_v40, %v9068_v41  ;;  %v1467_v23 = vpack.c.bf16 %v1459_v17, %v1323_v10  ;;  %v2005_v24 = vrot.slane %v1991_v2, %v9068_v41  ;;  %v1107_v15 = vcombine.high %v9169_v30, %v919_v8 }
 0x386   : > { %v9376_v25 = vrot.slane %v1274_v60, %v9068_v41  ;;  %v2037_v4 = vrot.slane %v2023_v49, %v9068_v41  ;;  %v1114_v33 = vrot.slane %v1106_v44, %v9063_v34  ;;  %v2138_v35 = vrot.slane %v2130_v47, %v9063_v34 }
 0x387   : > { %v1920_v26 = vcombine.low %v1869_v46, %v1901_v63  ;;  %7826 = vmatmul.mubr.msk.bf16.vlgmr.msra.gmra.mrb[8].mxu1 %vm2666_vm5, %v1467_v23  ;;  %v2145_v36 = vrot.slane %v2131_v14, %v9063_v34  ;;  %v1121_v39 = vrot.slane %v1107_v15, %v9063_v34  ;;  %v2114_v61 = vcombine.low %v9032_v21, %v2079_v7 }
 0x388   : > { %v2056_v11 = vcombine.low %v2005_v24, %v2037_v4  ;;  %v1154_v30 = vcombine.low %v1098_v59, %v1114_v33  ;;  %v1155_v8 = vcombine.high %v1098_v59, %v1114_v33  ;;  %7831 = vmatprep.mubr.msk.bf16.mxu1 %vm8597_vm0, %v8595_v13  ;;  %v2057_v56 = vcombine.high %v2005_v24, %v2037_v4 }
 0x389   : > { %v1170_v37 = vcombine.low %v1105_v50, %v1121_v39  ;;  %v1171_v27 = vcombine.high %v1105_v50, %v1121_v39  ;;  %v1460_v42 = vcombine.low %v9313_v58, %v9329_v18  ;;  %v2115_v20 = vcombine.high %v9032_v21, %v2079_v7 }
 0x38a   : > { %v2064_v9 = vpack.c.bf16 %v2056_v11, %v1920_v26  ;;  %v1162_v10 = vrot.slane %v1154_v30, %v9068_v41  ;;  %v1169_v17 = vrot.slane %v1155_v8, %v9068_v41  ;;  %v1921_v28 = vcombine.high %v1869_v46, %v1901_v63  ;;  %v2081_v26 = vpop.permute.xlu1 %2080 }
 0x38b   : > { %v1178_v60 = vrot.slane %v1170_v37, %v9068_v41  ;;  %v1185_v59 = vrot.slane %v1171_v27, %v9068_v41  ;;  %v2122_v45 = vrot.slane %v2114_v61, %v9063_v34  ;;  %v2129_v40 = vrot.slane %v2115_v20, %v9063_v34 }
 0x38c   : > { %v2765_v2 = vsel %vm2666_vm5, %v2064_v9, 0  ;;  %v7221_v49 = vcombine.low %v1162_v10, %v1169_v17  ;;  %v7223_v47 = vcombine.high %v1162_v10, %v1169_v17  ;;  %v2065_v14 = vpack.c.bf16 %v2057_v56, %v1921_v28 }
 0x38d   : > { %7830 = vmatpush3.bf16.xpose.msra.mxu1 %v2765_v2  ;;  %v7225_v44 = vcombine.low %v1178_v60, %v1185_v59  ;;  %v7227_v7 = vcombine.high %v1178_v60, %v1185_v59  ;;  %v2178_v50 = vcombine.low %v2122_v45, %v2138_v35  ;;  %v2179_v23 = vcombine.high %v2122_v45, %v2138_v35 }
 0x38e   : > { %v9398_v46 = vrot.slane %v7221_v49, %v9063_v34  ;;  %v9401_v63 = vrot.slane %v7223_v47, %v9063_v34  ;;  %7835 = vmatprep.subr.bf16.mxu1 %v8595_v13  ;;  %v2194_v24 = vcombine.low %v2129_v40, %v2145_v36  ;;  %v2195_v15 = vcombine.high %v2129_v40, %v2145_v36  ;;  %v2087_v49 = vpop.permute.xlu1 %2086 }
 0x38f   : > { %v9405_v4 = vrot.slane %v7225_v44, %v9063_v34  ;;  %v9408_v33 = vrot.slane %v7227_v7, %v9063_v34  ;;  %v2186_v39 = vrot.slane %v2178_v50, %v9068_v41  ;;  %v2193_v35 = vrot.slane %v2179_v23, %v9068_v41 }
 0x390   : > { %v1410_v61 = vcombine.low %v9398_v46, %v9401_v63  ;;  %v1324_v11 = vcombine.low %v9222_v12, %v9228_v6  ;;  %v2202_v30 = vrot.slane %v2194_v24, %v9068_v41  ;;  %v2209_v36 = vrot.slane %v2195_v15, %v9068_v41 }
 0x391   : > { %v9422_v8 = vrot.slane %v1306_v5, %v9068_v41  ;;  %v1442_v56 = vcombine.low %v9405_v4, %v9408_v33  ;;  %v7244_v37 = vcombine.low %v2186_v39, %v2193_v35  ;;  %v7246_v27 = vcombine.high %v2186_v39, %v2193_v35 }
 0x392   : > { %v1468_v20 = vpack.c.bf16 %v1460_v42, %v1324_v11  ;;  %v2812_v9 = vsel %vm2666_vm5, %v2065_v14, 0  ;;  %v7248_v10 = vcombine.low %v2202_v30, %v2209_v36  ;;  %v7250_v17 = vcombine.high %v2202_v30, %v2209_v36 }
 0x393   : > { %v1411_v28 = vcombine.high %v9398_v46, %v9401_v63  ;;  %v9430_v60 = vrot.slane %v1410_v61, %v9068_v41  ;;  %v1443_v5 = vcombine.high %v9405_v4, %v9408_v33  ;;  %v9435_v59 = vrot.slane %v1442_v56, %v9068_v41 }
 0x394   : > { %7832 = vmatmul.mubr.msk.bf16.vlgmr.msra.gmra.mrb[12].mxu1 %vm2666_vm5, %v1468_v20  ;;  %v9439_v42 = vrot.slane %v7244_v37, %v9063_v34  ;;  %v9442_v45 = vrot.slane %v7246_v27, %v9063_v34  ;;  %v2250_v40 = vcombine.low %v9042_v22, %v2081_v26  ;;  %v2251_v2 = vcombine.high %v9042_v22, %v2081_v26 }
 0x395   : > { %7836 = vmatpush3.bf16.xpose.msra.mxu1 %v2812_v9  ;;  %v9447_v47 = vrot.slane %v7248_v10, %v9063_v34  ;;  %7837 = vmatprep.mubr.msk.bf16.mxu1 %vm8597_vm0, %v8595_v13  ;;  %v1461_v14 = vcombine.high %v9313_v58, %v9329_v18  ;;  %v1870_v44 = vcombine.low %v9257_v51, %v9260_v52 }
 0x396   : > { %v9456_v7 = vrot.slane %v7250_v17, %v9063_v34  ;;  %v1325_v50 = vcombine.high %v9222_v12, %v9228_v6  ;;  %7847 = vmatprep.subr.bf16.mxu1 %v8595_v13  ;;  %v1902_v23 = vcombine.low %v9268_v57, %v9319_v38  ;;  %v2006_v24 = vcombine.low %v9332_v29, %v9339_v53 }
 0x397   : > { %v2258_v15 = vrot.slane %v2250_v40, %v9063_v34  ;;  %v1878_v58 = vrot.slane %v1870_v44, %v9068_v41  ;;  %v2038_v18 = vcombine.low %v9342_v62, %v9356_v43  ;;  %v2266_v26 = vcombine.low %v9307_v48, %v2087_v49 }
 0x398   : > { %v2265_v39 = vrot.slane %v2251_v2, %v9063_v34  ;;  %v1910_v12 = vrot.slane %v1902_v23, %v9068_v41  ;;  %v2014_v6 = vrot.slane %v2006_v24, %v9068_v41  ;;  %v2267_v35 = vcombine.high %v9307_v48, %v2087_v49 }
 0x399   : > { %v1469_v61 = vpack.c.bf16 %v1461_v14, %v1325_v50  ;;  %v2046_v11 = vrot.slane %v2038_v18, %v9068_v41  ;;  %v2274_v30 = vrot.slane %v2266_v26, %v9063_v34  ;;  %v1326_v36 = vcombine.low %v9376_v25, %v9422_v8 }
 0x39a   : > { %v1922_v56 = vcombine.low %v1878_v58, %v1910_v12  ;;  %v1923_v37 = vcombine.high %v1878_v58, %v1910_v12  ;;  %v2281_v27 = vrot.slane %v2267_v35, %v9063_v34  ;;  %v1462_v20 = vcombine.low %v9430_v60, %v9435_v59 }
 0x39b   : > { %v2058_v9 = vcombine.low %v2014_v6, %v2046_v11  ;;  %v2059_v10 = vcombine.high %v2014_v6, %v2046_v11  ;;  %v2314_v17 = vcombine.low %v2258_v15, %v2274_v30  ;;  %v2315_v40 = vcombine.high %v2258_v15, %v2274_v30 }
 0x39c   : > { %7838 = vmatmul.mubr.msk.bf16.vlgmr.msra.gmra.mrb[16].mxu1 %vm2666_vm5, %v1469_v61  ;;  %v2330_v48 = vcombine.low %v2265_v39, %v2281_v27  ;;  %v2331_v2 = vcombine.high %v2265_v39, %v2281_v27  ;;  %v1327_v49 = vcombine.high %v9376_v25, %v9422_v8  ;;  %v1463_v14 = vcombine.high %v9430_v60, %v9435_v59 }
 0x39d   : > { %v2066_v44 = vpack.c.bf16 %v2058_v9, %v1922_v56  ;;  %v2067_v50 = vpack.c.bf16 %v2059_v10, %v1923_v37  ;;  %v2322_v23 = vrot.slane %v2314_v17, %v9068_v41  ;;  %v2329_v24 = vrot.slane %v2315_v40, %v9068_v41  ;;  %7849 = vmatprep.mubr.msk.bf16.mxu1 %vm8597_vm0, %v8595_v13 }
 0x39e   : > { %v2338_v15 = vrot.slane %v2330_v48, %v9068_v41  ;;  %v2345_v58 = vrot.slane %v2331_v2, %v9068_v41  ;;  %v1871_v18 = vcombine.high %v9257_v51, %v9260_v52  ;;  %v1903_v25 = vcombine.high %v9268_v57, %v9319_v38 }
 0x39f   : > { %v2859_v8 = vsel %vm2666_vm5, %v2066_v44, 0  ;;  %v2906_v60 = vsel %vm2666_vm5, %v2067_v50, 0  ;;  %v7252_v59 = vcombine.low %v2322_v23, %v2329_v24  ;;  %v7254_v26 = vcombine.high %v2322_v23, %v2329_v24 }
 0x3a0   : > { %7842 = vmatpush3.bf16.xpose.msra.mxu0 %v2859_v8  ;;  %7848 = vmatpush3.bf16.xpose.msra.mxu1 %v2906_v60  ;;  %v7256_v39 = vcombine.low %v2338_v15, %v2345_v58  ;;  %v7258_v12 = vcombine.high %v2338_v15, %v2345_v58  ;;  %v1885_v6 = vrot.slane %v1871_v18, %v9068_v41 }
 0x3a1   : > { %v2530_v35 = vrot.slane %v7252_v59, %v9063_v34  ;;  %v2546_v61 = vrot.slane %v7254_v26, %v9063_v34  ;;  %7853 = vmatprep.subr.bf16.mxu0 %v8595_v13  ;;  %7859 = vmatprep.subr.bf16.mxu1 %v8595_v13  ;;  %v1917_v51 = vrot.slane %v1903_v25, %v9068_v41 }
 0x3a2   : > { %v2562_v52 = vrot.slane %v7256_v39, %v9063_v34  ;;  %v2578_v57 = vrot.slane %v7258_v12, %v9063_v34  ;;  %v2007_v38 = vcombine.high %v9332_v29, %v9339_v53  ;;  %v2039_v11 = vcombine.high %v9342_v62, %v9356_v43 }
 0x3a3   : > { %v1289_v30 = vrot.slane %v1275_v31, %v9068_v41  ;;  %v1307_v56 = vcombine.high %v9302_v55, %v9305_v16  ;;  %v1470_v37 = vpack.c.bf16 %v1462_v20, %v1326_v36  ;;  %v1471_v27 = vpack.c.bf16 %v1463_v14, %v1327_v49 }
 0x3a4   : > { %v1425_v9 = vrot.slane %v1411_v28, %v9068_v41  ;;  %v1457_v29 = vrot.slane %v1443_v5, %v9068_v41  ;;  %v2021_v53 = vrot.slane %v2007_v38, %v9068_v41  ;;  %v2053_v32 = vrot.slane %v2039_v11, %v9068_v41 }
 0x3a5   : > { %v1924_v54 = vcombine.low %v1885_v6, %v1917_v51  ;;  %v2450_v55 = vcombine.low %v9439_v42, %v9442_v45  ;;  %v2482_v16 = vcombine.low %v9447_v47, %v9456_v7  ;;  %v2586_v62 = vcombine.low %v2530_v35, %v2546_v61 }
 0x3a6   : > { %v2060_v31 = vcombine.low %v2021_v53, %v2053_v32  ;;  %v1925_v43 = vcombine.high %v1885_v6, %v1917_v51  ;;  %v2061_v46 = vcombine.high %v2021_v53, %v2053_v32  ;;  %v2618_v63 = vcombine.low %v2562_v52, %v2578_v57 }
 0x3a7   : > { %7844 = vmatmul.mubr.msk.bf16.vlgmr.msra.gmra.mrb[4].mxu0 %vm2666_vm5, %v1470_v37  ;;  %7850 = vmatmul.mubr.msk.bf16.vlgmr.msra.gmra.mrb[20].mxu1 %vm2666_vm5, %v1471_v27  ;;  %v2458_v4 = vrot.slane %v2450_v55, %v9068_v41  ;;  %v2490_v33 = vrot.slane %v2482_v16, %v9068_v41  ;;  %v2594_v28 = vrot.slane %v2586_v62, %v9068_v41 }
 0x3a8   : > { %v2068_v5 = vpack.c.bf16 %v2060_v31, %v1924_v54  ;;  %v2069_v36 = vpack.c.bf16 %v2061_v46, %v1925_v43  ;;  %7855 = vmatprep.mubr.msk.bf16.mxu0 %vm8597_vm0, %v8595_v13  ;;  %7861 = vmatprep.mubr.msk.bf16.mxu1 %vm8597_vm0, %v8595_v13  ;;  %v2626_v20 = vrot.slane %v2618_v63, %v9068_v41 }
 0x3a9   : > { %v1321_v10 = vrot.slane %v1307_v56, %v9068_v41  ;;  %v1464_v17 = vcombine.low %v1425_v9, %v1457_v29  ;;  %v2451_v40 = vcombine.high %v9439_v42, %v9442_v45  ;;  %v2483_v48 = vcombine.high %v9447_v47, %v9456_v7 }
 0x3aa   : > { %v2953_v2 = vsel %vm2666_vm5, %v2068_v5, 0  ;;  %v3000_v49 = vsel %vm2666_vm5, %v2069_v36, 0  ;;  %v2650_v14 = vcombine.low %v2594_v28, %v2626_v20  ;;  %v2651_v44 = vcombine.high %v2594_v28, %v2626_v20 }
 0x3ab   : > { %7854 = vmatpush3.bf16.xpose.msra.mxu0 %v2953_v2  ;;  %7860 = vmatpush3.bf16.xpose.msra.mxu1 %v3000_v49  ;;  %v2465_v50 = vrot.slane %v2451_v40, %v9068_v41  ;;  %v2497_v23 = vrot.slane %v2483_v48, %v9068_v41  ;;  %v2587_v24 = vcombine.high %v2530_v35, %v2546_v61 }
 0x3ac   : > { %v1465_v15 = vcombine.high %v1425_v9, %v1457_v29  ;;  %7865 = vmatprep.subr.bf16.mxu0 %v8595_v13  ;;  %7871 = vmatprep.subr.bf16.mxu1 %v8595_v13  ;;  %v2514_v42 = vcombine.low %v2458_v4, %v2490_v33  ;;  %v2619_v45 = vcombine.high %v2562_v52, %v2578_v57 }
 0x3ad   : > { %v2515_v47 = vcombine.high %v2458_v4, %v2490_v33  ;;  %v2516_v7 = vcombine.low %v2465_v50, %v2497_v23  ;;  %v2601_v58 = vrot.slane %v2587_v24, %v9068_v41  ;;  %v2517_v18 = vcombine.high %v2465_v50, %v2497_v23 }
 0x3ae   : > { %v1328_v25 = vcombine.low %v1289_v30, %v1321_v10  ;;  %v1329_v8 = vcombine.high %v1289_v30, %v1321_v10  ;;  %v2633_v60 = vrot.slane %v2619_v45, %v9068_v41  ;;  %v2658_v59 = vpack.c.bf16 %v2650_v14, %v2514_v42 }
 0x3af   : > { %v2659_v26 = vpack.c.bf16 %v2651_v44, %v2515_v47 }
 0x3b0   : > { %v1472_v39 = vpack.c.bf16 %v1464_v17, %v1328_v25  ;;  %v1473_v12 = vpack.c.bf16 %v1465_v15, %v1329_v8  ;;  %v2652_v6 = vcombine.low %v2601_v58, %v2633_v60  ;;  %v2653_v35 = vcombine.high %v2601_v58, %v2633_v60 }
 0x3b2   : > { %7856 = vmatmul.mubr.msk.bf16.vlgmr.msra.gmra.mrb[8].mxu0 %vm2666_vm5, %v1472_v39  ;;  %7862 = vmatmul.mubr.msk.bf16.vlgmr.msra.gmra.mrb[24].mxu1 %vm2666_vm5, %v1473_v12  ;;  %v9555_v61 = vpack.c.bf16 %v2652_v6, %v2516_v7  ;;  %v9557_v51 = vpack.c.bf16 %v2653_v35, %v2517_v18  ;;  %v9641_v35 = vpop.permute.xlu0 %2090 }
 0x3b3   : > { %7866 = vmatpush3.bf16.msra.mxu0 %v2658_v59  ;;  %7872 = vmatpush3.bf16.msra.mxu1 %v2659_v26  ;;  %v9633_v26 = vpop.permute.xlu1 %2092 }
 0x3b4   : > { %7867 = vmatprep.mubr.msk.bf16.mxu0 %vm8597_vm0, %v8595_v13  ;;  %7877 = vmatprep.subr.bf16.mxu0 %v8595_v13 }
 0x3b5   : > { %7873 = vmatprep.mubr.msk.bf16.mxu1 %vm8597_vm0, %v8595_v13  ;;  %7883 = vmatprep.subr.bf16.mxu1 %v8595_v13 }
 0x3b7   : > { %v9635_v39 = vpop.permute.xlu1 %2096 }
 0x3bb   : > { %v9637_v12 = vpop.permute.xlu1 %2098 }
 0x451   : > { %v9565_v52 = vpop.f32.mrb[4].mxu1 }
 0x452   : > { %v7821_v57 = vpop.f32.mrb[5].mxu1  ;;  %v3043_v38 = vsel %vm2666_vm5, %v9565_v52, -inf }
 0x453   : > { %3044 = vmax.xlane.f32.xlu0 %v3043_v38  ;;  %v9569_v11 = vpop.f32.mrb[6].mxu1 }
 0x454   : > { %v7822_v30 = vpop.f32.mrb[7].mxu1  ;;  %v3046_v56 = vsel %vm2666_vm5, %v9569_v11, -inf }
 0x455   : > { %3047 = vmax.xlane.f32.xlu1 %v3046_v56 }
 0x45a   : > { %v9573_v37 = vpop.f32.mrb[8].mxu1 }
 0x45b   : > { %v7827_v27 = vpop.f32.mrb[9].mxu1  ;;  %v3049_v40 = vsel %vm2666_vm5, %v9573_v37, -inf }
 0x45c   : > { %v9575_v9 = vpop.f32.mrb[10].mxu1 }
 0x45d   : > { %v7828_v29 = vpop.f32.mrb[11].mxu1  ;;  %v3052_v45 = vsel %vm2666_vm5, %v9575_v9, -inf }
 0x467   : > { %v9577_v53 = vpop.f32.mrb[12].mxu1 }
 0x468   : > { %v7833_v32 = vpop.f32.mrb[13].mxu1  ;;  %v3055_v7 = vsel %vm2666_vm5, %v9577_v53, -inf }
 0x469   : > { %v9579_v54 = vpop.f32.mrb[14].mxu1 }
 0x46a   : > { %v7834_v55 = vpop.f32.mrb[15].mxu1  ;;  %v3058_v47 = vsel %vm2666_vm5, %v9579_v54, -inf }
 0x46f   : > { %v9581_v16 = vpop.f32.mrb[16].mxu1 }
 0x470   : > { %v7839_v62 = vpop.f32.mrb[17].mxu1  ;;  %v3061_v18 = vsel %vm2666_vm5, %v9581_v16, -inf }
 0x471   : > { %v9583_v31 = vpop.f32.mrb[18].mxu1 }
 0x472   : > { %v7840_v43 = vpop.f32.mrb[19].mxu1  ;;  %v3064_v58 = vsel %vm2666_vm5, %v9583_v31, -inf }
 0x47a   : > { %v9585_v46 = vpop.f32.mrb[4].mxu0  ;;  %v9587_v63 = vpop.f32.mrb[20].mxu1 }
 0x47b   : > { %v7845_v4 = vpop.f32.mrb[5].mxu0  ;;  %v7851_v33 = vpop.f32.mrb[21].mxu1  ;;  %v3067_v28 = vsel %vm2666_vm5, %v9585_v46, -inf  ;;  %v3073_v8 = vsel %vm2666_vm5, %v9587_v63, -inf }
 0x47c   : > { %v9591_v5 = vpop.f32.mrb[22].mxu1  ;;  %3068 = vmax.xlane.f32.xlu0 %v3067_v28  ;;  %v9593_v36 = vpop.f32.mrb[6].mxu0 }
 0x47d   : > { %v7846_v20 = vpop.f32.mrb[7].mxu0  ;;  %v7852_v10 = vpop.f32.mrb[23].mxu1  ;;  %v3070_v17 = vsel %vm2666_vm5, %v9593_v36, -inf  ;;  %v3076_v25 = vsel %vm2666_vm5, %v9591_v5, -inf }
 0x47e   : > { %3071 = vmax.xlane.f32.xlu1 %v3070_v17 }
 0x480   : > { %3050 = vmax.xlane.f32.xlu0 %v3049_v40 }
 0x485   : > { %v9599_v48 = vpop.f32.mrb[8].mxu0  ;;  %v9601_v2 = vpop.f32.mrb[24].mxu1 }
 0x486   : > { %v7857_v49 = vpop.f32.mrb[9].mxu0  ;;  %v7863_v14 = vpop.f32.mrb[25].mxu1  ;;  %v3079_v44 = vsel %vm2666_vm5, %v9599_v48, -inf  ;;  %v3085_v59 = vsel %vm2666_vm5, %v9601_v2, -inf }
 0x487   : > { %v9605_v50 = vpop.f32.mrb[26].mxu1  ;;  %3080 = vmax.xlane.f32.xlu0 %v3079_v44  ;;  %v9607_v23 = vpop.f32.mrb[10].mxu0 }
 0x488   : > { %v7858_v24 = vpop.f32.mrb[11].mxu0  ;;  %v7864_v15 = vpop.f32.mrb[27].mxu1  ;;  %v3082_v42 = vsel %vm2666_vm5, %v9607_v23, -inf  ;;  %v3088_v60 = vsel %vm2666_vm5, %v9605_v50, -inf }
 0x489   : > { %3083 = vmax.xlane.f32.xlu1 %v3082_v42 }
 0x48b   : > { %3053 = vmax.xlane.f32.xlu0 %v3052_v45 }
 0x48d   : > { %3059 = vmax.xlane.f32.xlu1 %v3058_v47 }
 0x48f   : > { %3056 = vmax.xlane.f32.xlu0 %v3055_v7 }
 0x491   : > { %3065 = vmax.xlane.f32.xlu1 %v3064_v58 }
 0x493   : > { %3062 = vmax.xlane.f32.xlu0 %v3061_v18 }
 0x495   : > { %3077 = vmax.xlane.f32.xlu1 %v3076_v25 }
 0x497   : > { %3074 = vmax.xlane.f32.xlu0 %v3073_v8 }
 0x499   : > { %3089 = vmax.xlane.f32.xlu1 %v3088_v60 }
 0x4aa   : > { %2104 = vrot.lane.b32.xlu1 %v9042_v22, %s8603_s27 }
 0x4ad   : > { %2102 = vrot.lane.b32.xlu0 %v9032_v21, %s8603_s27 }
 0x4cc   : > { %3086 = vmax.xlane.f32.xlu0 %v3085_v59 }
 0x4e0   : > { %v3045_v30 = vpop.xlane.xlu0 %3044 }
 0x4e1   : > { %v3091_v56 = vsub.f32 %v9565_v52, %v3045_v30 }
 0x4e2   : > { %2108 = vrot.lane.b32.xlu0 %v9032_v21, %s8604_s20  ;;  %v3048_v6 = vpop.xlane.xlu1 %3047 }
 0x4e3   : > { %v3092_v57 = vsub.f32 %v9569_v11, %v3048_v6  ;;  %v3107_v27 = vmul.f32 1.442695, %v3091_v56 }
 0x4e5   : > { %v3109_v38 = vmul.f32 1.442695, %v3092_v57 }
 0x4e7   : > { %8257 = vpow2.f32 %v3109_v38 }
 0x4e8   : > { %8259 = vpow2.f32 %v3107_v27 }
 0x4f1   : > { %v9645_v29 = vpop.eup %8257 }
 0x4f2   : > { %v3142_v32 = vsel %vm2666_vm5, %v9645_v29, 0.0  ;;  %v9649_v55 = vpop.eup %8259 }
 0x4f3   : > { %3143 = vadd.xlane.f32.xlu1 %v3142_v32  ;;  %v3139_v21 = vsel %vm2666_vm5, %v9649_v55, 0.0 }
 0x501   : > { %3140 = vadd.xlane.f32.xlu0 %v3139_v21 }
 0x509   : > { %v3069_v11 = vpop.xlane.xlu0 %3068 }
 0x50a   : > { %v3099_v62 = vsub.f32 %v9585_v46, %v3069_v11 }
 0x50b   : > { %v3072_v43 = vpop.xlane.xlu1 %3071 }
 0x50c   : > { %v3123_v4 = vmul.f32 1.442695, %v3099_v62  ;;  %v3100_v52 = vsub.f32 %v9593_v36, %v3072_v43 }
 0x50d   : > { %v3051_v33 = vpop.xlane.xlu0 %3050 }
 0x50e   : > { %8261 = vpow2.f32 %v3123_v4  ;;  %v3125_v28 = vmul.f32 1.442695, %v3100_v52  ;;  %v3093_v20 = vsub.f32 %v9573_v37, %v3051_v33 }
 0x510   : > { %8263 = vpow2.f32 %v3125_v28  ;;  %v3111_v10 = vmul.f32 1.442695, %v3093_v20 }
 0x512   : > { %8265 = vpow2.f32 %v3111_v10 }
 0x514   : > { %v3081_v17 = vpop.xlane.xlu0 %3080 }
 0x515   : > { %v3103_v21 = vsub.f32 %v9599_v48, %v3081_v17 }
 0x516   : > { %v9656_v40 = vpop.xlane.xlu1 %3083 }
 0x517   : > { %v3104_v49 = vsub.f32 %v9607_v23, %v9656_v40 }
 0x518   : > { %v9660_v14 = vpop.eup %8261  ;;  %v3054_v46 = vpop.xlane.xlu0 %3053 }
 0x519   : > { %v3094_v44 = vsub.f32 %v9575_v9, %v3054_v46  ;;  %v3163_v36 = vsel %vm2666_vm5, %v9660_v14, 0.0 }
 0x51a   : > { %v9665_v24 = vpop.eup %8263  ;;  %v3060_v37 = vpop.xlane.xlu1 %3059  ;;  %3164 = vadd.xlane.f32.xlu0 %v3163_v36 }
 0x51b   : > { %v3113_v15 = vmul.f32 1.442695, %v3094_v44  ;;  %v3096_v42 = vsub.f32 %v9579_v54, %v3060_v37  ;;  %v3166_v45 = vsel %vm2666_vm5, %v9665_v24, 0.0 }
 0x51c   : > { %v9670_v47 = vpop.eup %8265  ;;  %v3057_v7 = vpop.xlane.xlu0 %3056  ;;  %3167 = vadd.xlane.f32.xlu1 %v3166_v45 }
 0x51d   : > { %8267 = vpow2.f32 %v3113_v15  ;;  %v3117_v58 = vmul.f32 1.442695, %v3096_v42  ;;  %v3095_v9 = vsub.f32 %v9577_v53, %v3057_v7  ;;  %v3145_v18 = vsel %vm2666_vm5, %v9670_v47, 0.0 }
 0x51e   : > { %v3066_v25 = vpop.xlane.xlu1 %3065  ;;  %3146 = vadd.xlane.f32.xlu0 %v3145_v18  ;;  %v3133_v15 = vmul.f32 1.442695, %v3104_v49 }
 0x51f   : > { %8269 = vpow2.f32 %v3117_v58  ;;  %v3115_v8 = vmul.f32 1.442695, %v3095_v9  ;;  %v3098_v54 = vsub.f32 %v9583_v31, %v3066_v25 }
 0x520   : > { %v3063_v60 = vpop.xlane.xlu0 %3062 }
 0x521   : > { %8271 = vpow2.f32 %v3115_v8  ;;  %v3097_v59 = vsub.f32 %v9581_v16, %v3063_v60  ;;  %v3121_v6 = vmul.f32 1.442695, %v3098_v54 }
 0x522   : > { %v3078_v57 = vpop.xlane.xlu1 %3077 }
 0x523   : > { %v3119_v38 = vmul.f32 1.442695, %v3097_v59  ;;  %v3102_v30 = vsub.f32 %v9591_v5, %v3078_v57  ;;  %v3131_v5 = vmul.f32 1.442695, %v3103_v21 }
 0x524   : > { %v3075_v56 = vpop.xlane.xlu0 %3074 }
 0x525   : > { %8273 = vpow2.f32 %v3119_v38  ;;  %v3129_v53 = vmul.f32 1.442695, %v3102_v30  ;;  %v3101_v27 = vsub.f32 %v9587_v63, %v3075_v56 }
 0x526   : > { %8275 = vpow2.f32 %v3121_v6  ;;  %v3090_v36 = vpop.xlane.xlu1 %3089 }
 0x527   : > { %v9679_v32 = vpop.eup %8267  ;;  %8277 = vpow2.f32 %v3129_v53  ;;  %v3127_v31 = vmul.f32 1.442695, %v3101_v27  ;;  %v3106_v42 = vsub.f32 %v9605_v50, %v3090_v36 }
 0x528   : > { %v3148_v16 = vsel %vm2666_vm5, %v9679_v32, 0.0  ;;  %v2103_v37 = vpop.permute.xlu0 %2102 }
 0x529   : > { %v9684_v11 = vpop.eup %8269  ;;  %3149 = vadd.xlane.f32.xlu1 %v3148_v16  ;;  %8279 = vpow2.f32 %v3127_v31  ;;  %v3137_v58 = vmul.f32 1.442695, %v3106_v42  ;;  %v2146_v21 = vcombine.low %v9641_v35, %v2103_v37 }
 0x52a   : > { %v3154_v63 = vsel %vm2666_vm5, %v9684_v11, 0.0  ;;  %8281 = vpow2.f32 %v3131_v5  ;;  %v9731_v40 = vpop.permute.xlu1 %2104 }
 0x52b   : > { %v9686_v62 = vpop.eup %8271  ;;  %8283 = vpow2.f32 %v3133_v15  ;;  %v2154_v16 = vrot.slane %v2146_v21, %v9063_v34 }
 0x52c   : > { %v3151_v43 = vsel %vm2666_vm5, %v9686_v62, 0.0 }
 0x52d   : > { %3155 = vadd.xlane.f32.xlu1 %v3154_v63  ;;  %3152 = vadd.xlane.f32.xlu0 %v3151_v43 }
 0x52f   : > { %v9692_v48 = vpop.eup %8273 }
 0x530   : > { %v9694_v4 = vpop.eup %8275  ;;  %v3157_v52 = vsel %vm2666_vm5, %v9692_v48, 0.0 }
 0x531   : > { %v9698_v33 = vpop.eup %8277  ;;  %3158 = vadd.xlane.f32.xlu0 %v3157_v52  ;;  %v3160_v20 = vsel %vm2666_vm5, %v9694_v4, 0.0 }
 0x532   : > { %v3172_v28 = vsel %vm2666_vm5, %v9698_v33, 0.0 }
 0x533   : > { %3173 = vadd.xlane.f32.xlu1 %v3172_v28  ;;  %v9704_v10 = vpop.eup %8279 }
 0x534   : > { %v3169_v17 = vsel %vm2666_vm5, %v9704_v10, 0.0  ;;  %v9708_v46 = vpop.eup %8281 }
 0x535   : > { %3161 = vadd.xlane.f32.xlu0 %v3160_v20  ;;  %v3175_v44 = vsel %vm2666_vm5, %v9708_v46, 0.0  ;;  %v9719_v18 = vpop.eup %8283 }
 0x539   : > { %3170 = vadd.xlane.f32.xlu0 %v3169_v17 }
 0x53d   : > { %3176 = vadd.xlane.f32.xlu0 %v3175_v44 }
 0x544   : > { %2110 = vrot.lane.b32.xlu1 %v9042_v22, %s8604_s20  ;;  %v3178_v22 = vsel %vm2666_vm5, %v9719_v18, 0.0 }
 0x559   : > { %v3087_v45 = vpop.xlane.xlu0 %3086 }
 0x55a   : > { %v3105_v7 = vsub.f32 %v9601_v2, %v3087_v45 }
 0x55c   : > { %v3135_v9 = vmul.f32 1.442695, %v3105_v7 }
 0x55d   : > { %v2109_v49 = vpop.permute.xlu0 %2108 }
 0x55e   : > { %8285 = vpow2.f32 %v3135_v9  ;;  %v2162_v56 = vcombine.low %v9635_v39, %v2109_v49  ;;  %v2283_v9 = vcombine.high %v9633_v26, %v9731_v40 }
 0x55f   : > { %8287 = vpow2.f32 %v3137_v58  ;;  %v2282_v58 = vcombine.low %v9633_v26, %v9731_v40 }
 0x560   : > { %v2170_v31 = vrot.slane %v2162_v56, %v9063_v34  ;;  %v2297_v40 = vrot.slane %v2283_v9, %v9063_v34 }
 0x562   : > { %v2210_v43 = vcombine.low %v2154_v16, %v2170_v31  ;;  %v2211_v52 = vcombine.high %v2154_v16, %v2170_v31 }
 0x564   : > { %v2225_v44 = vrot.slane %v2211_v52, %v9068_v41 }
 0x568   : > { %v9723_v25 = vpop.eup %8285  ;;  %3179 = vadd.xlane.f32.xlu1 %v3178_v22 }
 0x569   : > { %v3181_v23 = vsel %vm2666_vm5, %v9723_v25, 0.0  ;;  %v9727_v50 = vpop.eup %8287 }
 0x56a   : > { %3182 = vadd.xlane.f32.xlu0 %v3181_v23  ;;  %v3184_v2 = vsel %vm2666_vm5, %v9727_v50, 0.0 }
 0x56e   : > { %3185 = vadd.xlane.f32.xlu0 %v3184_v2 }
 0x580   : > { %v3144_v8 = vpop.xlane.xlu1 %3143 }
 0x581   : > { %8289 = vrcp.f32 %v3144_v8 }
 0x58b   : > { %v8290_v60 = vpop.eup %8289 }
 0x58c   : > { %v3204_v6 = vmul.f32 %v8290_v60, %v9645_v29  ;;  %v2163_v29 = vcombine.high %v9635_v39, %v2109_v49 }
 0x58e   : > { %v3141_v54 = vpop.xlane.xlu0 %3140  ;;  %v2177_v5 = vrot.slane %v2163_v29, %v9063_v34 }
 0x58f   : > { %8291 = vrcp.f32 %v3141_v54 }
 0x599   : > { %v8292_v59 = vpop.eup %8291 }
 0x59a   : > { %v3203_v57 = vmul.f32 %v8292_v59, %v9649_v55  ;;  %v2147_v55 = vcombine.high %v9641_v35, %v2103_v37  ;;  %v2218_v35 = vrot.slane %v2210_v43, %v9068_v41 }
 0x59c   : > { %v3219_v38 = vpack.c.bf16 %v3204_v6, %v3203_v57  ;;  %v2161_v63 = vrot.slane %v2147_v55, %v9063_v34  ;;  %v7245_v22 = vcombine.low %v2218_v35, %v2225_v44  ;;  %v7247_v8 = vcombine.high %v2218_v35, %v2225_v44 }
 0x59e   : > { %7868 = vmatmul.mubr.msk.bf16.vlgmr.msra.gmra.mrb[12].mxu0 %vm2666_vm5, %v3219_v38  ;;  %v2226_v17 = vcombine.low %v2161_v63, %v2177_v5  ;;  %v2227_v39 = vcombine.high %v2161_v63, %v2177_v5  ;;  %v2290_v38 = vrot.slane %v2282_v58, %v9063_v34 }
 0x59f   : > { %7878 = vmatpush3.bf16.msra.mxu0 %v9555_v61  ;;  %7879 = vmatprep.mubr.msk.bf16.mxu0 %vm8597_vm0, %v8595_v13 }
 0x5a0   : > { %7889 = vmatprep.subr.bf16.mxu0 %v8595_v13  ;;  %v2234_v15 = vrot.slane %v2226_v17, %v9068_v41  ;;  %v2241_v42 = vrot.slane %v2227_v39, %v9068_v41 }
 0x5a2   : > { %v7249_v54 = vcombine.low %v2234_v15, %v2241_v42  ;;  %v7251_v60 = vcombine.high %v2234_v15, %v2241_v42 }
 0x5a7   : > { %v3165_v30 = vpop.xlane.xlu0 %3164 }
 0x5a9   : > { %v3168_v53 = vpop.xlane.xlu1 %3167 }
 0x5ab   : > { %v3147_v27 = vpop.xlane.xlu0 %3146 }
 0x5ac   : > { %8293 = vrcp.f32 %v3147_v27 }
 0x5b6   : > { %v3150_v61 = vpop.xlane.xlu1 %3149  ;;  %v8294_v37 = vpop.eup %8293 }
 0x5b7   : > { %8295 = vrcp.f32 %v3150_v61  ;;  %v3205_v23 = vmul.f32 %v8294_v37, %v9670_v47  ;;  %v2401_v47 = vrot.slane %v7245_v22, %v9063_v34 }
 0x5ba   : > { %v3156_v28 = vpop.xlane.xlu1 %3155  ;;  %v3153_v20 = vpop.xlane.xlu0 %3152 }
 0x5bb   : > { %8297 = vrcp.f32 %v3156_v28 }
 0x5bc   : > { %8299 = vrcp.f32 %v3153_v20 }
 0x5be   : > { %v3159_v36 = vpop.xlane.xlu0 %3158 }
 0x5bf   : > { %8301 = vrcp.f32 %v3159_v36 }
 0x5c0   : > { %v3174_v45 = vpop.xlane.xlu1 %3173 }
 0x5c1   : > { %v8296_v7 = vpop.eup %8295 }
 0x5c2   : > { %v3206_v2 = vmul.f32 %v8296_v7, %v9679_v32  ;;  %v3162_v49 = vpop.xlane.xlu0 %3161 }
 0x5c3   : > { %8303 = vrcp.f32 %v3162_v49 }
 0x5c4   : > { %v2111_v59 = vpop.permute.xlu1 %2110  ;;  %v3220_v6 = vpack.c.bf16 %v3206_v2, %v3205_v23  ;;  %8305 = vrcp.f32 %v3165_v30  ;;  %v2433_v30 = vrot.slane %v7249_v54, %v9063_v34 }
 0x5c5   : > { %v8298_v57 = vpop.eup %8297  ;;  %v2298_v56 = vcombine.low %v9637_v12, %v2111_v59  ;;  %v2299_v27 = vcombine.high %v9637_v12, %v2111_v59  ;;  %8307 = vrcp.f32 %v3168_v53  ;;  %v2417_v12 = vrot.slane %v7247_v8, %v9063_v34 }
 0x5c6   : > { %v8300_v26 = vpop.eup %8299  ;;  %v3208_v32 = vmul.f32 %v8298_v57, %v9684_v11  ;;  %7874 = vmatmul.mubr.msk.bf16.vlgmr.msra.gmra.mrb[28].mxu1 %vm2666_vm5, %v3220_v6  ;;  %v3171_v21 = vpop.xlane.xlu0 %3170  ;;  %v2449_v11 = vrot.slane %v7251_v60, %v9063_v34 }
 0x5c7   : > { %v3207_v29 = vmul.f32 %v8300_v26, %v9686_v62  ;;  %v2306_v55 = vrot.slane %v2298_v56, %v9063_v34  ;;  %v2313_v31 = vrot.slane %v2299_v27, %v9063_v34  ;;  %7884 = vmatpush3.bf16.msra.mxu1 %v9557_v51  ;;  %7885 = vmatprep.mubr.msk.bf16.mxu1 %vm8597_vm0, %v8595_v13  ;;  %8309 = vrcp.f32 %v3171_v21 }
 0x5c8   : > { %7895 = vmatprep.subr.bf16.mxu1 %v8595_v13  ;;  %8311 = vrcp.f32 %v3174_v45  ;;  %v2466_v20 = vcombine.low %v2401_v47, %v2417_v12  ;;  %v2498_v17 = vcombine.low %v2433_v30, %v2449_v11  ;;  %v2467_v45 = vcombine.high %v2401_v47, %v2417_v12 }
 0x5c9   : > { %v2346_v53 = vcombine.low %v2290_v38, %v2306_v55  ;;  %v2347_v62 = vcombine.high %v2290_v38, %v2306_v55  ;;  %v2362_v61 = vcombine.low %v2297_v40, %v2313_v31  ;;  %v2363_v16 = vcombine.high %v2297_v40, %v2313_v31  ;;  %v8302_v63 = vpop.eup %8301 }
 0x5ca   : > { %v3221_v5 = vpack.c.bf16 %v3208_v32, %v3207_v29  ;;  %v3209_v15 = vmul.f32 %v8302_v63, %v9692_v48  ;;  %v2474_v49 = vrot.slane %v2466_v20, %v9068_v41  ;;  %v2506_v8 = vrot.slane %v2498_v17, %v9068_v41 }
 0x5cb   : > { %v2354_v51 = vrot.slane %v2346_v53, %v9068_v41  ;;  %v2361_v43 = vrot.slane %v2347_v62, %v9068_v41  ;;  %v2370_v52 = vrot.slane %v2362_v61, %v9068_v41  ;;  %v2377_v28 = vrot.slane %v2363_v16, %v9068_v41 }
 0x5cc   : > { %7880 = vmatmul.mubr.msk.bf16.vlgmr.msra.gmra.mrb[16].mxu0 %vm2666_vm5, %v3221_v5  ;;  %v2499_v54 = vcombine.high %v2433_v30, %v2449_v11  ;;  %v2481_v47 = vrot.slane %v2467_v45, %v9068_v41  ;;  %v2518_v21 = vcombine.low %v2474_v49, %v2506_v8  ;;  %v2519_v55 = vcombine.high %v2474_v49, %v2506_v8 }
 0x5cd   : > { %v8304_v39 = vpop.eup %8303  ;;  %v7253_v35 = vcombine.low %v2354_v51, %v2361_v43  ;;  %v7255_v44 = vcombine.high %v2354_v51, %v2361_v43  ;;  %v7257_v36 = vcombine.low %v2370_v52, %v2377_v28  ;;  %v7259_v37 = vcombine.high %v2370_v52, %v2377_v28  ;;  %7891 = vmatprep.mubr.msk.bf16.mxu0 %vm8597_vm0, %v8595_v13 }
 0x5ce   : > { %v3210_v42 = vmul.f32 %v8304_v39, %v9694_v4  ;;  %v8306_v23 = vpop.eup %8305  ;;  %v2513_v32 = vrot.slane %v2499_v54, %v9068_v41 }
 0x5cf   : > { %v2537_v7 = vrot.slane %v7253_v35, %v9063_v34  ;;  %v2553_v58 = vrot.slane %v7255_v44, %v9063_v34  ;;  %v2569_v9 = vrot.slane %v7257_v36, %v9063_v34  ;;  %v2585_v22 = vrot.slane %v7259_v37, %v9063_v34  ;;  %v8308_v60 = vpop.eup %8307 }
 0x5d0   : > { %v3222_v2 = vpack.c.bf16 %v3210_v42, %v3209_v15  ;;  %v3212_v12 = vmul.f32 %v8308_v60, %v9665_v24  ;;  %v3211_v16 = vmul.f32 %v8306_v23, %v9660_v14  ;;  %v2520_v63 = vcombine.low %v2481_v47, %v2513_v32  ;;  %v3177_v14 = vpop.xlane.xlu0 %3176 }
 0x5d1   : > { %v2602_v48 = vcombine.low %v2537_v7, %v2553_v58  ;;  %v2634_v59 = vcombine.low %v2569_v9, %v2585_v22  ;;  %v2603_v4 = vcombine.high %v2537_v7, %v2553_v58  ;;  %v2635_v6 = vcombine.high %v2569_v9, %v2585_v22  ;;  %v8310_v57 = vpop.eup %8309 }
 0x5d2   : > { %7886 = vmatmul.mubr.msk.bf16.vlgmr.msra.gmra.mrb[32].mxu1 %vm2666_vm5, %v3222_v2  ;;  %v8312_v40 = vpop.eup %8311  ;;  %v3213_v30 = vmul.f32 %v8310_v57, %v9704_v10  ;;  %v2521_v51 = vcombine.high %v2481_v47, %v2513_v32  ;;  %v3223_v43 = vpack.c.bf16 %v3212_v12, %v3211_v16  ;;  %8313 = vrcp.f32 %v3177_v14 }
 0x5d3   : > { %v2610_v38 = vrot.slane %v2602_v48, %v9068_v41  ;;  %v2642_v56 = vrot.slane %v2634_v59, %v9068_v41  ;;  %7897 = vmatprep.mubr.msk.bf16.mxu1 %vm8597_vm0, %v8595_v13  ;;  %v2617_v27 = vrot.slane %v2603_v4, %v9068_v41  ;;  %v2649_v26 = vrot.slane %v2635_v6, %v9068_v41 }
 0x5d4   : > { %v3214_v5 = vmul.f32 %v8312_v40, %v9698_v33  ;;  %v10228_v58 = vmov 0  }
 0x5d5   : > { %v2654_v29 = vcombine.low %v2610_v38, %v2642_v56  ;;  %v2655_v31 = vcombine.high %v2610_v38, %v2642_v56  ;;  %v2656_v62 = vcombine.low %v2617_v27, %v2649_v26  ;;  %v2657_v61 = vcombine.high %v2617_v27, %v2649_v26 }
 0x5d6   : > { %v3224_v52 = vpack.c.bf16 %v3214_v5, %v3213_v30 }
 0x5d7   : > { %v2662_v11 = vpack.c.bf16 %v2654_v29, %v2518_v21  ;;  %v2663_v53 = vpack.c.bf16 %v2655_v31, %v2519_v55  ;;  %v2664_v24 = vpack.c.bf16 %v2656_v62, %v2520_v63  ;;  %v2665_v10 = vpack.c.bf16 %v2657_v61, %v2521_v51 }
 0x5d9   : > { %7890 = vmatpush3.bf16.msra.mxu0 %v2662_v11  ;;  %7896 = vmatpush3.bf16.msra.mxu1 %v2663_v53 }
 0x5da   : > { %7901 = vmatprep.subr.bf16.mxu0 %v8595_v13  ;;  %7907 = vmatprep.subr.bf16.mxu1 %v8595_v13 }
 0x5dc   : > { %7892 = vmatmul.mubr.msk.bf16.vlgmr.msra.gmra.mrb[20].mxu0 %vm2666_vm5, %v3223_v43  ;;  %7898 = vmatmul.mubr.msk.bf16.vlgmr.msra.gmra.mrb[36].mxu1 %vm2666_vm5, %v3224_v52  ;;  %v8314_v17 = vpop.eup %8313 }
 0x5dd   : > { %7902 = vmatpush3.bf16.msra.mxu0 %v2664_v24  ;;  %7908 = vmatpush3.bf16.msra.mxu1 %v2665_v10  ;;  %v3215_v35 = vmul.f32 %v8314_v17, %v9708_v46 }
 0x5de   : > { %7903 = vmatprep.mubr.msk.bf16.mxu0 %vm8597_vm0, %v8595_v13  ;;  %7909 = vmatprep.mubr.msk.bf16.mxu1 %vm8597_vm0, %v8595_v13 }
 0x5df   : > { %7913 = vmatprep.subr.bf16.mxu0 %v8595_v13 }
 0x5f5   : > { %v3180_v33 = vpop.xlane.xlu1 %3179 }
 0x5f6   : > { %8315 = vrcp.f32 %v3180_v33 }
 0x5f7   : > { %v3183_v28 = vpop.xlane.xlu0 %3182 }
 0x5f8   : > { %8317 = vrcp.f32 %v3183_v28 }
 0x5fb   : > { %v3186_v20 = vpop.xlane.xlu0 %3185 }
 0x5fc   : > { %8319 = vrcp.f32 %v3186_v20 }
 0x600   : > { %v8316_v39 = vpop.eup %8315 }
 0x601   : > { %v3216_v44 = vmul.f32 %v8316_v39, %v9719_v18 }
 0x602   : > { %v8318_v37 = vpop.eup %8317 }
 0x603   : > { %v3225_v36 = vpack.c.bf16 %v3216_v44, %v3215_v35  ;;  %v3217_v42 = vmul.f32 %v8318_v37, %v9723_v25 }
 0x605   : > { %7904 = vmatmul.mubr.msk.bf16.vlgmr.msra.gmra.mrb[24].mxu0 %vm2666_vm5, %v3225_v36 }
 0x606   : > { %v8320_v15 = vpop.eup %8319  ;;  %7929 = vmatprep.mubr.msk.bf16.mxu0 %vm8597_vm0, %v8595_v13 }
 0x607   : > { %v3218_v45 = vmul.f32 %v8320_v15, %v9727_v50 }
 0x609   : > { %v3226_v7 = vpack.c.bf16 %v3218_v45, %v3217_v42 }
 0x60b   : > { %7910 = vmatmul.mubr.msk.bf16.vlgmr.msra.gmra.mrb[40].mxu1 %vm2666_vm5, %v3226_v7 }
 0x60c   : > { %4626 = vmatprep.mubr.bf16.mxu1 %v10228_v58 }
 0x671   : > { %v3264_v46 = vpop.f32.mrb[12].mxu0 }
 0x672   : > { %v7869_v9 = vpop.f32.mrb[13].mxu0 }
 0x673   : > { %v3267_v18 = vpop.f32.mrb[14].mxu0 }
 0x674   : > { %v7870_v22 = vpop.f32.mrb[15].mxu0 }
 0x699   : > { %v3308_v23 = vpop.f32.mrb[28].mxu1 }
 0x69a   : > { %v7875_v2 = vpop.f32.mrb[29].mxu1 }
 0x69b   : > { %v3311_v49 = vpop.f32.mrb[30].mxu1 }
 0x69c   : > { %v7876_v8 = vpop.f32.mrb[31].mxu1 }
 0x69f   : > { %v3352_v54 = vpop.f32.mrb[16].mxu0 }
 0x6a0   : > { %v3579_v60 = vcombine.low %v3264_v46, %v3352_v54  ;;  %v3580_v48 = vcombine.high %v3264_v46, %v3352_v54  ;;  %v7881_v59 = vpop.f32.mrb[17].mxu0 }
 0x6a1   : > { %v3355_v25 = vpop.f32.mrb[18].mxu0 }
 0x6a2   : > { %v3715_v4 = vcombine.low %v3267_v18, %v3355_v25  ;;  %v3716_v50 = vcombine.high %v3267_v18, %v3355_v25  ;;  %v7882_v6 = vpop.f32.mrb[19].mxu0  ;;  %v3587_v26 = vrot.slane %v3579_v60, %v9063_v34  ;;  %v3594_v40 = vrot.slane %v3580_v48, %v9063_v34 }
 0x6a4   : > { %v3723_v62 = vrot.slane %v3715_v4, %v9063_v34  ;;  %v3730_v61 = vrot.slane %v3716_v50, %v9063_v34 }
 0x6a5   : > { %v3396_v57 = vpop.f32.mrb[32].mxu1 }
 0x6a6   : > { %v3595_v38 = vcombine.low %v3308_v23, %v3396_v57  ;;  %v3596_v56 = vcombine.high %v3308_v23, %v3396_v57  ;;  %v7887_v27 = vpop.f32.mrb[33].mxu1 }
 0x6a7   : > { %v3399_v47 = vpop.f32.mrb[34].mxu1 }
 0x6a8   : > { %v3603_v32 = vrot.slane %v3595_v38, %v9063_v34  ;;  %v3610_v21 = vrot.slane %v3596_v56, %v9063_v34  ;;  %v3731_v29 = vcombine.low %v3311_v49, %v3399_v47  ;;  %v3732_v55 = vcombine.high %v3311_v49, %v3399_v47  ;;  %v7888_v31 = vpop.f32.mrb[35].mxu1 }
 0x6aa   : > { %v3643_v12 = vcombine.low %v3587_v26, %v3603_v32  ;;  %v3644_v30 = vcombine.high %v3587_v26, %v3603_v32  ;;  %v3659_v11 = vcombine.low %v3594_v40, %v3610_v21  ;;  %v3660_v53 = vcombine.high %v3594_v40, %v3610_v21 }
 0x6ab   : > { %v3739_v16 = vrot.slane %v3731_v29, %v9063_v34  ;;  %v3746_v5 = vrot.slane %v3732_v55, %v9063_v34 }
 0x6ac   : > { %v3651_v63 = vrot.slane %v3643_v12, %v9068_v41  ;;  %v3658_v51 = vrot.slane %v3644_v30, %v9068_v41  ;;  %v3667_v43 = vrot.slane %v3659_v11, %v9068_v41  ;;  %v3674_v52 = vrot.slane %v3660_v53, %v9068_v41 }
 0x6ad   : > { %v3779_v24 = vcombine.low %v3723_v62, %v3739_v16  ;;  %v3780_v10 = vcombine.high %v3723_v62, %v3739_v16  ;;  %v3795_v14 = vcombine.low %v3730_v61, %v3746_v5  ;;  %v3796_v33 = vcombine.high %v3730_v61, %v3746_v5  ;;  %v8113_v62 = vld [vmem:[#allocation7] sm:$0xff]  }
 0x6ae   : > { %v7276_v28 = vcombine.low %v3651_v63, %v3658_v51  ;;  %v7278_v20 = vcombine.high %v3651_v63, %v3658_v51  ;;  %v7280_v17 = vcombine.low %v3667_v43, %v3674_v52  ;;  %v7282_v39 = vcombine.high %v3667_v43, %v3674_v52  ;;  %7914 = vmatpush3.bf16.msra.mxu0 %v8113_v62  ;;  %v8114_v51 = vld [vmem:[#allocation7 + $0x8] sm:$0xff]  }
 0x6af   : > { %v3787_v35 = vrot.slane %v3779_v24, %v9068_v41  ;;  %v3794_v44 = vrot.slane %v3780_v10, %v9068_v41  ;;  %v3803_v36 = vrot.slane %v3795_v14, %v9068_v41  ;;  %v3810_v37 = vrot.slane %v3796_v33, %v9068_v41  ;;  %v9837_v15 = vpop.f32.mrb[20].mxu0  ;;  %v9839_v42 = vpop.f32.mrb[36].mxu1  ;;  %7915 = vmatprep.subr.bf16.mxu0 %v8595_v13 }
 0x6b0   : > { %v3859_v45 = vrot.slane %v7276_v28, %v9063_v34  ;;  %v3875_v7 = vrot.slane %v7278_v20, %v9063_v34  ;;  %v3891_v46 = vrot.slane %v7280_v17, %v9063_v34  ;;  %v3907_v9 = vrot.slane %v7282_v39, %v9063_v34  ;;  %v7893_v18 = vpop.f32.mrb[21].mxu0  ;;  %v7899_v22 = vpop.f32.mrb[37].mxu1  ;;  %v8115_v20 = vld [vmem:[#allocation7 + $0x10] sm:$0xff]   ;;  %v8116_v17 = vld [vmem:[#allocation7 + $0x18] sm:$0xff]   ;;  %v8117_v39 = vld [vmem:[#allocation7 + $0x20] sm:$0xff]  }
 0x6b1   : > { %v7284_v23 = vcombine.low %v3787_v35, %v3794_v44  ;;  %v7286_v2 = vcombine.high %v3787_v35, %v3794_v44  ;;  %v7288_v49 = vcombine.low %v3803_v36, %v3810_v37  ;;  %v7290_v8 = vcombine.high %v3803_v36, %v3810_v37  ;;  %v9845_v54 = vpop.f32.mrb[22].mxu0  ;;  %v9847_v60 = vpop.f32.mrb[38].mxu1  ;;  %v8118_v35 = vld [vmem:[#allocation7 + $0x28] sm:$0xff]  }
 0x6b2   : > { %v7894_v48 = vpop.f32.mrb[23].mxu0  ;;  %v7900_v59 = vpop.f32.mrb[39].mxu1  ;;  %v3916_v25 = vcombine.high %v3859_v45, %v3875_v7  ;;  %v3948_v4 = vcombine.high %v3891_v46, %v3907_v9  ;;  %v3915_v50 = vcombine.low %v3859_v45, %v3875_v7  ;;  %v3947_v6 = vcombine.low %v3891_v46, %v3907_v9  ;;  %7916 = vmatpush3.bf16.msra.mxu0 %v8114_v51 }
 0x6b3   : > { %v3995_v57 = vrot.slane %v7284_v23, %v9063_v34  ;;  %v4011_v38 = vrot.slane %v7286_v2, %v9063_v34  ;;  %v4027_v56 = vrot.slane %v7288_v49, %v9063_v34  ;;  %v4043_v27 = vrot.slane %v7290_v8, %v9063_v34  ;;  %7917 = vmatprep.subr.bf16.mxu0 %v8595_v13 }
 0x6b4   : > { %v3930_v26 = vrot.slane %v3916_v25, %v9068_v41  ;;  %v3962_v40 = vrot.slane %v3948_v4, %v9068_v41  ;;  %v9856_v47 = vrot.slane %v3915_v50, %v9068_v41  ;;  %v9859_v32 = vrot.slane %v3947_v6, %v9068_v41 }
 0x6b5   : > { %v4052_v21 = vcombine.high %v3995_v57, %v4011_v38  ;;  %v4084_v29 = vcombine.high %v4027_v56, %v4043_v27  ;;  %v4051_v55 = vcombine.low %v3995_v57, %v4011_v38  ;;  %v4083_v31 = vcombine.low %v4027_v56, %v4043_v27 }
 0x6b6   : > { %v3981_v12 = vcombine.low %v3930_v26, %v3962_v40  ;;  %v3979_v30 = vcombine.low %v9856_v47, %v9859_v32  ;;  %v3980_v11 = vcombine.high %v9856_v47, %v9859_v32  ;;  %v3982_v53 = vcombine.high %v3930_v26, %v3962_v40  ;;  %7918 = vmatpush3.bf16.msra.mxu0 %v8115_v20 }
 0x6b7   : > { %v4066_v61 = vrot.slane %v4052_v21, %v9068_v41  ;;  %v4098_v16 = vrot.slane %v4084_v29, %v9068_v41  ;;  %v9868_v5 = vrot.slane %v4051_v55, %v9068_v41  ;;  %v9871_v63 = vrot.slane %v4083_v31, %v9068_v41  ;;  %7919 = vmatprep.subr.bf16.mxu0 %v8595_v13 }
 0x6b9   : > { %v4117_v43 = vcombine.low %v4066_v61, %v4098_v16  ;;  %v4116_v52 = vcombine.high %v9868_v5, %v9871_v63  ;;  %v4115_v24 = vcombine.low %v9868_v5, %v9871_v63  ;;  %v4118_v10 = vcombine.high %v4066_v61, %v4098_v16 }
 0x6ba   : > { %7920 = vmatpush3.bf16.msra.mxu0 %v8116_v17 }
 0x6bb   : > { %v8051_v14 = vpack.i.bf16 %v4117_v43, %v3981_v12  ;;  %v8046_v33 = vpack.i.bf16 %v4116_v52, %v3980_v11  ;;  %v8056_v28 = vpack.i.bf16 %v4118_v10, %v3982_v53  ;;  %7921 = vmatprep.subr.bf16.mxu0 %v8595_v13 }
 0x6bd   : > { %8052 = vrot.lane.b32.xlu1 %v8051_v14, %s8603_s27  ;;  %8047 = vrot.lane.b32.xlu0 %v8046_v33, %s8604_s20  ;;  %s10234_s27 = sld [smem:[#allocation28_spill]] }
 0x6be   : > { %7922 = vmatpush3.bf16.msra.mxu0 %v8117_v39 }
 0x6bf   : > { %7923 = vmatprep.subr.bf16.mxu0 %v8595_v13 }
 0x6c1   : > { %8057 = vrot.lane.b32.xlu1 %v8056_v28, %s8602_s1  ;;  %s10232_s1 = sld [smem:[#allocation23_spill]] }
 0x6c2   : > { %7924 = vmatpush3.bf16.msra.mxu0 %v8118_v35 }
 0x6c3   : > { %7925 = vmatprep.subr.bf16.mxu0 %v8595_v13 }
 0x6d8   : > { %v3528_v44 = vpop.f32.mrb[24].mxu0 }
 0x6d9   : > { %v3611_v36 = vcombine.low %v9837_v15, %v3528_v44  ;;  %v3612_v37 = vcombine.high %v9837_v15, %v3528_v44  ;;  %v7905_v45 = vpop.f32.mrb[25].mxu0 }
 0x6da   : > { %v3531_v7 = vpop.f32.mrb[26].mxu0 }
 0x6db   : > { %v3747_v46 = vcombine.low %v9845_v54, %v3531_v7  ;;  %v3748_v9 = vcombine.high %v9845_v54, %v3531_v7  ;;  %v7906_v18 = vpop.f32.mrb[27].mxu0  ;;  %v3619_v8 = vrot.slane %v3611_v36, %v9063_v34  ;;  %v3626_v48 = vrot.slane %v3612_v37, %v9063_v34 }
 0x6dd   : > { %v3762_v27 = vrot.slane %v3748_v9, %v9063_v34 }
 0x6de   : > { %v3572_v22 = vpop.f32.mrb[40].mxu1 }
 0x6df   : > { %v3627_v23 = vcombine.low %v9839_v42, %v3572_v22  ;;  %v3628_v2 = vcombine.high %v9839_v42, %v3572_v22  ;;  %v7911_v49 = vpop.f32.mrb[41].mxu1  ;;  %v3755_v42 = vrot.slane %v3747_v46, %v9063_v34 }
 0x6e0   : > { %v3575_v59 = vpop.f32.mrb[42].mxu1 }
 0x6e1   : > { %v3635_v15 = vrot.slane %v3627_v23, %v9063_v34  ;;  %v3642_v25 = vrot.slane %v3628_v2, %v9063_v34  ;;  %v3763_v4 = vcombine.low %v9847_v60, %v3575_v59  ;;  %v3764_v54 = vcombine.high %v9847_v60, %v3575_v59  ;;  %v7912_v50 = vpop.f32.mrb[43].mxu1  ;;  %v8119_v2 = vld [vmem:[#allocation7 + $0x30] sm:$0xff]  }
 0x6e2   : > { %7926 = vmatpush3.bf16.msra.mxu0 %v8119_v2 }
 0x6e3   : > { %v3675_v6 = vcombine.low %v3619_v8, %v3635_v15  ;;  %v3676_v57 = vcombine.high %v3619_v8, %v3635_v15  ;;  %v3691_v38 = vcombine.low %v3626_v48, %v3642_v25  ;;  %v3692_v56 = vcombine.high %v3626_v48, %v3642_v25  ;;  %7927 = vmatprep.subr.bf16.mxu0 %v8595_v13 }
 0x6e4   : > { %v3771_v26 = vrot.slane %v3763_v4, %v9063_v34  ;;  %v3778_v40 = vrot.slane %v3764_v54, %v9063_v34 }
 0x6e5   : > { %v3683_v21 = vrot.slane %v3675_v6, %v9068_v41  ;;  %v3690_v29 = vrot.slane %v3676_v57, %v9068_v41  ;;  %v3699_v55 = vrot.slane %v3691_v38, %v9068_v41  ;;  %v3706_v60 = vrot.slane %v3692_v56, %v9068_v41 }
 0x6e6   : > { %v3811_v31 = vcombine.low %v3755_v42, %v3771_v26  ;;  %v3812_v12 = vcombine.high %v3755_v42, %v3771_v26  ;;  %v3827_v11 = vcombine.low %v3762_v27, %v3778_v40  ;;  %v3828_v53 = vcombine.high %v3762_v27, %v3778_v40  ;;  %v8120_v26 = vld [vmem:[#allocation7 + $0x38] sm:$0xff]  }
 0x6e7   : > { %v7277_v62 = vcombine.low %v3683_v21, %v3690_v29  ;;  %v7279_v61 = vcombine.high %v3683_v21, %v3690_v29  ;;  %v7281_v16 = vcombine.low %v3699_v55, %v3706_v60  ;;  %v7283_v51 = vcombine.high %v3699_v55, %v3706_v60  ;;  %7928 = vmatpush3.bf16.msra.mxu0 %v8120_v26 }
 0x6e8   : > { %v3819_v43 = vrot.slane %v3811_v31, %v9068_v41  ;;  %v3826_v52 = vrot.slane %v3812_v12, %v9068_v41  ;;  %v3835_v10 = vrot.slane %v3827_v11, %v9068_v41  ;;  %v3842_v14 = vrot.slane %v3828_v53, %v9068_v41 }
 0x6e9   : > { %v3866_v33 = vrot.slane %v7277_v62, %v9063_v34  ;;  %v3882_v28 = vrot.slane %v7279_v61, %v9063_v34  ;;  %v3898_v20 = vrot.slane %v7281_v16, %v9063_v34  ;;  %v3914_v17 = vrot.slane %v7283_v51, %v9063_v34 }
 0x6ea   : > { %v7285_v39 = vcombine.low %v3819_v43, %v3826_v52  ;;  %v7287_v35 = vcombine.high %v3819_v43, %v3826_v52  ;;  %v7289_v44 = vcombine.low %v3835_v10, %v3842_v14  ;;  %v7291_v36 = vcombine.high %v3835_v10, %v3842_v14 }
 0x6eb   : > { %v3931_v37 = vcombine.low %v3866_v33, %v3882_v28  ;;  %v3963_v45 = vcombine.low %v3898_v20, %v3914_v17  ;;  %v3932_v7 = vcombine.high %v3866_v33, %v3882_v28  ;;  %v3964_v46 = vcombine.high %v3898_v20, %v3914_v17 }
 0x6ec   : > { %v4002_v9 = vrot.slane %v7285_v39, %v9063_v34  ;;  %v4018_v18 = vrot.slane %v7287_v35, %v9063_v34  ;;  %v4034_v22 = vrot.slane %v7289_v44, %v9063_v34  ;;  %v4050_v23 = vrot.slane %v7291_v36, %v9063_v34 }
 0x6ed   : > { %v3939_v49 = vrot.slane %v3931_v37, %v9068_v41  ;;  %v3971_v8 = vrot.slane %v3963_v45, %v9068_v41  ;;  %v3946_v48 = vrot.slane %v3932_v7, %v9068_v41  ;;  %v3978_v59 = vrot.slane %v3964_v46, %v9068_v41 }
 0x6ee   : > { %v4067_v15 = vcombine.low %v4002_v9, %v4018_v18  ;;  %v4099_v25 = vcombine.low %v4034_v22, %v4050_v23  ;;  %v4068_v4 = vcombine.high %v4002_v9, %v4018_v18  ;;  %v4100_v54 = vcombine.high %v4034_v22, %v4050_v23 }
 0x6ef   : > { %v3984_v50 = vcombine.high %v3939_v49, %v3971_v8  ;;  %v3983_v6 = vcombine.low %v3939_v49, %v3971_v8  ;;  %v3986_v57 = vcombine.high %v3946_v48, %v3978_v59  ;;  %v3985_v38 = vcombine.low %v3946_v48, %v3978_v59  ;;  %v7292_v48 = vld [vmem:[%s10229_s21] ss:$0 sm:$0xff]  ;;  %s10233_s21 = sld [smem:[#allocation24_spill]] }
 0x6f0   : > { %v4075_v34 = vrot.slane %v4067_v15, %v9068_v41  ;;  %v4107_v56 = vrot.slane %v4099_v25, %v9068_v41  ;;  %v4082_v42 = vrot.slane %v4068_v4, %v9068_v41  ;;  %v4114_v27 = vrot.slane %v4100_v54, %v9068_v41  ;;  %v8329_v54 = vld [vmem:[%s8906_s26] sm:$0xff] }
 0x6f2   : > { %v4120_v40 = vcombine.high %v4075_v34, %v4107_v56  ;;  %v4119_v21 = vcombine.low %v4075_v34, %v4107_v56  ;;  %v4122_v29 = vcombine.high %v4082_v42, %v4114_v27  ;;  %v4121_v55 = vcombine.low %v4082_v42, %v4114_v27 }
 0x6f4   : > { %v8066_v60 = vpack.i.bf16 %v4120_v40, %v3984_v50  ;;  %v8061_v31 = vpack.i.bf16 %v4119_v21, %v3983_v6  ;;  %v8076_v12 = vpack.i.bf16 %v4122_v29, %v3986_v57  ;;  %v8071_v11 = vpack.i.bf16 %v4121_v55, %v3985_v38  ;;  %v8330_v38 = vld [vmem:[%s8906_s26 + $0x8] sm:$0xff] }
 0x6f6   : > { %8067 = vrot.lane.b32.xlu0 %v8066_v60, %s8600_s10  ;;  %8062 = vrot.lane.b32.xlu1 %v8061_v31, %s8601_s18  ;;  %v4380_v60 = vld [vmem:[#allocation8] sm:$0xff] }
 0x6f7   : > { %v4382_v31 = vld [vmem:[#allocation8 + $0x40] sm:$0xff] }
 0x6fa   : > { %8077 = vrot.lane.b32.xlu0 %v8076_v12, %s8598_s12  ;;  %8072 = vrot.lane.b32.xlu1 %v8071_v11, %s8599_s8  ;;  %v4381_v12 = vld [vmem:[#allocation8 + $0x8] sm:$0xff]  ;;  %v7305_v11 = vcombine.high %v4380_v60, %v4382_v31  ;;  %s10231_s8 = sld [smem:[#allocation26_spill]]  ;;  %s7025_s12 = sshll.u32 %s9945_s14, 4  ;;  %s10080_s12 = int_to_ptr.vmem [resolvable:$true] %s7025_s12 }
 0x6fb   : > { %s8475_s19 = scalar_lea.vmem %s10080_s12, 256 }
 0x6fc   : > { %4594 = vmatprep.subr.bf16.mxu1 %v7305_v11  ;;  %p8476_p10 = scmp.ne.s32.totalorder %s10080_s12, %s8475_s19 }
 0x6fe   : > { %p8477_p3 = pnand %p8476_p10, %p8851_p5 }
 0x700   : > { %p8478_p7 = pneg %p8477_p3 }
 0x72f   : > { %v8053_v13 = vpop.permute.xlu1 %8052  ;;  %v8048_v41 = vpop.permute.xlu0 %8047 }
 0x730   : > { %v8050_v53 = vunpack.i.h.bf16 %v8048_v41  ;;  %v8049_v62 = vunpack.i.l.bf16 %v8048_v41  ;;  %v8055_v16 = vunpack.i.h.bf16 %v8053_v13  ;;  %v8054_v51 = vunpack.i.l.bf16 %v8053_v13  ;;  %v4383_v13 = vld [vmem:[#allocation8 + $0x48] sm:$0xff] }
 0x731   : > { %v7304_v41 = vcombine.low %v4380_v60, %v4382_v31  ;;  %v4411_v60 = vld [vmem:[#allocation8 + $0x3c8] sm:$0xff] }
 0x732   : > { %v4180_v43 = vsel %vm2666_vm5, %v4115_v24, %v8050_v53  ;;  %v4179_v52 = vsel %vm2666_vm5, %v3979_v30, %v8049_v62  ;;  %v7306_v53 = vcombine.low %v4381_v12, %v4383_v13  ;;  %v7307_v62 = vcombine.high %v4381_v12, %v4383_v13 }
 0x733   : > { %v8058_v61 = vpop.permute.xlu1 %8057  ;;  %v4182_v20 = vsel %vm4181_vm6, %v4179_v52, %v8054_v51  ;;  %v4183_v17 = vsel %vm4181_vm6, %v4180_v43, %v8055_v16  ;;  %4595 = vmatpush1.bf16.msra.mxu1 %v7304_v41  ;;  %v4386_v16 = vld [vmem:[#allocation8 + $0xc0] sm:$0xff]  ;;  %v4385_v51 = vld [vmem:[#allocation8 + $0x88] sm:$0xff] }
 0x734   : > { %v8060_v10 = vunpack.i.h.bf16 %v8058_v61  ;;  %v8059_v14 = vunpack.i.l.bf16 %v8058_v61  ;;  %4637 = vmatprep.subr.bf16.mxu0 %v7307_v62  ;;  %v4384_v61 = vld [vmem:[#allocation8 + $0x80] sm:$0xff]  ;;  %v4387_v52 = vld [vmem:[#allocation8 + $0xc8] sm:$0xff] }
 0x735   : > { %v7309_v43 = vcombine.high %v4384_v61, %v4386_v16  ;;  %v8121_v62 = vld [vmem:[#allocation10 + $0x40] sm:$0xff]  }
 0x736   : > { %v4185_v44 = vsel %vm4184_vm7, %v4182_v20, %v8059_v14  ;;  %v4186_v36 = vsel %vm4184_vm7, %v4183_v17, %v8060_v10  ;;  %v7308_v10 = vcombine.low %v4384_v61, %v4386_v16  ;;  %v7310_v14 = vcombine.low %v4385_v51, %v4387_v52  ;;  %v4390_v20 = vld [vmem:[#allocation8 + $0x140] sm:$0xff]  ;;  %v4389_v17 = vld [vmem:[#allocation8 + $0x108] sm:$0xff] }
 0x737   : > { %4596 = vmatprep.subr.bf16.mxu1 %v7309_v43  ;;  %v8122_v61 = vld [vmem:[#allocation10 + $0xc0] sm:$0xff]  }
 0x738   : > { %4597 = vmatpush1.bf16.msra.mxu1 %v7308_v10 }
 0x768   : > { %v8063_v33 = vpop.permute.xlu1 %8062  ;;  %v8068_v28 = vpop.permute.xlu0 %8067 }
 0x769   : > { %v8065_v39 = vunpack.i.h.bf16 %v8063_v33  ;;  %v8064_v35 = vunpack.i.l.bf16 %v8063_v33  ;;  %v8070_v5 = vunpack.i.h.bf16 %v8068_v28  ;;  %v8069_v63 = vunpack.i.l.bf16 %v8068_v28  ;;  %v4388_v28 = vld [vmem:[#allocation8 + $0x100] sm:$0xff] }
 0x76a   : > { %v7311_v33 = vcombine.high %v4385_v51, %v4387_v52 }
 0x76b   : > { %v4188_v24 = vsel %vm4187_vm8, %v4185_v44, %v8064_v35  ;;  %v4189_v37 = vsel %vm4187_vm8, %v4186_v36, %v8065_v39  ;;  %v7313_v39 = vcombine.high %v4388_v28, %v4390_v20  ;;  %v4391_v35 = vld [vmem:[#allocation8 + $0x148] sm:$0xff]  ;;  %v4392_v44 = vld [vmem:[#allocation8 + $0x180] sm:$0xff] }
 0x76c   : > { %v8073_v47 = vpop.permute.xlu1 %8072  ;;  %v8078_v32 = vpop.permute.xlu0 %8077  ;;  %v4191_v9 = vsel %vm4190_vm9, %v4188_v24, %v8069_v63  ;;  %v4192_v18 = vsel %vm4190_vm9, %v4189_v37, %v8070_v5  ;;  %v4394_v36 = vld [vmem:[#allocation8 + $0x1c0] sm:$0xff]  ;;  %v7312_v5 = vcombine.low %v4388_v28, %v4390_v20  ;;  %v7315_v63 = vcombine.high %v4389_v17, %v4391_v35  ;;  %v4393_v24 = vld [vmem:[#allocation8 + $0x188] sm:$0xff] }
 0x76d   : > { %v8075_v30 = vunpack.i.h.bf16 %v8073_v47  ;;  %v8074_v45 = vunpack.i.l.bf16 %v8073_v47  ;;  %v8080_v7 = vunpack.i.h.bf16 %v8078_v32  ;;  %v8079_v46 = vunpack.i.l.bf16 %v8078_v32  ;;  %v4395_v37 = vld [vmem:[#allocation8 + $0x1c8] sm:$0xff]  ;;  %4598 = vmatprep.subr.bf16.mxu1 %v7313_v39 }
 0x76e   : > { %v7314_v47 = vcombine.low %v4389_v17, %v4391_v35  ;;  %v7317_v32 = vcombine.high %v4392_v44, %v4394_v36  ;;  %4599 = vmatpush1.bf16.msra.mxu1 %v7312_v5 }
 0x76f   : > { %v4194_v22 = vsel %vm4193_vm10, %v4191_v9, %v8074_v45  ;;  %v4195_v23 = vsel %vm4193_vm10, %v4192_v18, %v8075_v30  ;;  %v7319_v30 = vcombine.high %v4393_v24, %v4395_v37  ;;  %v4396_v45 = vld [vmem:[#allocation8 + $0x200] sm:$0xff]  ;;  %v4399_v9 = vld [vmem:[#allocation8 + $0x248] sm:$0xff]  ;;  %v7316_v18 = vcombine.low %v4392_v44, %v4394_v36 }
 0x770   : > { %v4197_v2 = vsel %vm4196_vm11, %v4194_v22, %v8079_v46  ;;  %v4198_v49 = vsel %vm4196_vm11, %v4195_v23, %v8080_v7  ;;  %v4398_v7 = vld [vmem:[#allocation8 + $0x240] sm:$0xff]  ;;  %v4397_v46 = vld [vmem:[#allocation8 + $0x208] sm:$0xff]  ;;  %4600 = vmatprep.subr.bf16.mxu1 %v7317_v32  ;;  %v7318_v22 = vcombine.low %v4393_v24, %v4395_v37 }
 0x771   : > { %v4199_v8 = vpack.c.bf16 %v4198_v49, %v4197_v2  ;;  %v7321_v23 = vcombine.high %v4396_v45, %v4398_v7  ;;  %v7323_v2 = vcombine.high %v4397_v46, %v4399_v9  ;;  %v4400_v49 = vld [vmem:[#allocation8 + $0x280] sm:$0xff] }
 0x772   : > { %4601 = vmatpush1.bf16.msra.mxu1 %v7316_v18  ;;  %v7301_v24 = vld [vmem:[%s10230_s22] ss:$0 sm:$0xff] }
 0x773   : > { %7930 = vmatmul.mubr.bf16.vlgmr.msra.gmra.mrb[28].mxu0 %v4199_v8  ;;  %v4402_v8 = vld [vmem:[#allocation8 + $0x2c0] sm:$0xff]  ;;  %4602 = vmatprep.subr.bf16.mxu1 %v7321_v23 }
 0x774   : > { %4669 = vmatprep.mubr.bf16.mxu0 %v10228_v58  ;;  %4638 = vmatpush1.bf16.msra.mxu0 %v7306_v53  ;;  %v8124_v23 = vld [vmem:[#allocation10 + $0x80] sm:$0xff]  }
 0x775   : > { %4639 = vmatprep.subr.bf16.mxu0 %v7311_v33 }
 0x778   : > { %4640 = vmatpush1.bf16.msra.mxu0 %v7310_v14 }
 0x779   : > { %4641 = vmatprep.subr.bf16.mxu0 %v7315_v63 }
 0x77c   : > { %4642 = vmatpush1.bf16.msra.mxu0 %v7314_v47 }
 0x77d   : > { %4643 = vmatprep.subr.bf16.mxu0 %v7319_v30 }
 0x780   : > { %4644 = vmatpush1.bf16.msra.mxu0 %v7318_v22  ;;  %v8123_v22 = vld [vmem:[#allocation10] sm:$0xff]  }
 0x781   : > { %4645 = vmatprep.subr.bf16.mxu0 %v7323_v2 }
 0x846   : > { %v4305_v59 = vpop.f32.mrb[28].mxu0 }
 0x847   : > { %v4306_v15 = vadd.f32 %v7292_v48, %v4305_v59  ;;  %v7931_v25 = vpop.f32.mrb[29].mxu0  ;;  %v4403_v59 = vld [vmem:[#allocation8 + $0x2c8] sm:$0xff] }
 0x848   : > { %v4308_v4 = vpop.f32.mrb[30].mxu0  ;;  %v7322_v25 = vcombine.low %v4397_v46, %v4399_v9 }
 0x849   : > { %v4312_v50 = vadd.f32 %v8329_v54, %v4306_v15  ;;  %v4309_v6 = vadd.f32 %v7292_v48, %v4308_v4  ;;  %v7932_v57 = vpop.f32.mrb[31].mxu0  ;;  %v4401_v48 = vld [vmem:[#allocation8 + $0x288] sm:$0xff]  ;;  %v7320_v15 = vcombine.low %v4396_v45, %v4398_v7  ;;  %v7325_v4 = vcombine.high %v4400_v49, %v4402_v8  ;;  %v7302_v7 = vld [vmem:[%s10231_s8] ss:$0 sm:$0xff]  ;;  %s7569_s8 = sshll.u32 %s8707_s17, 8 }
 0x84a   : > { %v7327_v54 = vcombine.high %v4401_v48, %v4403_v59  ;;  %v4405_v57 = vld [vmem:[#allocation8 + $0x308] sm:$0xff]  ;;  %4646 = vmatpush1.bf16.msra.mxu0 %v7322_v25  ;;  %v8132_v25 = vld [vmem:[#allocation10 + $0x90] sm:$0xff]   ;;  %s10087_s20 = scalar_lea.hbm %s10234_s27, %s7569_s8 }
 0x84b   : > { %4314 = vst [vmem:[%s9945_s14] sm:$0xff] %v4312_v50  ;;  %v4313_v34 = vadd.f32 %v8330_v38, %v4309_v6  ;;  %4318 = vadd.xlane.f32.xlu1 %v4312_v50  ;;  %v4406_v6 = vld [vmem:[#allocation8 + $0x340] sm:$0xff]  ;;  %v4407_v38 = vld [vmem:[#allocation8 + $0x348] sm:$0xff]  ;;  %4603 = vmatpush1.bf16.msra.mxu1 %v7320_v15  ;;  %v8131_v15 = vld [vmem:[#allocation10 + $0x10] sm:$0xff]  }
 0x84c   : > { %4604 = vmatprep.subr.bf16.mxu1 %v7325_v4  ;;  %4647 = vmatprep.subr.bf16.mxu0 %v7327_v54  ;;  %v7330_v12 = vcombine.low %v4405_v57, %v4407_v38  ;;  %v8133_v4 = vld [vmem:[#allocation10 + $0x58] sm:$0xff]  }
 0x84d   : > { %4315 = vst [vmem:[%s9945_s14 + $0x8] sm:$0xff] %v4313_v34  ;;  %4320 = vadd.xlane.f32.xlu0 %v4313_v34  ;;  %v8134_v54 = vld [vmem:[#allocation10 + $0xd8] sm:$0xff]  }
 0x8d8   : > { %v4319_v56 = vpop.xlane.xlu1 %4318 }
 0x8d9   : > { %v4322_v42 = vmul.f32 0.0078125, %v4319_v56  ;;  %v7326_v56 = vcombine.low %v4401_v48, %v4403_v59  ;;  %v8128_v48 = vld [vmem:[#allocation10 + $0x88] sm:$0xff]   ;;  %v8129_v59 = vld [vmem:[#allocation10 + $0x50] sm:$0xff]  }
 0x8da   : > { %v4321_v27 = vpop.xlane.xlu0 %4320 }
 0x8db   : > { %v9950_v26 = vsub.f32 %v4312_v50, %v4322_v42  ;;  %v4323_v40 = vmul.f32 0.0078125, %v4321_v27  ;;  %v4404_v50 = vld [vmem:[#allocation8 + $0x300] sm:$0xff]  ;;  %v7331_v27 = vcombine.high %v4405_v57, %v4407_v38  ;;  %4648 = vmatpush1.bf16.msra.mxu0 %v7326_v56 }
 0x8dc   : > { %v7329_v42 = vcombine.high %v4404_v50, %v4406_v6  ;;  %v7328_v31 = vcombine.low %v4404_v50, %v4406_v6  ;;  %v8135_v50 = vld [vmem:[#allocation10 + $0x18] sm:$0xff]   ;;  %v8137_v57 = vld [vmem:[#allocation10 + $0x60] sm:$0xff]  }
 0x8dd   : > { %v9952_v21 = vsub.f32 %v4313_v34, %v4323_v40  ;;  %v4326_v29 = vmul.f32 %v9950_v26, %v9950_v26  ;;  %v7324_v34 = vcombine.low %v4400_v49, %v4402_v8  ;;  %v4408_v40 = vld [vmem:[#allocation8 + $0x380] sm:$0xff]  ;;  %4649 = vmatprep.subr.bf16.mxu0 %v7331_v27  ;;  %v8125_v49 = vld [vmem:[#allocation10 + $0x48] sm:$0xff]   ;;  %v8136_v6 = vld [vmem:[#allocation10 + $0x98] sm:$0xff]  }
 0x8de   : > { %v8126_v8 = vld [vmem:[#allocation10 + $0xc8] sm:$0xff]   ;;  %v8138_v38 = vld [vmem:[#allocation10 + $0xe0] sm:$0xff]  }
 0x8df   : > { %4328 = vadd.xlane.f32.xlu0 %v4326_v29  ;;  %v4327_v55 = vmul.f32 %v9952_v21, %v9952_v21  ;;  %v4410_v29 = vld [vmem:[#allocation8 + $0x3c0] sm:$0xff]  ;;  %4605 = vmatpush1.bf16.msra.mxu1 %v7324_v34  ;;  %v8142_v27 = vld [vmem:[#allocation10 + $0xe8] sm:$0xff]  }
 0x8e0   : > { %4606 = vmatprep.subr.bf16.mxu1 %v7329_v42  ;;  %v7333_v11 = vcombine.high %v4408_v40, %v4410_v29  ;;  %v7332_v41 = vcombine.low %v4408_v40, %v4410_v29  ;;  %4650 = vmatpush1.bf16.msra.mxu0 %v7330_v12  ;;  %v8139_v34 = vld [vmem:[#allocation10 + $0x20] sm:$0xff]   ;;  %v8141_v42 = vld [vmem:[#allocation10 + $0x68] sm:$0xff]   ;;  %v8148_v12 = vld [vmem:[#allocation10 + $0xb0] sm:$0xff]  }
 0x8e1   : > { %v8140_v56 = vld [vmem:[#allocation10 + $0xa0] sm:$0xff]   ;;  %v8143_v40 = vld [vmem:[#allocation10 + $0x28] sm:$0xff]  }
 0x8e2   : > { %v8144_v29 = vld [vmem:[#allocation10 + $0xa8] sm:$0xff]  }
 0x8e3   : > { %4330 = vadd.xlane.f32.xlu0 %v4327_v55  ;;  %v4409_v55 = vld [vmem:[#allocation8 + $0x388] sm:$0xff]  ;;  %4607 = vmatpush1.bf16.msra.mxu1 %v7328_v31  ;;  %v8147_v31 = vld [vmem:[#allocation10 + $0x30] sm:$0xff]  }
 0x8e4   : > { %v7335_v13 = vcombine.high %v4409_v55, %v4411_v60  ;;  %4608 = vmatprep.subr.bf16.mxu1 %v7333_v11  ;;  %v7334_v53 = vcombine.low %v4409_v55, %v4411_v60  ;;  %v8145_v55 = vld [vmem:[#allocation10 + $0x70] sm:$0xff]   ;;  %v8149_v11 = vld [vmem:[#allocation10 + $0x78] sm:$0xff]  }
 0x8e5   : > { %v8146_v60 = vld [vmem:[#allocation10 + $0xf0] sm:$0xff]  }
 0x8e6   : > { %4651 = vmatprep.subr.bf16.mxu0 %v7335_v13  ;;  %v8150_v13 = vld [vmem:[#allocation10 + $0xf8] sm:$0xff]  }
 0x8e7   : > { %4609 = vmatpush1.bf16.msra.mxu1 %v7332_v41  ;;  %4652 = vmatpush1.bf16.msra.mxu0 %v7334_v53  ;;  %v8151_v41 = vld [vmem:[#allocation10 + $0x38] sm:$0xff]  }
 0x8e8   : > { %7621 = vmatprep.subr.bf16.mxu1 %v8121_v62  ;;  %7643 = vmatprep.subr.bf16.mxu0 %v8122_v61  ;;  %v8152_v53 = vld [vmem:[#allocation10 + $0xb8] sm:$0xff]   ;;  %v5032_v62 = vld [vmem:[#allocation8 + $0x10] sm:$0xff] }
 0x8e9   : > { %v5034_v61 = vld [vmem:[#allocation8 + $0x50] sm:$0xff] }
 0x96c   : > { %v4329_v16 = vpop.xlane.xlu0 %4328 }
 0x96d   : > { %v4332_v51 = vmul.f32 0.007874016, %v4329_v16  ;;  %v5033_v16 = vld [vmem:[#allocation8 + $0x18] sm:$0xff] }
 0x96f   : > { %8321 = vrsqrt.f32 %v4332_v51  ;;  %vm4336_vm12 = vcmp.eq.f32.partialorder %v4332_v51, inf  ;;  %v4339_v33 = vand.u32 2147483648, %v4332_v51  ;;  %vm4338_vm13 = vcmp.eq.f32.partialorder %v4332_v51, 0.0 }
 0x970   : > { %v4331_v43 = vpop.xlane.xlu0 %4330 }
 0x971   : > { %v4333_v52 = vmul.f32 0.007874016, %v4331_v43  ;;  %v7369_v43 = vcombine.high %v5032_v62, %v5034_v61 }
 0x973   : > { %8323 = vrsqrt.f32 %v4333_v52  ;;  %vm4343_vm14 = vcmp.eq.f32.partialorder %v4333_v52, inf  ;;  %v4346_v44 = vand.u32 2147483648, %v4333_v52  ;;  %vm4345_vm15 = vcmp.eq.f32.partialorder %v4333_v52, 0.0 }
 0x979   : > { %v8322_v10 = vpop.eup %8321 }
 0x97a   : > { %v4335_v14 = vmul.f32 %v8322_v10, %v4332_v51 }
 0x97c   : > { %v4337_v28 = vsel %vm4336_vm12, %v4332_v51, %v4335_v14  ;;  %v7368_v51 = vcombine.low %v5032_v62, %v5034_v61  ;;  %v5047_v62 = vld [vmem:[#allocation8 + $0x1d8] sm:$0xff] }
 0x97d   : > { %v8324_v20 = vpop.eup %8323  ;;  %v4340_v17 = vsel %vm4338_vm13, %v4339_v33, %v4337_v28  ;;  %v4412_v33 = vld [vmem:[%s10232_s1] sm:$0xf]  ;;  %v9974_v28 = vsub.s32 3, %v8955_v0 }
 0x97e   : > { %v4348_v39 = vadd.f32 1e-06, %v4340_v17  ;;  %v4342_v35 = vmul.f32 %v8324_v20, %v4333_v52  ;;  %v4417_v20 = vrot.slane %v4412_v33, %v8958_v1  ;;  %v4425_v17 = vrot.slane %v4412_v33, %v9021_v19 }
 0x980   : > { %8325 = vrcp.f32 %v4348_v39  ;;  %v4344_v36 = vsel %vm4343_vm14, %v4333_v52, %v4342_v35  ;;  %v5035_v52 = vld [vmem:[#allocation8 + $0x58] sm:$0xff]  ;;  %v4421_v39 = vrot.slane %v4412_v33, %v8964_v3  ;;  %v4429_v35 = vrot.slane %v4412_v33, %v9974_v28 }
 0x981   : > { %v4347_v5 = vsel %vm4345_vm15, %v4346_v44, %v4344_v36  ;;  %v7370_v10 = vcombine.low %v5033_v16, %v5035_v52  ;;  %v7371_v14 = vcombine.high %v5033_v16, %v5035_v52  ;;  %v5048_v52 = vld [vmem:[#allocation8 + $0x210] sm:$0xff]  ;;  %v5051_v33 = vld [vmem:[#allocation8 + $0x258] sm:$0xff] }
 0x982   : > { %v4349_v63 = vadd.f32 1e-06, %v4347_v5 }
 0x984   : > { %8327 = vrcp.f32 %v4349_v63 }
 0x98a   : > { %v8326_v37 = vpop.eup %8325 }
 0x98b   : > { %v4358_v47 = vmul.f32 %v8326_v37, %v7301_v24 }
 0x98d   : > { %v4360_v30 = vmul.f32 %v4358_v47, %v9950_v26  ;;  %v8127_v26 = vld [vmem:[#allocation10 + $0x8] sm:$0xff]  }
 0x98e   : > { %v8328_v32 = vpop.eup %8327 }
 0x98f   : > { %v4359_v45 = vmul.f32 %v8328_v32, %v7301_v24  ;;  %v4368_v9 = vadd.f32 %v7302_v7, %v4360_v30 }
 0x991   : > { %v4361_v46 = vmul.f32 %v4359_v45, %v9952_v21  ;;  %v8130_v21 = vld [vmem:[#allocation10 + $0xd0] sm:$0xff]  }
 0x993   : > { %v4369_v18 = vadd.f32 %v7302_v7, %v4361_v46 }
 0x995   : > { %v9966_v2 = vpack.c.bf16 %v4369_v18, %v4368_v9 }
 0x997   : > { %4627 = vmatmul.mubr.bf16.vlgmr.msra.gmra.mrb[44].mxu1 %v9966_v2  ;;  %4670 = vmatmul.mubr.bf16.vlgmr.msra.gmra.mrb[32].mxu0 %v9966_v2 }
 0x998   : > { %7622 = vmatpush3.bf16.msra.mxu1 %v8123_v22  ;;  %7644 = vmatpush3.bf16.msra.mxu0 %v8124_v23 }
 0x999   : > { %7623 = vmatprep.subr.bf16.mxu1 %v8125_v49  ;;  %7645 = vmatprep.subr.bf16.mxu0 %v8126_v8 }
 0x99c   : > { %7624 = vmatpush3.bf16.msra.mxu1 %v8127_v26  ;;  %7646 = vmatpush3.bf16.msra.mxu0 %v8128_v48  ;;  %v5036_v48 = vld [vmem:[#allocation8 + $0x90] sm:$0xff] }
 0x99d   : > { %7625 = vmatprep.subr.bf16.mxu1 %v8129_v59  ;;  %7647 = vmatprep.subr.bf16.mxu0 %v8130_v21  ;;  %v5038_v59 = vld [vmem:[#allocation8 + $0xd0] sm:$0xff] }
 0x9a0   : > { %7626 = vmatpush3.bf16.msra.mxu1 %v8131_v15  ;;  %7648 = vmatpush3.bf16.msra.mxu0 %v8132_v25 }
 0x9a1   : > { %7627 = vmatprep.subr.bf16.mxu1 %v8133_v4  ;;  %7649 = vmatprep.subr.bf16.mxu0 %v8134_v54  ;;  %v5037_v54 = vld [vmem:[#allocation8 + $0x98] sm:$0xff] }
 0x9a4   : > { %7628 = vmatpush3.bf16.msra.mxu1 %v8135_v50  ;;  %7650 = vmatpush3.bf16.msra.mxu0 %v8136_v6  ;;  %v5039_v50 = vld [vmem:[#allocation8 + $0xd8] sm:$0xff] }
 0x9a5   : > { %7629 = vmatprep.subr.bf16.mxu1 %v8137_v57  ;;  %7651 = vmatprep.subr.bf16.mxu0 %v8138_v38 }
 0x9a8   : > { %7630 = vmatpush3.bf16.msra.mxu1 %v8139_v34  ;;  %7652 = vmatpush3.bf16.msra.mxu0 %v8140_v56  ;;  %v7373_v56 = vcombine.high %v5036_v48, %v5038_v59 }
 0x9a9   : > { %7631 = vmatprep.subr.bf16.mxu1 %v8141_v42  ;;  %7653 = vmatprep.subr.bf16.mxu0 %v8142_v27  ;;  %v7375_v42 = vcombine.high %v5037_v54, %v5039_v50  ;;  %v5040_v27 = vld [vmem:[#allocation8 + $0x110] sm:$0xff] }
 0x9ac   : > { %7632 = vmatpush3.bf16.msra.mxu1 %v8143_v40  ;;  %7654 = vmatpush3.bf16.msra.mxu0 %v8144_v29  ;;  %v5042_v40 = vld [vmem:[#allocation8 + $0x150] sm:$0xff]  ;;  %v5041_v29 = vld [vmem:[#allocation8 + $0x118] sm:$0xff] }
 0x9ad   : > { %7633 = vmatprep.subr.bf16.mxu1 %v8145_v55  ;;  %7655 = vmatprep.subr.bf16.mxu0 %v8146_v60  ;;  %v5043_v55 = vld [vmem:[#allocation8 + $0x158] sm:$0xff]  ;;  %v7372_v60 = vcombine.low %v5036_v48, %v5038_v59  ;;  %v7376_v61 = vcombine.low %v5040_v27, %v5042_v40 }
 0x9ae   : > { %v7378_v16 = vcombine.low %v5041_v29, %v5043_v55 }
 0x9b0   : > { %7634 = vmatpush3.bf16.msra.mxu1 %v8147_v31  ;;  %7656 = vmatpush3.bf16.msra.mxu0 %v8148_v12  ;;  %v7374_v31 = vcombine.low %v5037_v54, %v5039_v50  ;;  %v7377_v12 = vcombine.high %v5040_v27, %v5042_v40  ;;  %v8153_v54 = vld [vmem:[#allocation10 + $0x140] sm:$0xff]   ;;  %v8161_v27 = vld [vmem:[#allocation10 + $0x150] sm:$0xff]  }
 0x9b1   : > { %7635 = vmatprep.subr.bf16.mxu1 %v8149_v11  ;;  %7657 = vmatprep.subr.bf16.mxu0 %v8150_v13  ;;  %v7379_v11 = vcombine.high %v5041_v29, %v5043_v55  ;;  %v5044_v13 = vld [vmem:[#allocation8 + $0x190] sm:$0xff]  ;;  %v8154_v50 = vld [vmem:[#allocation10 + $0x1c0] sm:$0xff]  }
 0x9b2   : > { %v8162_v40 = vld [vmem:[#allocation10 + $0x1d0] sm:$0xff]  }
 0x9b3   : > { %v8163_v29 = vld [vmem:[#allocation10 + $0x110] sm:$0xff]  }
 0x9b4   : > { %7636 = vmatpush3.bf16.msra.mxu1 %v8151_v41  ;;  %7658 = vmatpush3.bf16.msra.mxu0 %v8152_v53  ;;  %v5046_v41 = vld [vmem:[#allocation8 + $0x1d0] sm:$0xff]  ;;  %v5045_v53 = vld [vmem:[#allocation8 + $0x198] sm:$0xff] }
 0x9b5   : > { %5246 = vmatprep.subr.bf16.mxu1 %v7369_v43  ;;  %5289 = vmatprep.subr.bf16.mxu0 %v7371_v14  ;;  %v7383_v43 = vcombine.high %v5045_v53, %v5047_v62  ;;  %v5049_v14 = vld [vmem:[#allocation8 + $0x218] sm:$0xff]  ;;  %v8164_v55 = vld [vmem:[#allocation10 + $0x190] sm:$0xff]  }
 0xa6a   : > { %v4628_v44 = vpop.f32.mrb[44].mxu1  ;;  %v4671_v36 = vpop.f32.mrb[32].mxu0 }
 0xa6b   : > { %v4629_v5 = vadd.f32 %v4628_v44, %v4417_v20  ;;  %v4672_v63 = vadd.f32 %v4671_v36, %v4425_v17  ;;  %v4630_v24 = vpop.f32.mrb[45].mxu1  ;;  %v4673_v37 = vpop.f32.mrb[33].mxu0  ;;  %v5052_v44 = vld [vmem:[#allocation8 + $0x290] sm:$0xff] }
 0xa6c   : > { %v4631_v47 = vadd.f32 %v4630_v24, %v4421_v39  ;;  %v4674_v32 = vadd.f32 %v4673_v37, %v4429_v35  ;;  %v4632_v30 = vpop.f32.mrb[46].mxu1  ;;  %v4675_v45 = vpop.f32.mrb[34].mxu0  ;;  %v5054_v36 = vld [vmem:[#allocation8 + $0x2d0] sm:$0xff]  ;;  %v7386_v37 = vcombine.low %v5049_v14, %v5051_v33 }
 0xa6d   : > { %v4633_v0 = vadd.f32 %v4632_v30, %v4417_v20  ;;  %v4676_v7 = vadd.f32 %v4675_v45, %v4425_v17  ;;  %v4634_v46 = vpop.f32.mrb[47].mxu1  ;;  %v4677_v9 = vpop.f32.mrb[35].mxu0  ;;  %v4680_v23 = vmax.f32 %v4629_v5, 0.0  ;;  %v4682_v49 = vmax.f32 %v4672_v63, 0.0  ;;  %v5053_v5 = vld [vmem:[#allocation8 + $0x298] sm:$0xff]  ;;  %v5056_v30 = vld [vmem:[#allocation8 + $0x310] sm:$0xff] }
 0xa6e   : > { %v4635_v18 = vadd.f32 %v4634_v46, %v4421_v39  ;;  %v4678_v22 = vadd.f32 %v4677_v9, %v4429_v35  ;;  %v4681_v21 = vmax.f32 %v4631_v47, 0.0  ;;  %v4683_v15 = vmax.f32 %v4674_v32, 0.0  ;;  %v5055_v63 = vld [vmem:[#allocation8 + $0x2d8] sm:$0xff]  ;;  %v5058_v45 = vld [vmem:[#allocation8 + $0x350] sm:$0xff] }
 0xa6f   : > { %v4684_v8 = vmax.f32 %v4633_v0, 0.0  ;;  %v4686_v26 = vmax.f32 %v4676_v7, 0.0  ;;  %v7380_v20 = vcombine.low %v5044_v13, %v5046_v41  ;;  %v7382_v17 = vcombine.low %v5045_v53, %v5047_v62  ;;  %v5057_v0 = vld [vmem:[#allocation8 + $0x318] sm:$0xff]  ;;  %v8171_v53 = vld [vmem:[#allocation10 + $0x120] sm:$0xff]  }
 0xa70   : > { %v4685_v25 = vmax.f32 %v4635_v18, 0.0  ;;  %v4687_v4 = vmax.f32 %v4678_v22, 0.0  ;;  %v7387_v35 = vcombine.high %v5049_v14, %v5051_v33  ;;  %v7389_v47 = vcombine.high %v5052_v44, %v5054_v36  ;;  %v5059_v7 = vld [vmem:[#allocation8 + $0x358] sm:$0xff]  ;;  %v8172_v62 = vld [vmem:[#allocation10 + $0x1a0] sm:$0xff]   ;;  %v8179_v14 = vld [vmem:[#allocation10 + $0x130] sm:$0xff]  }
 0xa71   : > { %v4688_v6 = vpack.c.bf16 %v4684_v8, %v4680_v23  ;;  %v4690_v57 = vpack.c.bf16 %v4686_v26, %v4682_v49  ;;  %v7391_v32 = vcombine.high %v5053_v5, %v5055_v63  ;;  %v7388_v46 = vcombine.low %v5052_v44, %v5054_v36  ;;  %v5060_v23 = vld [vmem:[#allocation8 + $0x390] sm:$0xff]  ;;  %v5061_v8 = vld [vmem:[#allocation8 + $0x398] sm:$0xff]  ;;  %v9984_v44 = vld [vmem:[#allocation8 + $0x20] sm:$0xff] }
 0xa72   : > { %v4689_v38 = vpack.c.bf16 %v4685_v25, %v4681_v21  ;;  %v4691_v34 = vpack.c.bf16 %v4687_v4, %v4683_v15  ;;  %v7390_v9 = vcombine.low %v5053_v5, %v5055_v63  ;;  %v7393_v18 = vcombine.high %v5056_v30, %v5058_v45  ;;  %v5062_v49 = vld [vmem:[#allocation8 + $0x3d0] sm:$0xff]  ;;  %v5063_v26 = vld [vmem:[#allocation8 + $0x3d8] sm:$0xff]  ;;  %v9986_v36 = vld [vmem:[#allocation8 + $0x60] sm:$0xff] }
 0xa73   : > { %v7395_v22 = vcombine.high %v5057_v0, %v5059_v7  ;;  %v7392_v48 = vcombine.low %v5056_v30, %v5058_v45  ;;  %v7394_v59 = vcombine.low %v5057_v0, %v5059_v7  ;;  %v7397_v21 = vcombine.high %v5060_v23, %v5062_v49  ;;  %v8180_v33 = vld [vmem:[#allocation10 + $0x1b0] sm:$0xff]   ;;  %v9988_v5 = vld [vmem:[#allocation8 + $0x28] sm:$0xff] }
 0xa74   : > { %4980 = vmatprep.mubr.bf16.mxu1 %v4689_v38  ;;  %5021 = vmatprep.mubr.bf16.mxu0 %v4691_v34  ;;  %v7399_v15 = vcombine.high %v5061_v8, %v5063_v26  ;;  %v7396_v25 = vcombine.low %v5060_v23, %v5062_v49  ;;  %v7398_v4 = vcombine.low %v5061_v8, %v5063_v26  ;;  %v8157_v38 = vld [vmem:[#allocation10 + $0x148] sm:$0xff]  }
 0xa75   : > { %4981 = vmatmul.mubr.bf16.vlgmr.msra.gmra.mrb[48].mxu1 %v4688_v6  ;;  %5022 = vmatmul.mubr.bf16.vlgmr.msra.gmra.mrb[36].mxu0 %v4690_v57  ;;  %v8155_v6 = vld [vmem:[#allocation10 + $0x100] sm:$0xff]   ;;  %v8158_v34 = vld [vmem:[#allocation10 + $0x1c8] sm:$0xff]   ;;  %v7432_v63 = vcombine.low %v9984_v44, %v9986_v36 }
 0xa76   : > { %5247 = vmatpush1.bf16.msra.mxu1 %v7368_v51  ;;  %5290 = vmatpush1.bf16.msra.mxu0 %v7370_v10  ;;  %v7381_v51 = vcombine.high %v5044_v13, %v5046_v41  ;;  %v5050_v10 = vld [vmem:[#allocation8 + $0x250] sm:$0xff]  ;;  %v8156_v57 = vld [vmem:[#allocation10 + $0x180] sm:$0xff]  }
 0xa77   : > { %5248 = vmatprep.subr.bf16.mxu1 %v7373_v56  ;;  %5291 = vmatprep.subr.bf16.mxu0 %v7375_v42  ;;  %v7385_v39 = vcombine.high %v5048_v52, %v5050_v10  ;;  %v7384_v24 = vcombine.low %v5048_v52, %v5050_v10  ;;  %v8159_v56 = vld [vmem:[#allocation10 + $0x108] sm:$0xff]   ;;  %v8169_v13 = vld [vmem:[#allocation10 + $0x160] sm:$0xff]   ;;  %v8177_v52 = vld [vmem:[#allocation10 + $0x170] sm:$0xff]  }
 0xa78   : > { %5278 = vmatprep.mubr.bf16.mxu1 %v10228_v58  ;;  %5321 = vmatprep.mubr.bf16.mxu0 %v10228_v58  ;;  %v8160_v42 = vld [vmem:[#allocation10 + $0x188] sm:$0xff]   ;;  %v8170_v41 = vld [vmem:[#allocation10 + $0x1e0] sm:$0xff]   ;;  %v8178_v10 = vld [vmem:[#allocation10 + $0x1f0] sm:$0xff]  }
 0xa7a   : > { %5249 = vmatpush1.bf16.msra.mxu1 %v7372_v60  ;;  %5292 = vmatpush1.bf16.msra.mxu0 %v7374_v31  ;;  %v8165_v60 = vld [vmem:[#allocation10 + $0x158] sm:$0xff]  }
 0xa7b   : > { %5250 = vmatprep.subr.bf16.mxu1 %v7377_v12  ;;  %5293 = vmatprep.subr.bf16.mxu0 %v7379_v11  ;;  %v8166_v31 = vld [vmem:[#allocation10 + $0x1d8] sm:$0xff]  }
 0xa7c   : > { %v8167_v12 = vld [vmem:[#allocation10 + $0x118] sm:$0xff]  }
 0xa7d   : > { %v8168_v11 = vld [vmem:[#allocation10 + $0x198] sm:$0xff]  }
 0xa7e   : > { %5251 = vmatpush1.bf16.msra.mxu1 %v7376_v61  ;;  %5294 = vmatpush1.bf16.msra.mxu0 %v7378_v16  ;;  %v8173_v61 = vld [vmem:[#allocation10 + $0x168] sm:$0xff]  }
 0xa7f   : > { %5252 = vmatprep.subr.bf16.mxu1 %v7381_v51  ;;  %5295 = vmatprep.subr.bf16.mxu0 %v7383_v43  ;;  %v8174_v16 = vld [vmem:[#allocation10 + $0x1e8] sm:$0xff]  }
 0xa80   : > { %v8175_v51 = vld [vmem:[#allocation10 + $0x128] sm:$0xff]  }
 0xa81   : > { %v8176_v43 = vld [vmem:[#allocation10 + $0x1a8] sm:$0xff]  }
 0xa82   : > { %5253 = vmatpush1.bf16.msra.mxu1 %v7380_v20  ;;  %5296 = vmatpush1.bf16.msra.mxu0 %v7382_v17  ;;  %v8181_v20 = vld [vmem:[#allocation10 + $0x178] sm:$0xff]  }
 0xa83   : > { %5254 = vmatprep.subr.bf16.mxu1 %v7385_v39  ;;  %5297 = vmatprep.subr.bf16.mxu0 %v7387_v35  ;;  %v8182_v17 = vld [vmem:[#allocation10 + $0x1f8] sm:$0xff]  }
 0xa84   : > { %v8183_v39 = vld [vmem:[#allocation10 + $0x138] sm:$0xff]  }
 0xa85   : > { %v8184_v35 = vld [vmem:[#allocation10 + $0x1b8] sm:$0xff]  }
 0xa86   : > { %5255 = vmatpush1.bf16.msra.mxu1 %v7384_v24  ;;  %5298 = vmatpush1.bf16.msra.mxu0 %v7386_v37  ;;  %v7433_v24 = vcombine.high %v9984_v44, %v9986_v36  ;;  %v9994_v37 = vld [vmem:[#allocation8 + $0x68] sm:$0xff] }
 0xa87   : > { %5256 = vmatprep.subr.bf16.mxu1 %v7389_v47  ;;  %5299 = vmatprep.subr.bf16.mxu0 %v7391_v32  ;;  %v7434_v47 = vcombine.low %v9988_v5, %v9994_v37  ;;  %v7435_v32 = vcombine.high %v9988_v5, %v9994_v37  ;;  %v5700_v37 = vld [vmem:[#allocation8 + $0x220] sm:$0xff] }
 0xa8a   : > { %5257 = vmatpush1.bf16.msra.mxu1 %v7388_v46  ;;  %5300 = vmatpush1.bf16.msra.mxu0 %v7390_v9 }
 0xa8b   : > { %5258 = vmatprep.subr.bf16.mxu1 %v7393_v18  ;;  %5301 = vmatprep.subr.bf16.mxu0 %v7395_v22 }
 0xa8e   : > { %5259 = vmatpush1.bf16.msra.mxu1 %v7392_v48  ;;  %5302 = vmatpush1.bf16.msra.mxu0 %v7394_v59 }
 0xa8f   : > { %5260 = vmatprep.subr.bf16.mxu1 %v7397_v21  ;;  %5303 = vmatprep.subr.bf16.mxu0 %v7399_v15  ;;  %v5064_v21 = vld [vmem:[%s10232_s1 + $0x4] sm:$0xf] }
 0xa90   : > { %v5069_v15 = vrot.slane %v5064_v21, %v8958_v1 }
 0xa92   : > { %5261 = vmatpush1.bf16.msra.mxu1 %v7396_v25  ;;  %5304 = vmatpush1.bf16.msra.mxu0 %v7398_v4  ;;  %v5077_v25 = vrot.slane %v5064_v21, %v9021_v19  ;;  %v5073_v4 = vrot.slane %v5064_v21, %v8964_v3 }
 0xa93   : > { %7665 = vmatprep.subr.bf16.mxu1 %v8153_v54  ;;  %7687 = vmatprep.subr.bf16.mxu0 %v8154_v50  ;;  %v5081_v54 = vrot.slane %v5064_v21, %v9974_v28  ;;  %v5699_v21 = vld [vmem:[#allocation8 + $0x1e8] sm:$0xff] }
 0xa95   : > { %5279 = vmatmul.mubr.bf16.vlgmr.msra.gmra.mrb[52].mxu1 %v9966_v2  ;;  %5322 = vmatmul.mubr.bf16.vlgmr.msra.gmra.mrb[40].mxu0 %v9966_v2 }
 0xa96   : > { %7666 = vmatpush3.bf16.msra.mxu1 %v8155_v6  ;;  %7688 = vmatpush3.bf16.msra.mxu0 %v8156_v57 }
 0xa97   : > { %7667 = vmatprep.subr.bf16.mxu1 %v8157_v38  ;;  %7689 = vmatprep.subr.bf16.mxu0 %v8158_v34 }
 0xa9a   : > { %7668 = vmatpush3.bf16.msra.mxu1 %v8159_v56  ;;  %7690 = vmatpush3.bf16.msra.mxu0 %v8160_v42 }
 0xa9b   : > { %7669 = vmatprep.subr.bf16.mxu1 %v8161_v27  ;;  %7691 = vmatprep.subr.bf16.mxu0 %v8162_v40 }
 0xa9e   : > { %7670 = vmatpush3.bf16.msra.mxu1 %v8163_v29  ;;  %7692 = vmatpush3.bf16.msra.mxu0 %v8164_v55 }
 0xa9f   : > { %7671 = vmatprep.subr.bf16.mxu1 %v8165_v60  ;;  %7693 = vmatprep.subr.bf16.mxu0 %v8166_v31 }
 0xaa2   : > { %7672 = vmatpush3.bf16.msra.mxu1 %v8167_v12  ;;  %7694 = vmatpush3.bf16.msra.mxu0 %v8168_v11 }
 0xaa3   : > { %7673 = vmatprep.subr.bf16.mxu1 %v8169_v13  ;;  %7695 = vmatprep.subr.bf16.mxu0 %v8170_v41 }
 0xaa6   : > { %7674 = vmatpush3.bf16.msra.mxu1 %v8171_v53  ;;  %7696 = vmatpush3.bf16.msra.mxu0 %v8172_v62 }
 0xaa7   : > { %7675 = vmatprep.subr.bf16.mxu1 %v8173_v61  ;;  %7697 = vmatprep.subr.bf16.mxu0 %v8174_v16  ;;  %v5688_v16 = vld [vmem:[#allocation8 + $0xa0] sm:$0xff] }
 0xaaa   : > { %7676 = vmatpush3.bf16.msra.mxu1 %v8175_v51  ;;  %7698 = vmatpush3.bf16.msra.mxu0 %v8176_v43  ;;  %v5690_v51 = vld [vmem:[#allocation8 + $0xe0] sm:$0xff] }
 0xaab   : > { %7677 = vmatprep.subr.bf16.mxu1 %v8177_v52  ;;  %7699 = vmatprep.subr.bf16.mxu0 %v8178_v10 }
 0xaae   : > { %7678 = vmatpush3.bf16.msra.mxu1 %v8179_v14  ;;  %7700 = vmatpush3.bf16.msra.mxu0 %v8180_v33  ;;  %v5689_v33 = vld [vmem:[#allocation8 + $0xa8] sm:$0xff] }
 0xaaf   : > { %7679 = vmatprep.subr.bf16.mxu1 %v8181_v20  ;;  %7701 = vmatprep.subr.bf16.mxu0 %v8182_v17  ;;  %v5691_v20 = vld [vmem:[#allocation8 + $0xe8] sm:$0xff] }
 0xab2   : > { %7680 = vmatpush3.bf16.msra.mxu1 %v8183_v39  ;;  %7702 = vmatpush3.bf16.msra.mxu0 %v8184_v35 }
 0xab3   : > { %5898 = vmatprep.subr.bf16.mxu1 %v7433_v24  ;;  %5941 = vmatprep.subr.bf16.mxu0 %v7435_v32  ;;  %v7437_v32 = vcombine.high %v5688_v16, %v5690_v51 }
 0xb48   : > { %v7637_v30 = vpop.f32.mrb[48].mxu1  ;;  %v7659_v45 = vpop.f32.mrb[36].mxu0 }
 0xb49   : > { %v7638_v0 = vpop.f32.mrb[49].mxu1  ;;  %v7660_v7 = vpop.f32.mrb[37].mxu0 }
 0xb4a   : > { %v7639_v46 = vadd.f32 %v7638_v0, %v7637_v30  ;;  %v7661_v9 = vadd.f32 %v7660_v7, %v7659_v45  ;;  %v7640_v18 = vpop.f32.mrb[50].mxu1  ;;  %v7662_v22 = vpop.f32.mrb[38].mxu0  ;;  %v7439_v30 = vcombine.high %v5689_v33, %v5691_v20  ;;  %v5692_v45 = vld [vmem:[#allocation8 + $0x120] sm:$0xff]  ;;  %v5693_v7 = vld [vmem:[#allocation8 + $0x128] sm:$0xff] }
 0xb4b   : > { %v7641_v23 = vpop.f32.mrb[51].mxu1  ;;  %v7663_v49 = vpop.f32.mrb[39].mxu0  ;;  %v5694_v0 = vld [vmem:[#allocation8 + $0x160] sm:$0xff] }
 0xb4c   : > { %v10000_v8 = vadd.f32 %v7661_v9, %v7639_v46  ;;  %v7642_v26 = vadd.f32 %v7641_v23, %v7640_v18  ;;  %v7664_v48 = vadd.f32 %v7663_v49, %v7662_v22  ;;  %v5695_v46 = vld [vmem:[#allocation8 + $0x168] sm:$0xff]  ;;  %v7436_v9 = vcombine.low %v5688_v16, %v5690_v51  ;;  %v5696_v49 = vld [vmem:[#allocation8 + $0x1a0] sm:$0xff] }
 0xb4d   : > { %v7438_v18 = vcombine.low %v5689_v33, %v5691_v20  ;;  %v7441_v22 = vcombine.high %v5692_v45, %v5694_v0  ;;  %v7443_v23 = vcombine.high %v5693_v7, %v5695_v46  ;;  %v7440_v44 = vcombine.low %v5692_v45, %v5694_v0  ;;  %v5713_v16 = vld [vmem:[#allocation8 + $0x3a8] sm:$0xff] }
 0xb4e   : > { %v10002_v59 = vadd.f32 %v7664_v48, %v7642_v26  ;;  %v5698_v26 = vld [vmem:[#allocation8 + $0x1e0] sm:$0xff]  ;;  %v5697_v48 = vld [vmem:[#allocation8 + $0x1a8] sm:$0xff]  ;;  %v7442_v36 = vcombine.low %v5693_v7, %v5695_v46  ;;  %v8193_v7 = vld [vmem:[#allocation10 + $0x250] sm:$0xff]  }
 0xb4f   : > { %v7445_v5 = vcombine.high %v5696_v49, %v5698_v26  ;;  %v5715_v51 = vld [vmem:[#allocation8 + $0x3e8] sm:$0xff]  ;;  %v8194_v46 = vld [vmem:[#allocation10 + $0x2d0] sm:$0xff]  }
 0xb50   : > { %v7462_v20 = vcombine.low %v5713_v16, %v5715_v51  ;;  %v8191_v45 = vld [vmem:[#allocation10 + $0x208] sm:$0xff]  }
 0xb51   : > { %v8192_v0 = vld [vmem:[#allocation10 + $0x288] sm:$0xff]  }
 0xb68   : > { %v5280_v50 = vpop.f32.mrb[52].mxu1  ;;  %v5323_v6 = vpop.f32.mrb[40].mxu0 }
 0xb69   : > { %v5281_v57 = vadd.f32 %v5280_v50, %v5069_v15  ;;  %v5324_v38 = vadd.f32 %v5323_v6, %v5077_v25  ;;  %v5282_v34 = vpop.f32.mrb[53].mxu1  ;;  %v5325_v56 = vpop.f32.mrb[41].mxu0 }
 0xb6a   : > { %v5283_v42 = vadd.f32 %v5282_v34, %v5073_v4  ;;  %v5326_v27 = vadd.f32 %v5325_v56, %v5081_v54  ;;  %v5284_v40 = vpop.f32.mrb[54].mxu1  ;;  %v5327_v29 = vpop.f32.mrb[42].mxu0  ;;  %v5705_v34 = vld [vmem:[#allocation8 + $0x2a8] sm:$0xff] }
 0xb6b   : > { %v5285_v55 = vadd.f32 %v5284_v40, %v5069_v15  ;;  %v5328_v60 = vadd.f32 %v5327_v29, %v5077_v25  ;;  %v5286_v31 = vpop.f32.mrb[55].mxu1  ;;  %v5329_v12 = vpop.f32.mrb[43].mxu0  ;;  %v5332_v41 = vmax.f32 %v5281_v57, 0.0  ;;  %v5334_v53 = vmax.f32 %v5324_v38, 0.0  ;;  %v5701_v15 = vld [vmem:[#allocation8 + $0x228] sm:$0xff]  ;;  %v5704_v57 = vld [vmem:[#allocation8 + $0x2a0] sm:$0xff] }
 0xb6c   : > { %v5287_v11 = vadd.f32 %v5286_v31, %v5073_v4  ;;  %v5330_v13 = vadd.f32 %v5329_v12, %v5081_v54  ;;  %v5333_v43 = vmax.f32 %v5283_v42, 0.0  ;;  %v5335_v52 = vmax.f32 %v5326_v27, 0.0  ;;  %v5703_v25 = vld [vmem:[#allocation8 + $0x268] sm:$0xff]  ;;  %v5706_v38 = vld [vmem:[#allocation8 + $0x2e0] sm:$0xff] }
 0xb6d   : > { %v5336_v62 = vmax.f32 %v5285_v55, 0.0  ;;  %v5338_v61 = vmax.f32 %v5328_v60, 0.0  ;;  %v7444_v4 = vcombine.low %v5696_v49, %v5698_v26  ;;  %v7446_v54 = vcombine.low %v5697_v48, %v5699_v21  ;;  %v5707_v56 = vld [vmem:[#allocation8 + $0x2e8] sm:$0xff]  ;;  %v5708_v55 = vld [vmem:[#allocation8 + $0x320] sm:$0xff]  ;;  %v8199_v49 = vld [vmem:[#allocation10 + $0x218] sm:$0xff]  }
 0xb6e   : > { %v5337_v10 = vmax.f32 %v5287_v11, 0.0  ;;  %v5339_v14 = vmax.f32 %v5330_v13, 0.0  ;;  %v7451_v6 = vcombine.high %v5701_v15, %v5703_v25  ;;  %v7450_v27 = vcombine.low %v5701_v15, %v5703_v25  ;;  %v5710_v60 = vld [vmem:[#allocation8 + $0x360] sm:$0xff]  ;;  %v5709_v31 = vld [vmem:[#allocation8 + $0x328] sm:$0xff]  ;;  %v8200_v26 = vld [vmem:[#allocation10 + $0x298] sm:$0xff]  }
 0xb6f   : > { %v5340_v17 = vpack.c.bf16 %v5336_v62, %v5332_v41  ;;  %v5342_v39 = vpack.c.bf16 %v5338_v61, %v5334_v53  ;;  %v7453_v40 = vcombine.high %v5704_v57, %v5706_v38  ;;  %v7455_v29 = vcombine.high %v5705_v34, %v5707_v56  ;;  %v5711_v12 = vld [vmem:[#allocation8 + $0x368] sm:$0xff]  ;;  %v5712_v62 = vld [vmem:[#allocation8 + $0x3a0] sm:$0xff]  ;;  %v8209_v15 = vld [vmem:[#allocation10 + $0x270] sm:$0xff]  }
 0xb70   : > { %v5341_v35 = vpack.c.bf16 %v5337_v10, %v5333_v43  ;;  %v5343_v24 = vpack.c.bf16 %v5339_v14, %v5335_v52  ;;  %v7452_v11 = vcombine.low %v5704_v57, %v5706_v38  ;;  %v7454_v13 = vcombine.low %v5705_v34, %v5707_v56  ;;  %v5714_v61 = vld [vmem:[#allocation8 + $0x3e0] sm:$0xff]  ;;  %v8210_v25 = vld [vmem:[#allocation10 + $0x2f0] sm:$0xff]   ;;  %v8215_v57 = vld [vmem:[#allocation10 + $0x238] sm:$0xff]  }
 0xb71   : > { %v7457_v41 = vcombine.high %v5708_v55, %v5710_v60  ;;  %v7459_v53 = vcombine.high %v5709_v31, %v5711_v12  ;;  %v7456_v43 = vcombine.low %v5708_v55, %v5710_v60  ;;  %v7458_v52 = vcombine.low %v5709_v31, %v5711_v12  ;;  %v8216_v38 = vld [vmem:[#allocation10 + $0x2b8] sm:$0xff]   ;;  %v10021_v34 = vld [vmem:[#allocation8 + $0x30] sm:$0xff]  ;;  %v7303_v31 = vld [vmem:[%s10233_s21] ss:$0 sm:$0xff]  ;;  %s8607_s21 = smov [#allocation12]  }
 0xb72   : > { %5632 = vmatprep.mubr.bf16.mxu1 %v5341_v35  ;;  %5673 = vmatprep.mubr.bf16.mxu0 %v5343_v24  ;;  %v7461_v10 = vcombine.high %v5712_v62, %v5714_v61  ;;  %v7463_v14 = vcombine.high %v5713_v16, %v5715_v51  ;;  %v7460_v33 = vcombine.low %v5712_v62, %v5714_v61  ;;  %v8187_v35 = vld [vmem:[#allocation10 + $0x200] sm:$0xff]   ;;  %v10023_v56 = vld [vmem:[#allocation8 + $0x70] sm:$0xff] }
 0xb73   : > { %5633 = vmatmul.mubr.bf16.vlgmr.msra.gmra.mrb[56].mxu1 %v5340_v17  ;;  %5674 = vmatmul.mubr.bf16.vlgmr.msra.gmra.mrb[44].mxu0 %v5342_v39  ;;  %v8185_v17 = vld [vmem:[#allocation10 + $0x240] sm:$0xff]  }
 0xb74   : > { %5899 = vmatpush1.bf16.msra.mxu1 %v7432_v63  ;;  %5942 = vmatpush1.bf16.msra.mxu0 %v7434_v47  ;;  %v7447_v63 = vcombine.high %v5697_v48, %v5699_v21  ;;  %v5702_v47 = vld [vmem:[#allocation8 + $0x260] sm:$0xff] }
 0xb75   : > { %5900 = vmatprep.subr.bf16.mxu1 %v7437_v32  ;;  %5943 = vmatprep.subr.bf16.mxu0 %v7439_v30  ;;  %v7449_v50 = vcombine.high %v5700_v37, %v5702_v47  ;;  %v7448_v42 = vcombine.low %v5700_v37, %v5702_v47  ;;  %v8186_v39 = vld [vmem:[#allocation10 + $0x2c0] sm:$0xff]   ;;  %v8189_v32 = vld [vmem:[#allocation10 + $0x248] sm:$0xff]  }
 0xb76   : > { %5930 = vmatprep.mubr.bf16.mxu1 %v10228_v58  ;;  %5973 = vmatprep.mubr.bf16.mxu0 %v10228_v58  ;;  %v8188_v24 = vld [vmem:[#allocation10 + $0x280] sm:$0xff]   ;;  %v8190_v30 = vld [vmem:[#allocation10 + $0x2c8] sm:$0xff]  }
 0xb77   : > { %v8201_v48 = vld [vmem:[#allocation10 + $0x260] sm:$0xff]   ;;  %v8207_v37 = vld [vmem:[#allocation10 + $0x228] sm:$0xff]  }
 0xb78   : > { %5901 = vmatpush1.bf16.msra.mxu1 %v7436_v9  ;;  %5944 = vmatpush1.bf16.msra.mxu0 %v7438_v18  ;;  %v8195_v9 = vld [vmem:[#allocation10 + $0x210] sm:$0xff]   ;;  %v8202_v21 = vld [vmem:[#allocation10 + $0x2e0] sm:$0xff]   ;;  %v8208_v47 = vld [vmem:[#allocation10 + $0x2a8] sm:$0xff]  }
 0xb79   : > { %5902 = vmatprep.subr.bf16.mxu1 %v7441_v22  ;;  %5945 = vmatprep.subr.bf16.mxu0 %v7443_v23  ;;  %v8196_v18 = vld [vmem:[#allocation10 + $0x290] sm:$0xff]   ;;  %v8197_v22 = vld [vmem:[#allocation10 + $0x258] sm:$0xff]  }
 0xb7a   : > { %v8198_v23 = vld [vmem:[#allocation10 + $0x2d8] sm:$0xff]  }
 0xb7c   : > { %5903 = vmatpush1.bf16.msra.mxu1 %v7440_v44  ;;  %5946 = vmatpush1.bf16.msra.mxu0 %v7442_v36  ;;  %v8203_v44 = vld [vmem:[#allocation10 + $0x220] sm:$0xff]  }
 0xb7d   : > { %5904 = vmatprep.subr.bf16.mxu1 %v7445_v5  ;;  %5947 = vmatprep.subr.bf16.mxu0 %v7447_v63  ;;  %v8204_v36 = vld [vmem:[#allocation10 + $0x2a0] sm:$0xff]   ;;  %v8205_v5 = vld [vmem:[#allocation10 + $0x268] sm:$0xff]  }
 0xb7e   : > { %v8206_v63 = vld [vmem:[#allocation10 + $0x2e8] sm:$0xff]  }
 0xb80   : > { %5905 = vmatpush1.bf16.msra.mxu1 %v7444_v4  ;;  %5948 = vmatpush1.bf16.msra.mxu0 %v7446_v54  ;;  %v8211_v4 = vld [vmem:[#allocation10 + $0x230] sm:$0xff]  }
 0xb81   : > { %5906 = vmatprep.subr.bf16.mxu1 %v7449_v50  ;;  %5949 = vmatprep.subr.bf16.mxu0 %v7451_v6  ;;  %v8212_v54 = vld [vmem:[#allocation10 + $0x2b0] sm:$0xff]   ;;  %v8213_v50 = vld [vmem:[#allocation10 + $0x278] sm:$0xff]  }
 0xb82   : > { %v8214_v6 = vld [vmem:[#allocation10 + $0x2f8] sm:$0xff]  }
 0xb84   : > { %5907 = vmatpush1.bf16.msra.mxu1 %v7448_v42  ;;  %5950 = vmatpush1.bf16.msra.mxu0 %v7450_v27  ;;  %v10025_v42 = vld [vmem:[#allocation8 + $0x38] sm:$0xff]  ;;  %v7496_v27 = vcombine.low %v10021_v34, %v10023_v56 }
 0xb85   : > { %5908 = vmatprep.subr.bf16.mxu1 %v7453_v40  ;;  %5951 = vmatprep.subr.bf16.mxu0 %v7455_v29  ;;  %v7497_v40 = vcombine.high %v10021_v34, %v10023_v56  ;;  %v10031_v29 = vld [vmem:[#allocation8 + $0x78] sm:$0xff] }
 0xb86   : > { %v7498_v55 = vcombine.low %v10025_v42, %v10031_v29  ;;  %v7499_v60 = vcombine.high %v10025_v42, %v10031_v29  ;;  %v6352_v29 = vld [vmem:[#allocation8 + $0x230] sm:$0xff] }
 0xb88   : > { %5909 = vmatpush1.bf16.msra.mxu1 %v7452_v11  ;;  %5952 = vmatpush1.bf16.msra.mxu0 %v7454_v13 }
 0xb89   : > { %5910 = vmatprep.subr.bf16.mxu1 %v7457_v41  ;;  %5953 = vmatprep.subr.bf16.mxu0 %v7459_v53  ;;  %v8331_v53 = vld [vmem:[%s9945_s14] sm:$0xff] }
 0xb8a   : > { %v4378_v62 = vadd.f32 %v8331_v53, %v7303_v31 }
 0xb8c   : > { %5911 = vmatpush1.bf16.msra.mxu1 %v7456_v43  ;;  %5954 = vmatpush1.bf16.msra.mxu0 %v7458_v52  ;;  %v8332_v52 = vld [vmem:[%s9945_s14 + $0x8] sm:$0xff]  ;;  %s8479_s14 = sshll.u32 %s8607_s21, 4  ;;  %s8480_s14 = int_to_ptr.vmem [resolvable:$false] %s8479_s14 }
 0xb8d   : > { %5912 = vmatprep.subr.bf16.mxu1 %v7461_v10  ;;  %5955 = vmatprep.subr.bf16.mxu0 %v7463_v14  ;;  %v4379_v10 = vadd.f32 %v8332_v52, %v7303_v31  ;;  %v6346_v52 = vld [vmem:[#allocation8 + $0x170] sm:$0xff]  ;;  %s8481_s26 = scalar_lea.vmem %s8480_s14, 512  ;;  %p8482_p12 = scmp.lt.s32.totalorder %s10080_s12, %s8480_s14 }
 0xb8e   : > { %p8483_p2 = scmp.lt.s32.totalorder %s8481_s26, %s8475_s19 }
 0xb90   : > { %5913 = vmatpush1.bf16.msra.mxu1 %v7460_v33  ;;  %5956 = vmatpush1.bf16.msra.mxu0 %v7462_v20  ;;  %v5030_v20 = vadd.f32 %v10000_v8, %v4378_v62  ;;  %p8484_p1 = por %p8483_p2, %p8482_p12 }
 0xb91   : > { %7709 = vmatprep.subr.bf16.mxu1 %v8185_v17  ;;  %7731 = vmatprep.subr.bf16.mxu0 %v8186_v39 }
 0xb92   : > { %p8485_p13 = pnand %p8484_p1, %p8478_p7 }
 0xb93   : > { %5931 = vmatmul.mubr.bf16.vlgmr.msra.gmra.mrb[60].mxu1 %v9966_v2  ;;  %5974 = vmatmul.mubr.bf16.vlgmr.msra.gmra.mrb[48].mxu0 %v9966_v2 }
 0xb94   : > { %7710 = vmatpush3.bf16.msra.mxu1 %v8187_v35  ;;  %7732 = vmatpush3.bf16.msra.mxu0 %v8188_v24  ;;  %v5031_v24 = vadd.f32 %v10002_v59, %v4379_v10  ;;  %v6345_v10 = vld [vmem:[#allocation8 + $0x138] sm:$0xff] }
 0xb95   : > { %7711 = vmatprep.subr.bf16.mxu1 %v8189_v32  ;;  %7733 = vmatprep.subr.bf16.mxu0 %v8190_v30 }
 0xb98   : > { %7712 = vmatpush3.bf16.msra.mxu1 %v8191_v45  ;;  %7734 = vmatpush3.bf16.msra.mxu0 %v8192_v0  ;;  %v5716_v0 = vld [vmem:[%s10232_s1 + $0x8] sm:$0xf] }
 0xb99   : > { %7713 = vmatprep.subr.bf16.mxu1 %v8193_v7  ;;  %7735 = vmatprep.subr.bf16.mxu0 %v8194_v46  ;;  %v5721_v7 = vrot.slane %v5716_v0, %v8958_v1  ;;  %v5729_v46 = vrot.slane %v5716_v0, %v9021_v19  ;;  %v5725_v8 = vrot.slane %v5716_v0, %v8964_v3 }
 0xb9c   : > { %7714 = vmatpush3.bf16.msra.mxu1 %v8195_v9  ;;  %7736 = vmatpush3.bf16.msra.mxu0 %v8196_v18  ;;  %v5733_v9 = vrot.slane %v5716_v0, %v9974_v28  ;;  %v6351_v0 = vld [vmem:[#allocation8 + $0x1f8] sm:$0xff] }
 0xb9d   : > { %7715 = vmatprep.subr.bf16.mxu1 %v8197_v22  ;;  %7737 = vmatprep.subr.bf16.mxu0 %v8198_v23 }
 0xba0   : > { %7716 = vmatpush3.bf16.msra.mxu1 %v8199_v49  ;;  %7738 = vmatpush3.bf16.msra.mxu0 %v8200_v26 }
 0xba1   : > { %7717 = vmatprep.subr.bf16.mxu1 %v8201_v48  ;;  %7739 = vmatprep.subr.bf16.mxu0 %v8202_v21 }
 0xba4   : > { %7718 = vmatpush3.bf16.msra.mxu1 %v8203_v44  ;;  %7740 = vmatpush3.bf16.msra.mxu0 %v8204_v36 }
 0xba5   : > { %7719 = vmatprep.subr.bf16.mxu1 %v8205_v5  ;;  %7741 = vmatprep.subr.bf16.mxu0 %v8206_v63 }
 0xba8   : > { %7720 = vmatpush3.bf16.msra.mxu1 %v8207_v37  ;;  %7742 = vmatpush3.bf16.msra.mxu0 %v8208_v47 }
 0xba9   : > { %7721 = vmatprep.subr.bf16.mxu1 %v8209_v15  ;;  %7743 = vmatprep.subr.bf16.mxu0 %v8210_v25 }
 0xbac   : > { %7722 = vmatpush3.bf16.msra.mxu1 %v8211_v4  ;;  %7744 = vmatpush3.bf16.msra.mxu0 %v8212_v54 }
 0xbad   : > { %7723 = vmatprep.subr.bf16.mxu1 %v8213_v50  ;;  %7745 = vmatprep.subr.bf16.mxu0 %v8214_v6 }
 0xbb0   : > { %7724 = vmatpush3.bf16.msra.mxu1 %v8215_v57  ;;  %7746 = vmatpush3.bf16.msra.mxu0 %v8216_v38  ;;  %v6340_v57 = vld [vmem:[#allocation8 + $0xb0] sm:$0xff] }
 0xbb1   : > { %6550 = vmatprep.subr.bf16.mxu1 %v7497_v40  ;;  %6593 = vmatprep.subr.bf16.mxu0 %v7499_v60  ;;  %v6342_v38 = vld [vmem:[#allocation8 + $0xf0] sm:$0xff] }
 0xc46   : > { %v7681_v12 = vpop.f32.mrb[56].mxu1  ;;  %v7703_v11 = vpop.f32.mrb[44].mxu0 }
 0xc47   : > { %v7682_v13 = vpop.f32.mrb[57].mxu1  ;;  %v7704_v41 = vpop.f32.mrb[45].mxu0 }
 0xc48   : > { %v7683_v61 = vadd.f32 %v7682_v13, %v7681_v12  ;;  %v7705_v16 = vadd.f32 %v7704_v41, %v7703_v11  ;;  %v7684_v51 = vpop.f32.mrb[58].mxu1  ;;  %v7706_v43 = vpop.f32.mrb[46].mxu0  ;;  %v6341_v11 = vld [vmem:[#allocation8 + $0xb8] sm:$0xff] }
 0xc49   : > { %v7685_v14 = vpop.f32.mrb[59].mxu1  ;;  %v7707_v33 = vpop.f32.mrb[47].mxu0  ;;  %v6343_v13 = vld [vmem:[#allocation8 + $0xf8] sm:$0xff] }
 0xc4a   : > { %v5676_v17 = vadd.f32 %v7705_v16, %v7683_v61  ;;  %v7686_v39 = vadd.f32 %v7685_v14, %v7684_v51  ;;  %v7708_v35 = vadd.f32 %v7707_v33, %v7706_v43  ;;  %v7501_v16 = vcombine.high %v6340_v57, %v6342_v38  ;;  %v6344_v43 = vld [vmem:[#allocation8 + $0x130] sm:$0xff]  ;;  %v6347_v14 = vld [vmem:[#allocation8 + $0x178] sm:$0xff] }
 0xc4b   : > { %v7503_v51 = vcombine.high %v6341_v11, %v6343_v13  ;;  %v7500_v33 = vcombine.low %v6340_v57, %v6342_v38  ;;  %v7504_v34 = vcombine.low %v6344_v43, %v6346_v52  ;;  %v7506_v56 = vcombine.low %v6345_v10, %v6347_v14  ;;  %v6367_v57 = vld [vmem:[#allocation8 + $0x3f8] sm:$0xff] }
 0xc4c   : > { %v10044_v32 = vadd.f32 %v5676_v17, %v5030_v20  ;;  %v5679_v30 = vadd.f32 %v7708_v35, %v7686_v39  ;;  %v7502_v20 = vcombine.low %v6341_v11, %v6343_v13  ;;  %v7505_v17 = vcombine.high %v6344_v43, %v6346_v52  ;;  %v6348_v35 = vld [vmem:[#allocation8 + $0x1b0] sm:$0xff]  ;;  %v8217_v13 = vld [vmem:[#allocation10 + $0x340] sm:$0xff]   ;;  %v8224_v43 = vld [vmem:[#allocation10 + $0x388] sm:$0xff]  }
 0xc4d   : > { %v7507_v39 = vcombine.high %v6345_v10, %v6347_v14  ;;  %v8225_v52 = vld [vmem:[#allocation10 + $0x350] sm:$0xff]  }
 0xc4e   : > { %v10046_v45 = vadd.f32 %v5679_v30, %v5031_v24  ;;  %v6350_v24 = vld [vmem:[#allocation8 + $0x1f0] sm:$0xff]  ;;  %v6349_v30 = vld [vmem:[#allocation8 + $0x1b8] sm:$0xff] }
 0xc4f   : > { %v7509_v42 = vcombine.high %v6348_v35, %v6350_v24  ;;  %v8226_v10 = vld [vmem:[#allocation10 + $0x3d0] sm:$0xff]  }
 0xc50   : > { %v8227_v14 = vld [vmem:[#allocation10 + $0x310] sm:$0xff]  }
 0xc66   : > { %v5932_v18 = vpop.f32.mrb[60].mxu1  ;;  %v5975_v22 = vpop.f32.mrb[48].mxu0 }
 0xc67   : > { %v5933_v59 = vadd.f32 %v5932_v18, %v5721_v7  ;;  %v5976_v23 = vadd.f32 %v5975_v22, %v5729_v46  ;;  %v5934_v49 = vpop.f32.mrb[61].mxu1  ;;  %v5977_v26 = vpop.f32.mrb[49].mxu0  ;;  %v6356_v22 = vld [vmem:[#allocation8 + $0x2b0] sm:$0xff] }
 0xc68   : > { %v5935_v48 = vadd.f32 %v5934_v49, %v5725_v8  ;;  %v5978_v21 = vadd.f32 %v5977_v26, %v5733_v9  ;;  %v5936_v44 = vpop.f32.mrb[62].mxu1  ;;  %v5979_v36 = vpop.f32.mrb[50].mxu0  ;;  %v6359_v49 = vld [vmem:[#allocation8 + $0x2f8] sm:$0xff] }
 0xc69   : > { %v5937_v5 = vadd.f32 %v5936_v44, %v5721_v7  ;;  %v5980_v63 = vadd.f32 %v5979_v36, %v5729_v46  ;;  %v5938_v37 = vpop.f32.mrb[63].mxu1  ;;  %v5981_v47 = vpop.f32.mrb[51].mxu0  ;;  %v5984_v4 = vmax.f32 %v5933_v59, 0.0  ;;  %v5986_v54 = vmax.f32 %v5976_v23, 0.0  ;;  %v6353_v7 = vld [vmem:[#allocation8 + $0x238] sm:$0xff]  ;;  %v6358_v59 = vld [vmem:[#allocation8 + $0x2f0] sm:$0xff] }
 0xc6a   : > { %v5939_v15 = vadd.f32 %v5938_v37, %v5725_v8  ;;  %v5982_v25 = vadd.f32 %v5981_v47, %v5733_v9  ;;  %v5985_v40 = vmax.f32 %v5935_v48, 0.0  ;;  %v5987_v60 = vmax.f32 %v5978_v21, 0.0  ;;  %v6355_v46 = vld [vmem:[#allocation8 + $0x278] sm:$0xff]  ;;  %v6360_v36 = vld [vmem:[#allocation8 + $0x330] sm:$0xff] }
 0xc6b   : > { %v5988_v50 = vmax.f32 %v5937_v5, 0.0  ;;  %v5990_v6 = vmax.f32 %v5980_v63, 0.0  ;;  %v7508_v8 = vcombine.low %v6348_v35, %v6350_v24  ;;  %v7510_v9 = vcombine.low %v6349_v30, %v6351_v0  ;;  %v6357_v23 = vld [vmem:[#allocation8 + $0x2b8] sm:$0xff]  ;;  %v6362_v5 = vld [vmem:[#allocation8 + $0x370] sm:$0xff]  ;;  %v8233_v35 = vld [vmem:[#allocation10 + $0x360] sm:$0xff]  }
 0xc6c   : > { %v5989_v31 = vmax.f32 %v5939_v15, 0.0  ;;  %v5991_v12 = vmax.f32 %v5982_v25, 0.0  ;;  %v7514_v48 = vcombine.low %v6353_v7, %v6355_v46  ;;  %v7517_v21 = vcombine.high %v6356_v22, %v6358_v59  ;;  %v6361_v63 = vld [vmem:[#allocation8 + $0x338] sm:$0xff]  ;;  %v8234_v24 = vld [vmem:[#allocation10 + $0x3e0] sm:$0xff]  }
 0xc6d   : > { %v5992_v41 = vpack.c.bf16 %v5988_v50, %v5984_v4  ;;  %v5994_v53 = vpack.c.bf16 %v5990_v6, %v5986_v54  ;;  %v7519_v44 = vcombine.high %v6357_v23, %v6359_v49  ;;  %v6363_v37 = vld [vmem:[#allocation8 + $0x378] sm:$0xff]  ;;  %v7516_v47 = vcombine.low %v6356_v22, %v6358_v59  ;;  %v6364_v54 = vld [vmem:[#allocation8 + $0x3b0] sm:$0xff] }
 0xc6e   : > { %v5993_v62 = vpack.c.bf16 %v5989_v31, %v5985_v40  ;;  %v5995_v61 = vpack.c.bf16 %v5991_v12, %v5987_v60  ;;  %v7518_v15 = vcombine.low %v6357_v23, %v6359_v49  ;;  %v7521_v25 = vcombine.high %v6360_v36, %v6362_v5  ;;  %v6366_v50 = vld [vmem:[#allocation8 + $0x3f0] sm:$0xff]  ;;  %v6365_v6 = vld [vmem:[#allocation8 + $0x3b8] sm:$0xff] }
 0xc6f   : > { %v7523_v4 = vcombine.high %v6361_v63, %v6363_v37  ;;  %v7520_v38 = vcombine.low %v6360_v36, %v6362_v5  ;;  %v7522_v40 = vcombine.low %v6361_v63, %v6363_v37  ;;  %v7525_v60 = vcombine.high %v6364_v54, %v6366_v50 }
 0xc70   : > { %6284 = vmatprep.mubr.bf16.mxu1 %v5993_v62  ;;  %6325 = vmatprep.mubr.bf16.mxu0 %v5995_v61  ;;  %v7527_v31 = vcombine.high %v6365_v6, %v6367_v57  ;;  %v7524_v12 = vcombine.low %v6364_v54, %v6366_v50  ;;  %v7526_v11 = vcombine.low %v6365_v6, %v6367_v57  ;;  %v8220_v62 = vld [vmem:[#allocation10 + $0x380] sm:$0xff]   ;;  %v8221_v61 = vld [vmem:[#allocation10 + $0x348] sm:$0xff]  }
 0xc71   : > { %6285 = vmatmul.mubr.bf16.vlgmr.msra.gmra.mrb[64].mxu1 %v5992_v41  ;;  %6326 = vmatmul.mubr.bf16.vlgmr.msra.gmra.mrb[52].mxu0 %v5994_v53  ;;  %v8218_v41 = vld [vmem:[#allocation10 + $0x3c0] sm:$0xff]   ;;  %v6368_v54 = vld [vmem:[%s10232_s1 + $0xc] sm:$0xf] }
 0xc72   : > { %6551 = vmatpush1.bf16.msra.mxu1 %v7496_v27  ;;  %6594 = vmatpush1.bf16.msra.mxu0 %v7498_v55  ;;  %v7511_v27 = vcombine.high %v6349_v30, %v6351_v0  ;;  %v6354_v55 = vld [vmem:[#allocation8 + $0x270] sm:$0xff]  ;;  %v8219_v53 = vld [vmem:[#allocation10 + $0x300] sm:$0xff]   ;;  %v6373_v50 = vrot.slane %v6368_v54, %v8958_v1  ;;  %v6381_v6 = vrot.slane %v6368_v54, %v9021_v19 }
 0xc73   : > { %6552 = vmatprep.subr.bf16.mxu1 %v7501_v16  ;;  %6595 = vmatprep.subr.bf16.mxu0 %v7503_v51  ;;  %v7513_v18 = vcombine.high %v6352_v29, %v6354_v55  ;;  %v7512_v26 = vcombine.low %v6352_v29, %v6354_v55  ;;  %v8222_v16 = vld [vmem:[#allocation10 + $0x3c8] sm:$0xff]   ;;  %v8235_v30 = vld [vmem:[#allocation10 + $0x320] sm:$0xff]   ;;  %v8241_v29 = vld [vmem:[#allocation10 + $0x370] sm:$0xff]   ;;  %v6377_v57 = vrot.slane %v6368_v54, %v8964_v3 }
 0xc74   : > { %6582 = vmatprep.mubr.bf16.mxu1 %v10228_v58  ;;  %6625 = vmatprep.mubr.bf16.mxu0 %v10228_v58  ;;  %v7515_v58 = vcombine.high %v6353_v7, %v6355_v46  ;;  %v8223_v51 = vld [vmem:[#allocation10 + $0x308] sm:$0xff]   ;;  %v8236_v0 = vld [vmem:[#allocation10 + $0x3a0] sm:$0xff]   ;;  %v8242_v55 = vld [vmem:[#allocation10 + $0x3f0] sm:$0xff]  }
 0xc75   : > { %v8243_v7 = vld [vmem:[#allocation10 + $0x330] sm:$0xff]  }
 0xc76   : > { %6553 = vmatpush1.bf16.msra.mxu1 %v7500_v33  ;;  %6596 = vmatpush1.bf16.msra.mxu0 %v7502_v20  ;;  %v8229_v33 = vld [vmem:[#allocation10 + $0x358] sm:$0xff]   ;;  %v8244_v46 = vld [vmem:[#allocation10 + $0x3b0] sm:$0xff]  }
 0xc77   : > { %6554 = vmatprep.subr.bf16.mxu1 %v7505_v17  ;;  %6597 = vmatprep.subr.bf16.mxu0 %v7507_v39  ;;  %v8230_v20 = vld [vmem:[#allocation10 + $0x3d8] sm:$0xff]  }
 0xc78   : > { %v8231_v17 = vld [vmem:[#allocation10 + $0x318] sm:$0xff]  }
 0xc79   : > { %v8232_v39 = vld [vmem:[#allocation10 + $0x398] sm:$0xff]  }
 0xc7a   : > { %6555 = vmatpush1.bf16.msra.mxu1 %v7504_v34  ;;  %6598 = vmatpush1.bf16.msra.mxu0 %v7506_v56  ;;  %v8237_v34 = vld [vmem:[#allocation10 + $0x368] sm:$0xff]  }
 0xc7b   : > { %6556 = vmatprep.subr.bf16.mxu1 %v7509_v42  ;;  %6599 = vmatprep.subr.bf16.mxu0 %v7511_v27  ;;  %v8238_v56 = vld [vmem:[#allocation10 + $0x3e8] sm:$0xff]  }
 0xc7c   : > { %v8239_v42 = vld [vmem:[#allocation10 + $0x328] sm:$0xff]  }
 0xc7d   : > { %v8240_v27 = vld [vmem:[#allocation10 + $0x3a8] sm:$0xff]  }
 0xc7e   : > { %6557 = vmatpush1.bf16.msra.mxu1 %v7508_v8  ;;  %6600 = vmatpush1.bf16.msra.mxu0 %v7510_v9  ;;  %v8245_v8 = vld [vmem:[#allocation10 + $0x378] sm:$0xff]  }
 0xc7f   : > { %6558 = vmatprep.subr.bf16.mxu1 %v7513_v18  ;;  %6601 = vmatprep.subr.bf16.mxu0 %v7515_v58  ;;  %v8246_v9 = vld [vmem:[#allocation10 + $0x3f8] sm:$0xff]  }
 0xc80   : > { %v8247_v18 = vld [vmem:[#allocation10 + $0x338] sm:$0xff]  }
 0xc81   : > { %v8248_v58 = vld [vmem:[#allocation10 + $0x3b8] sm:$0xff]  }
 0xc82   : > { %6559 = vmatpush1.bf16.msra.mxu1 %v7512_v26  ;;  %6602 = vmatpush1.bf16.msra.mxu0 %v7514_v48 }
 0xc83   : > { %6560 = vmatprep.subr.bf16.mxu1 %v7517_v21  ;;  %6603 = vmatprep.subr.bf16.mxu0 %v7519_v44 }
 0xc86   : > { %6561 = vmatpush1.bf16.msra.mxu1 %v7516_v47  ;;  %6604 = vmatpush1.bf16.msra.mxu0 %v7518_v15 }
 0xc87   : > { %6562 = vmatprep.subr.bf16.mxu1 %v7521_v25  ;;  %6605 = vmatprep.subr.bf16.mxu0 %v7523_v4 }
 0xc8a   : > { %6563 = vmatpush1.bf16.msra.mxu1 %v7520_v38  ;;  %6606 = vmatpush1.bf16.msra.mxu0 %v7522_v40  ;;  %v6385_v38 = vrot.slane %v6368_v54, %v9974_v28 }
 0xc8b   : > { %6564 = vmatprep.subr.bf16.mxu1 %v7525_v60  ;;  %6607 = vmatprep.subr.bf16.mxu0 %v7527_v31 }
 0xc8e   : > { %6565 = vmatpush1.bf16.msra.mxu1 %v7524_v12  ;;  %6608 = vmatpush1.bf16.msra.mxu0 %v7526_v11 }
 0xc8f   : > { %7753 = vmatprep.subr.bf16.mxu1 %v8217_v13  ;;  %7775 = vmatprep.subr.bf16.mxu0 %v8218_v41 }
 0xc91   : > { %6583 = vmatmul.mubr.bf16.vlgmr.msra.gmra.mrb[68].mxu1 %v9966_v2  ;;  %6626 = vmatmul.mubr.bf16.vlgmr.msra.gmra.mrb[56].mxu0 %v9966_v2  ;;  %v8228_v2 = vld [vmem:[#allocation10 + $0x390] sm:$0xff]  }
 0xc92   : > { %7754 = vmatpush3.bf16.msra.mxu1 %v8219_v53  ;;  %7776 = vmatpush3.bf16.msra.mxu0 %v8220_v62 }
 0xc93   : > { %7755 = vmatprep.subr.bf16.mxu1 %v8221_v61  ;;  %7777 = vmatprep.subr.bf16.mxu0 %v8222_v16 }
 0xc96   : > { %7756 = vmatpush3.bf16.msra.mxu1 %v8223_v51  ;;  %7778 = vmatpush3.bf16.msra.mxu0 %v8224_v43 }
 0xc97   : > { %7757 = vmatprep.subr.bf16.mxu1 %v8225_v52  ;;  %7779 = vmatprep.subr.bf16.mxu0 %v8226_v10 }
 0xc9a   : > { %7758 = vmatpush3.bf16.msra.mxu1 %v8227_v14  ;;  %7780 = vmatpush3.bf16.msra.mxu0 %v8228_v2 }
 0xc9b   : > { %7759 = vmatprep.subr.bf16.mxu1 %v8229_v33  ;;  %7781 = vmatprep.subr.bf16.mxu0 %v8230_v20 }
 0xc9e   : > { %7760 = vmatpush3.bf16.msra.mxu1 %v8231_v17  ;;  %7782 = vmatpush3.bf16.msra.mxu0 %v8232_v39 }
 0xc9f   : > { %7761 = vmatprep.subr.bf16.mxu1 %v8233_v35  ;;  %7783 = vmatprep.subr.bf16.mxu0 %v8234_v24 }
 0xca2   : > { %7762 = vmatpush3.bf16.msra.mxu1 %v8235_v30  ;;  %7784 = vmatpush3.bf16.msra.mxu0 %v8236_v0 }
 0xca3   : > { %7763 = vmatprep.subr.bf16.mxu1 %v8237_v34  ;;  %7785 = vmatprep.subr.bf16.mxu0 %v8238_v56 }
 0xca6   : > { %7764 = vmatpush3.bf16.msra.mxu1 %v8239_v42  ;;  %7786 = vmatpush3.bf16.msra.mxu0 %v8240_v27 }
 0xca7   : > { %7765 = vmatprep.subr.bf16.mxu1 %v8241_v29  ;;  %7787 = vmatprep.subr.bf16.mxu0 %v8242_v55 }
 0xcaa   : > { %7766 = vmatpush3.bf16.msra.mxu1 %v8243_v7  ;;  %7788 = vmatpush3.bf16.msra.mxu0 %v8244_v46 }
 0xcab   : > { %7767 = vmatprep.subr.bf16.mxu1 %v8245_v8  ;;  %7789 = vmatprep.subr.bf16.mxu0 %v8246_v9 }
 0xcae   : > { %7768 = vmatpush3.bf16.msra.mxu1 %v8247_v18  ;;  %7790 = vmatpush3.bf16.msra.mxu0 %v8248_v58 }
 0xd44   : > { %v7725_v22 = vpop.f32.mrb[64].mxu1  ;;  %v7747_v59 = vpop.f32.mrb[52].mxu0 }
 0xd45   : > { %v7726_v23 = vpop.f32.mrb[65].mxu1  ;;  %v7748_v49 = vpop.f32.mrb[53].mxu0 }
 0xd46   : > { %v7727_v26 = vadd.f32 %v7726_v23, %v7725_v22  ;;  %v7749_v48 = vadd.f32 %v7748_v49, %v7747_v59  ;;  %v7728_v21 = vpop.f32.mrb[66].mxu1  ;;  %v7750_v44 = vpop.f32.mrb[54].mxu0 }
 0xd47   : > { %v7729_v36 = vpop.f32.mrb[67].mxu1  ;;  %v7751_v5 = vpop.f32.mrb[55].mxu0 }
 0xd48   : > { %v6328_v63 = vadd.f32 %v7749_v48, %v7727_v26  ;;  %v7730_v37 = vadd.f32 %v7729_v36, %v7728_v21  ;;  %v7752_v47 = vadd.f32 %v7751_v5, %v7750_v44 }
 0xd4a   : > { %v10066_v15 = vadd.f32 %v6328_v63, %v10044_v32  ;;  %v6331_v25 = vadd.f32 %v7752_v47, %v7730_v37 }
 0xd4c   : > { %v10069_v4 = vadd.f32 %v6331_v25, %v10046_v45 }
 0xd64   : > { %v6584_v40 = vpop.f32.mrb[68].mxu1  ;;  %v6627_v60 = vpop.f32.mrb[56].mxu0 }
 0xd65   : > { %v6585_v32 = vadd.f32 %v6584_v40, %v6373_v50  ;;  %v6628_v31 = vadd.f32 %v6627_v60, %v6381_v6  ;;  %v6586_v12 = vpop.f32.mrb[69].mxu1  ;;  %v6629_v11 = vpop.f32.mrb[57].mxu0 }
 0xd66   : > { %v6587_v45 = vadd.f32 %v6586_v12, %v6377_v57  ;;  %v6630_v13 = vadd.f32 %v6629_v11, %v6385_v38  ;;  %v6588_v41 = vpop.f32.mrb[70].mxu1  ;;  %v6631_v53 = vpop.f32.mrb[58].mxu0 }
 0xd67   : > { %v6589_v62 = vadd.f32 %v6588_v41, %v6373_v50  ;;  %v6632_v61 = vadd.f32 %v6631_v53, %v6381_v6  ;;  %v6590_v16 = vpop.f32.mrb[71].mxu1  ;;  %v6633_v1 = vpop.f32.mrb[59].mxu0  ;;  %v6636_v43 = vmax.f32 %v6585_v32, 0.0  ;;  %v6638_v3 = vmax.f32 %v6628_v31, 0.0 }
 0xd68   : > { %v6591_v51 = vadd.f32 %v6590_v16, %v6377_v57  ;;  %v6634_v19 = vadd.f32 %v6633_v1, %v6385_v38  ;;  %v6637_v10 = vmax.f32 %v6587_v45, 0.0  ;;  %v6639_v14 = vmax.f32 %v6630_v13, 0.0 }
 0xd69   : > { %v6640_v28 = vmax.f32 %v6589_v62, 0.0  ;;  %v6642_v52 = vmax.f32 %v6632_v61, 0.0 }
 0xd6a   : > { %v6641_v2 = vmax.f32 %v6591_v51, 0.0  ;;  %v6643_v33 = vmax.f32 %v6634_v19, 0.0 }
 0xd6b   : > { %v6644_v20 = vpack.c.bf16 %v6640_v28, %v6636_v43  ;;  %v6646_v17 = vpack.c.bf16 %v6642_v52, %v6638_v3 }
 0xd6c   : > { %v6645_v39 = vpack.c.bf16 %v6641_v2, %v6637_v10  ;;  %v6647_v35 = vpack.c.bf16 %v6643_v33, %v6639_v14 }
 0xd6e   : > { %6936 = vmatprep.mubr.bf16.mxu1 %v6645_v39  ;;  %6977 = vmatprep.mubr.bf16.mxu0 %v6647_v35 }
 0xd6f   : > { %6937 = vmatmul.mubr.bf16.vlgmr.msra.gmra.mrb[72].mxu1 %v6644_v20  ;;  %6978 = vmatmul.mubr.bf16.vlgmr.msra.gmra.mrb[60].mxu0 %v6646_v17 }
 0xd70   : > { %8488 = shalt.err (!%p8485_p13)
}
 0xd71   : > { %s8489_s28 = scalar_lea.hbm %s10087_s20, 256  ;;  %s8493_s10 = scalar_lea.hbm %s10234_s27, 512 }
 0xd72   : > { %p8490_p9 = scmp.ne.s32.totalorder %s10087_s20, %s8489_s28  ;;  %p8494_p4 = scmp.lt.u32.totalorder %s10087_s20, %s10234_s27 }
 0xd73   : > { %p8495_p8 = scmp.lt.u32.totalorder %s8493_s10, %s8489_s28  ;;  %p8497_p10 = scmp.lt.u32.totalorder %s8489_s28, %s10087_s20 }
 0xd74   : > { %p8491_p0 = pnand %p8490_p9, %p8851_p5 }
 0xd75   : > { %p8496_p6 = por %p8495_p8, %p8494_p4 }
 0xd76   : > { %p8492_p11 = pneg %p8491_p0 }
 0xd77   : > { %p8498_p3 = por %p8497_p10, %p8496_p6 }
 0xd79   : > { %p8499_p7 = pnand %p8498_p3, %p8492_p11 }
 0xd7b   : > { %8502 = shalt.err (!%p8499_p7)
}
 0xd7c   : > { %s8608_s19 = smov 128   ;;  %s8609_s14 = smov 8  }
 0xd7d   : > { %7952 = dma.vmem_to_hbm [thread:$0]  (%p8851_p5), %s10080_s12, 256, %s10087_s20, %s6996_s24, %s8608_s19, %s8608_s19, %s8609_s14  }
 0xd7e   : > { %s547_s26 = scalar_lea.vmem [#allocation11], %s8902_s23  ;;  %s10235_s24 = sld [smem:[#allocation27_spill]] }
 0xd7f   : > { %s7009_s28 = sshll.u32 %s547_s26, 4  ;;  %s6991_s23 = scalar_lea.sflag [#allocation4], %s8899_s13  ;;  %s10118_s28 = int_to_ptr.vmem [resolvable:$true] %s7009_s28 }
 0xd80   : > { %s8503_s25 = scalar_lea.vmem %s10118_s28, 256  ;;  %s8610_s10 = smov [#allocation11]  }
 0xd81   : > { %p8504_p12 = scmp.ne.s32.totalorder %s10118_s28, %s8503_s25  ;;  %s8507_s18 = sshll.u32 %s8610_s10, 4  ;;  %s8508_s18 = int_to_ptr.vmem [resolvable:$false] %s8507_s18 }
 0xd82   : > { %s8509_s21 = scalar_lea.vmem %s8508_s18, 512  ;;  %p8510_p13 = scmp.lt.s32.totalorder %s10118_s28, %s8508_s18 }
 0xd83   : > { %p8505_p2 = pnand %p8504_p12, %p8851_p5  ;;  %p8511_p9 = scmp.lt.s32.totalorder %s8509_s21, %s8503_s25 }
 0xd84   : > { %s10126_s22 = scalar_lea.hbm %s10235_s24, %s7569_s8 }
 0xd85   : > { %p8506_p1 = pneg %p8505_p2  ;;  %p8512_p0 = por %p8511_p9, %p8510_p13 }
 0xd87   : > { %p8513_p11 = pnand %p8512_p0, %p8506_p1 }
 0xe42   : > { %v7769_v24 = vpop.f32.mrb[72].mxu1  ;;  %v7791_v30 = vpop.f32.mrb[60].mxu0 }
 0xe43   : > { %v7770_v0 = vpop.f32.mrb[73].mxu1  ;;  %v7792_v34 = vpop.f32.mrb[61].mxu0 }
 0xe44   : > { %v7771_v56 = vadd.f32 %v7770_v0, %v7769_v24  ;;  %v7793_v42 = vadd.f32 %v7792_v34, %v7791_v30  ;;  %v7772_v27 = vpop.f32.mrb[74].mxu1  ;;  %v7794_v29 = vpop.f32.mrb[62].mxu0 }
 0xe45   : > { %v7773_v55 = vpop.f32.mrb[75].mxu1  ;;  %v7795_v7 = vpop.f32.mrb[63].mxu0 }
 0xe46   : > { %v6980_v46 = vadd.f32 %v7793_v42, %v7771_v56  ;;  %v7774_v8 = vadd.f32 %v7773_v55, %v7772_v27  ;;  %v7796_v9 = vadd.f32 %v7795_v7, %v7794_v29 }
 0xe48   : > { %v6986_v18 = vadd.f32 %v6980_v46, %v10066_v15  ;;  %v6983_v58 = vadd.f32 %v7796_v9, %v7774_v8 }
 0xe4a   : > { %6988 = vst [vmem:[%s547_s26] sm:$0xff] %v6986_v18  ;;  %v6987_v22 = vadd.f32 %v6983_v58, %v10069_v4 }
 0xe4c   : > { %6989 = vst [vmem:[%s547_s26 + $0x8] sm:$0xff] %v6987_v22 }
 0xe4d   : > { %8516 = shalt.err (!%p8513_p11)
}
 0xe4e   : > { %s8517_s17 = scalar_lea.hbm %s10126_s22, 256  ;;  %s8521_s12 = scalar_lea.hbm %s10235_s24, 512 }
 0xe4f   : > { %p8518_p4 = scmp.ne.s32.totalorder %s10126_s22, %s8517_s17  ;;  %p8522_p10 = scmp.lt.u32.totalorder %s10126_s22, %s10235_s24 }
 0xe50   : > { %p8523_p3 = scmp.lt.u32.totalorder %s8521_s12, %s8517_s17  ;;  %p8525_p12 = scmp.lt.u32.totalorder %s8517_s17, %s10126_s22 }
 0xe51   : > { %p8519_p8 = pnand %p8518_p4, %p8851_p5 }
 0xe52   : > { %p8524_p7 = por %p8523_p3, %p8522_p10 }
 0xe53   : > { %p8520_p6 = pneg %p8519_p8 }
 0xe54   : > { %p8526_p2 = por %p8525_p12, %p8524_p7 }
 0xe56   : > { %p8527_p1 = pnand %p8526_p2, %p8520_p6 }
 0xe58   : > { %8530 = shalt.err (!%p8527_p1)
}
 0xe59   : > { %7951 = dma.vmem_to_hbm [thread:$0]  (%p8851_p5), %s10118_s28, 256, %s10126_s22, %s6991_s23, %s8608_s19, %s8608_s19, %s8609_s14  }
 0xe5a PF: > { %s10236_s25 = sld [smem:[#allocation19_spill]]  ;;  %s10237_s18 = sld [smem:[#allocation20_spill]] }
 0xe5b   : > { %p10239_p9 = scmp.ge.s32.totalorder %s8581_s16, 2 }
 0xe60   : > { %s7040_s21 = sand.u32 1, %s10236_s25   ;;  %p10238_p13 = scmp.ne.s32.totalorder %s10237_s18, 0 }
 0xe61   : > { %s7041_s17 = scalar_lea.sflag [#allocation4], %s7040_s21 }
 0xe62   : > { %p7973_p0 = pnand %p10239_p9, %p10238_p13 }
 0xe64   : > { %8560 = dma.done.wait (!%p7973_p0), %s7041_s17, 256  }
 0xe65   : > { %8562 = vsyncadd (!%p7973_p0), %s7041_s17, 4294967040  ;;  %s7050_s11 = scalar_lea.sflag [#allocation13], %s7040_s21 }
 0xe66   : > { %8564 = dma.done.wait (!%p7973_p0), %s7050_s11, 256  }
 0xe67   : > { %8566 = vsyncadd (!%p7973_p0), %s7050_s11, 4294967040  ;;  %s10240_s13 = smov %s8837_s29  ;;  %p33_p5 = scmp.ge.s32.totalorder %s8837_s29, 4  }
 0xe68   : > { %s10241_s29 = smov %s8573_s30  ;;  %s10242_s30 = smov %s8577_s15 }
 0xe69   : > { %s10243_s15 = smov %s8847_s4  ;;  %s10244_s16 = smov %s10240_s13 }
 0xe6a   :  { %35 = sbr.rel (!%p33_p5) target bundleno = 18 (0x12), region = 150 }
 0xe71   :  { %7055 = vsyncpa [#allocation3], 1 }
 0xe72   :  { %7057 = vsyncpa [#allocation3 + $0x1], 1 }
 0xe73   :  { %7058 = vsyncpa [#allocation6], 1 }
 0xe74   :  { %7059 = vsyncpa [#allocation9], 1 }
 0xe75   :  { %7060 = vsyncpa [#allocation4], 1 }
 0xe76   :  { %7062 = vsyncpa [#allocation4 + $0x1], 1 }
 0xe77   :  { %7063 = vsyncpa [#allocation13], 1 }
 0xe78   :  { %7065 = vsyncpa [#allocation13 + $0x1], 1 }

</bundles_post_ra>
